<compile_context>
chip_gen: v7x
topology: tpu7x:2x2x1
jax: 0.10.0
libtpu: 0.0.40
codegen_flags: <defaults>
</compile_context>

<pallas_src>
import functools

import jax
import jax.numpy as jnp
from jax.experimental import pallas as pl
from jax.experimental.pallas import tpu as pltpu

NZ = 100   # latent dim
NGF = 64   # generator feature maps
NC = 3     # output image channels
K = 4      # kernel size (all layers)
BN_EPS = 1e-5

# (Cin, Cout, kernel, stride, padding)
LAYER_CFG = [
    (NZ,      NGF * 8, K, 1, 0),   # 1x1   -> 4x4
    (NGF * 8, NGF * 4, K, 2, 1),   # 4x4   -> 8x8
    (NGF * 4, NGF * 2, K, 2, 1),   # 8x8   -> 16x16
    (NGF * 2, NGF,     K, 2, 1),   # 16x16 -> 32x32
    (NGF,     NC,      K, 2, 1),   # 32x32 -> 64x64
]


def _round_up(x, m):
    return (x + m - 1) // m * m


# ----------------------------------------------------------------------------
# Pallas kernels
# ----------------------------------------------------------------------------
def _matmul_kernel(a_ref, b_ref, o_ref, *, act):
    """One (tm, K) x (K, Nc) MXU tile; optional fused tanh epilogue."""
    acc = jnp.dot(a_ref[0], b_ref[0], preferred_element_type=jnp.float32)
    if act == "tanh":
        acc = jnp.tanh(acc)
    o_ref[0] = acc.astype(o_ref.dtype)


def batched_matmul(a, b, act=None, tm_max=256):
    """a: (P, M, Kd) , b: (P, Kd, Nc) -> (P, M, Nc) f32.  bf16 MXU, f32 accum.

    Kd and Nc fit in one block at DCGAN sizes, so there is no reduction grid
    axis: the weight block is resident per phase and the output is written
    directly (no accumulator scratch)."""
    P, M, Kd = a.shape
    Nc = b.shape[-1]
    tm = min(tm_max, _round_up(M, 8))
    Mp = _round_up(M, tm)
    a = a.astype(jnp.bfloat16)
    b = b.astype(jnp.bfloat16)
    if Mp != M:
        a = jnp.pad(a, ((0, 0), (0, Mp - M), (0, 0)))

    out = pl.pallas_call(
        functools.partial(_matmul_kernel, act=act),
        out_shape=jax.ShapeDtypeStruct((P, Mp, Nc), jnp.float32),
        grid_spec=pltpu.PrefetchScalarGridSpec(
            num_scalar_prefetch=0,
            grid=(P, Mp // tm),
            in_specs=[
                pl.BlockSpec((1, tm, Kd), lambda p, i: (p, i, 0)),
                # full weight block, constant across M tiles -> VMEM resident
                pl.BlockSpec((1, Kd, Nc), lambda p, i: (p, 0, 0)),
            ],
            out_specs=pl.BlockSpec((1, tm, Nc), lambda p, i: (p, i, 0)),
        ),
        compiler_params=pltpu.CompilerParams(
            dimension_semantics=("parallel", "parallel")),
    )(a, b)
    return out[:, :M] if Mp != M else out


def _bn_relu_kernel(x_ref, g_ref, b_ref, o_ref, sum_ref, ssq_ref, sc_ref, *,
                    m_true):
    """Two-pass training-mode BatchNorm + ReLU, tiled over rows.

    pass 0 (program_id(0)==0): accumulate per-channel sum / sumsq in scratch.
    pass 1: compute scale/shift once, then normalise + ReLU each tile."""
    p = pl.program_id(0)
    i = pl.program_id(1)

    @pl.when(jnp.logical_and(p == 0, i == 0))
    def _():
        sum_ref[...] = jnp.zeros_like(sum_ref)
        ssq_ref[...] = jnp.zeros_like(ssq_ref)

    @pl.when(p == 0)
    def _():
        x = x_ref[...]
        sum_ref[...] += jnp.sum(x, axis=0, keepdims=True)
        ssq_ref[...] += jnp.sum(x * x, axis=0, keepdims=True)

    @pl.when(jnp.logical_and(p == 1, i == 0))
    def _():
        inv_m = jnp.float32(1.0 / m_true)
        mean = sum_ref[...] * inv_m
        var = ssq_ref[...] * inv_m - mean * mean       # biased var, like torch train
        scale = jax.lax.rsqrt(var + BN_EPS) * g_ref[...]
        sc_ref[0:1, :] = scale
        sc_ref[1:2, :] = b_ref[...] - mean * scale

    @pl.when(p == 1)
    def _():
        y = x_ref[...] * sc_ref[0:1, :] + sc_ref[1:2, :]
        o_ref[...] = jnp.maximum(y, 0.0)


def pallas_bn_relu(x, gamma, beta, tm_max=512):
    """x: (M, C) f32; gamma/beta: (C,).  Batch statistics over all M rows."""
    M, C = x.shape
    tm = min(tm_max, _round_up(M, 8))
    Mp = _round_up(M, tm)
    x_p = jnp.pad(x, ((0, Mp - M), (0, 0))) if Mp != M else x
    g = gamma.reshape(1, C).astype(jnp.float32)
    b = beta.reshape(1, C).astype(jnp.float32)

    out = pl.pallas_call(
        functools.partial(_bn_relu_kernel, m_true=M),
        out_shape=jax.ShapeDtypeStruct((Mp, C), jnp.float32),
        grid_spec=pltpu.PrefetchScalarGridSpec(
            num_scalar_prefetch=0,
            grid=(2, Mp // tm),
            in_specs=[
                pl.BlockSpec((tm, C), lambda p, i: (i, 0)),
                pl.BlockSpec((1, C), lambda p, i: (0, 0)),
                pl.BlockSpec((1, C), lambda p, i: (0, 0)),
            ],
            # (i*p, 0): all pass-0 steps park on block 0 (never written there),
            # so each output block is written back exactly once, after pass 1.
            out_specs=pl.BlockSpec((tm, C), lambda p, i: (i * p, 0)),
            scratch_shapes=[
                pltpu.VMEM((1, C), jnp.float32),   # per-channel sum
                pltpu.VMEM((1, C), jnp.float32),   # per-channel sum of squares
                pltpu.VMEM((2, C), jnp.float32),   # [scale; shift]
            ],
        ),
        compiler_params=pltpu.CompilerParams(
            dimension_semantics=("arbitrary", "arbitrary")),
    )(x_p, g, b)
    return out[:M] if Mp != M else out


# ----------------------------------------------------------------------------
# Sub-pixel (phase) decomposition glue for stride-2 ConvTranspose2d (k=4, p=1)
# ----------------------------------------------------------------------------
# out[n, 2p+rh, 2q+rw, co] = sum_{a,b,ci} xpad[n, p+rh+a, q+rw+b, ci]
#                                         * w[ci, co, (3-rh)-2a, (3-rw)-2b]
def _phase_patches(x):
    """x: (N,H,W,C) -> (4, N*H*W, 4*C) bf16. Phase order (rh,rw); taps (a,b,ci)."""
    N, H, W, C = x.shape
    xp = jnp.pad(x, ((0, 0), (1, 1), (1, 1), (0, 0)))
    phases = []
    for rh in (0, 1):
        for rw in (0, 1):
            taps = [xp[:, rh + a:rh + a + H, rw + b:rw + b + W, :]
                    for a in (0, 1) for b in (0, 1)]
            t = jnp.stack(taps, axis=3)                      # (N, H, W, 4, C)
            phases.append(t.reshape(N * H * W, 4 * C))
    return jnp.stack(phases, axis=0).astype(jnp.bfloat16)


def _phase_weights(w, cout_pad):
    """w: (Cin, Cout, 4, 4) ConvTranspose2d layout -> (4, 4*Cin, cout_pad) bf16."""
    cin, cout = w.shape[0], w.shape[1]
    mats = []
    for rh in (0, 1):
        for rw in (0, 1):
            khs = (3 - rh, 1 - rh)      # tap a -> kernel row
            kws = (3 - rw, 1 - rw)      # tap b -> kernel col
            taps = [w[:, :, khs[a], kws[b]] for a in (0, 1) for b in (0, 1)]
            m = jnp.stack(taps, axis=0).reshape(4 * cin, cout)   # rows = (a,b,ci)
            if cout_pad > cout:
                m = jnp.pad(m, ((0, 0), (0, cout_pad - cout)))   # lane-dense N
            mats.append(m)
    return jnp.stack(mats, axis=0).astype(jnp.bfloat16)


def _deinterleave(y, N, H, W):
    """y: (4, N*H*W, C) with phases ordered (rh, rw) -> (N, 2H, 2W, C)."""
    C = y.shape[-1]
    y = y.reshape(2, 2, N, H, W, C)
    y = jnp.transpose(y, (2, 3, 0, 4, 1, 5))
    return y.reshape(N, 2 * H, 2 * W, C)


# ----------------------------------------------------------------------------
# Generator
# ----------------------------------------------------------------------------
def init_params(key):
    params = []
    keys = jax.random.split(key, len(LAYER_CFG))
    for (cin, cout, k, _, _), wk in zip(LAYER_CFG, keys):
        w = 0.02 * jax.random.normal(wk, (cin, cout, k, k), jnp.float32)
        params.append({"w": w,
                       "gamma": jnp.ones((cout,), jnp.float32),
                       "beta": jnp.zeros((cout,), jnp.float32)})
    return params


@jax.jit
def generator_forward(z_nchw, params):
    """z_nchw: (N, nz, 1, 1) -> images (N, nc, 64, 64), like the torch module."""
    N = z_nchw.shape[0]

    # --- layer 1: ConvTranspose2d(nz, 8*ngf, 4, 1, 0) on 1x1 input == z @ W
    p = params[0]
    cout0 = LAYER_CFG[0][1]
    z2 = z_nchw.reshape(N, NZ).astype(jnp.float32)
    z2 = jnp.pad(z2, ((0, 0), (0, 128 - NZ)))                       # K: 100 -> 128
    w1 = jnp.transpose(p["w"], (0, 2, 3, 1)).reshape(NZ, K * K * cout0)
    w1 = jnp.pad(w1, ((0, 128 - NZ), (0, 0)))
    h = batched_matmul(z2[None], w1[None])[0]                       # (N, 16*cout0)
    h = pallas_bn_relu(h.reshape(N * K * K, cout0), p["gamma"], p["beta"])
    x = h.reshape(N, K, K, cout0)                                   # NHWC 4x4

    # --- layers 2..5: stride-2 ConvTranspose2d via sub-pixel phase decomposition
    n_layers = len(LAYER_CFG)
    for li in range(1, n_layers):
        cin, cout, _, _, _ = LAYER_CFG[li]
        p = params[li]
        last = li == n_layers - 1
        cout_pad = 128 if last else cout     # lane-dense final stores (3 -> 128)

        Nn, H, W, _ = x.shape
        patches = _phase_patches(x)                                 # (4, M, 4*cin)
        wmat = _phase_weights(p["w"], cout_pad)                     # (4, 4*cin, cp)
        y = batched_matmul(patches, wmat, act="tanh" if last else None)
        if last:
            y = y[:, :, :cout]               # drop lane padding in glue only
        else:
            M = Nn * H * W
            y = pallas_bn_relu(y.reshape(4 * M, cout), p["gamma"], p["beta"])
            y = y.reshape(4, M, cout)
        x = _deinterleave(y, Nn, H, W)

    return jnp.transpose(x, (0, 3, 1, 2))    # NHWC -> NCHW


# ----------------------------------------------------------------------------
# Pure-JAX reference (f32) for a semantics check
# ----------------------------------------------------------------------------
def _ref_conv_transpose(x, w, stride, pad):
    k = w.shape[2]
    w_conv = jnp.transpose(w[:, :, ::-1, ::-1], (1, 0, 2, 3))       # (Cout,Cin,k,k)
    return jax.lax.conv_general_dilated(
        x, w_conv, window_strides=(1, 1),
        padding=[(k - 1 - pad, k - 1 - pad)] * 2,
        lhs_dilation=(stride, stride), rhs_dilation=(1, 1),
        dimension_numbers=("NCHW", "OIHW", "NCHW"))


@jax.jit
def reference_forward(z_nchw, params):
    x = z_nchw.astype(jnp.float32)
    n_layers = len(LAYER_CFG)
    for li, ((cin, cout, k, s, pd), p) in enumerate(zip(LAYER_CFG, params)):
        x = _ref_conv_transpose(x, p["w"], s, pd)
        if li < n_layers - 1:
            mean = jnp.mean(x, axis=(0, 2, 3), keepdims=True)
            var = jnp.mean((x - mean) ** 2, axis=(0, 2, 3), keepdims=True)
            x = (x - mean) * jax.lax.rsqrt(var + BN_EPS)
            x = x * p["gamma"].reshape(1, -1, 1, 1) + p["beta"].reshape(1, -1, 1, 1)
            x = jnp.maximum(x, 0.0)
        else:
            x = jnp.tanh(x)
    return x


if __name__ == "__main__":
    key = jax.random.PRNGKey(0)
    kz, kw = jax.random.split(key)
    batch = 2
    z = jax.random.normal(kz, (batch, NZ, 1, 1), jnp.float32)   # NCHW latent
    params = init_params(kw)

    imgs = jax.block_until_ready(generator_forward(z, params))

    assert imgs.shape == (batch, NC, 64, 64), imgs.shape
    assert bool(jnp.all(jnp.isfinite(imgs)))
    assert bool(jnp.all(jnp.abs(imgs) <= 1.0 + 1e-5))           # tanh range

    # semantics check vs. f32 XLA reference (bf16 MXU path -> loose tolerance)
    ref = jax.block_until_ready(reference_forward(z, params))
    err = float(jnp.mean(jnp.abs(imgs - ref)))
    assert err < 5e-2, err

    print("KERNEL_OK")
</pallas_src>

<mosaic_0001>
module attributes {stable_mosaic.version = 11 : i64} {
  func.func @_matmul_kernel(%arg0: i32, %arg1: i32, %arg2: memref<1x8x128xbf16, #tpu.memory_space<vmem>>, %arg3: memref<1x128x8192xbf16, #tpu.memory_space<vmem>>, %arg4: memref<1x8x8192xf32, #tpu.memory_space<vmem>>) attributes {dimension_semantics = [#tpu.dimension_semantics<parallel>, #tpu.dimension_semantics<parallel>], iteration_bounds = array<i64: 1, 1>, scalar_prefetch = 0 : i64, scratch_operands = 0 : i64, tpu.core_type = #tpu.core_type<tc>, window_params = [{transform_indices = @transform_0, window_bounds = array<i64: 1, 8, 128>}, {transform_indices = @transform_1, window_bounds = array<i64: 1, 128, 8192>}, {transform_indices = @transform_2, window_bounds = array<i64: 1, 8, 8192>}]} {
    %c0 = arith.constant 0 : index
    %c0_0 = arith.constant 0 : index
    %c0_1 = arith.constant 0 : index
    %0 = vector.load %arg2[%c0, %c0_0, %c0_1] : memref<1x8x128xbf16, #tpu.memory_space<vmem>>, vector<1x8x128xbf16>
    %1 = vector.shape_cast %0 : vector<1x8x128xbf16> to vector<8x128xbf16>
    %c0_2 = arith.constant 0 : index
    %c0_3 = arith.constant 0 : index
    %c0_4 = arith.constant 0 : index
    %2 = vector.load %arg3[%c0_2, %c0_3, %c0_4] : memref<1x128x8192xbf16, #tpu.memory_space<vmem>>, vector<1x128x8192xbf16>
    %3 = vector.shape_cast %2 : vector<1x128x8192xbf16> to vector<128x8192xbf16>
    %cst = arith.constant dense<0.000000e+00> : vector<8x8192xf32>
    %4 = tpu.matmul %1, %3, %cst {dimension_numbers = #tpu.dot_dimension_numbers<[1], [0], [0], [1], [0, 0, 1, 1], [], []>} : vector<8x128xbf16>, vector<128x8192xbf16>, vector<8x8192xf32> -> vector<8x8192xf32>
    %c0_5 = arith.constant 0 : index
    %c0_6 = arith.constant 0 : index
    %c0_7 = arith.constant 0 : index
    %5 = vector.load %arg4[%c0_5, %c0_6, %c0_7] : memref<1x8x8192xf32, #tpu.memory_space<vmem>>, vector<1x8x8192xf32>
    %6 = vector.shape_cast %5 : vector<1x8x8192xf32> to vector<8x8192xf32>
    %7 = vector.shape_cast %4 : vector<8x8192xf32> to vector<1x8x8192xf32>
    tpu.vector_store %arg4[%c0_5, %c0_6, %c0_7], %7 {strides = array<i32>} : memref<1x8x8192xf32, #tpu.memory_space<vmem>>, vector<1x8x8192xf32>,
    return
  }
  func.func @transform_0(%arg0: i32, %arg1: i32) -> (i32, i32, i32) {
    %c0_i32 = arith.constant 0 : i32
    %c0_i32_0 = arith.constant 0 : i32
    return %arg0, %arg1, %c0_i32 : i32, i32, i32
  }
  func.func @transform_1(%arg0: i32, %arg1: i32) -> (i32, i32, i32) {
    %c0_i32 = arith.constant 0 : i32
    %c0_i32_0 = arith.constant 0 : i32
    %c0_i32_1 = arith.constant 0 : i32
    return %arg0, %c0_i32, %c0_i32_0 : i32, i32, i32
  }
  func.func @transform_2(%arg0: i32, %arg1: i32) -> (i32, i32, i32) {
    %c0_i32 = arith.constant 0 : i32
    %c0_i32_0 = arith.constant 0 : i32
    return %arg0, %arg1, %c0_i32 : i32, i32, i32
  }
}

module attributes {stable_mosaic.version = 11 : i64} {
  func.func @_bn_relu_kernel(%arg0: i32, %arg1: i32, %arg2: memref<32x512xf32, #tpu.memory_space<vmem>>, %arg3: memref<1x512xf32, #tpu.memory_space<vmem>>, %arg4: memref<1x512xf32, #tpu.memory_space<vmem>>, %arg5: memref<32x512xf32, #tpu.memory_space<vmem>>, %arg6: memref<1x512xf32, #tpu.memory_space<vmem>>, %arg7: memref<1x512xf32, #tpu.memory_space<vmem>>, %arg8: memref<2x512xf32, #tpu.memory_space<vmem>>) attributes {dimension_semantics = [#tpu.dimension_semantics<arbitrary>, #tpu.dimension_semantics<arbitrary>], iteration_bounds = array<i64: 2, 1>, scalar_prefetch = 0 : i64, scratch_operands = 3 : i64, tpu.core_type = #tpu.core_type<tc>, window_params = [{transform_indices = @transform_0, window_bounds = array<i64: 32, 512>}, {pipeline_mode = #tpu.pipeline_mode<synchronous>, transform_indices = @transform_1, window_bounds = array<i64: 1, 512>}, {pipeline_mode = #tpu.pipeline_mode<synchronous>, transform_indices = @transform_2, window_bounds = array<i64: 1, 512>}, {transform_indices = @transform_3, window_bounds = array<i64: 32, 512>}]} {
    %c0_i32 = arith.constant 0 : i32
    %0 = arith.cmpi eq, %arg0, %c0_i32 : i32
    %c0_i32_0 = arith.constant 0 : i32
    %1 = arith.cmpi eq, %arg1, %c0_i32_0 : i32
    %2 = arith.andi %0, %1 : i1
    %3 = arith.extui %2 : i1 to i32
    %c0_i32_1 = arith.constant 0 : i32
    %4 = arith.cmpi ne, %3, %c0_i32_1 : i32
    scf.if %4 {
      %cst = arith.constant 0.000000e+00 : f32
      %16 = vector.broadcast %cst : f32 to vector<1x512xf32>
      %c0 = arith.constant 0 : index
      %c0_8 = arith.constant 0 : index
      %17 = vector.load %arg6[%c0, %c0_8] : memref<1x512xf32, #tpu.memory_space<vmem>>, vector<1x512xf32>
      tpu.vector_store %arg6[%c0, %c0_8], %16 {strides = array<i32>} : memref<1x512xf32, #tpu.memory_space<vmem>>, vector<1x512xf32>,
      %cst_9 = arith.constant 0.000000e+00 : f32
      %18 = vector.broadcast %cst_9 : f32 to vector<1x512xf32>
      %c0_10 = arith.constant 0 : index
      %c0_11 = arith.constant 0 : index
      %19 = vector.load %arg7[%c0_10, %c0_11] : memref<1x512xf32, #tpu.memory_space<vmem>>, vector<1x512xf32>
      tpu.vector_store %arg7[%c0_10, %c0_11], %18 {strides = array<i32>} : memref<1x512xf32, #tpu.memory_space<vmem>>, vector<1x512xf32>,
    } else {
    }
    %c0_i32_2 = arith.constant 0 : i32
    %5 = arith.cmpi eq, %arg0, %c0_i32_2 : i32
    %6 = arith.extui %5 : i1 to i32
    %c0_i32_3 = arith.constant 0 : i32
    %7 = arith.cmpi ne, %6, %c0_i32_3 : i32
    scf.if %7 {
      %c0 = arith.constant 0 : index
      %c0_8 = arith.constant 0 : index
      %16 = vector.load %arg2[%c0, %c0_8] : memref<32x512xf32, #tpu.memory_space<vmem>>, vector<32x512xf32>
      %c0_9 = arith.constant 0 : index
      %c0_10 = arith.constant 0 : index
      %17 = vector.load %arg6[%c0_9, %c0_10] : memref<1x512xf32, #tpu.memory_space<vmem>>, vector<1x512xf32>
      %cst = arith.constant dense<0.000000e+00> : vector<512xf32>
      %18 = vector.multi_reduction <add>, %16, %cst [0] : vector<32x512xf32> to vector<512xf32>
      %19 = vector.shape_cast %18 : vector<512xf32> to vector<1x512xf32>
      %20 = arith.addf %17, %19 : vector<1x512xf32>
      %c0_11 = arith.constant 0 : index
      %c0_12 = arith.constant 0 : index
      %21 = vector.load %arg6[%c0_11, %c0_12] : memref<1x512xf32, #tpu.memory_space<vmem>>, vector<1x512xf32>
      tpu.vector_store %arg6[%c0_11, %c0_12], %20 {strides = array<i32>} : memref<1x512xf32, #tpu.memory_space<vmem>>, vector<1x512xf32>,
      %c0_13 = arith.constant 0 : index
      %c0_14 = arith.constant 0 : index
      %22 = vector.load %arg7[%c0_13, %c0_14] : memref<1x512xf32, #tpu.memory_space<vmem>>, vector<1x512xf32>
      %23 = arith.mulf %16, %16 : vector<32x512xf32>
      %cst_15 = arith.constant dense<0.000000e+00> : vector<512xf32>
      %24 = vector.multi_reduction <add>, %23, %cst_15 [0] : vector<32x512xf32> to vector<512xf32>
      %25 = vector.shape_cast %24 : vector<512xf32> to vector<1x512xf32>
      %26 = arith.addf %22, %25 : vector<1x512xf32>
      %c0_16 = arith.constant 0 : index
      %c0_17 = arith.constant 0 : index
      %27 = vector.load %arg7[%c0_16, %c0_17] : memref<1x512xf32, #tpu.memory_space<vmem>>, vector<1x512xf32>
      tpu.vector_store %arg7[%c0_16, %c0_17], %26 {strides = array<i32>} : memref<1x512xf32, #tpu.memory_space<vmem>>, vector<1x512xf32>,
    } else {
    }
    %c1_i32 = arith.constant 1 : i32
    %8 = arith.cmpi eq, %arg0, %c1_i32 : i32
    %c0_i32_4 = arith.constant 0 : i32
    %9 = arith.cmpi eq, %arg1, %c0_i32_4 : i32
    %10 = arith.andi %8, %9 : i1
    %11 = arith.extui %10 : i1 to i32
    %c0_i32_5 = arith.constant 0 : i32
    %12 = arith.cmpi ne, %11, %c0_i32_5 : i32
    scf.if %12 {
      %c0 = arith.constant 0 : index
      %c0_8 = arith.constant 0 : index
      %16 = vector.load %arg6[%c0, %c0_8] : memref<1x512xf32, #tpu.memory_space<vmem>>, vector<1x512xf32>
      %cst = arith.constant 3.125000e-02 : f32
      %17 = vector.broadcast %cst : f32 to vector<1x512xf32>
      %18 = arith.mulf %16, %17 : vector<1x512xf32>
      %c0_9 = arith.constant 0 : index
      %c0_10 = arith.constant 0 : index
      %19 = vector.load %arg7[%c0_9, %c0_10] : memref<1x512xf32, #tpu.memory_space<vmem>>, vector<1x512xf32>
      %cst_11 = arith.constant 3.125000e-02 : f32
      %20 = vector.broadcast %cst_11 : f32 to vector<1x512xf32>
      %21 = arith.mulf %19, %20 : vector<1x512xf32>
      %22 = arith.mulf %18, %18 : vector<1x512xf32>
      %23 = arith.subf %21, %22 : vector<1x512xf32>
      %cst_12 = arith.constant 9.99999974E-6 : f32
      %24 = vector.broadcast %cst_12 : f32 to vector<1x512xf32>
      %25 = arith.addf %23, %24 : vector<1x512xf32>
      %26 = math.rsqrt %25 : vector<1x512xf32>
      %c0_13 = arith.constant 0 : index
      %c0_14 = arith.constant 0 : index
      %27 = vector.load %arg3[%c0_13, %c0_14] : memref<1x512xf32, #tpu.memory_space<vmem>>, vector<1x512xf32>
      %28 = arith.mulf %26, %27 : vector<1x512xf32>
      %c0_15 = arith.constant 0 : index
      %c0_16 = arith.constant 0 : index
      %29 = vector.load %arg8[%c0_15, %c0_16] : memref<2x512xf32, #tpu.memory_space<vmem>>, vector<1x512xf32>
      tpu.vector_store %arg8[%c0_15, %c0_16], %28 {strides = array<i32>} : memref<2x512xf32, #tpu.memory_space<vmem>>, vector<1x512xf32>,
      %c0_17 = arith.constant 0 : index
      %c0_18 = arith.constant 0 : index
      %30 = vector.load %arg4[%c0_17, %c0_18] : memref<1x512xf32, #tpu.memory_space<vmem>>, vector<1x512xf32>
      %31 = arith.mulf %18, %28 : vector<1x512xf32>
      %32 = arith.subf %30, %31 : vector<1x512xf32>
      %c1 = arith.constant 1 : index
      %c0_19 = arith.constant 0 : index
      %33 = vector.load %arg8[%c1, %c0_19] : memref<2x512xf32, #tpu.memory_space<vmem>>, vector<1x512xf32>
      tpu.vector_store %arg8[%c1, %c0_19], %32 {strides = array<i32>} : memref<2x512xf32, #tpu.memory_space<vmem>>, vector<1x512xf32>,
    } else {
    }
    %c1_i32_6 = arith.constant 1 : i32
    %13 = arith.cmpi eq, %arg0, %c1_i32_6 : i32
    %14 = arith.extui %13 : i1 to i32
    %c0_i32_7 = arith.constant 0 : i32
    %15 = arith.cmpi ne, %14, %c0_i32_7 : i32
    scf.if %15 {
      %c0 = arith.constant 0 : index
      %c0_8 = arith.constant 0 : index
      %16 = vector.load %arg2[%c0, %c0_8] : memref<32x512xf32, #tpu.memory_space<vmem>>, vector<32x512xf32>
      %c0_9 = arith.constant 0 : index
      %c0_10 = arith.constant 0 : index
      %17 = vector.load %arg8[%c0_9, %c0_10] : memref<2x512xf32, #tpu.memory_space<vmem>>, vector<1x512xf32>
      %18 = vector.broadcast %17 : vector<1x512xf32> to vector<32x512xf32>
      %19 = arith.mulf %16, %18 : vector<32x512xf32>
      %c1 = arith.constant 1 : index
      %c0_11 = arith.constant 0 : index
      %20 = vector.load %arg8[%c1, %c0_11] : memref<2x512xf32, #tpu.memory_space<vmem>>, vector<1x512xf32>
      %21 = vector.broadcast %20 : vector<1x512xf32> to vector<32x512xf32>
      %22 = arith.addf %19, %21 : vector<32x512xf32>
      %cst = arith.constant 0.000000e+00 : f32
      %23 = vector.broadcast %cst : f32 to vector<32x512xf32>
      %24 = arith.maximumf %22, %23 : vector<32x512xf32>
      %c0_12 = arith.constant 0 : index
      %c0_13 = arith.constant 0 : index
      %25 = vector.load %arg5[%c0_12, %c0_13] : memref<32x512xf32, #tpu.memory_space<vmem>>, vector<32x512xf32>
      tpu.vector_store %arg5[%c0_12, %c0_13], %24 {strides = array<i32>} : memref<32x512xf32, #tpu.memory_space<vmem>>, vector<32x512xf32>,
    } else {
    }
    return
  }
  func.func @transform_0(%arg0: i32, %arg1: i32) -> (i32, i32) {
    %c0_i32 = arith.constant 0 : i32
    %c0_i32_0 = arith.constant 0 : i32
    return %arg1, %c0_i32 : i32, i32
  }
  func.func @transform_1(%arg0: i32, %arg1: i32) -> (i32, i32) {
    %c0_i32 = arith.constant 0 : i32
    %c0_i32_0 = arith.constant 0 : i32
    %c0_i32_1 = arith.constant 0 : i32
    return %c0_i32, %c0_i32_0 : i32, i32
  }
  func.func @transform_2(%arg0: i32, %arg1: i32) -> (i32, i32) {
    %c0_i32 = arith.constant 0 : i32
    %c0_i32_0 = arith.constant 0 : i32
    %c0_i32_1 = arith.constant 0 : i32
    return %c0_i32, %c0_i32_0 : i32, i32
  }
  func.func @transform_3(%arg0: i32, %arg1: i32) -> (i32, i32) {
    %0 = arith.muli %arg1, %arg0 : i32
    %c0_i32 = arith.constant 0 : i32
    %c0_i32_0 = arith.constant 0 : i32
    return %0, %c0_i32 : i32, i32
  }
}

module attributes {stable_mosaic.version = 11 : i64} {
  func.func @_matmul_kernel(%arg0: i32, %arg1: i32, %arg2: memref<1x32x2048xbf16, #tpu.memory_space<vmem>>, %arg3: memref<1x2048x256xbf16, #tpu.memory_space<vmem>>, %arg4: memref<1x32x256xf32, #tpu.memory_space<vmem>>) attributes {dimension_semantics = [#tpu.dimension_semantics<parallel>, #tpu.dimension_semantics<parallel>], iteration_bounds = array<i64: 4, 1>, scalar_prefetch = 0 : i64, scratch_operands = 0 : i64, tpu.core_type = #tpu.core_type<tc>, window_params = [{transform_indices = @transform_0, window_bounds = array<i64: 1, 32, 2048>}, {transform_indices = @transform_1, window_bounds = array<i64: 1, 2048, 256>}, {transform_indices = @transform_2, window_bounds = array<i64: 1, 32, 256>}]} {
    %c0 = arith.constant 0 : index
    %c0_0 = arith.constant 0 : index
    %c0_1 = arith.constant 0 : index
    %0 = vector.load %arg2[%c0, %c0_0, %c0_1] : memref<1x32x2048xbf16, #tpu.memory_space<vmem>>, vector<1x32x2048xbf16>
    %1 = vector.shape_cast %0 : vector<1x32x2048xbf16> to vector<32x2048xbf16>
    %c0_2 = arith.constant 0 : index
    %c0_3 = arith.constant 0 : index
    %c0_4 = arith.constant 0 : index
    %2 = vector.load %arg3[%c0_2, %c0_3, %c0_4] : memref<1x2048x256xbf16, #tpu.memory_space<vmem>>, vector<1x2048x256xbf16>
    %3 = vector.shape_cast %2 : vector<1x2048x256xbf16> to vector<2048x256xbf16>
    %cst = arith.constant dense<0.000000e+00> : vector<32x256xf32>
    %4 = tpu.matmul %1, %3, %cst {dimension_numbers = #tpu.dot_dimension_numbers<[1], [0], [0], [1], [0, 0, 1, 1], [], []>} : vector<32x2048xbf16>, vector<2048x256xbf16>, vector<32x256xf32> -> vector<32x256xf32>
    %c0_5 = arith.constant 0 : index
    %c0_6 = arith.constant 0 : index
    %c0_7 = arith.constant 0 : index
    %5 = vector.load %arg4[%c0_5, %c0_6, %c0_7] : memref<1x32x256xf32, #tpu.memory_space<vmem>>, vector<1x32x256xf32>
    %6 = vector.shape_cast %5 : vector<1x32x256xf32> to vector<32x256xf32>
    %7 = vector.shape_cast %4 : vector<32x256xf32> to vector<1x32x256xf32>
    tpu.vector_store %arg4[%c0_5, %c0_6, %c0_7], %7 {strides = array<i32>} : memref<1x32x256xf32, #tpu.memory_space<vmem>>, vector<1x32x256xf32>,
    return
  }
  func.func @transform_0(%arg0: i32, %arg1: i32) -> (i32, i32, i32) {
    %c0_i32 = arith.constant 0 : i32
    %c0_i32_0 = arith.constant 0 : i32
    return %arg0, %arg1, %c0_i32 : i32, i32, i32
  }
  func.func @transform_1(%arg0: i32, %arg1: i32) -> (i32, i32, i32) {
    %c0_i32 = arith.constant 0 : i32
    %c0_i32_0 = arith.constant 0 : i32
    %c0_i32_1 = arith.constant 0 : i32
    return %arg0, %c0_i32, %c0_i32_0 : i32, i32, i32
  }
  func.func @transform_2(%arg0: i32, %arg1: i32) -> (i32, i32, i32) {
    %c0_i32 = arith.constant 0 : i32
    %c0_i32_0 = arith.constant 0 : i32
    return %arg0, %arg1, %c0_i32 : i32, i32, i32
  }
}

module attributes {stable_mosaic.version = 11 : i64} {
  func.func @_bn_relu_kernel(%arg0: i32, %arg1: i32, %arg2: memref<128x256xf32, #tpu.memory_space<vmem>>, %arg3: memref<1x256xf32, #tpu.memory_space<vmem>>, %arg4: memref<1x256xf32, #tpu.memory_space<vmem>>, %arg5: memref<128x256xf32, #tpu.memory_space<vmem>>, %arg6: memref<1x256xf32, #tpu.memory_space<vmem>>, %arg7: memref<1x256xf32, #tpu.memory_space<vmem>>, %arg8: memref<2x256xf32, #tpu.memory_space<vmem>>) attributes {dimension_semantics = [#tpu.dimension_semantics<arbitrary>, #tpu.dimension_semantics<arbitrary>], iteration_bounds = array<i64: 2, 1>, scalar_prefetch = 0 : i64, scratch_operands = 3 : i64, tpu.core_type = #tpu.core_type<tc>, window_params = [{transform_indices = @transform_0, window_bounds = array<i64: 128, 256>}, {pipeline_mode = #tpu.pipeline_mode<synchronous>, transform_indices = @transform_1, window_bounds = array<i64: 1, 256>}, {pipeline_mode = #tpu.pipeline_mode<synchronous>, transform_indices = @transform_2, window_bounds = array<i64: 1, 256>}, {transform_indices = @transform_3, window_bounds = array<i64: 128, 256>}]} {
    %c0_i32 = arith.constant 0 : i32
    %0 = arith.cmpi eq, %arg0, %c0_i32 : i32
    %c0_i32_0 = arith.constant 0 : i32
    %1 = arith.cmpi eq, %arg1, %c0_i32_0 : i32
    %2 = arith.andi %0, %1 : i1
    %3 = arith.extui %2 : i1 to i32
    %c0_i32_1 = arith.constant 0 : i32
    %4 = arith.cmpi ne, %3, %c0_i32_1 : i32
    scf.if %4 {
      %cst = arith.constant 0.000000e+00 : f32
      %16 = vector.broadcast %cst : f32 to vector<1x256xf32>
      %c0 = arith.constant 0 : index
      %c0_8 = arith.constant 0 : index
      %17 = vector.load %arg6[%c0, %c0_8] : memref<1x256xf32, #tpu.memory_space<vmem>>, vector<1x256xf32>
      tpu.vector_store %arg6[%c0, %c0_8], %16 {strides = array<i32>} : memref<1x256xf32, #tpu.memory_space<vmem>>, vector<1x256xf32>,
      %cst_9 = arith.constant 0.000000e+00 : f32
      %18 = vector.broadcast %cst_9 : f32 to vector<1x256xf32>
      %c0_10 = arith.constant 0 : index
      %c0_11 = arith.constant 0 : index
      %19 = vector.load %arg7[%c0_10, %c0_11] : memref<1x256xf32, #tpu.memory_space<vmem>>, vector<1x256xf32>
      tpu.vector_store %arg7[%c0_10, %c0_11], %18 {strides = array<i32>} : memref<1x256xf32, #tpu.memory_space<vmem>>, vector<1x256xf32>,
    } else {
    }
    %c0_i32_2 = arith.constant 0 : i32
    %5 = arith.cmpi eq, %arg0, %c0_i32_2 : i32
    %6 = arith.extui %5 : i1 to i32
    %c0_i32_3 = arith.constant 0 : i32
    %7 = arith.cmpi ne, %6, %c0_i32_3 : i32
    scf.if %7 {
      %c0 = arith.constant 0 : index
      %c0_8 = arith.constant 0 : index
      %16 = vector.load %arg2[%c0, %c0_8] : memref<128x256xf32, #tpu.memory_space<vmem>>, vector<128x256xf32>
      %c0_9 = arith.constant 0 : index
      %c0_10 = arith.constant 0 : index
      %17 = vector.load %arg6[%c0_9, %c0_10] : memref<1x256xf32, #tpu.memory_space<vmem>>, vector<1x256xf32>
      %cst = arith.constant dense<0.000000e+00> : vector<256xf32>
      %18 = vector.multi_reduction <add>, %16, %cst [0] : vector<128x256xf32> to vector<256xf32>
      %19 = vector.shape_cast %18 : vector<256xf32> to vector<1x256xf32>
      %20 = arith.addf %17, %19 : vector<1x256xf32>
      %c0_11 = arith.constant 0 : index
      %c0_12 = arith.constant 0 : index
      %21 = vector.load %arg6[%c0_11, %c0_12] : memref<1x256xf32, #tpu.memory_space<vmem>>, vector<1x256xf32>
      tpu.vector_store %arg6[%c0_11, %c0_12], %20 {strides = array<i32>} : memref<1x256xf32, #tpu.memory_space<vmem>>, vector<1x256xf32>,
      %c0_13 = arith.constant 0 : index
      %c0_14 = arith.constant 0 : index
      %22 = vector.load %arg7[%c0_13, %c0_14] : memref<1x256xf32, #tpu.memory_space<vmem>>, vector<1x256xf32>
      %23 = arith.mulf %16, %16 : vector<128x256xf32>
      %cst_15 = arith.constant dense<0.000000e+00> : vector<256xf32>
      %24 = vector.multi_reduction <add>, %23, %cst_15 [0] : vector<128x256xf32> to vector<256xf32>
      %25 = vector.shape_cast %24 : vector<256xf32> to vector<1x256xf32>
      %26 = arith.addf %22, %25 : vector<1x256xf32>
      %c0_16 = arith.constant 0 : index
      %c0_17 = arith.constant 0 : index
      %27 = vector.load %arg7[%c0_16, %c0_17] : memref<1x256xf32, #tpu.memory_space<vmem>>, vector<1x256xf32>
      tpu.vector_store %arg7[%c0_16, %c0_17], %26 {strides = array<i32>} : memref<1x256xf32, #tpu.memory_space<vmem>>, vector<1x256xf32>,
    } else {
    }
    %c1_i32 = arith.constant 1 : i32
    %8 = arith.cmpi eq, %arg0, %c1_i32 : i32
    %c0_i32_4 = arith.constant 0 : i32
    %9 = arith.cmpi eq, %arg1, %c0_i32_4 : i32
    %10 = arith.andi %8, %9 : i1
    %11 = arith.extui %10 : i1 to i32
    %c0_i32_5 = arith.constant 0 : i32
    %12 = arith.cmpi ne, %11, %c0_i32_5 : i32
    scf.if %12 {
      %c0 = arith.constant 0 : index
      %c0_8 = arith.constant 0 : index
      %16 = vector.load %arg6[%c0, %c0_8] : memref<1x256xf32, #tpu.memory_space<vmem>>, vector<1x256xf32>
      %cst = arith.constant 7.812500e-03 : f32
      %17 = vector.broadcast %cst : f32 to vector<1x256xf32>
      %18 = arith.mulf %16, %17 : vector<1x256xf32>
      %c0_9 = arith.constant 0 : index
      %c0_10 = arith.constant 0 : index
      %19 = vector.load %arg7[%c0_9, %c0_10] : memref<1x256xf32, #tpu.memory_space<vmem>>, vector<1x256xf32>
      %cst_11 = arith.constant 7.812500e-03 : f32
      %20 = vector.broadcast %cst_11 : f32 to vector<1x256xf32>
      %21 = arith.mulf %19, %20 : vector<1x256xf32>
      %22 = arith.mulf %18, %18 : vector<1x256xf32>
      %23 = arith.subf %21, %22 : vector<1x256xf32>
      %cst_12 = arith.constant 9.99999974E-6 : f32
      %24 = vector.broadcast %cst_12 : f32 to vector<1x256xf32>
      %25 = arith.addf %23, %24 : vector<1x256xf32>
      %26 = math.rsqrt %25 : vector<1x256xf32>
      %c0_13 = arith.constant 0 : index
      %c0_14 = arith.constant 0 : index
      %27 = vector.load %arg3[%c0_13, %c0_14] : memref<1x256xf32, #tpu.memory_space<vmem>>, vector<1x256xf32>
      %28 = arith.mulf %26, %27 : vector<1x256xf32>
      %c0_15 = arith.constant 0 : index
      %c0_16 = arith.constant 0 : index
      %29 = vector.load %arg8[%c0_15, %c0_16] : memref<2x256xf32, #tpu.memory_space<vmem>>, vector<1x256xf32>
      tpu.vector_store %arg8[%c0_15, %c0_16], %28 {strides = array<i32>} : memref<2x256xf32, #tpu.memory_space<vmem>>, vector<1x256xf32>,
      %c0_17 = arith.constant 0 : index
      %c0_18 = arith.constant 0 : index
      %30 = vector.load %arg4[%c0_17, %c0_18] : memref<1x256xf32, #tpu.memory_space<vmem>>, vector<1x256xf32>
      %31 = arith.mulf %18, %28 : vector<1x256xf32>
      %32 = arith.subf %30, %31 : vector<1x256xf32>
      %c1 = arith.constant 1 : index
      %c0_19 = arith.constant 0 : index
      %33 = vector.load %arg8[%c1, %c0_19] : memref<2x256xf32, #tpu.memory_space<vmem>>, vector<1x256xf32>
      tpu.vector_store %arg8[%c1, %c0_19], %32 {strides = array<i32>} : memref<2x256xf32, #tpu.memory_space<vmem>>, vector<1x256xf32>,
    } else {
    }
    %c1_i32_6 = arith.constant 1 : i32
    %13 = arith.cmpi eq, %arg0, %c1_i32_6 : i32
    %14 = arith.extui %13 : i1 to i32
    %c0_i32_7 = arith.constant 0 : i32
    %15 = arith.cmpi ne, %14, %c0_i32_7 : i32
    scf.if %15 {
      %c0 = arith.constant 0 : index
      %c0_8 = arith.constant 0 : index
      %16 = vector.load %arg2[%c0, %c0_8] : memref<128x256xf32, #tpu.memory_space<vmem>>, vector<128x256xf32>
      %c0_9 = arith.constant 0 : index
      %c0_10 = arith.constant 0 : index
      %17 = vector.load %arg8[%c0_9, %c0_10] : memref<2x256xf32, #tpu.memory_space<vmem>>, vector<1x256xf32>
      %18 = vector.broadcast %17 : vector<1x256xf32> to vector<128x256xf32>
      %19 = arith.mulf %16, %18 : vector<128x256xf32>
      %c1 = arith.constant 1 : index
      %c0_11 = arith.constant 0 : index
      %20 = vector.load %arg8[%c1, %c0_11] : memref<2x256xf32, #tpu.memory_space<vmem>>, vector<1x256xf32>
      %21 = vector.broadcast %20 : vector<1x256xf32> to vector<128x256xf32>
      %22 = arith.addf %19, %21 : vector<128x256xf32>
      %cst = arith.constant 0.000000e+00 : f32
      %23 = vector.broadcast %cst : f32 to vector<128x256xf32>
      %24 = arith.maximumf %22, %23 : vector<128x256xf32>
      %c0_12 = arith.constant 0 : index
      %c0_13 = arith.constant 0 : index
      %25 = vector.load %arg5[%c0_12, %c0_13] : memref<128x256xf32, #tpu.memory_space<vmem>>, vector<128x256xf32>
      tpu.vector_store %arg5[%c0_12, %c0_13], %24 {strides = array<i32>} : memref<128x256xf32, #tpu.memory_space<vmem>>, vector<128x256xf32>,
    } else {
    }
    return
  }
  func.func @transform_0(%arg0: i32, %arg1: i32) -> (i32, i32) {
    %c0_i32 = arith.constant 0 : i32
    %c0_i32_0 = arith.constant 0 : i32
    return %arg1, %c0_i32 : i32, i32
  }
  func.func @transform_1(%arg0: i32, %arg1: i32) -> (i32, i32) {
    %c0_i32 = arith.constant 0 : i32
    %c0_i32_0 = arith.constant 0 : i32
    %c0_i32_1 = arith.constant 0 : i32
    return %c0_i32, %c0_i32_0 : i32, i32
  }
  func.func @transform_2(%arg0: i32, %arg1: i32) -> (i32, i32) {
    %c0_i32 = arith.constant 0 : i32
    %c0_i32_0 = arith.constant 0 : i32
    %c0_i32_1 = arith.constant 0 : i32
    return %c0_i32, %c0_i32_0 : i32, i32
  }
  func.func @transform_3(%arg0: i32, %arg1: i32) -> (i32, i32) {
    %0 = arith.muli %arg1, %arg0 : i32
    %c0_i32 = arith.constant 0 : i32
    %c0_i32_0 = arith.constant 0 : i32
    return %0, %c0_i32 : i32, i32
  }
}

module attributes {stable_mosaic.version = 11 : i64} {
  func.func @_matmul_kernel(%arg0: i32, %arg1: i32, %arg2: memref<1x128x1024xbf16, #tpu.memory_space<vmem>>, %arg3: memref<1x1024x128xbf16, #tpu.memory_space<vmem>>, %arg4: memref<1x128x128xf32, #tpu.memory_space<vmem>>) attributes {dimension_semantics = [#tpu.dimension_semantics<parallel>, #tpu.dimension_semantics<parallel>], iteration_bounds = array<i64: 4, 1>, scalar_prefetch = 0 : i64, scratch_operands = 0 : i64, tpu.core_type = #tpu.core_type<tc>, window_params = [{transform_indices = @transform_0, window_bounds = array<i64: 1, 128, 1024>}, {transform_indices = @transform_1, window_bounds = array<i64: 1, 1024, 128>}, {transform_indices = @transform_2, window_bounds = array<i64: 1, 128, 128>}]} {
    %c0 = arith.constant 0 : index
    %c0_0 = arith.constant 0 : index
    %c0_1 = arith.constant 0 : index
    %0 = vector.load %arg2[%c0, %c0_0, %c0_1] : memref<1x128x1024xbf16, #tpu.memory_space<vmem>>, vector<1x128x1024xbf16>
    %1 = vector.shape_cast %0 : vector<1x128x1024xbf16> to vector<128x1024xbf16>
    %c0_2 = arith.constant 0 : index
    %c0_3 = arith.constant 0 : index
    %c0_4 = arith.constant 0 : index
    %2 = vector.load %arg3[%c0_2, %c0_3, %c0_4] : memref<1x1024x128xbf16, #tpu.memory_space<vmem>>, vector<1x1024x128xbf16>
    %3 = vector.shape_cast %2 : vector<1x1024x128xbf16> to vector<1024x128xbf16>
    %cst = arith.constant dense<0.000000e+00> : vector<128x128xf32>
    %4 = tpu.matmul %1, %3, %cst {dimension_numbers = #tpu.dot_dimension_numbers<[1], [0], [0], [1], [0, 0, 1, 1], [], []>} : vector<128x1024xbf16>, vector<1024x128xbf16>, vector<128x128xf32> -> vector<128x128xf32>
    %c0_5 = arith.constant 0 : index
    %c0_6 = arith.constant 0 : index
    %c0_7 = arith.constant 0 : index
    %5 = vector.load %arg4[%c0_5, %c0_6, %c0_7] : memref<1x128x128xf32, #tpu.memory_space<vmem>>, vector<1x128x128xf32>
    %6 = vector.shape_cast %5 : vector<1x128x128xf32> to vector<128x128xf32>
    %7 = vector.shape_cast %4 : vector<128x128xf32> to vector<1x128x128xf32>
    tpu.vector_store %arg4[%c0_5, %c0_6, %c0_7], %7 {strides = array<i32>} : memref<1x128x128xf32, #tpu.memory_space<vmem>>, vector<1x128x128xf32>,
    return
  }
  func.func @transform_0(%arg0: i32, %arg1: i32) -> (i32, i32, i32) {
    %c0_i32 = arith.constant 0 : i32
    %c0_i32_0 = arith.constant 0 : i32
    return %arg0, %arg1, %c0_i32 : i32, i32, i32
  }
  func.func @transform_1(%arg0: i32, %arg1: i32) -> (i32, i32, i32) {
    %c0_i32 = arith.constant 0 : i32
    %c0_i32_0 = arith.constant 0 : i32
    %c0_i32_1 = arith.constant 0 : i32
    return %arg0, %c0_i32, %c0_i32_0 : i32, i32, i32
  }
  func.func @transform_2(%arg0: i32, %arg1: i32) -> (i32, i32, i32) {
    %c0_i32 = arith.constant 0 : i32
    %c0_i32_0 = arith.constant 0 : i32
    return %arg0, %arg1, %c0_i32 : i32, i32, i32
  }
}

module attributes {stable_mosaic.version = 11 : i64} {
  func.func @_bn_relu_kernel(%arg0: i32, %arg1: i32, %arg2: memref<512x128xf32, #tpu.memory_space<vmem>>, %arg3: memref<1x128xf32, #tpu.memory_space<vmem>>, %arg4: memref<1x128xf32, #tpu.memory_space<vmem>>, %arg5: memref<512x128xf32, #tpu.memory_space<vmem>>, %arg6: memref<1x128xf32, #tpu.memory_space<vmem>>, %arg7: memref<1x128xf32, #tpu.memory_space<vmem>>, %arg8: memref<2x128xf32, #tpu.memory_space<vmem>>) attributes {dimension_semantics = [#tpu.dimension_semantics<arbitrary>, #tpu.dimension_semantics<arbitrary>], iteration_bounds = array<i64: 2, 1>, scalar_prefetch = 0 : i64, scratch_operands = 3 : i64, tpu.core_type = #tpu.core_type<tc>, window_params = [{transform_indices = @transform_0, window_bounds = array<i64: 512, 128>}, {pipeline_mode = #tpu.pipeline_mode<synchronous>, transform_indices = @transform_1, window_bounds = array<i64: 1, 128>}, {pipeline_mode = #tpu.pipeline_mode<synchronous>, transform_indices = @transform_2, window_bounds = array<i64: 1, 128>}, {transform_indices = @transform_3, window_bounds = array<i64: 512, 128>}]} {
    %c0_i32 = arith.constant 0 : i32
    %0 = arith.cmpi eq, %arg0, %c0_i32 : i32
    %c0_i32_0 = arith.constant 0 : i32
    %1 = arith.cmpi eq, %arg1, %c0_i32_0 : i32
    %2 = arith.andi %0, %1 : i1
    %3 = arith.extui %2 : i1 to i32
    %c0_i32_1 = arith.constant 0 : i32
    %4 = arith.cmpi ne, %3, %c0_i32_1 : i32
    scf.if %4 {
      %cst = arith.constant 0.000000e+00 : f32
      %16 = vector.broadcast %cst : f32 to vector<1x128xf32>
      %c0 = arith.constant 0 : index
      %c0_8 = arith.constant 0 : index
      %17 = vector.load %arg6[%c0, %c0_8] : memref<1x128xf32, #tpu.memory_space<vmem>>, vector<1x128xf32>
      tpu.vector_store %arg6[%c0, %c0_8], %16 {strides = array<i32>} : memref<1x128xf32, #tpu.memory_space<vmem>>, vector<1x128xf32>,
      %cst_9 = arith.constant 0.000000e+00 : f32
      %18 = vector.broadcast %cst_9 : f32 to vector<1x128xf32>
      %c0_10 = arith.constant 0 : index
      %c0_11 = arith.constant 0 : index
      %19 = vector.load %arg7[%c0_10, %c0_11] : memref<1x128xf32, #tpu.memory_space<vmem>>, vector<1x128xf32>
      tpu.vector_store %arg7[%c0_10, %c0_11], %18 {strides = array<i32>} : memref<1x128xf32, #tpu.memory_space<vmem>>, vector<1x128xf32>,
    } else {
    }
    %c0_i32_2 = arith.constant 0 : i32
    %5 = arith.cmpi eq, %arg0, %c0_i32_2 : i32
    %6 = arith.extui %5 : i1 to i32
    %c0_i32_3 = arith.constant 0 : i32
    %7 = arith.cmpi ne, %6, %c0_i32_3 : i32
    scf.if %7 {
      %c0 = arith.constant 0 : index
      %c0_8 = arith.constant 0 : index
      %16 = vector.load %arg2[%c0, %c0_8] : memref<512x128xf32, #tpu.memory_space<vmem>>, vector<512x128xf32>
      %c0_9 = arith.constant 0 : index
      %c0_10 = arith.constant 0 : index
      %17 = vector.load %arg6[%c0_9, %c0_10] : memref<1x128xf32, #tpu.memory_space<vmem>>, vector<1x128xf32>
      %cst = arith.constant dense<0.000000e+00> : vector<128xf32>
      %18 = vector.multi_reduction <add>, %16, %cst [0] : vector<512x128xf32> to vector<128xf32>
      %19 = vector.shape_cast %18 : vector<128xf32> to vector<1x128xf32>
      %20 = arith.addf %17, %19 : vector<1x128xf32>
      %c0_11 = arith.constant 0 : index
      %c0_12 = arith.constant 0 : index
      %21 = vector.load %arg6[%c0_11, %c0_12] : memref<1x128xf32, #tpu.memory_space<vmem>>, vector<1x128xf32>
      tpu.vector_store %arg6[%c0_11, %c0_12], %20 {strides = array<i32>} : memref<1x128xf32, #tpu.memory_space<vmem>>, vector<1x128xf32>,
      %c0_13 = arith.constant 0 : index
      %c0_14 = arith.constant 0 : index
      %22 = vector.load %arg7[%c0_13, %c0_14] : memref<1x128xf32, #tpu.memory_space<vmem>>, vector<1x128xf32>
      %23 = arith.mulf %16, %16 : vector<512x128xf32>
      %cst_15 = arith.constant dense<0.000000e+00> : vector<128xf32>
      %24 = vector.multi_reduction <add>, %23, %cst_15 [0] : vector<512x128xf32> to vector<128xf32>
      %25 = vector.shape_cast %24 : vector<128xf32> to vector<1x128xf32>
      %26 = arith.addf %22, %25 : vector<1x128xf32>
      %c0_16 = arith.constant 0 : index
      %c0_17 = arith.constant 0 : index
      %27 = vector.load %arg7[%c0_16, %c0_17] : memref<1x128xf32, #tpu.memory_space<vmem>>, vector<1x128xf32>
      tpu.vector_store %arg7[%c0_16, %c0_17], %26 {strides = array<i32>} : memref<1x128xf32, #tpu.memory_space<vmem>>, vector<1x128xf32>,
    } else {
    }
    %c1_i32 = arith.constant 1 : i32
    %8 = arith.cmpi eq, %arg0, %c1_i32 : i32
    %c0_i32_4 = arith.constant 0 : i32
    %9 = arith.cmpi eq, %arg1, %c0_i32_4 : i32
    %10 = arith.andi %8, %9 : i1
    %11 = arith.extui %10 : i1 to i32
    %c0_i32_5 = arith.constant 0 : i32
    %12 = arith.cmpi ne, %11, %c0_i32_5 : i32
    scf.if %12 {
      %c0 = arith.constant 0 : index
      %c0_8 = arith.constant 0 : index
      %16 = vector.load %arg6[%c0, %c0_8] : memref<1x128xf32, #tpu.memory_space<vmem>>, vector<1x128xf32>
      %cst = arith.constant 0.001953125 : f32
      %17 = vector.broadcast %cst : f32 to vector<1x128xf32>
      %18 = arith.mulf %16, %17 : vector<1x128xf32>
      %c0_9 = arith.constant 0 : index
      %c0_10 = arith.constant 0 : index
      %19 = vector.load %arg7[%c0_9, %c0_10] : memref<1x128xf32, #tpu.memory_space<vmem>>, vector<1x128xf32>
      %cst_11 = arith.constant 0.001953125 : f32
      %20 = vector.broadcast %cst_11 : f32 to vector<1x128xf32>
      %21 = arith.mulf %19, %20 : vector<1x128xf32>
      %22 = arith.mulf %18, %18 : vector<1x128xf32>
      %23 = arith.subf %21, %22 : vector<1x128xf32>
      %cst_12 = arith.constant 9.99999974E-6 : f32
      %24 = vector.broadcast %cst_12 : f32 to vector<1x128xf32>
      %25 = arith.addf %23, %24 : vector<1x128xf32>
      %26 = math.rsqrt %25 : vector<1x128xf32>
      %c0_13 = arith.constant 0 : index
      %c0_14 = arith.constant 0 : index
      %27 = vector.load %arg3[%c0_13, %c0_14] : memref<1x128xf32, #tpu.memory_space<vmem>>, vector<1x128xf32>
      %28 = arith.mulf %26, %27 : vector<1x128xf32>
      %c0_15 = arith.constant 0 : index
      %c0_16 = arith.constant 0 : index
      %29 = vector.load %arg8[%c0_15, %c0_16] : memref<2x128xf32, #tpu.memory_space<vmem>>, vector<1x128xf32>
      tpu.vector_store %arg8[%c0_15, %c0_16], %28 {strides = array<i32>} : memref<2x128xf32, #tpu.memory_space<vmem>>, vector<1x128xf32>,
      %c0_17 = arith.constant 0 : index
      %c0_18 = arith.constant 0 : index
      %30 = vector.load %arg4[%c0_17, %c0_18] : memref<1x128xf32, #tpu.memory_space<vmem>>, vector<1x128xf32>
      %31 = arith.mulf %18, %28 : vector<1x128xf32>
      %32 = arith.subf %30, %31 : vector<1x128xf32>
      %c1 = arith.constant 1 : index
      %c0_19 = arith.constant 0 : index
      %33 = vector.load %arg8[%c1, %c0_19] : memref<2x128xf32, #tpu.memory_space<vmem>>, vector<1x128xf32>
      tpu.vector_store %arg8[%c1, %c0_19], %32 {strides = array<i32>} : memref<2x128xf32, #tpu.memory_space<vmem>>, vector<1x128xf32>,
    } else {
    }
    %c1_i32_6 = arith.constant 1 : i32
    %13 = arith.cmpi eq, %arg0, %c1_i32_6 : i32
    %14 = arith.extui %13 : i1 to i32
    %c0_i32_7 = arith.constant 0 : i32
    %15 = arith.cmpi ne, %14, %c0_i32_7 : i32
    scf.if %15 {
      %c0 = arith.constant 0 : index
      %c0_8 = arith.constant 0 : index
      %16 = vector.load %arg2[%c0, %c0_8] : memref<512x128xf32, #tpu.memory_space<vmem>>, vector<512x128xf32>
      %c0_9 = arith.constant 0 : index
      %c0_10 = arith.constant 0 : index
      %17 = vector.load %arg8[%c0_9, %c0_10] : memref<2x128xf32, #tpu.memory_space<vmem>>, vector<1x128xf32>
      %18 = vector.broadcast %17 : vector<1x128xf32> to vector<512x128xf32>
      %19 = arith.mulf %16, %18 : vector<512x128xf32>
      %c1 = arith.constant 1 : index
      %c0_11 = arith.constant 0 : index
      %20 = vector.load %arg8[%c1, %c0_11] : memref<2x128xf32, #tpu.memory_space<vmem>>, vector<1x128xf32>
      %21 = vector.broadcast %20 : vector<1x128xf32> to vector<512x128xf32>
      %22 = arith.addf %19, %21 : vector<512x128xf32>
      %cst = arith.constant 0.000000e+00 : f32
      %23 = vector.broadcast %cst : f32 to vector<512x128xf32>
      %24 = arith.maximumf %22, %23 : vector<512x128xf32>
      %c0_12 = arith.constant 0 : index
      %c0_13 = arith.constant 0 : index
      %25 = vector.load %arg5[%c0_12, %c0_13] : memref<512x128xf32, #tpu.memory_space<vmem>>, vector<512x128xf32>
      tpu.vector_store %arg5[%c0_12, %c0_13], %24 {strides = array<i32>} : memref<512x128xf32, #tpu.memory_space<vmem>>, vector<512x128xf32>,
    } else {
    }
    return
  }
  func.func @transform_0(%arg0: i32, %arg1: i32) -> (i32, i32) {
    %c0_i32 = arith.constant 0 : i32
    %c0_i32_0 = arith.constant 0 : i32
    return %arg1, %c0_i32 : i32, i32
  }
  func.func @transform_1(%arg0: i32, %arg1: i32) -> (i32, i32) {
    %c0_i32 = arith.constant 0 : i32
    %c0_i32_0 = arith.constant 0 : i32
    %c0_i32_1 = arith.constant 0 : i32
    return %c0_i32, %c0_i32_0 : i32, i32
  }
  func.func @transform_2(%arg0: i32, %arg1: i32) -> (i32, i32) {
    %c0_i32 = arith.constant 0 : i32
    %c0_i32_0 = arith.constant 0 : i32
    %c0_i32_1 = arith.constant 0 : i32
    return %c0_i32, %c0_i32_0 : i32, i32
  }
  func.func @transform_3(%arg0: i32, %arg1: i32) -> (i32, i32) {
    %0 = arith.muli %arg1, %arg0 : i32
    %c0_i32 = arith.constant 0 : i32
    %c0_i32_0 = arith.constant 0 : i32
    return %0, %c0_i32 : i32, i32
  }
}

module attributes {stable_mosaic.version = 11 : i64} {
  func.func @_matmul_kernel(%arg0: i32, %arg1: i32, %arg2: memref<1x256x512xbf16, #tpu.memory_space<vmem>>, %arg3: memref<1x512x64xbf16, #tpu.memory_space<vmem>>, %arg4: memref<1x256x64xf32, #tpu.memory_space<vmem>>) attributes {dimension_semantics = [#tpu.dimension_semantics<parallel>, #tpu.dimension_semantics<parallel>], iteration_bounds = array<i64: 4, 2>, scalar_prefetch = 0 : i64, scratch_operands = 0 : i64, tpu.core_type = #tpu.core_type<tc>, window_params = [{transform_indices = @transform_0, window_bounds = array<i64: 1, 256, 512>}, {transform_indices = @transform_1, window_bounds = array<i64: 1, 512, 64>}, {transform_indices = @transform_2, window_bounds = array<i64: 1, 256, 64>}]} {
    %c0 = arith.constant 0 : index
    %c0_0 = arith.constant 0 : index
    %c0_1 = arith.constant 0 : index
    %0 = vector.load %arg2[%c0, %c0_0, %c0_1] : memref<1x256x512xbf16, #tpu.memory_space<vmem>>, vector<1x256x512xbf16>
    %1 = vector.shape_cast %0 : vector<1x256x512xbf16> to vector<256x512xbf16>
    %c0_2 = arith.constant 0 : index
    %c0_3 = arith.constant 0 : index
    %c0_4 = arith.constant 0 : index
    %2 = vector.load %arg3[%c0_2, %c0_3, %c0_4] : memref<1x512x64xbf16, #tpu.memory_space<vmem>>, vector<1x512x64xbf16>
    %3 = vector.shape_cast %2 : vector<1x512x64xbf16> to vector<512x64xbf16>
    %cst = arith.constant dense<0.000000e+00> : vector<256x64xf32>
    %4 = tpu.matmul %1, %3, %cst {dimension_numbers = #tpu.dot_dimension_numbers<[1], [0], [0], [1], [0, 0, 1, 1], [], []>} : vector<256x512xbf16>, vector<512x64xbf16>, vector<256x64xf32> -> vector<256x64xf32>
    %c0_5 = arith.constant 0 : index
    %c0_6 = arith.constant 0 : index
    %c0_7 = arith.constant 0 : index
    %5 = vector.load %arg4[%c0_5, %c0_6, %c0_7] : memref<1x256x64xf32, #tpu.memory_space<vmem>>, vector<1x256x64xf32>
    %6 = vector.shape_cast %5 : vector<1x256x64xf32> to vector<256x64xf32>
    %7 = vector.shape_cast %4 : vector<256x64xf32> to vector<1x256x64xf32>
    tpu.vector_store %arg4[%c0_5, %c0_6, %c0_7], %7 {strides = array<i32>} : memref<1x256x64xf32, #tpu.memory_space<vmem>>, vector<1x256x64xf32>,
    return
  }
  func.func @transform_0(%arg0: i32, %arg1: i32) -> (i32, i32, i32) {
    %c0_i32 = arith.constant 0 : i32
    %c0_i32_0 = arith.constant 0 : i32
    return %arg0, %arg1, %c0_i32 : i32, i32, i32
  }
  func.func @transform_1(%arg0: i32, %arg1: i32) -> (i32, i32, i32) {
    %c0_i32 = arith.constant 0 : i32
    %c0_i32_0 = arith.constant 0 : i32
    %c0_i32_1 = arith.constant 0 : i32
    return %arg0, %c0_i32, %c0_i32_0 : i32, i32, i32
  }
  func.func @transform_2(%arg0: i32, %arg1: i32) -> (i32, i32, i32) {
    %c0_i32 = arith.constant 0 : i32
    %c0_i32_0 = arith.constant 0 : i32
    return %arg0, %arg1, %c0_i32 : i32, i32, i32
  }
}

module attributes {stable_mosaic.version = 11 : i64} {
  func.func @_bn_relu_kernel(%arg0: i32, %arg1: i32, %arg2: memref<512x64xf32, #tpu.memory_space<vmem>>, %arg3: memref<1x64xf32, #tpu.memory_space<vmem>>, %arg4: memref<1x64xf32, #tpu.memory_space<vmem>>, %arg5: memref<512x64xf32, #tpu.memory_space<vmem>>, %arg6: memref<1x64xf32, #tpu.memory_space<vmem>>, %arg7: memref<1x64xf32, #tpu.memory_space<vmem>>, %arg8: memref<2x64xf32, #tpu.memory_space<vmem>>) attributes {dimension_semantics = [#tpu.dimension_semantics<arbitrary>, #tpu.dimension_semantics<arbitrary>], iteration_bounds = array<i64: 2, 4>, scalar_prefetch = 0 : i64, scratch_operands = 3 : i64, tpu.core_type = #tpu.core_type<tc>, window_params = [{transform_indices = @transform_0, window_bounds = array<i64: 512, 64>}, {pipeline_mode = #tpu.pipeline_mode<synchronous>, transform_indices = @transform_1, window_bounds = array<i64: 1, 64>}, {pipeline_mode = #tpu.pipeline_mode<synchronous>, transform_indices = @transform_2, window_bounds = array<i64: 1, 64>}, {transform_indices = @transform_3, window_bounds = array<i64: 512, 64>}]} {
    %c0_i32 = arith.constant 0 : i32
    %0 = arith.cmpi eq, %arg0, %c0_i32 : i32
    %c0_i32_0 = arith.constant 0 : i32
    %1 = arith.cmpi eq, %arg1, %c0_i32_0 : i32
    %2 = arith.andi %0, %1 : i1
    %3 = arith.extui %2 : i1 to i32
    %c0_i32_1 = arith.constant 0 : i32
    %4 = arith.cmpi ne, %3, %c0_i32_1 : i32
    scf.if %4 {
      %cst = arith.constant 0.000000e+00 : f32
      %16 = vector.broadcast %cst : f32 to vector<1x64xf32>
      %c0 = arith.constant 0 : index
      %c0_8 = arith.constant 0 : index
      %17 = vector.load %arg6[%c0, %c0_8] : memref<1x64xf32, #tpu.memory_space<vmem>>, vector<1x64xf32>
      tpu.vector_store %arg6[%c0, %c0_8], %16 {strides = array<i32>} : memref<1x64xf32, #tpu.memory_space<vmem>>, vector<1x64xf32>,
      %cst_9 = arith.constant 0.000000e+00 : f32
      %18 = vector.broadcast %cst_9 : f32 to vector<1x64xf32>
      %c0_10 = arith.constant 0 : index
      %c0_11 = arith.constant 0 : index
      %19 = vector.load %arg7[%c0_10, %c0_11] : memref<1x64xf32, #tpu.memory_space<vmem>>, vector<1x64xf32>
      tpu.vector_store %arg7[%c0_10, %c0_11], %18 {strides = array<i32>} : memref<1x64xf32, #tpu.memory_space<vmem>>, vector<1x64xf32>,
    } else {
    }
    %c0_i32_2 = arith.constant 0 : i32
    %5 = arith.cmpi eq, %arg0, %c0_i32_2 : i32
    %6 = arith.extui %5 : i1 to i32
    %c0_i32_3 = arith.constant 0 : i32
    %7 = arith.cmpi ne, %6, %c0_i32_3 : i32
    scf.if %7 {
      %c0 = arith.constant 0 : index
      %c0_8 = arith.constant 0 : index
      %16 = vector.load %arg2[%c0, %c0_8] : memref<512x64xf32, #tpu.memory_space<vmem>>, vector<512x64xf32>
      %c0_9 = arith.constant 0 : index
      %c0_10 = arith.constant 0 : index
      %17 = vector.load %arg6[%c0_9, %c0_10] : memref<1x64xf32, #tpu.memory_space<vmem>>, vector<1x64xf32>
      %cst = arith.constant dense<0.000000e+00> : vector<64xf32>
      %18 = vector.multi_reduction <add>, %16, %cst [0] : vector<512x64xf32> to vector<64xf32>
      %19 = vector.shape_cast %18 : vector<64xf32> to vector<1x64xf32>
      %20 = arith.addf %17, %19 : vector<1x64xf32>
      %c0_11 = arith.constant 0 : index
      %c0_12 = arith.constant 0 : index
      %21 = vector.load %arg6[%c0_11, %c0_12] : memref<1x64xf32, #tpu.memory_space<vmem>>, vector<1x64xf32>
      tpu.vector_store %arg6[%c0_11, %c0_12], %20 {strides = array<i32>} : memref<1x64xf32, #tpu.memory_space<vmem>>, vector<1x64xf32>,
      %c0_13 = arith.constant 0 : index
      %c0_14 = arith.constant 0 : index
      %22 = vector.load %arg7[%c0_13, %c0_14] : memref<1x64xf32, #tpu.memory_space<vmem>>, vector<1x64xf32>
      %23 = arith.mulf %16, %16 : vector<512x64xf32>
      %cst_15 = arith.constant dense<0.000000e+00> : vector<64xf32>
      %24 = vector.multi_reduction <add>, %23, %cst_15 [0] : vector<512x64xf32> to vector<64xf32>
      %25 = vector.shape_cast %24 : vector<64xf32> to vector<1x64xf32>
      %26 = arith.addf %22, %25 : vector<1x64xf32>
      %c0_16 = arith.constant 0 : index
      %c0_17 = arith.constant 0 : index
      %27 = vector.load %arg7[%c0_16, %c0_17] : memref<1x64xf32, #tpu.memory_space<vmem>>, vector<1x64xf32>
      tpu.vector_store %arg7[%c0_16, %c0_17], %26 {strides = array<i32>} : memref<1x64xf32, #tpu.memory_space<vmem>>, vector<1x64xf32>,
    } else {
    }
    %c1_i32 = arith.constant 1 : i32
    %8 = arith.cmpi eq, %arg0, %c1_i32 : i32
    %c0_i32_4 = arith.constant 0 : i32
    %9 = arith.cmpi eq, %arg1, %c0_i32_4 : i32
    %10 = arith.andi %8, %9 : i1
    %11 = arith.extui %10 : i1 to i32
    %c0_i32_5 = arith.constant 0 : i32
    %12 = arith.cmpi ne, %11, %c0_i32_5 : i32
    scf.if %12 {
      %c0 = arith.constant 0 : index
      %c0_8 = arith.constant 0 : index
      %16 = vector.load %arg6[%c0, %c0_8] : memref<1x64xf32, #tpu.memory_space<vmem>>, vector<1x64xf32>
      %cst = arith.constant 4.8828125E-4 : f32
      %17 = vector.broadcast %cst : f32 to vector<1x64xf32>
      %18 = arith.mulf %16, %17 : vector<1x64xf32>
      %c0_9 = arith.constant 0 : index
      %c0_10 = arith.constant 0 : index
      %19 = vector.load %arg7[%c0_9, %c0_10] : memref<1x64xf32, #tpu.memory_space<vmem>>, vector<1x64xf32>
      %cst_11 = arith.constant 4.8828125E-4 : f32
      %20 = vector.broadcast %cst_11 : f32 to vector<1x64xf32>
      %21 = arith.mulf %19, %20 : vector<1x64xf32>
      %22 = arith.mulf %18, %18 : vector<1x64xf32>
      %23 = arith.subf %21, %22 : vector<1x64xf32>
      %cst_12 = arith.constant 9.99999974E-6 : f32
      %24 = vector.broadcast %cst_12 : f32 to vector<1x64xf32>
      %25 = arith.addf %23, %24 : vector<1x64xf32>
      %26 = math.rsqrt %25 : vector<1x64xf32>
      %c0_13 = arith.constant 0 : index
      %c0_14 = arith.constant 0 : index
      %27 = vector.load %arg3[%c0_13, %c0_14] : memref<1x64xf32, #tpu.memory_space<vmem>>, vector<1x64xf32>
      %28 = arith.mulf %26, %27 : vector<1x64xf32>
      %c0_15 = arith.constant 0 : index
      %c0_16 = arith.constant 0 : index
      %29 = vector.load %arg8[%c0_15, %c0_16] : memref<2x64xf32, #tpu.memory_space<vmem>>, vector<1x64xf32>
      tpu.vector_store %arg8[%c0_15, %c0_16], %28 {strides = array<i32>} : memref<2x64xf32, #tpu.memory_space<vmem>>, vector<1x64xf32>,
      %c0_17 = arith.constant 0 : index
      %c0_18 = arith.constant 0 : index
      %30 = vector.load %arg4[%c0_17, %c0_18] : memref<1x64xf32, #tpu.memory_space<vmem>>, vector<1x64xf32>
      %31 = arith.mulf %18, %28 : vector<1x64xf32>
      %32 = arith.subf %30, %31 : vector<1x64xf32>
      %c1 = arith.constant 1 : index
      %c0_19 = arith.constant 0 : index
      %33 = vector.load %arg8[%c1, %c0_19] : memref<2x64xf32, #tpu.memory_space<vmem>>, vector<1x64xf32>
      tpu.vector_store %arg8[%c1, %c0_19], %32 {strides = array<i32>} : memref<2x64xf32, #tpu.memory_space<vmem>>, vector<1x64xf32>,
    } else {
    }
    %c1_i32_6 = arith.constant 1 : i32
    %13 = arith.cmpi eq, %arg0, %c1_i32_6 : i32
    %14 = arith.extui %13 : i1 to i32
    %c0_i32_7 = arith.constant 0 : i32
    %15 = arith.cmpi ne, %14, %c0_i32_7 : i32
    scf.if %15 {
      %c0 = arith.constant 0 : index
      %c0_8 = arith.constant 0 : index
      %16 = vector.load %arg2[%c0, %c0_8] : memref<512x64xf32, #tpu.memory_space<vmem>>, vector<512x64xf32>
      %c0_9 = arith.constant 0 : index
      %c0_10 = arith.constant 0 : index
      %17 = vector.load %arg8[%c0_9, %c0_10] : memref<2x64xf32, #tpu.memory_space<vmem>>, vector<1x64xf32>
      %18 = vector.broadcast %17 : vector<1x64xf32> to vector<512x64xf32>
      %19 = arith.mulf %16, %18 : vector<512x64xf32>
      %c1 = arith.constant 1 : index
      %c0_11 = arith.constant 0 : index
      %20 = vector.load %arg8[%c1, %c0_11] : memref<2x64xf32, #tpu.memory_space<vmem>>, vector<1x64xf32>
      %21 = vector.broadcast %20 : vector<1x64xf32> to vector<512x64xf32>
      %22 = arith.addf %19, %21 : vector<512x64xf32>
      %cst = arith.constant 0.000000e+00 : f32
      %23 = vector.broadcast %cst : f32 to vector<512x64xf32>
      %24 = arith.maximumf %22, %23 : vector<512x64xf32>
      %c0_12 = arith.constant 0 : index
      %c0_13 = arith.constant 0 : index
      %25 = vector.load %arg5[%c0_12, %c0_13] : memref<512x64xf32, #tpu.memory_space<vmem>>, vector<512x64xf32>
      tpu.vector_store %arg5[%c0_12, %c0_13], %24 {strides = array<i32>} : memref<512x64xf32, #tpu.memory_space<vmem>>, vector<512x64xf32>,
    } else {
    }
    return
  }
  func.func @transform_0(%arg0: i32, %arg1: i32) -> (i32, i32) {
    %c0_i32 = arith.constant 0 : i32
    %c0_i32_0 = arith.constant 0 : i32
    return %arg1, %c0_i32 : i32, i32
  }
  func.func @transform_1(%arg0: i32, %arg1: i32) -> (i32, i32) {
    %c0_i32 = arith.constant 0 : i32
    %c0_i32_0 = arith.constant 0 : i32
    %c0_i32_1 = arith.constant 0 : i32
    return %c0_i32, %c0_i32_0 : i32, i32
  }
  func.func @transform_2(%arg0: i32, %arg1: i32) -> (i32, i32) {
    %c0_i32 = arith.constant 0 : i32
    %c0_i32_0 = arith.constant 0 : i32
    %c0_i32_1 = arith.constant 0 : i32
    return %c0_i32, %c0_i32_0 : i32, i32
  }
  func.func @transform_3(%arg0: i32, %arg1: i32) -> (i32, i32) {
    %0 = arith.muli %arg1, %arg0 : i32
    %c0_i32 = arith.constant 0 : i32
    %c0_i32_0 = arith.constant 0 : i32
    return %0, %c0_i32 : i32, i32
  }
}

module attributes {stable_mosaic.version = 11 : i64} {
  func.func @_matmul_kernel(%arg0: i32, %arg1: i32, %arg2: memref<1x256x256xbf16, #tpu.memory_space<vmem>>, %arg3: memref<1x256x128xbf16, #tpu.memory_space<vmem>>, %arg4: memref<1x256x128xf32, #tpu.memory_space<vmem>>) attributes {dimension_semantics = [#tpu.dimension_semantics<parallel>, #tpu.dimension_semantics<parallel>], iteration_bounds = array<i64: 4, 8>, scalar_prefetch = 0 : i64, scratch_operands = 0 : i64, tpu.core_type = #tpu.core_type<tc>, window_params = [{transform_indices = @transform_0, window_bounds = array<i64: 1, 256, 256>}, {transform_indices = @transform_1, window_bounds = array<i64: 1, 256, 128>}, {transform_indices = @transform_2, window_bounds = array<i64: 1, 256, 128>}]} {
    %c0 = arith.constant 0 : index
    %c0_0 = arith.constant 0 : index
    %c0_1 = arith.constant 0 : index
    %0 = vector.load %arg2[%c0, %c0_0, %c0_1] : memref<1x256x256xbf16, #tpu.memory_space<vmem>>, vector<1x256x256xbf16>
    %1 = vector.shape_cast %0 : vector<1x256x256xbf16> to vector<256x256xbf16>
    %c0_2 = arith.constant 0 : index
    %c0_3 = arith.constant 0 : index
    %c0_4 = arith.constant 0 : index
    %2 = vector.load %arg3[%c0_2, %c0_3, %c0_4] : memref<1x256x128xbf16, #tpu.memory_space<vmem>>, vector<1x256x128xbf16>
    %3 = vector.shape_cast %2 : vector<1x256x128xbf16> to vector<256x128xbf16>
    %cst = arith.constant dense<0.000000e+00> : vector<256x128xf32>
    %4 = tpu.matmul %1, %3, %cst {dimension_numbers = #tpu.dot_dimension_numbers<[1], [0], [0], [1], [0, 0, 1, 1], [], []>} : vector<256x256xbf16>, vector<256x128xbf16>, vector<256x128xf32> -> vector<256x128xf32>
    %5 = math.tanh %4 : vector<256x128xf32>
    %c0_5 = arith.constant 0 : index
    %c0_6 = arith.constant 0 : index
    %c0_7 = arith.constant 0 : index
    %6 = vector.load %arg4[%c0_5, %c0_6, %c0_7] : memref<1x256x128xf32, #tpu.memory_space<vmem>>, vector<1x256x128xf32>
    %7 = vector.shape_cast %6 : vector<1x256x128xf32> to vector<256x128xf32>
    %8 = vector.shape_cast %5 : vector<256x128xf32> to vector<1x256x128xf32>
    tpu.vector_store %arg4[%c0_5, %c0_6, %c0_7], %8 {strides = array<i32>} : memref<1x256x128xf32, #tpu.memory_space<vmem>>, vector<1x256x128xf32>,
    return
  }
  func.func @transform_0(%arg0: i32, %arg1: i32) -> (i32, i32, i32) {
    %c0_i32 = arith.constant 0 : i32
    %c0_i32_0 = arith.constant 0 : i32
    return %arg0, %arg1, %c0_i32 : i32, i32, i32
  }
  func.func @transform_1(%arg0: i32, %arg1: i32) -> (i32, i32, i32) {
    %c0_i32 = arith.constant 0 : i32
    %c0_i32_0 = arith.constant 0 : i32
    %c0_i32_1 = arith.constant 0 : i32
    return %arg0, %c0_i32, %c0_i32_0 : i32, i32, i32
  }
  func.func @transform_2(%arg0: i32, %arg1: i32) -> (i32, i32, i32) {
    %c0_i32 = arith.constant 0 : i32
    %c0_i32_0 = arith.constant 0 : i32
    return %arg0, %arg1, %c0_i32 : i32, i32, i32
  }
}

</mosaic_0001>

<bundles_post_ra>
// kernel: squeeze.65
= control target key start
LH: loop header
LB: loop body
LE: loop exit
PB: predicated region body
PF: predicated region fallthrough
CT: control target
= control target key end

     0   :  { %s1540_s0 = inlined_call_operand.vmem [shape: f32[1,2,8192], index: 0, kind: input, shape index: {}]   ;;  %s1541_s1 = inlined_call_operand.vmem [shape: f32[32,512], index: 1, kind: output, shape index: {}]  }
   0x1   :  { %v764_v0 = vld [vmem:[%s1540_s0 + $0x7e] sm:$0x3]  ;;  %v765_v1 = vld [vmem:[%s1540_s0 + $0x7c] sm:$0x3]  ;;  %v766_v2 = vld [vmem:[%s1540_s0 + $0x7a] sm:$0x3] }
   0x2   :  { %8 = vst [vmem:[#allocation0 + $0x1f8] sm:$0x3] %v764_v0  ;;  %13 = vst [vmem:[#allocation0 + $0x1f0] sm:$0x3] %v765_v1  ;;  %v767_v3 = vld [vmem:[%s1540_s0 + $0x78] sm:$0x3] }
   0x3   :  { %18 = vst [vmem:[#allocation0 + $0x1e8] sm:$0x3] %v766_v2  ;;  %v768_v4 = vld [vmem:[%s1540_s0 + $0x76] sm:$0x3]  ;;  %v769_v5 = vld [vmem:[%s1540_s0 + $0x74] sm:$0x3] }
   0x4   :  { %23 = vst [vmem:[#allocation0 + $0x1e0] sm:$0x3] %v767_v3  ;;  %28 = vst [vmem:[#allocation0 + $0x1d8] sm:$0x3] %v768_v4  ;;  %v770_v6 = vld [vmem:[%s1540_s0 + $0x72] sm:$0x3] }
   0x5   :  { %33 = vst [vmem:[#allocation0 + $0x1d0] sm:$0x3] %v769_v5  ;;  %v771_v7 = vld [vmem:[%s1540_s0 + $0x70] sm:$0x3]  ;;  %v772_v8 = vld [vmem:[%s1540_s0 + $0x6e] sm:$0x3] }
   0x6   :  { %38 = vst [vmem:[#allocation0 + $0x1c8] sm:$0x3] %v770_v6  ;;  %43 = vst [vmem:[#allocation0 + $0x1c0] sm:$0x3] %v771_v7  ;;  %v773_v9 = vld [vmem:[%s1540_s0 + $0x6c] sm:$0x3] }
   0x7   :  { %48 = vst [vmem:[#allocation0 + $0x1b8] sm:$0x3] %v772_v8  ;;  %v774_v10 = vld [vmem:[%s1540_s0 + $0x6a] sm:$0x3]  ;;  %v775_v11 = vld [vmem:[%s1540_s0 + $0x68] sm:$0x3] }
   0x8   :  { %53 = vst [vmem:[#allocation0 + $0x1b0] sm:$0x3] %v773_v9  ;;  %58 = vst [vmem:[#allocation0 + $0x1a8] sm:$0x3] %v774_v10  ;;  %v776_v12 = vld [vmem:[%s1540_s0 + $0x66] sm:$0x3] }
   0x9   :  { %63 = vst [vmem:[#allocation0 + $0x1a0] sm:$0x3] %v775_v11  ;;  %v777_v13 = vld [vmem:[%s1540_s0 + $0x64] sm:$0x3]  ;;  %v778_v14 = vld [vmem:[%s1540_s0 + $0x62] sm:$0x3] }
   0xa   :  { %68 = vst [vmem:[#allocation0 + $0x198] sm:$0x3] %v776_v12  ;;  %73 = vst [vmem:[#allocation0 + $0x190] sm:$0x3] %v777_v13  ;;  %v779_v15 = vld [vmem:[%s1540_s0 + $0x60] sm:$0x3] }
   0xb   :  { %78 = vst [vmem:[#allocation0 + $0x188] sm:$0x3] %v778_v14  ;;  %v780_v16 = vld [vmem:[%s1540_s0 + $0x5e] sm:$0x3]  ;;  %v781_v17 = vld [vmem:[%s1540_s0 + $0x5c] sm:$0x3] }
   0xc   :  { %83 = vst [vmem:[#allocation0 + $0x180] sm:$0x3] %v779_v15  ;;  %88 = vst [vmem:[#allocation0 + $0x178] sm:$0x3] %v780_v16  ;;  %v782_v18 = vld [vmem:[%s1540_s0 + $0x5a] sm:$0x3] }
   0xd   :  { %93 = vst [vmem:[#allocation0 + $0x170] sm:$0x3] %v781_v17  ;;  %v783_v19 = vld [vmem:[%s1540_s0 + $0x58] sm:$0x3]  ;;  %v784_v20 = vld [vmem:[%s1540_s0 + $0x56] sm:$0x3] }
   0xe   :  { %98 = vst [vmem:[#allocation0 + $0x168] sm:$0x3] %v782_v18  ;;  %103 = vst [vmem:[#allocation0 + $0x160] sm:$0x3] %v783_v19  ;;  %v785_v21 = vld [vmem:[%s1540_s0 + $0x54] sm:$0x3] }
   0xf   :  { %108 = vst [vmem:[#allocation0 + $0x158] sm:$0x3] %v784_v20  ;;  %v786_v22 = vld [vmem:[%s1540_s0 + $0x52] sm:$0x3]  ;;  %v787_v23 = vld [vmem:[%s1540_s0 + $0x50] sm:$0x3] }
  0x10   :  { %113 = vst [vmem:[#allocation0 + $0x150] sm:$0x3] %v785_v21  ;;  %118 = vst [vmem:[#allocation0 + $0x148] sm:$0x3] %v786_v22  ;;  %v788_v24 = vld [vmem:[%s1540_s0 + $0x4e] sm:$0x3] }
  0x11   :  { %123 = vst [vmem:[#allocation0 + $0x140] sm:$0x3] %v787_v23  ;;  %v789_v25 = vld [vmem:[%s1540_s0 + $0x4c] sm:$0x3]  ;;  %v790_v26 = vld [vmem:[%s1540_s0 + $0x4a] sm:$0x3] }
  0x12   :  { %128 = vst [vmem:[#allocation0 + $0x138] sm:$0x3] %v788_v24  ;;  %133 = vst [vmem:[#allocation0 + $0x130] sm:$0x3] %v789_v25  ;;  %v791_v27 = vld [vmem:[%s1540_s0 + $0x48] sm:$0x3] }
  0x13   :  { %138 = vst [vmem:[#allocation0 + $0x128] sm:$0x3] %v790_v26  ;;  %v792_v28 = vld [vmem:[%s1540_s0 + $0x46] sm:$0x3]  ;;  %v793_v29 = vld [vmem:[%s1540_s0 + $0x44] sm:$0x3] }
  0x14   :  { %143 = vst [vmem:[#allocation0 + $0x120] sm:$0x3] %v791_v27  ;;  %148 = vst [vmem:[#allocation0 + $0x118] sm:$0x3] %v792_v28  ;;  %v794_v30 = vld [vmem:[%s1540_s0 + $0x42] sm:$0x3] }
  0x15   :  { %153 = vst [vmem:[#allocation0 + $0x110] sm:$0x3] %v793_v29  ;;  %v795_v31 = vld [vmem:[%s1540_s0 + $0x40] sm:$0x3]  ;;  %v796_v32 = vld [vmem:[%s1540_s0 + $0x3e] sm:$0x3] }
  0x16   :  { %158 = vst [vmem:[#allocation0 + $0x108] sm:$0x3] %v794_v30  ;;  %163 = vst [vmem:[#allocation0 + $0x100] sm:$0x3] %v795_v31  ;;  %v797_v33 = vld [vmem:[%s1540_s0 + $0x3c] sm:$0x3] }
  0x17   :  { %168 = vst [vmem:[#allocation0 + $0xf8] sm:$0x3] %v796_v32  ;;  %v798_v34 = vld [vmem:[%s1540_s0 + $0x3a] sm:$0x3]  ;;  %v799_v35 = vld [vmem:[%s1540_s0 + $0x38] sm:$0x3] }
  0x18   :  { %173 = vst [vmem:[#allocation0 + $0xf0] sm:$0x3] %v797_v33  ;;  %178 = vst [vmem:[#allocation0 + $0xe8] sm:$0x3] %v798_v34  ;;  %v800_v36 = vld [vmem:[%s1540_s0 + $0x36] sm:$0x3] }
  0x19   :  { %183 = vst [vmem:[#allocation0 + $0xe0] sm:$0x3] %v799_v35  ;;  %v801_v37 = vld [vmem:[%s1540_s0 + $0x34] sm:$0x3]  ;;  %v802_v38 = vld [vmem:[%s1540_s0 + $0x32] sm:$0x3] }
  0x1a   :  { %188 = vst [vmem:[#allocation0 + $0xd8] sm:$0x3] %v800_v36  ;;  %193 = vst [vmem:[#allocation0 + $0xd0] sm:$0x3] %v801_v37  ;;  %v803_v39 = vld [vmem:[%s1540_s0 + $0x30] sm:$0x3] }
  0x1b   :  { %198 = vst [vmem:[#allocation0 + $0xc8] sm:$0x3] %v802_v38  ;;  %v804_v40 = vld [vmem:[%s1540_s0 + $0x2e] sm:$0x3]  ;;  %v805_v41 = vld [vmem:[%s1540_s0 + $0x2c] sm:$0x3] }
  0x1c   :  { %203 = vst [vmem:[#allocation0 + $0xc0] sm:$0x3] %v803_v39  ;;  %208 = vst [vmem:[#allocation0 + $0xb8] sm:$0x3] %v804_v40  ;;  %v806_v42 = vld [vmem:[%s1540_s0 + $0x2a] sm:$0x3] }
  0x1d   :  { %213 = vst [vmem:[#allocation0 + $0xb0] sm:$0x3] %v805_v41  ;;  %v807_v43 = vld [vmem:[%s1540_s0 + $0x28] sm:$0x3]  ;;  %v808_v44 = vld [vmem:[%s1540_s0 + $0x26] sm:$0x3] }
  0x1e   :  { %218 = vst [vmem:[#allocation0 + $0xa8] sm:$0x3] %v806_v42  ;;  %223 = vst [vmem:[#allocation0 + $0xa0] sm:$0x3] %v807_v43  ;;  %v809_v45 = vld [vmem:[%s1540_s0 + $0x24] sm:$0x3] }
  0x1f   :  { %228 = vst [vmem:[#allocation0 + $0x98] sm:$0x3] %v808_v44  ;;  %v810_v46 = vld [vmem:[%s1540_s0 + $0x22] sm:$0x3]  ;;  %v811_v47 = vld [vmem:[%s1540_s0 + $0x20] sm:$0x3] }
  0x20   :  { %233 = vst [vmem:[#allocation0 + $0x90] sm:$0x3] %v809_v45  ;;  %238 = vst [vmem:[#allocation0 + $0x88] sm:$0x3] %v810_v46  ;;  %v812_v48 = vld [vmem:[%s1540_s0 + $0x1e] sm:$0x3] }
  0x21   :  { %243 = vst [vmem:[#allocation0 + $0x80] sm:$0x3] %v811_v47  ;;  %v813_v49 = vld [vmem:[%s1540_s0 + $0x1c] sm:$0x3]  ;;  %v814_v50 = vld [vmem:[%s1540_s0 + $0x1a] sm:$0x3] }
  0x22   :  { %248 = vst [vmem:[#allocation0 + $0x78] sm:$0x3] %v812_v48  ;;  %253 = vst [vmem:[#allocation0 + $0x70] sm:$0x3] %v813_v49  ;;  %v815_v51 = vld [vmem:[%s1540_s0 + $0x18] sm:$0x3] }
  0x23   :  { %258 = vst [vmem:[#allocation0 + $0x68] sm:$0x3] %v814_v50  ;;  %v816_v52 = vld [vmem:[%s1540_s0 + $0x16] sm:$0x3]  ;;  %v817_v53 = vld [vmem:[%s1540_s0 + $0x14] sm:$0x3] }
  0x24   :  { %263 = vst [vmem:[#allocation0 + $0x60] sm:$0x3] %v815_v51  ;;  %268 = vst [vmem:[#allocation0 + $0x58] sm:$0x3] %v816_v52  ;;  %v818_v54 = vld [vmem:[%s1540_s0 + $0x12] sm:$0x3] }
  0x25   :  { %273 = vst [vmem:[#allocation0 + $0x50] sm:$0x3] %v817_v53  ;;  %v819_v55 = vld [vmem:[%s1540_s0 + $0x10] sm:$0x3]  ;;  %v820_v56 = vld [vmem:[%s1540_s0 + $0xe] sm:$0x3] }
  0x26   :  { %278 = vst [vmem:[#allocation0 + $0x48] sm:$0x3] %v818_v54  ;;  %283 = vst [vmem:[#allocation0 + $0x40] sm:$0x3] %v819_v55  ;;  %v821_v57 = vld [vmem:[%s1540_s0 + $0xc] sm:$0x3] }
  0x27   :  { %288 = vst [vmem:[#allocation0 + $0x38] sm:$0x3] %v820_v56  ;;  %v822_v58 = vld [vmem:[%s1540_s0 + $0xa] sm:$0x3]  ;;  %v823_v59 = vld [vmem:[%s1540_s0 + $0x8] sm:$0x3] }
  0x28   :  { %293 = vst [vmem:[#allocation0 + $0x30] sm:$0x3] %v821_v57  ;;  %298 = vst [vmem:[#allocation0 + $0x28] sm:$0x3] %v822_v58  ;;  %v824_v60 = vld [vmem:[%s1540_s0 + $0x6] sm:$0x3] }
  0x29   :  { %303 = vst [vmem:[#allocation0 + $0x20] sm:$0x3] %v823_v59  ;;  %v825_v61 = vld [vmem:[%s1540_s0 + $0x4] sm:$0x3]  ;;  %v826_v62 = vld [vmem:[%s1540_s0 + $0x2] sm:$0x3] }
  0x2a   :  { %308 = vst [vmem:[#allocation0 + $0x18] sm:$0x3] %v824_v60  ;;  %313 = vst [vmem:[#allocation0 + $0x10] sm:$0x3] %v825_v61  ;;  %v318_v63 = vld [vmem:[%s1540_s0] sm:$0x3] }
  0x2b   :  { %317 = vst [vmem:[#allocation0 + $0x8] sm:$0x3] %v826_v62  ;;  %v451_v0 = vld [vmem:[#allocation0 + $0xb0] sm:$0x3]   ;;  %v457_v1 = vld [vmem:[#allocation0 + $0xb8] sm:$0x3]  }
  0x2c   :  { %319 = vst [vmem:[#allocation0] sm:$0x3] %v318_v63  ;;  %v433_v2 = vld [vmem:[#allocation0 + $0x98] sm:$0x3]   ;;  %v439_v3 = vld [vmem:[#allocation0 + $0xa0] sm:$0x3]  }
  0x2d   :  { %v445_v4 = vld [vmem:[#allocation0 + $0xa8] sm:$0x3]   ;;  %870 = vst [vmem:[%s1541_s1 + $0x15] sm:$0x1] %v451_v0   ;;  %871 = vst [vmem:[%s1541_s1 + $0x54] sm:$0x2] %v451_v0  }
  0x2e   :  { %872 = vst [vmem:[%s1541_s1 + $0x1d] sm:$0x1] %v457_v1   ;;  %873 = vst [vmem:[%s1541_s1 + $0x5c] sm:$0x2] %v457_v1   ;;  %v415_v5 = vld [vmem:[#allocation0 + $0x80] sm:$0x3]  }
  0x2f   :  { %v421_v6 = vld [vmem:[#allocation0 + $0x88] sm:$0x3]   ;;  %v427_v7 = vld [vmem:[#allocation0 + $0x90] sm:$0x3]   ;;  %864 = vst [vmem:[%s1541_s1 + $0x1c] sm:$0x1] %v433_v2  }
  0x30   :  { %865 = vst [vmem:[%s1541_s1 + $0x5b] sm:$0x2] %v433_v2   ;;  %866 = vst [vmem:[%s1541_s1 + $0x5] sm:$0x1] %v439_v3   ;;  %v397_v8 = vld [vmem:[#allocation0 + $0x68] sm:$0x3]  }
  0x31   :  { %867 = vst [vmem:[%s1541_s1 + $0x44] sm:$0x2] %v439_v3   ;;  %868 = vst [vmem:[%s1541_s1 + $0xd] sm:$0x1] %v445_v4   ;;  %v403_v9 = vld [vmem:[#allocation0 + $0x70] sm:$0x3]  }
  0x32   :  { %869 = vst [vmem:[%s1541_s1 + $0x4c] sm:$0x2] %v445_v4   ;;  %v409_v10 = vld [vmem:[#allocation0 + $0x78] sm:$0x3]   ;;  %858 = vst [vmem:[%s1541_s1 + $0x4] sm:$0x1] %v415_v5  }
  0x33   :  { %859 = vst [vmem:[%s1541_s1 + $0x43] sm:$0x2] %v415_v5   ;;  %860 = vst [vmem:[%s1541_s1 + $0xc] sm:$0x1] %v421_v6   ;;  %v379_v11 = vld [vmem:[#allocation0 + $0x50] sm:$0x3]  }
  0x34   :  { %861 = vst [vmem:[%s1541_s1 + $0x4b] sm:$0x2] %v421_v6   ;;  %862 = vst [vmem:[%s1541_s1 + $0x14] sm:$0x1] %v427_v7   ;;  %v385_v12 = vld [vmem:[#allocation0 + $0x58] sm:$0x3]  }
  0x35   :  { %863 = vst [vmem:[%s1541_s1 + $0x53] sm:$0x2] %v427_v7   ;;  %v391_v13 = vld [vmem:[#allocation0 + $0x60] sm:$0x3]   ;;  %852 = vst [vmem:[%s1541_s1 + $0xb] sm:$0x1] %v397_v8  }
  0x36   :  { %853 = vst [vmem:[%s1541_s1 + $0x4a] sm:$0x2] %v397_v8   ;;  %854 = vst [vmem:[%s1541_s1 + $0x13] sm:$0x1] %v403_v9   ;;  %v361_v14 = vld [vmem:[#allocation0 + $0x38] sm:$0x3]  }
  0x37   :  { %855 = vst [vmem:[%s1541_s1 + $0x52] sm:$0x2] %v403_v9   ;;  %856 = vst [vmem:[%s1541_s1 + $0x1b] sm:$0x1] %v409_v10   ;;  %v367_v15 = vld [vmem:[#allocation0 + $0x40] sm:$0x3]  }
  0x38   :  { %857 = vst [vmem:[%s1541_s1 + $0x5a] sm:$0x2] %v409_v10   ;;  %v373_v16 = vld [vmem:[#allocation0 + $0x48] sm:$0x3]   ;;  %846 = vst [vmem:[%s1541_s1 + $0x12] sm:$0x1] %v379_v11  }
  0x39   :  { %847 = vst [vmem:[%s1541_s1 + $0x51] sm:$0x2] %v379_v11   ;;  %848 = vst [vmem:[%s1541_s1 + $0x1a] sm:$0x1] %v385_v12   ;;  %v343_v17 = vld [vmem:[#allocation0 + $0x20] sm:$0x3]  }
  0x3a   :  { %849 = vst [vmem:[%s1541_s1 + $0x59] sm:$0x2] %v385_v12   ;;  %850 = vst [vmem:[%s1541_s1 + $0x3] sm:$0x1] %v391_v13   ;;  %v349_v18 = vld [vmem:[#allocation0 + $0x28] sm:$0x3]  }
  0x3b   :  { %851 = vst [vmem:[%s1541_s1 + $0x42] sm:$0x2] %v391_v13   ;;  %v355_v19 = vld [vmem:[#allocation0 + $0x30] sm:$0x3]   ;;  %840 = vst [vmem:[%s1541_s1 + $0x19] sm:$0x1] %v361_v14  }
  0x3c   :  { %841 = vst [vmem:[%s1541_s1 + $0x58] sm:$0x2] %v361_v14   ;;  %842 = vst [vmem:[%s1541_s1 + $0x2] sm:$0x1] %v367_v15   ;;  %v325_v20 = vld [vmem:[#allocation0 + $0x8] sm:$0x3]  }
  0x3d   :  { %843 = vst [vmem:[%s1541_s1 + $0x41] sm:$0x2] %v367_v15   ;;  %844 = vst [vmem:[%s1541_s1 + $0xa] sm:$0x1] %v373_v16   ;;  %v331_v21 = vld [vmem:[#allocation0 + $0x10] sm:$0x3]  }
  0x3e   :  { %845 = vst [vmem:[%s1541_s1 + $0x49] sm:$0x2] %v373_v16   ;;  %v337_v22 = vld [vmem:[#allocation0 + $0x18] sm:$0x3]   ;;  %834 = vst [vmem:[%s1541_s1 + $0x1] sm:$0x1] %v343_v17  }
  0x3f   :  { %835 = vst [vmem:[%s1541_s1 + $0x40] sm:$0x2] %v343_v17   ;;  %836 = vst [vmem:[%s1541_s1 + $0x9] sm:$0x1] %v349_v18   ;;  %v320_v23 = vld [vmem:[#allocation0] sm:$0x3]  }
  0x40   :  { %837 = vst [vmem:[%s1541_s1 + $0x48] sm:$0x2] %v349_v18   ;;  %838 = vst [vmem:[%s1541_s1 + $0x11] sm:$0x1] %v355_v19   ;;  %v463_v24 = vld [vmem:[#allocation0 + $0xc0] sm:$0x3]  }
  0x41   :  { %839 = vst [vmem:[%s1541_s1 + $0x50] sm:$0x2] %v355_v19   ;;  %828 = vst [vmem:[%s1541_s1 + $0x8] sm:$0x1] %v325_v20   ;;  %v469_v25 = vld [vmem:[#allocation0 + $0xc8] sm:$0x3]  }
  0x42   :  { %829 = vst [vmem:[%s1541_s1 + $0x47] sm:$0x2] %v325_v20   ;;  %830 = vst [vmem:[%s1541_s1 + $0x10] sm:$0x1] %v331_v21   ;;  %v475_v26 = vld [vmem:[#allocation0 + $0xd0] sm:$0x3]  }
  0x43   :  { %831 = vst [vmem:[%s1541_s1 + $0x4f] sm:$0x2] %v331_v21   ;;  %832 = vst [vmem:[%s1541_s1 + $0x18] sm:$0x1] %v337_v22   ;;  %v481_v27 = vld [vmem:[#allocation0 + $0xd8] sm:$0x3]  }
  0x44   :  { %833 = vst [vmem:[%s1541_s1 + $0x57] sm:$0x2] %v337_v22   ;;  %321 = vst [vmem:[%s1541_s1] sm:$0x1] %v320_v23   ;;  %v487_v28 = vld [vmem:[#allocation0 + $0xe0] sm:$0x3]  }
  0x45   :  { %827 = vst [vmem:[%s1541_s1 + $0x3f] sm:$0x2] %v320_v23   ;;  %874 = vst [vmem:[%s1541_s1 + $0x6] sm:$0x1] %v463_v24   ;;  %v493_v29 = vld [vmem:[#allocation0 + $0xe8] sm:$0x3]  }
  0x46   :  { %875 = vst [vmem:[%s1541_s1 + $0x45] sm:$0x2] %v463_v24   ;;  %876 = vst [vmem:[%s1541_s1 + $0xe] sm:$0x1] %v469_v25   ;;  %v499_v30 = vld [vmem:[#allocation0 + $0xf0] sm:$0x3]  }
  0x47   :  { %877 = vst [vmem:[%s1541_s1 + $0x4d] sm:$0x2] %v469_v25   ;;  %878 = vst [vmem:[%s1541_s1 + $0x16] sm:$0x1] %v475_v26   ;;  %v505_v31 = vld [vmem:[#allocation0 + $0xf8] sm:$0x3]  }
  0x48   :  { %879 = vst [vmem:[%s1541_s1 + $0x55] sm:$0x2] %v475_v26   ;;  %880 = vst [vmem:[%s1541_s1 + $0x1e] sm:$0x1] %v481_v27   ;;  %v511_v32 = vld [vmem:[#allocation0 + $0x100] sm:$0x3]  }
  0x49   :  { %881 = vst [vmem:[%s1541_s1 + $0x5d] sm:$0x2] %v481_v27   ;;  %882 = vst [vmem:[%s1541_s1 + $0x7] sm:$0x1] %v487_v28   ;;  %v517_v33 = vld [vmem:[#allocation0 + $0x108] sm:$0x3]  }
  0x4a   :  { %883 = vst [vmem:[%s1541_s1 + $0x46] sm:$0x2] %v487_v28   ;;  %884 = vst [vmem:[%s1541_s1 + $0xf] sm:$0x1] %v493_v29   ;;  %v523_v34 = vld [vmem:[#allocation0 + $0x110] sm:$0x3]  }
  0x4b   :  { %885 = vst [vmem:[%s1541_s1 + $0x4e] sm:$0x2] %v493_v29   ;;  %886 = vst [vmem:[%s1541_s1 + $0x17] sm:$0x1] %v499_v30   ;;  %v529_v35 = vld [vmem:[#allocation0 + $0x118] sm:$0x3]  }
  0x4c   :  { %887 = vst [vmem:[%s1541_s1 + $0x56] sm:$0x2] %v499_v30   ;;  %888 = vst [vmem:[%s1541_s1 + $0x1f] sm:$0x1] %v505_v31   ;;  %v535_v36 = vld [vmem:[#allocation0 + $0x120] sm:$0x3]  }
  0x4d   :  { %889 = vst [vmem:[%s1541_s1 + $0x5e] sm:$0x2] %v505_v31   ;;  %890 = vst [vmem:[%s1541_s1 + $0x20] sm:$0x1] %v511_v32   ;;  %v541_v37 = vld [vmem:[#allocation0 + $0x128] sm:$0x3]  }
  0x4e   :  { %891 = vst [vmem:[%s1541_s1 + $0x5f] sm:$0x2] %v511_v32   ;;  %892 = vst [vmem:[%s1541_s1 + $0x28] sm:$0x1] %v517_v33   ;;  %v547_v38 = vld [vmem:[#allocation0 + $0x130] sm:$0x3]  }
  0x4f   :  { %893 = vst [vmem:[%s1541_s1 + $0x67] sm:$0x2] %v517_v33   ;;  %894 = vst [vmem:[%s1541_s1 + $0x30] sm:$0x1] %v523_v34   ;;  %v553_v39 = vld [vmem:[#allocation0 + $0x138] sm:$0x3]  }
  0x50   :  { %895 = vst [vmem:[%s1541_s1 + $0x6f] sm:$0x2] %v523_v34   ;;  %896 = vst [vmem:[%s1541_s1 + $0x38] sm:$0x1] %v529_v35   ;;  %v559_v40 = vld [vmem:[#allocation0 + $0x140] sm:$0x3]  }
  0x51   :  { %897 = vst [vmem:[%s1541_s1 + $0x77] sm:$0x2] %v529_v35   ;;  %898 = vst [vmem:[%s1541_s1 + $0x21] sm:$0x1] %v535_v36   ;;  %v565_v41 = vld [vmem:[#allocation0 + $0x148] sm:$0x3]  }
  0x52   :  { %899 = vst [vmem:[%s1541_s1 + $0x60] sm:$0x2] %v535_v36   ;;  %900 = vst [vmem:[%s1541_s1 + $0x29] sm:$0x1] %v541_v37   ;;  %v571_v42 = vld [vmem:[#allocation0 + $0x150] sm:$0x3]  }
  0x53   :  { %901 = vst [vmem:[%s1541_s1 + $0x68] sm:$0x2] %v541_v37   ;;  %902 = vst [vmem:[%s1541_s1 + $0x31] sm:$0x1] %v547_v38   ;;  %v577_v43 = vld [vmem:[#allocation0 + $0x158] sm:$0x3]  }
  0x54   :  { %903 = vst [vmem:[%s1541_s1 + $0x70] sm:$0x2] %v547_v38   ;;  %904 = vst [vmem:[%s1541_s1 + $0x39] sm:$0x1] %v553_v39   ;;  %v583_v44 = vld [vmem:[#allocation0 + $0x160] sm:$0x3]  }
  0x55   :  { %905 = vst [vmem:[%s1541_s1 + $0x78] sm:$0x2] %v553_v39   ;;  %906 = vst [vmem:[%s1541_s1 + $0x22] sm:$0x1] %v559_v40   ;;  %v589_v45 = vld [vmem:[#allocation0 + $0x168] sm:$0x3]  }
  0x56   :  { %907 = vst [vmem:[%s1541_s1 + $0x61] sm:$0x2] %v559_v40   ;;  %908 = vst [vmem:[%s1541_s1 + $0x2a] sm:$0x1] %v565_v41   ;;  %v595_v46 = vld [vmem:[#allocation0 + $0x170] sm:$0x3]  }
  0x57   :  { %909 = vst [vmem:[%s1541_s1 + $0x69] sm:$0x2] %v565_v41   ;;  %910 = vst [vmem:[%s1541_s1 + $0x32] sm:$0x1] %v571_v42   ;;  %v601_v47 = vld [vmem:[#allocation0 + $0x178] sm:$0x3]  }
  0x58   :  { %911 = vst [vmem:[%s1541_s1 + $0x71] sm:$0x2] %v571_v42   ;;  %912 = vst [vmem:[%s1541_s1 + $0x3a] sm:$0x1] %v577_v43   ;;  %v607_v48 = vld [vmem:[#allocation0 + $0x180] sm:$0x3]  }
  0x59   :  { %913 = vst [vmem:[%s1541_s1 + $0x79] sm:$0x2] %v577_v43   ;;  %914 = vst [vmem:[%s1541_s1 + $0x23] sm:$0x1] %v583_v44   ;;  %v613_v49 = vld [vmem:[#allocation0 + $0x188] sm:$0x3]  }
  0x5a   :  { %915 = vst [vmem:[%s1541_s1 + $0x62] sm:$0x2] %v583_v44   ;;  %916 = vst [vmem:[%s1541_s1 + $0x2b] sm:$0x1] %v589_v45   ;;  %v619_v50 = vld [vmem:[#allocation0 + $0x190] sm:$0x3]  }
  0x5b   :  { %917 = vst [vmem:[%s1541_s1 + $0x6a] sm:$0x2] %v589_v45   ;;  %918 = vst [vmem:[%s1541_s1 + $0x33] sm:$0x1] %v595_v46   ;;  %v625_v51 = vld [vmem:[#allocation0 + $0x198] sm:$0x3]  }
  0x5c   :  { %919 = vst [vmem:[%s1541_s1 + $0x72] sm:$0x2] %v595_v46   ;;  %920 = vst [vmem:[%s1541_s1 + $0x3b] sm:$0x1] %v601_v47   ;;  %v631_v52 = vld [vmem:[#allocation0 + $0x1a0] sm:$0x3]  }
  0x5d   :  { %921 = vst [vmem:[%s1541_s1 + $0x7a] sm:$0x2] %v601_v47   ;;  %922 = vst [vmem:[%s1541_s1 + $0x24] sm:$0x1] %v607_v48   ;;  %v637_v53 = vld [vmem:[#allocation0 + $0x1a8] sm:$0x3]  }
  0x5e   :  { %923 = vst [vmem:[%s1541_s1 + $0x63] sm:$0x2] %v607_v48   ;;  %924 = vst [vmem:[%s1541_s1 + $0x2c] sm:$0x1] %v613_v49   ;;  %v643_v54 = vld [vmem:[#allocation0 + $0x1b0] sm:$0x3]  }
  0x5f   :  { %925 = vst [vmem:[%s1541_s1 + $0x6b] sm:$0x2] %v613_v49   ;;  %926 = vst [vmem:[%s1541_s1 + $0x34] sm:$0x1] %v619_v50   ;;  %v649_v55 = vld [vmem:[#allocation0 + $0x1b8] sm:$0x3]  }
  0x60   :  { %927 = vst [vmem:[%s1541_s1 + $0x73] sm:$0x2] %v619_v50   ;;  %928 = vst [vmem:[%s1541_s1 + $0x3c] sm:$0x1] %v625_v51   ;;  %v655_v56 = vld [vmem:[#allocation0 + $0x1c0] sm:$0x3]  }
  0x61   :  { %929 = vst [vmem:[%s1541_s1 + $0x7b] sm:$0x2] %v625_v51   ;;  %930 = vst [vmem:[%s1541_s1 + $0x25] sm:$0x1] %v631_v52   ;;  %v661_v57 = vld [vmem:[#allocation0 + $0x1c8] sm:$0x3]  }
  0x62   :  { %931 = vst [vmem:[%s1541_s1 + $0x64] sm:$0x2] %v631_v52   ;;  %932 = vst [vmem:[%s1541_s1 + $0x2d] sm:$0x1] %v637_v53   ;;  %v667_v58 = vld [vmem:[#allocation0 + $0x1d0] sm:$0x3]  }
  0x63   :  { %933 = vst [vmem:[%s1541_s1 + $0x6c] sm:$0x2] %v637_v53   ;;  %934 = vst [vmem:[%s1541_s1 + $0x35] sm:$0x1] %v643_v54   ;;  %v673_v59 = vld [vmem:[#allocation0 + $0x1d8] sm:$0x3]  }
  0x64   :  { %935 = vst [vmem:[%s1541_s1 + $0x74] sm:$0x2] %v643_v54   ;;  %936 = vst [vmem:[%s1541_s1 + $0x3d] sm:$0x1] %v649_v55   ;;  %v679_v60 = vld [vmem:[#allocation0 + $0x1e0] sm:$0x3]  }
  0x65   :  { %937 = vst [vmem:[%s1541_s1 + $0x7c] sm:$0x2] %v649_v55   ;;  %938 = vst [vmem:[%s1541_s1 + $0x26] sm:$0x1] %v655_v56   ;;  %v685_v61 = vld [vmem:[#allocation0 + $0x1e8] sm:$0x3]  }
  0x66   :  { %939 = vst [vmem:[%s1541_s1 + $0x65] sm:$0x2] %v655_v56   ;;  %940 = vst [vmem:[%s1541_s1 + $0x2e] sm:$0x1] %v661_v57   ;;  %v691_v62 = vld [vmem:[#allocation0 + $0x1f0] sm:$0x3]  }
  0x67   :  { %941 = vst [vmem:[%s1541_s1 + $0x6d] sm:$0x2] %v661_v57   ;;  %942 = vst [vmem:[%s1541_s1 + $0x36] sm:$0x1] %v667_v58   ;;  %v697_v63 = vld [vmem:[#allocation0 + $0x1f8] sm:$0x3]  }
  0x68   :  { %943 = vst [vmem:[%s1541_s1 + $0x75] sm:$0x2] %v667_v58   ;;  %944 = vst [vmem:[%s1541_s1 + $0x3e] sm:$0x1] %v673_v59  }
  0x69   :  { %945 = vst [vmem:[%s1541_s1 + $0x7d] sm:$0x2] %v673_v59   ;;  %946 = vst [vmem:[%s1541_s1 + $0x27] sm:$0x1] %v679_v60  }
  0x6a   :  { %947 = vst [vmem:[%s1541_s1 + $0x66] sm:$0x2] %v679_v60   ;;  %948 = vst [vmem:[%s1541_s1 + $0x2f] sm:$0x1] %v685_v61  }
  0x6b   :  { %949 = vst [vmem:[%s1541_s1 + $0x6e] sm:$0x2] %v685_v61   ;;  %950 = vst [vmem:[%s1541_s1 + $0x37] sm:$0x1] %v691_v62  }
  0x6c   :  { %951 = vst [vmem:[%s1541_s1 + $0x76] sm:$0x2] %v691_v62   ;;  %952 = vst [vmem:[%s1541_s1 + $0x3f] sm:$0x1] %v697_v63  }
  0x6d   :  { %953 = vst [vmem:[%s1541_s1 + $0x7e] sm:$0x2] %v697_v63  }

// kernel: generator_forward.10
= control target key start
LH: loop header
LB: loop body
LE: loop exit
PB: predicated region body
PF: predicated region fallthrough
CT: control target
= control target key end

     0   :  { %s698_s12 = smov 0   ;;  %s700_s13 = smov 0   ;;  %s891_s0 = inlined_call_operand.vmem [shape: f32[32,512], index: 0, kind: input, shape index: {}]   ;;  %s892_s1 = inlined_call_operand.vmem [shape: f32[1,512], index: 1, kind: input, shape index: {}]   ;;  %s893_s2 = inlined_call_operand.vmem [shape: f32[1,512], index: 2, kind: input, shape index: {}]   ;;  %s894_s3 = inlined_call_operand.vmem [shape: f32[32,512], index: 3, kind: output, shape index: {}]  }
   0x1   :  { %s702_s14 = smov 0  }
   0x2 LB: > { %s25_s15 = sadd.s32 1, %s670_s13  ;;  %p613_p0 = scmp.ge.s32.totalorder %s674_s14, 1  ;;  %s674_s14 = sphi %s702_s14, %s13_s14   ;;  %s670_s13 = sphi %s700_s13, %s896_s13   ;;  %s666_s12 = sphi %s698_s12, %s895_s12  }
   0x3   : > { %p27_p1 = scmp.ge.s32.totalorder %s25_s15, 2  ;;  %p153_p2 = scmp.lt.s32.totalorder %s674_s14, 3 }
   0x5   : > { %s898_s15 = smov (%p27_p1, %s25_s15), 0  ;;  %p154_p3 = pnand %p613_p0, %p153_p2 }
   0x6   : > { %p196_p4 = scmp.eq.s32.totalorder (!%p154_p3), %s666_s12, 0 }
   0x7   : > { %157 = sbr.rel (%p154_p3) target bundleno = 119 (0x77), region = 32 }
   0xe   : > { %201 = sbr.rel (!%p196_p4) target bundleno = 21 (0x15), region = 36  ;;  %v202_v0 = vlaneseq (%p196_p4)  ;;  %v676_v1 = vmov (%p196_p4), 0.0  }
  0x10   : > { %vm204_vm0 = vcmp.lt.s32.totalorder (%p196_p4), %v202_v0, 512 }
  0x11   : > { %206 = vst.msk [vmem:[#allocation2] sm:$0xf] (%p196_p4), %vm204_vm0, %v676_v1  ;;  %207 = vst.msk [vmem:[#allocation3] sm:$0xf] (%p196_p4), %vm204_vm0, %v676_v1 }
  0x15 PF: > { %p615_p5 = scmp.ne.s32.totalorder %s666_s12, 0 }
  0x16   : > { %v211_v2 = vld [vmem:[%s891_s0] sm:$0xff] (!%p615_p5)  ;;  %v212_v3 = vld [vmem:[%s891_s0 + $0x8] sm:$0xff] (!%p615_p5)  ;;  %v213_v4 = vld [vmem:[%s891_s0 + $0x10] sm:$0xff] (!%p615_p5)  ;;  %v273_v5 = vlaneseq (!%p615_p5)  ;;  %v677_v9 = vmov (!%p615_p5), 1966171168  }
  0x17   : > { %210 = sbr.rel (%p615_p5) target bundleno = 62 (0x3e), region = 40  ;;  %v214_v6 = vld [vmem:[%s891_s0 + $0x18] sm:$0xff] (!%p615_p5)  ;;  %v215_v7 = vld [vmem:[%s891_s0 + $0x20] sm:$0xff] (!%p615_p5)  ;;  %v216_v8 = vld [vmem:[%s891_s0 + $0x28] sm:$0xff] (!%p615_p5)  ;;  %v271_v10 = vunpack.c.l.s4 (!%p615_p5), %v677_v9  ;;  %v300_v11 = vmul.f32 (!%p615_p5), %v211_v2, %v211_v2  ;;  %v301_v12 = vmul.f32 (!%p615_p5), %v212_v3, %v212_v3  ;;  %v302_v18 = vmul.f32 (!%p615_p5), %v213_v4, %v213_v4 }
  0x18   : > { %v217_v13 = vld [vmem:[%s891_s0 + $0x30] sm:$0xff] (!%p615_p5)  ;;  %v218_v14 = vld [vmem:[%s891_s0 + $0x38] sm:$0xff] (!%p615_p5)  ;;  %v228_v15 = vadd.f32 (!%p615_p5), %v215_v7, %v211_v2  ;;  %v237_v16 = vadd.f32 (!%p615_p5), %v216_v8, %v212_v3  ;;  %v274_v17 = vshrl.u32 (!%p615_p5), %v273_v5, 7  ;;  %v219_v19 = vld [vmem:[%s891_s0 + $0x40] sm:$0xff] (!%p615_p5)  ;;  %v303_v24 = vmul.f32 (!%p615_p5), %v214_v6, %v214_v6 }
  0x19   : > { %v220_v20 = vld [vmem:[%s891_s0 + $0x48] sm:$0xff] (!%p615_p5)  ;;  %v246_v21 = vadd.f32 (!%p615_p5), %v217_v13, %v213_v4  ;;  %v255_v22 = vadd.f32 (!%p615_p5), %v218_v14, %v214_v6  ;;  %v272_v23 = vunpack.c.0.s8 (!%p615_p5), %v271_v10  ;;  %v221_v25 = vld [vmem:[%s891_s0 + $0x50] sm:$0xff] (!%p615_p5)  ;;  %v222_v26 = vld [vmem:[%s891_s0 + $0x58] sm:$0xff] (!%p615_p5)  ;;  %v304_v29 = vmul.f32 (!%p615_p5), %v215_v7, %v215_v7 }
  0x1a   : > { %v229_v27 = vadd.f32 (!%p615_p5), %v228_v15, %v219_v19  ;;  %v238_v28 = vadd.f32 (!%p615_p5), %v237_v16, %v220_v20  ;;  %v305_v30 = vmul.f32 (!%p615_p5), %v216_v8, %v216_v8  ;;  %v223_v31 = vld [vmem:[%s891_s0 + $0x60] sm:$0xff] (!%p615_p5)  ;;  %v224_v32 = vld [vmem:[%s891_s0 + $0x68] sm:$0xff] (!%p615_p5)  ;;  %v306_v36 = vmul.f32 (!%p615_p5), %v217_v13, %v217_v13  ;;  %v225_v37 = vld [vmem:[%s891_s0 + $0x70] sm:$0xff] (!%p615_p5) }
  0x1b   : > { %v247_v33 = vadd.f32 (!%p615_p5), %v246_v21, %v221_v25  ;;  %v256_v34 = vadd.f32 (!%p615_p5), %v255_v22, %v222_v26  ;;  %v763_v35 = vsub.s32 (!%p615_p5), %v272_v23, %v274_v17  ;;  %v226_v38 = vld [vmem:[%s891_s0 + $0x78] sm:$0xff] (!%p615_p5)  ;;  %v307_v41 = vmul.f32 (!%p615_p5), %v218_v14, %v218_v14 }
  0x1c   : > { %v230_v39 = vadd.f32 (!%p615_p5), %v229_v27, %v223_v31  ;;  %v239_v40 = vadd.f32 (!%p615_p5), %v238_v28, %v224_v32  ;;  %v308_v42 = vmul.f32 (!%p615_p5), %v219_v19, %v219_v19  ;;  %v309_v45 = vmul.f32 (!%p615_p5), %v220_v20, %v220_v20 }
  0x1d   : > { %v248_v43 = vadd.f32 (!%p615_p5), %v247_v33, %v225_v37  ;;  %v257_v44 = vadd.f32 (!%p615_p5), %v256_v34, %v226_v38  ;;  %v310_v46 = vmul.f32 (!%p615_p5), %v221_v25, %v221_v25  ;;  %v311_v49 = vmul.f32 (!%p615_p5), %v222_v26, %v222_v26 }
  0x1e   : > { %v231_v47 = vrot.slane %v230_v39, 4  ;;  %v240_v48 = vrot.slane %v239_v40, 4  ;;  %v312_v50 = vmul.f32 %v223_v31, %v223_v31  ;;  %v313_v53 = vmul.f32 %v224_v32, %v224_v32 }
  0x1f   : > { %v249_v51 = vrot.slane %v248_v43, 4  ;;  %v258_v52 = vrot.slane %v257_v44, 4  ;;  %v314_v54 = vmul.f32 %v225_v37, %v225_v37  ;;  %v315_v57 = vmul.f32 %v226_v38, %v226_v38 }
  0x20   : > { %v232_v55 = vadd.f32 %v231_v47, %v230_v39  ;;  %v241_v56 = vadd.f32 %v240_v48, %v239_v40  ;;  %v316_v58 = vadd.f32 %v304_v29, %v300_v11  ;;  %v325_v61 = vadd.f32 %v305_v30, %v301_v12 }
  0x21   : > { %v250_v59 = vadd.f32 %v249_v51, %v248_v43  ;;  %v259_v60 = vadd.f32 %v258_v52, %v257_v44  ;;  %v334_v62 = vadd.f32 %v306_v36, %v302_v18  ;;  %v343_v2 = vadd.f32 %v307_v41, %v303_v24 }
  0x22   : > { %v233_v63 = vrot.slane %v232_v55, 2  ;;  %v242_v0 = vrot.slane %v241_v56, 2  ;;  %v317_v1 = vadd.f32 %v316_v58, %v308_v42  ;;  %v326_v6 = vadd.f32 %v325_v61, %v309_v45 }
  0x23   : > { %v251_v3 = vrot.slane %v250_v59, 2  ;;  %v260_v4 = vrot.slane %v259_v60, 2  ;;  %v335_v7 = vadd.f32 %v334_v62, %v310_v46  ;;  %v344_v13 = vadd.f32 %v343_v2, %v311_v49 }
  0x24   : > { %v234_v8 = vadd.f32 %v233_v63, %v232_v55  ;;  %v243_v9 = vadd.f32 %v242_v0, %v241_v56  ;;  %v318_v10 = vadd.f32 %v317_v1, %v312_v50  ;;  %v327_v16 = vadd.f32 %v326_v6, %v313_v53  ;;  %v227_v50 = vld [vmem:[#allocation2] sm:$0xf]  ;;  %v299_v63 = vld [vmem:[#allocation3] sm:$0xf] }
  0x25   : > { %v252_v14 = vadd.f32 %v251_v3, %v250_v59  ;;  %v261_v15 = vadd.f32 %v260_v4, %v259_v60  ;;  %v336_v11 = vadd.f32 %v335_v7, %v314_v54  ;;  %v345_v18 = vadd.f32 %v344_v13, %v315_v57 }
  0x26   : > { %v235_v17 = vrot.slane %v234_v8, 1  ;;  %v244_v19 = vrot.slane %v243_v9, 1  ;;  %v319_v12 = vrot.slane %v318_v10, 4  ;;  %v328_v22 = vrot.slane %v327_v16, 4 }
  0x27   : > { %v253_v20 = vrot.slane %v252_v14, 1  ;;  %v262_v21 = vrot.slane %v261_v15, 1  ;;  %v337_v23 = vrot.slane %v336_v11, 4  ;;  %v346_v27 = vrot.slane %v345_v18, 4 }
  0x28   : > { %v236_v24 = vadd.f32 %v235_v17, %v234_v8  ;;  %v245_v25 = vadd.f32 %v244_v19, %v243_v9  ;;  %v320_v26 = vadd.f32 %v319_v12, %v318_v10  ;;  %v329_v30 = vadd.f32 %v328_v22, %v327_v16 }
  0x29   : > { %v254_v28 = vadd.f32 %v253_v20, %v252_v14  ;;  %v263_v29 = vadd.f32 %v262_v21, %v261_v15  ;;  %v338_v31 = vadd.f32 %v337_v23, %v336_v11  ;;  %v347_v34 = vadd.f32 %v346_v27, %v345_v18 }
  0x2a   : > { %v268_v32 = vcombine.low %v236_v24, %v245_v25  ;;  %v321_v33 = vrot.slane %v320_v26, 2  ;;  %v330_v37 = vrot.slane %v329_v30, 2  ;;  %vm296_vm1 = vcmp.lt.s32.totalorder %v273_v5, 512 }
  0x2b   : > { %v269_v36 = vcombine.low %v254_v28, %v263_v29  ;;  %v339_v38 = vrot.slane %v338_v31, 2  ;;  %v348_v41 = vrot.slane %v347_v34, 2 }
  0x2c   : > { %v276_v39 = vrot.slane %v268_v32, %v763_v35  ;;  %v322_v40 = vadd.f32 %v321_v33, %v320_v26  ;;  %v331_v43 = vadd.f32 %v330_v37, %v329_v30 }
  0x2d   : > { %v283_v42 = vrot.slane %v269_v36, %v763_v35  ;;  %v340_v44 = vadd.f32 %v339_v38, %v338_v31  ;;  %v349_v46 = vadd.f32 %v348_v41, %v347_v34 }
  0x2e   : > { %v323_v45 = vrot.slane %v322_v40, 1  ;;  %v332_v48 = vrot.slane %v331_v43, 1 }
  0x2f   : > { %v284_v47 = vcombine.low %v276_v39, %v283_v42  ;;  %v341_v49 = vrot.slane %v340_v44, 1  ;;  %v350_v52 = vrot.slane %v349_v46, 1 }
  0x30   : > { %v324_v51 = vadd.f32 %v323_v45, %v322_v40  ;;  %v333_v54 = vadd.f32 %v332_v48, %v331_v43 }
  0x31   : > { %v291_v53 = vrot.slane %v284_v47, %v763_v35  ;;  %v342_v55 = vadd.f32 %v341_v49, %v340_v44  ;;  %v351_v56 = vadd.f32 %v350_v52, %v349_v46 }
  0x32   : > { %v356_v58 = vcombine.low %v324_v51, %v333_v54 }
  0x33   : > { %v293_v57 = vadd.f32 %v291_v53, %v227_v50  ;;  %v357_v59 = vcombine.low %v342_v55, %v351_v56 }
  0x34   : > { %v364_v60 = vrot.slane %v356_v58, %v763_v35 }
  0x35   : > { %298 = vst.msk [vmem:[#allocation2] sm:$0xf] %vm296_vm1, %v293_v57  ;;  %v371_v61 = vrot.slane %v357_v59, %v763_v35 }
  0x37   : > { %v372_v62 = vcombine.low %v364_v60, %v371_v61 }
  0x39   : > { %v379_v0 = vrot.slane %v372_v62, %v763_v35 }
  0x3b   : > { %v381_v1 = vadd.f32 %v379_v0, %v299_v63 }
  0x3d   : > { %382 = vst.msk [vmem:[#allocation3] sm:$0xf] %vm296_vm1, %v381_v1 }
  0x3e PF: > { %p383_p6 = scmp.eq.s32.totalorder %s666_s12, 1 }
  0x3f   : > { %v388_v5 = vld [vmem:[#allocation2] sm:$0xf] (%p383_p6)  ;;  %v398_v9 = vlaneseq (%p383_p6) }
  0x40   : > { %387 = sbr.rel (!%p383_p6) target bundleno = 93 (0x5d), region = 44  ;;  %v389_v3 = vmul.f32 (%p383_p6), 0.03125, %v388_v5  ;;  %v396_v10 = vld [vmem:[%s892_s1] sm:$0xf] (%p383_p6) }
  0x41   : > { %vm400_vm2 = vcmp.lt.s32.totalorder (%p383_p6), %v398_v9, 512  ;;  %v403_v14 = vld [vmem:[%s893_s2] sm:$0xf] (%p383_p6) }
  0x42   : > { %v392_v6 = vmul.f32 (%p383_p6), %v389_v3, %v389_v3 }
  0x44   : > { %v390_v2 = vld [vmem:[#allocation3] sm:$0xf] (%p383_p6) }
  0x45   : > { %v391_v4 = vmul.f32 (%p383_p6), 0.03125, %v390_v2 }
  0x47   : > { %v393_v7 = vsub.f32 %v391_v4, %v392_v6 }
  0x49   : > { %v394_v8 = vadd.f32 1e-05, %v393_v7 }
  0x4b   : > { %650 = vrsqrt.f32 %v394_v8 }
  0x55   : > { %v651_v35 = vpop.eup %650 }
  0x56   : > { %v397_v13 = vmul.f32 %v651_v35, %v396_v10 }
  0x58   : > { %402 = vst.msk [vmem:[#allocation4] ss:$2 sm:$0xf] %vm400_vm2, %v397_v13  ;;  %v404_v15 = vmul.f32 %v397_v13, %v389_v3 }
  0x5a   : > { %v405_v16 = vsub.f32 %v403_v14, %v404_v15 }
  0x5c   : > { %407 = vst.msk [vmem:[#allocation4 + $0x1] ss:$2 sm:$0xf] %vm400_vm2, %v405_v16 }
  0x5d PF: > { %p617_p7 = scmp.ne.s32.totalorder %s666_s12, 1 }
  0x5e   : > { %v429_v11 = vlaneseq (!%p617_p7)  ;;  %v411_v18 = vld [vmem:[%s891_s0] sm:$0xff] (!%p617_p7)  ;;  %v412_v21 = vld [vmem:[%s891_s0 + $0x8] sm:$0xff] (!%p617_p7)  ;;  %v413_v25 = vld [vmem:[%s891_s0 + $0x10] sm:$0xff] (!%p617_p7) }
  0x5f   : > { %410 = sbr.rel (%p617_p7) target bundleno = 119 (0x77), region = 48  ;;  %v427_v19 = vld [vmem:[#allocation4] ss:$2 sm:$0xf] (!%p617_p7)  ;;  %v415_v26 = vld [vmem:[%s891_s0 + $0x20] sm:$0xff] (!%p617_p7)  ;;  %v414_v32 = vld [vmem:[%s891_s0 + $0x18] sm:$0xff] (!%p617_p7) }
  0x60   : > { %v430_v17 = vshrl.u32 (!%p617_p7), %v429_v11, 7  ;;  %v416_v27 = vld [vmem:[%s891_s0 + $0x28] sm:$0xff] (!%p617_p7)  ;;  %v417_v33 = vld [vmem:[%s891_s0 + $0x30] sm:$0xff] (!%p617_p7)  ;;  %v418_v34 = vld [vmem:[%s891_s0 + $0x38] sm:$0xff] (!%p617_p7) }
  0x61   : > { %v419_v52 = vld [vmem:[%s891_s0 + $0x40] sm:$0xff] (!%p617_p7)  ;;  %v420_v53 = vld [vmem:[%s891_s0 + $0x48] sm:$0xff] (!%p617_p7)  ;;  %v421_v54 = vld [vmem:[%s891_s0 + $0x50] sm:$0xff] (!%p617_p7) }
  0x62   : > { %v431_v20 = vsub.s32 (!%p617_p7), 0, %v430_v17  ;;  %v435_v22 = vsub.s32 (!%p617_p7), 1, %v430_v17  ;;  %v439_v23 = vsub.s32 (!%p617_p7), 2, %v430_v17  ;;  %v443_v24 = vsub.s32 (!%p617_p7), 3, %v430_v17  ;;  %v422_v59 = vld [vmem:[%s891_s0 + $0x58] sm:$0xff] (!%p617_p7)  ;;  %v423_v60 = vld [vmem:[%s891_s0 + $0x60] sm:$0xff] (!%p617_p7) }
  0x63   : > { %v466_v12 = vld [vmem:[#allocation4 + $0x1] ss:$2 sm:$0xf] (!%p617_p7)  ;;  %v425_v5 = vld [vmem:[%s891_s0 + $0x70] sm:$0xff] (!%p617_p7)  ;;  %v426_v2 = vld [vmem:[%s891_s0 + $0x78] sm:$0xff] (!%p617_p7) }
  0x64   : > { %v432_v28 = vrot.slane (!%p617_p7), %v427_v19, %v431_v20  ;;  %v471_v29 = vrot.slane (!%p617_p7), %v466_v12, %v431_v20  ;;  %v436_v30 = vrot.slane (!%p617_p7), %v427_v19, %v435_v22  ;;  %v475_v31 = vrot.slane (!%p617_p7), %v466_v12, %v435_v22  ;;  %v424_v61 = vld [vmem:[%s891_s0 + $0x68] sm:$0xff] (!%p617_p7) }
  0x65   : > { %v440_v36 = vrot.slane (!%p617_p7), %v427_v19, %v439_v23  ;;  %v479_v37 = vrot.slane (!%p617_p7), %v466_v12, %v439_v23  ;;  %v444_v38 = vrot.slane (!%p617_p7), %v427_v19, %v443_v24  ;;  %v483_v39 = vrot.slane (!%p617_p7), %v466_v12, %v443_v24 }
  0x66   : > { %v449_v40 = vmul.f32 %v432_v28, %v411_v18  ;;  %v450_v41 = vmul.f32 %v436_v30, %v412_v21  ;;  %v453_v42 = vmul.f32 %v432_v28, %v415_v26  ;;  %v454_v43 = vmul.f32 %v436_v30, %v416_v27 }
  0x67   : > { %v451_v44 = vmul.f32 %v440_v36, %v413_v25  ;;  %v452_v45 = vmul.f32 %v444_v38, %v414_v32  ;;  %v455_v46 = vmul.f32 %v440_v36, %v417_v33  ;;  %v456_v47 = vmul.f32 %v444_v38, %v418_v34 }
  0x68   : > { %v488_v48 = vadd.f32 %v471_v29, %v449_v40  ;;  %v489_v49 = vadd.f32 %v475_v31, %v450_v41  ;;  %v492_v50 = vadd.f32 %v471_v29, %v453_v42  ;;  %v493_v51 = vadd.f32 %v475_v31, %v454_v43 }
  0x69   : > { %v490_v55 = vadd.f32 %v479_v37, %v451_v44  ;;  %v491_v56 = vadd.f32 %v483_v39, %v452_v45  ;;  %v494_v57 = vadd.f32 %v479_v37, %v455_v46  ;;  %v495_v58 = vadd.f32 %v483_v39, %v456_v47 }
  0x6a   : > { %v504_v62 = vmax.f32 %v488_v48, 0.0  ;;  %v505_v63 = vmax.f32 %v489_v49, 0.0  ;;  %v508_v0 = vmax.f32 %v492_v50, 0.0  ;;  %v509_v1 = vmax.f32 %v493_v51, 0.0 }
  0x6b   : > { %v506_v3 = vmax.f32 %v490_v55, 0.0  ;;  %v507_v4 = vmax.f32 %v491_v56, 0.0  ;;  %v510_v6 = vmax.f32 %v494_v57, 0.0  ;;  %v511_v7 = vmax.f32 %v495_v58, 0.0 }
  0x6c   : > { %520 = vst [vmem:[%s894_s3] sm:$0xff] %v504_v62  ;;  %521 = vst [vmem:[%s894_s3 + $0x8] sm:$0xff] %v505_v63  ;;  %v457_v8 = vmul.f32 %v432_v28, %v419_v52  ;;  %v458_v9 = vmul.f32 %v436_v30, %v420_v53  ;;  %v459_v10 = vmul.f32 %v440_v36, %v421_v54 }
  0x6d   : > { %524 = vst [vmem:[%s894_s3 + $0x20] sm:$0xff] %v508_v0  ;;  %525 = vst [vmem:[%s894_s3 + $0x28] sm:$0xff] %v509_v1  ;;  %v460_v35 = vmul.f32 %v444_v38, %v422_v59  ;;  %v461_v13 = vmul.f32 %v432_v28, %v423_v60  ;;  %v462_v14 = vmul.f32 %v436_v30, %v424_v61 }
  0x6e   : > { %522 = vst [vmem:[%s894_s3 + $0x10] sm:$0xff] %v506_v3  ;;  %523 = vst [vmem:[%s894_s3 + $0x18] sm:$0xff] %v507_v4  ;;  %v463_v15 = vmul.f32 %v440_v36, %v425_v5  ;;  %v464_v16 = vmul.f32 %v444_v38, %v426_v2  ;;  %v496_v11 = vadd.f32 %v471_v29, %v457_v8 }
  0x6f   : > { %526 = vst [vmem:[%s894_s3 + $0x30] sm:$0xff] %v510_v6  ;;  %527 = vst [vmem:[%s894_s3 + $0x38] sm:$0xff] %v511_v7  ;;  %v497_v17 = vadd.f32 %v475_v31, %v458_v9  ;;  %v498_v19 = vadd.f32 %v479_v37, %v459_v10  ;;  %v499_v12 = vadd.f32 %v483_v39, %v460_v35 }
  0x70   : > { %v500_v18 = vadd.f32 %v471_v29, %v461_v13  ;;  %v501_v20 = vadd.f32 %v475_v31, %v462_v14  ;;  %v502_v21 = vadd.f32 %v479_v37, %v463_v15  ;;  %v503_v22 = vadd.f32 %v483_v39, %v464_v16 }
  0x71   : > { %v512_v23 = vmax.f32 %v496_v11, 0.0  ;;  %v513_v24 = vmax.f32 %v497_v17, 0.0  ;;  %v514_v25 = vmax.f32 %v498_v19, 0.0  ;;  %v515_v26 = vmax.f32 %v499_v12, 0.0 }
  0x72   : > { %v516_v27 = vmax.f32 %v500_v18, 0.0  ;;  %v517_v32 = vmax.f32 %v501_v20, 0.0  ;;  %v518_v33 = vmax.f32 %v502_v21, 0.0  ;;  %v519_v34 = vmax.f32 %v503_v22, 0.0 }
  0x73   : > { %528 = vst [vmem:[%s894_s3 + $0x40] sm:$0xff] %v512_v23  ;;  %529 = vst [vmem:[%s894_s3 + $0x48] sm:$0xff] %v513_v24 }
  0x74   : > { %530 = vst [vmem:[%s894_s3 + $0x50] sm:$0xff] %v514_v25  ;;  %531 = vst [vmem:[%s894_s3 + $0x58] sm:$0xff] %v515_v26 }
  0x75   : > { %532 = vst [vmem:[%s894_s3 + $0x60] sm:$0xff] %v516_v27  ;;  %533 = vst [vmem:[%s894_s3 + $0x68] sm:$0xff] %v517_v32 }
  0x76   : > { %534 = vst [vmem:[%s894_s3 + $0x70] sm:$0xff] %v518_v33  ;;  %535 = vst [vmem:[%s894_s3 + $0x78] sm:$0xff] %v519_v34 }
  0x77 PF: > { %s13_s14 = sadd.s32 1, %s674_s14   ;;  %s895_s12 = smov %s670_s13 }
  0x78   : > { %p10_p8 = scmp.ge.s32.totalorder %s13_s14, 4   ;;  %s896_s13 = smov %s898_s15 }
  0x7a   :  { %12 = sbr.rel (!%p10_p8) target bundleno = 2 (0x2), region = 80 }

// kernel: generator_forward.9
= control target key start
LH: loop header
LB: loop body
LE: loop exit
PB: predicated region body
PF: predicated region fallthrough
CT: control target
= control target key end

     0   :  { %v4981_v3 = vmov 0   ;;  %s6805_s1 = inlined_call_operand.vmem [shape: bf16[1,128,8192], index: 1, kind: input, shape index: {}]   ;;  %s6806_s0 = inlined_call_operand.vmem [shape: bf16[1,8,128], index: 0, kind: input, shape index: {}]   ;;  %s6807_s2 = inlined_call_operand.vmem [shape: f32[1,8,8192], index: 2, kind: output, shape index: {}]  }
   0x1   :  { %v13_v0 = vld [vmem:[%s6805_s1] sm:$0xff]  ;;  %v14_v2 = vld [vmem:[%s6805_s1 + $0x8] sm:$0xff]  ;;  %3117 = vmatprep.mubr.bf16.mxu0 %v4981_v3  ;;  %3158 = vmatprep.mubr.bf16.mxu1 %v4981_v3  ;;  %v15_v63 = vld [vmem:[%s6805_s1 + $0x10] sm:$0xff] }
   0x2   :  { %v45_v1 = vld [vmem:[%s6805_s1 + $0x100] sm:$0xff]  ;;  %v46_v5 = vld [vmem:[%s6805_s1 + $0x108] sm:$0xff] }
   0x3   :  { %v4466_v4 = vcombine.high %v13_v0, %v45_v1  ;;  %v4465_v6 = vcombine.low %v13_v0, %v45_v1  ;;  %v77_v7 = vld [vmem:[%s6805_s1 + $0x200] sm:$0xff]  ;;  %v4468_v9 = vcombine.high %v14_v2, %v46_v5  ;;  %v4467_v10 = vcombine.low %v14_v2, %v46_v5  ;;  %v78_v12 = vld [vmem:[%s6805_s1 + $0x208] sm:$0xff]  ;;  %v47_v0 = vld [vmem:[%s6805_s1 + $0x110] sm:$0xff] }
   0x4   :  { %v109_v8 = vld [vmem:[%s6805_s1 + $0x300] sm:$0xff]  ;;  %v110_v13 = vld [vmem:[%s6805_s1 + $0x308] sm:$0xff]  ;;  %v16_v1 = vld [vmem:[%s6805_s1 + $0x18] sm:$0xff] }
   0x5   :  { %v4530_v11 = vcombine.high %v77_v7, %v109_v8  ;;  %v141_v14 = vld [vmem:[%s6805_s1 + $0x400] sm:$0xff]  ;;  %3085 = vmatprep.subr.bf16.mxu0 %v4466_v4  ;;  %v4532_v15 = vcombine.high %v78_v12, %v110_v13  ;;  %v142_v17 = vld [vmem:[%s6805_s1 + $0x408] sm:$0xff]  ;;  %3126 = vmatprep.subr.bf16.mxu1 %v4468_v9  ;;  %v4529_v19 = vcombine.low %v77_v7, %v109_v8  ;;  %v48_v2 = vld [vmem:[%s6805_s1 + $0x118] sm:$0xff] }
   0x6   :  { %v173_v16 = vld [vmem:[%s6805_s1 + $0x500] sm:$0xff]  ;;  %v174_v18 = vld [vmem:[%s6805_s1 + $0x508] sm:$0xff]  ;;  %3086 = vmatpush1.bf16.msra.mxu0 %v4465_v6  ;;  %3127 = vmatpush1.bf16.msra.mxu1 %v4467_v10  ;;  %v4531_v20 = vcombine.low %v78_v12, %v110_v13  ;;  %v4470_v6 = vcombine.high %v15_v63, %v47_v0  ;;  %v4472_v7 = vcombine.high %v16_v1, %v48_v2  ;;  %v79_v8 = vld [vmem:[%s6805_s1 + $0x210] sm:$0xff] }
   0x7   :  { %3087 = vmatprep.subr.bf16.mxu0 %v4530_v11  ;;  %v4594_v21 = vcombine.high %v141_v14, %v173_v16  ;;  %3128 = vmatprep.subr.bf16.mxu1 %v4532_v15  ;;  %v4596_v22 = vcombine.high %v142_v17, %v174_v18  ;;  %v205_v23 = vld [vmem:[%s6805_s1 + $0x600] sm:$0xff]  ;;  %v206_v25 = vld [vmem:[%s6805_s1 + $0x608] sm:$0xff]  ;;  %v4593_v27 = vcombine.low %v141_v14, %v173_v16  ;;  %v111_v9 = vld [vmem:[%s6805_s1 + $0x310] sm:$0xff] }
   0x8   :  { %v237_v24 = vld [vmem:[%s6805_s1 + $0x700] sm:$0xff]  ;;  %v238_v26 = vld [vmem:[%s6805_s1 + $0x708] sm:$0xff]  ;;  %v4595_v28 = vcombine.low %v142_v17, %v174_v18  ;;  %v80_v10 = vld [vmem:[%s6805_s1 + $0x218] sm:$0xff]  ;;  %v4469_v13 = vcombine.low %v15_v63, %v47_v0  ;;  %v4471_v14 = vcombine.low %v16_v1, %v48_v2  ;;  %v4534_v15 = vcombine.high %v79_v8, %v111_v9 }
   0x9   :  { %v4658_v29 = vcombine.high %v205_v23, %v237_v24  ;;  %v4660_v30 = vcombine.high %v206_v25, %v238_v26  ;;  %v269_v31 = vld [vmem:[%s6805_s1 + $0x800] sm:$0xff]  ;;  %v270_v33 = vld [vmem:[%s6805_s1 + $0x808] sm:$0xff]  ;;  %v4657_v35 = vcombine.low %v205_v23, %v237_v24  ;;  %v4659_v36 = vcombine.low %v206_v25, %v238_v26  ;;  %v112_v11 = vld [vmem:[%s6805_s1 + $0x318] sm:$0xff] }
   0xa   :  { %3088 = vmatpush1.bf16.msra.mxu0 %v4529_v19  ;;  %3129 = vmatpush1.bf16.msra.mxu1 %v4531_v20  ;;  %v301_v32 = vld [vmem:[%s6805_s1 + $0x900] sm:$0xff]  ;;  %v302_v34 = vld [vmem:[%s6805_s1 + $0x908] sm:$0xff]  ;;  %v4536_v16 = vcombine.high %v80_v10, %v112_v11  ;;  %v143_v17 = vld [vmem:[%s6805_s1 + $0x410] sm:$0xff] }
   0xb   :  { %3089 = vmatprep.subr.bf16.mxu0 %v4594_v21  ;;  %3130 = vmatprep.subr.bf16.mxu1 %v4596_v22  ;;  %v4722_v37 = vcombine.high %v269_v31, %v301_v32  ;;  %v4724_v38 = vcombine.high %v270_v33, %v302_v34  ;;  %v333_v39 = vld [vmem:[%s6805_s1 + $0xa00] sm:$0xff]  ;;  %v334_v41 = vld [vmem:[%s6805_s1 + $0xa08] sm:$0xff]  ;;  %v4721_v43 = vcombine.low %v269_v31, %v301_v32  ;;  %v175_v18 = vld [vmem:[%s6805_s1 + $0x510] sm:$0xff] }
   0xc   :  { %v365_v40 = vld [vmem:[%s6805_s1 + $0xb00] sm:$0xff]  ;;  %v366_v42 = vld [vmem:[%s6805_s1 + $0xb08] sm:$0xff]  ;;  %v4723_v44 = vcombine.low %v270_v33, %v302_v34  ;;  %v144_v19 = vld [vmem:[%s6805_s1 + $0x418] sm:$0xff]  ;;  %v4533_v21 = vcombine.low %v79_v8, %v111_v9  ;;  %v4535_v22 = vcombine.low %v80_v10, %v112_v11  ;;  %v4598_v23 = vcombine.high %v143_v17, %v175_v18 }
   0xd   :  { %v4786_v45 = vcombine.high %v333_v39, %v365_v40  ;;  %v4788_v46 = vcombine.high %v334_v41, %v366_v42  ;;  %v397_v47 = vld [vmem:[%s6805_s1 + $0xc00] sm:$0xff]  ;;  %v398_v49 = vld [vmem:[%s6805_s1 + $0xc08] sm:$0xff]  ;;  %v4785_v51 = vcombine.low %v333_v39, %v365_v40  ;;  %v4787_v52 = vcombine.low %v334_v41, %v366_v42  ;;  %v176_v20 = vld [vmem:[%s6805_s1 + $0x518] sm:$0xff] }
   0xe   :  { %3090 = vmatpush1.bf16.msra.mxu0 %v4593_v27  ;;  %3131 = vmatpush1.bf16.msra.mxu1 %v4595_v28  ;;  %v429_v48 = vld [vmem:[%s6805_s1 + $0xd00] sm:$0xff]  ;;  %v430_v50 = vld [vmem:[%s6805_s1 + $0xd08] sm:$0xff]  ;;  %v4600_v24 = vcombine.high %v144_v19, %v176_v20  ;;  %v207_v25 = vld [vmem:[%s6805_s1 + $0x610] sm:$0xff] }
   0xf   :  { %3091 = vmatprep.subr.bf16.mxu0 %v4658_v29  ;;  %3132 = vmatprep.subr.bf16.mxu1 %v4660_v30  ;;  %v4850_v53 = vcombine.high %v397_v47, %v429_v48  ;;  %v4852_v54 = vcombine.high %v398_v49, %v430_v50  ;;  %v461_v55 = vld [vmem:[%s6805_s1 + $0xe00] sm:$0xff]  ;;  %v462_v57 = vld [vmem:[%s6805_s1 + $0xe08] sm:$0xff]  ;;  %v4849_v59 = vcombine.low %v397_v47, %v429_v48  ;;  %v239_v26 = vld [vmem:[%s6805_s1 + $0x710] sm:$0xff] }
  0x10   :  { %v493_v56 = vld [vmem:[%s6805_s1 + $0xf00] sm:$0xff]  ;;  %v494_v58 = vld [vmem:[%s6805_s1 + $0xf08] sm:$0xff]  ;;  %v4851_v60 = vcombine.low %v398_v49, %v430_v50  ;;  %v208_v27 = vld [vmem:[%s6805_s1 + $0x618] sm:$0xff]  ;;  %v4597_v29 = vcombine.low %v143_v17, %v175_v18  ;;  %v4599_v30 = vcombine.low %v144_v19, %v176_v20  ;;  %v4662_v31 = vcombine.high %v207_v25, %v239_v26 }
  0x11   :  { %v4914_v61 = vcombine.high %v461_v55, %v493_v56  ;;  %v4916_v62 = vcombine.high %v462_v57, %v494_v58  ;;  %v4913_v4 = vcombine.low %v461_v55, %v493_v56  ;;  %v4915_v5 = vcombine.low %v462_v57, %v494_v58  ;;  %v5122_v12 = vld [vmem:[%s6806_s0] sm:$0xf]  ;;  %v240_v28 = vld [vmem:[%s6805_s1 + $0x718] sm:$0xff]  ;;  %v271_v33 = vld [vmem:[%s6805_s1 + $0x810] sm:$0xff] }
  0x12   :  { %3092 = vmatpush1.bf16.msra.mxu0 %v4657_v35  ;;  %3133 = vmatpush1.bf16.msra.mxu1 %v4659_v36  ;;  %v4664_v32 = vcombine.high %v208_v27, %v240_v28  ;;  %v303_v34 = vld [vmem:[%s6805_s1 + $0x910] sm:$0xff]  ;;  %v272_v35 = vld [vmem:[%s6805_s1 + $0x818] sm:$0xff]  ;;  %v17_v1 = vld [vmem:[%s6805_s1 + $0x20] sm:$0xff] }
  0x13   :  { %3093 = vmatprep.subr.bf16.mxu0 %v4722_v37  ;;  %3134 = vmatprep.subr.bf16.mxu1 %v4724_v38  ;;  %v304_v36 = vld [vmem:[%s6805_s1 + $0x918] sm:$0xff]  ;;  %v4661_v37 = vcombine.low %v207_v25, %v239_v26  ;;  %v4663_v38 = vcombine.low %v208_v27, %v240_v28  ;;  %v4726_v39 = vcombine.high %v271_v33, %v303_v34  ;;  %v335_v41 = vld [vmem:[%s6805_s1 + $0xa10] sm:$0xff]  ;;  %v49_v2 = vld [vmem:[%s6805_s1 + $0x120] sm:$0xff] }
  0x14   :  { %v4728_v40 = vcombine.high %v272_v35, %v304_v36  ;;  %v367_v42 = vld [vmem:[%s6805_s1 + $0xb10] sm:$0xff]  ;;  %v4474_v8 = vcombine.high %v17_v1, %v49_v2  ;;  %v81_v10 = vld [vmem:[%s6805_s1 + $0x220] sm:$0xff] }
  0x15   :  { %v4790_v47 = vcombine.high %v335_v41, %v367_v42  ;;  %v399_v49 = vld [vmem:[%s6805_s1 + $0xc10] sm:$0xff]  ;;  %v113_v11 = vld [vmem:[%s6805_s1 + $0x320] sm:$0xff] }
  0x16   :  { %3094 = vmatpush1.bf16.msra.mxu0 %v4721_v43  ;;  %3135 = vmatpush1.bf16.msra.mxu1 %v4723_v44  ;;  %v336_v43 = vld [vmem:[%s6805_s1 + $0xa18] sm:$0xff]  ;;  %v431_v50 = vld [vmem:[%s6805_s1 + $0xd10] sm:$0xff]  ;;  %v4538_v17 = vcombine.high %v81_v10, %v113_v11  ;;  %v145_v19 = vld [vmem:[%s6805_s1 + $0x420] sm:$0xff] }
  0x17   :  { %3095 = vmatprep.subr.bf16.mxu0 %v4786_v45  ;;  %3136 = vmatprep.subr.bf16.mxu1 %v4788_v46  ;;  %v368_v44 = vld [vmem:[%s6805_s1 + $0xb18] sm:$0xff]  ;;  %v4725_v45 = vcombine.low %v271_v33, %v303_v34  ;;  %v4727_v46 = vcombine.low %v272_v35, %v304_v36  ;;  %v4854_v55 = vcombine.high %v399_v49, %v431_v50  ;;  %v463_v57 = vld [vmem:[%s6805_s1 + $0xe10] sm:$0xff]  ;;  %v177_v20 = vld [vmem:[%s6805_s1 + $0x520] sm:$0xff] }
  0x18   :  { %v4792_v48 = vcombine.high %v336_v43, %v368_v44  ;;  %v495_v58 = vld [vmem:[%s6805_s1 + $0xf10] sm:$0xff]  ;;  %v4602_v25 = vcombine.high %v145_v19, %v177_v20  ;;  %v209_v27 = vld [vmem:[%s6805_s1 + $0x620] sm:$0xff] }
  0x19   :  { %v4918_v63 = vcombine.high %v463_v57, %v495_v58  ;;  %v241_v28 = vld [vmem:[%s6805_s1 + $0x720] sm:$0xff] }
  0x1a   :  { %3096 = vmatpush1.bf16.msra.mxu0 %v4785_v51  ;;  %3137 = vmatpush1.bf16.msra.mxu1 %v4787_v52  ;;  %v400_v51 = vld [vmem:[%s6805_s1 + $0xc18] sm:$0xff]  ;;  %v4666_v33 = vcombine.high %v209_v27, %v241_v28  ;;  %v273_v35 = vld [vmem:[%s6805_s1 + $0x820] sm:$0xff] }
  0x1b   :  { %3097 = vmatprep.subr.bf16.mxu0 %v4850_v53  ;;  %3138 = vmatprep.subr.bf16.mxu1 %v4852_v54  ;;  %v432_v52 = vld [vmem:[%s6805_s1 + $0xd18] sm:$0xff]  ;;  %v4789_v53 = vcombine.low %v335_v41, %v367_v42  ;;  %v4791_v54 = vcombine.low %v336_v43, %v368_v44  ;;  %v305_v36 = vld [vmem:[%s6805_s1 + $0x920] sm:$0xff] }
  0x1c   :  { %v4856_v56 = vcombine.high %v400_v51, %v432_v52  ;;  %v4730_v41 = vcombine.high %v273_v35, %v305_v36  ;;  %v337_v43 = vld [vmem:[%s6805_s1 + $0xa20] sm:$0xff] }
  0x1d   :  { %v369_v44 = vld [vmem:[%s6805_s1 + $0xb20] sm:$0xff] }
  0x1e   :  { %3098 = vmatpush1.bf16.msra.mxu0 %v4849_v59  ;;  %3139 = vmatpush1.bf16.msra.mxu1 %v4851_v60  ;;  %v464_v59 = vld [vmem:[%s6805_s1 + $0xe18] sm:$0xff] }
  0x1f   :  { %3099 = vmatprep.subr.bf16.mxu0 %v4914_v61  ;;  %3140 = vmatprep.subr.bf16.mxu1 %v4916_v62  ;;  %v496_v60 = vld [vmem:[%s6805_s1 + $0xf18] sm:$0xff]  ;;  %v4853_v61 = vcombine.low %v399_v49, %v431_v50  ;;  %v4855_v62 = vcombine.low %v400_v51, %v432_v52  ;;  %v4794_v49 = vcombine.high %v337_v43, %v369_v44  ;;  %v401_v51 = vld [vmem:[%s6805_s1 + $0xc20] sm:$0xff] }
  0x20   :  { %v4920_v0 = vcombine.high %v464_v59, %v496_v60  ;;  %v433_v52 = vld [vmem:[%s6805_s1 + $0xd20] sm:$0xff] }
  0x22   :  { %3100 = vmatpush1.bf16.msra.mxu0 %v4913_v4  ;;  %3141 = vmatpush1.bf16.msra.mxu1 %v4915_v5  ;;  %v18_v4 = vld [vmem:[%s6805_s1 + $0x28] sm:$0xff] }
  0x23   :  { %3167 = vmatprep.subr.bf16.mxu0 %v4470_v6  ;;  %3208 = vmatprep.subr.bf16.mxu1 %v4472_v7  ;;  %v50_v5 = vld [vmem:[%s6805_s1 + $0x128] sm:$0xff]  ;;  %v4917_v6 = vcombine.low %v463_v57, %v495_v58  ;;  %v4919_v7 = vcombine.low %v464_v59, %v496_v60  ;;  %v4858_v57 = vcombine.high %v401_v51, %v433_v52  ;;  %v465_v59 = vld [vmem:[%s6805_s1 + $0xe20] sm:$0xff] }
  0x24   :  { %v4476_v9 = vcombine.high %v18_v4, %v50_v5  ;;  %v497_v60 = vld [vmem:[%s6805_s1 + $0xf20] sm:$0xff] }
  0x25   :  { %3118 = vmatmul.mubr.bf16.vlgmr.msra.gmra.mrb[0].mxu0 %v5122_v12  ;;  %3159 = vmatmul.mubr.bf16.vlgmr.msra.gmra.mrb[0].mxu1 %v5122_v12 }
  0x26   :  { %3168 = vmatpush1.bf16.msra.mxu0 %v4469_v13  ;;  %3209 = vmatpush1.bf16.msra.mxu1 %v4471_v14  ;;  %v82_v13 = vld [vmem:[%s6805_s1 + $0x228] sm:$0xff] }
  0x27   :  { %3169 = vmatprep.subr.bf16.mxu0 %v4534_v15  ;;  %3210 = vmatprep.subr.bf16.mxu1 %v4536_v16  ;;  %v114_v14 = vld [vmem:[%s6805_s1 + $0x328] sm:$0xff]  ;;  %v4473_v15 = vcombine.low %v17_v1, %v49_v2  ;;  %v4475_v16 = vcombine.low %v18_v4, %v50_v5  ;;  %v4922_v1 = vcombine.high %v465_v59, %v497_v60  ;;  %v19_v4 = vld [vmem:[%s6805_s1 + $0x30] sm:$0xff] }
  0x28   :  { %3199 = vmatprep.mubr.bf16.mxu0 %v4981_v3  ;;  %3240 = vmatprep.mubr.bf16.mxu1 %v4981_v3  ;;  %v4540_v18 = vcombine.high %v82_v13, %v114_v14  ;;  %v51_v5 = vld [vmem:[%s6805_s1 + $0x130] sm:$0xff] }
  0x2a   :  { %3170 = vmatpush1.bf16.msra.mxu0 %v4533_v21  ;;  %3211 = vmatpush1.bf16.msra.mxu1 %v4535_v22  ;;  %v146_v21 = vld [vmem:[%s6805_s1 + $0x428] sm:$0xff] }
  0x2b   :  { %3171 = vmatprep.subr.bf16.mxu0 %v4598_v23  ;;  %3212 = vmatprep.subr.bf16.mxu1 %v4600_v24  ;;  %v178_v22 = vld [vmem:[%s6805_s1 + $0x528] sm:$0xff]  ;;  %v4537_v23 = vcombine.low %v81_v10, %v113_v11  ;;  %v4539_v24 = vcombine.low %v82_v13, %v114_v14  ;;  %v4478_v10 = vcombine.high %v19_v4, %v51_v5  ;;  %v83_v13 = vld [vmem:[%s6805_s1 + $0x230] sm:$0xff] }
  0x2c   :  { %v4604_v26 = vcombine.high %v146_v21, %v178_v22  ;;  %v115_v14 = vld [vmem:[%s6805_s1 + $0x330] sm:$0xff] }
  0x2e   :  { %3172 = vmatpush1.bf16.msra.mxu0 %v4597_v29  ;;  %3213 = vmatpush1.bf16.msra.mxu1 %v4599_v30  ;;  %v210_v29 = vld [vmem:[%s6805_s1 + $0x628] sm:$0xff] }
  0x2f   :  { %3173 = vmatprep.subr.bf16.mxu0 %v4662_v31  ;;  %3214 = vmatprep.subr.bf16.mxu1 %v4664_v32  ;;  %v242_v30 = vld [vmem:[%s6805_s1 + $0x728] sm:$0xff]  ;;  %v4601_v31 = vcombine.low %v145_v19, %v177_v20  ;;  %v4603_v32 = vcombine.low %v146_v21, %v178_v22  ;;  %v4542_v19 = vcombine.high %v83_v13, %v115_v14  ;;  %v147_v21 = vld [vmem:[%s6805_s1 + $0x430] sm:$0xff] }
  0x30   :  { %v4668_v34 = vcombine.high %v210_v29, %v242_v30  ;;  %v179_v22 = vld [vmem:[%s6805_s1 + $0x530] sm:$0xff] }
  0x32   :  { %3174 = vmatpush1.bf16.msra.mxu0 %v4661_v37  ;;  %3215 = vmatpush1.bf16.msra.mxu1 %v4663_v38  ;;  %v274_v37 = vld [vmem:[%s6805_s1 + $0x828] sm:$0xff] }
  0x33   :  { %3175 = vmatprep.subr.bf16.mxu0 %v4726_v39  ;;  %3216 = vmatprep.subr.bf16.mxu1 %v4728_v40  ;;  %v306_v38 = vld [vmem:[%s6805_s1 + $0x928] sm:$0xff]  ;;  %v4665_v39 = vcombine.low %v209_v27, %v241_v28  ;;  %v4667_v40 = vcombine.low %v210_v29, %v242_v30  ;;  %v4606_v27 = vcombine.high %v147_v21, %v179_v22  ;;  %v211_v29 = vld [vmem:[%s6805_s1 + $0x630] sm:$0xff] }
  0x34   :  { %v4732_v42 = vcombine.high %v274_v37, %v306_v38  ;;  %v243_v30 = vld [vmem:[%s6805_s1 + $0x730] sm:$0xff] }
  0x36   :  { %3176 = vmatpush1.bf16.msra.mxu0 %v4725_v45  ;;  %3217 = vmatpush1.bf16.msra.mxu1 %v4727_v46  ;;  %v338_v45 = vld [vmem:[%s6805_s1 + $0xa28] sm:$0xff] }
  0x37   :  { %3177 = vmatprep.subr.bf16.mxu0 %v4790_v47  ;;  %3218 = vmatprep.subr.bf16.mxu1 %v4792_v48  ;;  %v370_v46 = vld [vmem:[%s6805_s1 + $0xb28] sm:$0xff]  ;;  %v4729_v47 = vcombine.low %v273_v35, %v305_v36  ;;  %v4731_v48 = vcombine.low %v274_v37, %v306_v38  ;;  %v4670_v35 = vcombine.high %v211_v29, %v243_v30  ;;  %v275_v37 = vld [vmem:[%s6805_s1 + $0x830] sm:$0xff] }
  0x38   :  { %v4796_v50 = vcombine.high %v338_v45, %v370_v46  ;;  %v307_v38 = vld [vmem:[%s6805_s1 + $0x930] sm:$0xff] }
  0x3a   :  { %3178 = vmatpush1.bf16.msra.mxu0 %v4789_v53  ;;  %3219 = vmatpush1.bf16.msra.mxu1 %v4791_v54  ;;  %v402_v53 = vld [vmem:[%s6805_s1 + $0xc28] sm:$0xff] }
  0x3b   :  { %3179 = vmatprep.subr.bf16.mxu0 %v4854_v55  ;;  %3220 = vmatprep.subr.bf16.mxu1 %v4856_v56  ;;  %v434_v54 = vld [vmem:[%s6805_s1 + $0xd28] sm:$0xff]  ;;  %v4793_v55 = vcombine.low %v337_v43, %v369_v44  ;;  %v4795_v56 = vcombine.low %v338_v45, %v370_v46  ;;  %v4734_v43 = vcombine.high %v275_v37, %v307_v38  ;;  %v339_v45 = vld [vmem:[%s6805_s1 + $0xa30] sm:$0xff] }
  0x3c   :  { %v4860_v58 = vcombine.high %v402_v53, %v434_v54  ;;  %v371_v46 = vld [vmem:[%s6805_s1 + $0xb30] sm:$0xff] }
  0x3e   :  { %3180 = vmatpush1.bf16.msra.mxu0 %v4853_v61  ;;  %3221 = vmatpush1.bf16.msra.mxu1 %v4855_v62  ;;  %v466_v61 = vld [vmem:[%s6805_s1 + $0xe28] sm:$0xff] }
  0x3f   :  { %3181 = vmatprep.subr.bf16.mxu0 %v4918_v63  ;;  %3222 = vmatprep.subr.bf16.mxu1 %v4920_v0  ;;  %v498_v62 = vld [vmem:[%s6805_s1 + $0xf28] sm:$0xff]  ;;  %v4857_v63 = vcombine.low %v401_v51, %v433_v52  ;;  %v4859_v0 = vcombine.low %v402_v53, %v434_v54  ;;  %v4798_v51 = vcombine.high %v339_v45, %v371_v46  ;;  %v403_v53 = vld [vmem:[%s6805_s1 + $0xc30] sm:$0xff] }
  0x40   :  { %v4924_v2 = vcombine.high %v466_v61, %v498_v62  ;;  %v435_v54 = vld [vmem:[%s6805_s1 + $0xd30] sm:$0xff] }
  0x42   :  { %3182 = vmatpush1.bf16.msra.mxu0 %v4917_v6  ;;  %3223 = vmatpush1.bf16.msra.mxu1 %v4919_v7  ;;  %v20_v6 = vld [vmem:[%s6805_s1 + $0x38] sm:$0xff] }
  0x43   :  { %3249 = vmatprep.subr.bf16.mxu0 %v4474_v8  ;;  %3290 = vmatprep.subr.bf16.mxu1 %v4476_v9  ;;  %v52_v7 = vld [vmem:[%s6805_s1 + $0x138] sm:$0xff]  ;;  %v4921_v8 = vcombine.low %v465_v59, %v497_v60  ;;  %v4923_v9 = vcombine.low %v466_v61, %v498_v62  ;;  %v4862_v59 = vcombine.high %v403_v53, %v435_v54  ;;  %v467_v61 = vld [vmem:[%s6805_s1 + $0xe30] sm:$0xff] }
  0x44   :  { %v4480_v11 = vcombine.high %v20_v6, %v52_v7  ;;  %v499_v62 = vld [vmem:[%s6805_s1 + $0xf30] sm:$0xff] }
  0x45   :  { %3200 = vmatmul.mubr.bf16.vlgmr.msra.gmra.mrb[4].mxu0 %v5122_v12  ;;  %3241 = vmatmul.mubr.bf16.vlgmr.msra.gmra.mrb[4].mxu1 %v5122_v12 }
  0x46   :  { %3250 = vmatpush1.bf16.msra.mxu0 %v4473_v15  ;;  %3291 = vmatpush1.bf16.msra.mxu1 %v4475_v16  ;;  %v84_v15 = vld [vmem:[%s6805_s1 + $0x238] sm:$0xff] }
  0x47   :  { %3251 = vmatprep.subr.bf16.mxu0 %v4538_v17  ;;  %3292 = vmatprep.subr.bf16.mxu1 %v4540_v18  ;;  %v116_v16 = vld [vmem:[%s6805_s1 + $0x338] sm:$0xff]  ;;  %v4477_v17 = vcombine.low %v19_v4, %v51_v5  ;;  %v4479_v18 = vcombine.low %v20_v6, %v52_v7  ;;  %v4926_v4 = vcombine.high %v467_v61, %v499_v62  ;;  %v21_v6 = vld [vmem:[%s6805_s1 + $0x40] sm:$0xff] }
  0x48   :  { %3281 = vmatprep.mubr.bf16.mxu0 %v4981_v3  ;;  %3322 = vmatprep.mubr.bf16.mxu1 %v4981_v3  ;;  %v4544_v20 = vcombine.high %v84_v15, %v116_v16  ;;  %v53_v7 = vld [vmem:[%s6805_s1 + $0x140] sm:$0xff] }
  0x4a   :  { %3252 = vmatpush1.bf16.msra.mxu0 %v4537_v23  ;;  %3293 = vmatpush1.bf16.msra.mxu1 %v4539_v24  ;;  %v148_v23 = vld [vmem:[%s6805_s1 + $0x438] sm:$0xff] }
  0x4b   :  { %3253 = vmatprep.subr.bf16.mxu0 %v4602_v25  ;;  %3294 = vmatprep.subr.bf16.mxu1 %v4604_v26  ;;  %v180_v24 = vld [vmem:[%s6805_s1 + $0x538] sm:$0xff]  ;;  %v4541_v25 = vcombine.low %v83_v13, %v115_v14  ;;  %v4543_v26 = vcombine.low %v84_v15, %v116_v16  ;;  %v4482_v13 = vcombine.high %v21_v6, %v53_v7  ;;  %v85_v15 = vld [vmem:[%s6805_s1 + $0x240] sm:$0xff] }
  0x4c   :  { %v4608_v28 = vcombine.high %v148_v23, %v180_v24  ;;  %v117_v16 = vld [vmem:[%s6805_s1 + $0x340] sm:$0xff] }
  0x4e   :  { %3254 = vmatpush1.bf16.msra.mxu0 %v4601_v31  ;;  %3295 = vmatpush1.bf16.msra.mxu1 %v4603_v32  ;;  %v212_v31 = vld [vmem:[%s6805_s1 + $0x638] sm:$0xff] }
  0x4f   :  { %3255 = vmatprep.subr.bf16.mxu0 %v4666_v33  ;;  %3296 = vmatprep.subr.bf16.mxu1 %v4668_v34  ;;  %v244_v32 = vld [vmem:[%s6805_s1 + $0x738] sm:$0xff]  ;;  %v4605_v33 = vcombine.low %v147_v21, %v179_v22  ;;  %v4607_v34 = vcombine.low %v148_v23, %v180_v24  ;;  %v4546_v21 = vcombine.high %v85_v15, %v117_v16  ;;  %v149_v23 = vld [vmem:[%s6805_s1 + $0x440] sm:$0xff] }
  0x50   :  { %v4672_v36 = vcombine.high %v212_v31, %v244_v32  ;;  %v181_v24 = vld [vmem:[%s6805_s1 + $0x540] sm:$0xff] }
  0x52   :  { %3256 = vmatpush1.bf16.msra.mxu0 %v4665_v39  ;;  %3297 = vmatpush1.bf16.msra.mxu1 %v4667_v40  ;;  %v276_v39 = vld [vmem:[%s6805_s1 + $0x838] sm:$0xff] }
  0x53   :  { %3257 = vmatprep.subr.bf16.mxu0 %v4730_v41  ;;  %3298 = vmatprep.subr.bf16.mxu1 %v4732_v42  ;;  %v308_v40 = vld [vmem:[%s6805_s1 + $0x938] sm:$0xff]  ;;  %v4669_v41 = vcombine.low %v211_v29, %v243_v30  ;;  %v4671_v42 = vcombine.low %v212_v31, %v244_v32  ;;  %v4610_v29 = vcombine.high %v149_v23, %v181_v24  ;;  %v213_v31 = vld [vmem:[%s6805_s1 + $0x640] sm:$0xff] }
  0x54   :  { %v4736_v44 = vcombine.high %v276_v39, %v308_v40  ;;  %v245_v32 = vld [vmem:[%s6805_s1 + $0x740] sm:$0xff] }
  0x56   :  { %3258 = vmatpush1.bf16.msra.mxu0 %v4729_v47  ;;  %3299 = vmatpush1.bf16.msra.mxu1 %v4731_v48  ;;  %v340_v47 = vld [vmem:[%s6805_s1 + $0xa38] sm:$0xff] }
  0x57   :  { %3259 = vmatprep.subr.bf16.mxu0 %v4794_v49  ;;  %3300 = vmatprep.subr.bf16.mxu1 %v4796_v50  ;;  %v372_v48 = vld [vmem:[%s6805_s1 + $0xb38] sm:$0xff]  ;;  %v4733_v49 = vcombine.low %v275_v37, %v307_v38  ;;  %v4735_v50 = vcombine.low %v276_v39, %v308_v40  ;;  %v4674_v37 = vcombine.high %v213_v31, %v245_v32  ;;  %v277_v39 = vld [vmem:[%s6805_s1 + $0x840] sm:$0xff] }
  0x58   :  { %v4800_v52 = vcombine.high %v340_v47, %v372_v48  ;;  %v309_v40 = vld [vmem:[%s6805_s1 + $0x940] sm:$0xff] }
  0x5a   :  { %3260 = vmatpush1.bf16.msra.mxu0 %v4793_v55  ;;  %3301 = vmatpush1.bf16.msra.mxu1 %v4795_v56  ;;  %v404_v55 = vld [vmem:[%s6805_s1 + $0xc38] sm:$0xff] }
  0x5b   :  { %3261 = vmatprep.subr.bf16.mxu0 %v4858_v57  ;;  %3302 = vmatprep.subr.bf16.mxu1 %v4860_v58  ;;  %v436_v56 = vld [vmem:[%s6805_s1 + $0xd38] sm:$0xff]  ;;  %v4797_v57 = vcombine.low %v339_v45, %v371_v46  ;;  %v4799_v58 = vcombine.low %v340_v47, %v372_v48  ;;  %v4738_v45 = vcombine.high %v277_v39, %v309_v40  ;;  %v341_v47 = vld [vmem:[%s6805_s1 + $0xa40] sm:$0xff] }
  0x5c   :  { %v4864_v60 = vcombine.high %v404_v55, %v436_v56  ;;  %v373_v48 = vld [vmem:[%s6805_s1 + $0xb40] sm:$0xff] }
  0x5e   :  { %3262 = vmatpush1.bf16.msra.mxu0 %v4857_v63  ;;  %3303 = vmatpush1.bf16.msra.mxu1 %v4859_v0  ;;  %v468_v63 = vld [vmem:[%s6805_s1 + $0xe38] sm:$0xff] }
  0x5f   :  { %3263 = vmatprep.subr.bf16.mxu0 %v4922_v1  ;;  %3304 = vmatprep.subr.bf16.mxu1 %v4924_v2  ;;  %v500_v0 = vld [vmem:[%s6805_s1 + $0xf38] sm:$0xff]  ;;  %v4861_v1 = vcombine.low %v403_v53, %v435_v54  ;;  %v4863_v2 = vcombine.low %v404_v55, %v436_v56  ;;  %v4802_v53 = vcombine.high %v341_v47, %v373_v48  ;;  %v405_v55 = vld [vmem:[%s6805_s1 + $0xc40] sm:$0xff] }
  0x60   :  { %v4928_v5 = vcombine.high %v468_v63, %v500_v0  ;;  %v437_v56 = vld [vmem:[%s6805_s1 + $0xd40] sm:$0xff] }
  0x62   :  { %3264 = vmatpush1.bf16.msra.mxu0 %v4921_v8  ;;  %3305 = vmatpush1.bf16.msra.mxu1 %v4923_v9  ;;  %v22_v8 = vld [vmem:[%s6805_s1 + $0x48] sm:$0xff] }
  0x63   :  { %3331 = vmatprep.subr.bf16.mxu0 %v4478_v10  ;;  %3372 = vmatprep.subr.bf16.mxu1 %v4480_v11  ;;  %v54_v9 = vld [vmem:[%s6805_s1 + $0x148] sm:$0xff]  ;;  %v4925_v10 = vcombine.low %v467_v61, %v499_v62  ;;  %v4927_v11 = vcombine.low %v468_v63, %v500_v0  ;;  %v4866_v61 = vcombine.high %v405_v55, %v437_v56  ;;  %v469_v63 = vld [vmem:[%s6805_s1 + $0xe40] sm:$0xff] }
  0x64   :  { %v4484_v14 = vcombine.high %v22_v8, %v54_v9  ;;  %v501_v0 = vld [vmem:[%s6805_s1 + $0xf40] sm:$0xff] }
  0x65   :  { %3282 = vmatmul.mubr.bf16.vlgmr.msra.gmra.mrb[8].mxu0 %v5122_v12  ;;  %3323 = vmatmul.mubr.bf16.vlgmr.msra.gmra.mrb[8].mxu1 %v5122_v12 }
  0x66   :  { %3332 = vmatpush1.bf16.msra.mxu0 %v4477_v17  ;;  %3373 = vmatpush1.bf16.msra.mxu1 %v4479_v18  ;;  %v86_v17 = vld [vmem:[%s6805_s1 + $0x248] sm:$0xff] }
  0x67   :  { %3333 = vmatprep.subr.bf16.mxu0 %v4542_v19  ;;  %3374 = vmatprep.subr.bf16.mxu1 %v4544_v20  ;;  %v118_v18 = vld [vmem:[%s6805_s1 + $0x348] sm:$0xff]  ;;  %v4481_v19 = vcombine.low %v21_v6, %v53_v7  ;;  %v4483_v20 = vcombine.low %v22_v8, %v54_v9  ;;  %v4930_v6 = vcombine.high %v469_v63, %v501_v0  ;;  %v23_v8 = vld [vmem:[%s6805_s1 + $0x50] sm:$0xff] }
  0x68   :  { %3363 = vmatprep.mubr.bf16.mxu0 %v4981_v3  ;;  %3404 = vmatprep.mubr.bf16.mxu1 %v4981_v3  ;;  %v4548_v22 = vcombine.high %v86_v17, %v118_v18  ;;  %v55_v9 = vld [vmem:[%s6805_s1 + $0x150] sm:$0xff] }
  0x6a   :  { %3334 = vmatpush1.bf16.msra.mxu0 %v4541_v25  ;;  %3375 = vmatpush1.bf16.msra.mxu1 %v4543_v26  ;;  %v150_v25 = vld [vmem:[%s6805_s1 + $0x448] sm:$0xff] }
  0x6b   :  { %3335 = vmatprep.subr.bf16.mxu0 %v4606_v27  ;;  %3376 = vmatprep.subr.bf16.mxu1 %v4608_v28  ;;  %v182_v26 = vld [vmem:[%s6805_s1 + $0x548] sm:$0xff]  ;;  %v4545_v27 = vcombine.low %v85_v15, %v117_v16  ;;  %v4547_v28 = vcombine.low %v86_v17, %v118_v18  ;;  %v4486_v15 = vcombine.high %v23_v8, %v55_v9  ;;  %v87_v17 = vld [vmem:[%s6805_s1 + $0x250] sm:$0xff] }
  0x6c   :  { %v4612_v30 = vcombine.high %v150_v25, %v182_v26  ;;  %v119_v18 = vld [vmem:[%s6805_s1 + $0x350] sm:$0xff] }
  0x6e   :  { %3336 = vmatpush1.bf16.msra.mxu0 %v4605_v33  ;;  %3377 = vmatpush1.bf16.msra.mxu1 %v4607_v34  ;;  %v214_v33 = vld [vmem:[%s6805_s1 + $0x648] sm:$0xff] }
  0x6f   :  { %3337 = vmatprep.subr.bf16.mxu0 %v4670_v35  ;;  %3378 = vmatprep.subr.bf16.mxu1 %v4672_v36  ;;  %v246_v34 = vld [vmem:[%s6805_s1 + $0x748] sm:$0xff]  ;;  %v4609_v35 = vcombine.low %v149_v23, %v181_v24  ;;  %v4611_v36 = vcombine.low %v150_v25, %v182_v26  ;;  %v4550_v23 = vcombine.high %v87_v17, %v119_v18  ;;  %v151_v25 = vld [vmem:[%s6805_s1 + $0x450] sm:$0xff] }
  0x70   :  { %v4676_v38 = vcombine.high %v214_v33, %v246_v34  ;;  %v183_v26 = vld [vmem:[%s6805_s1 + $0x550] sm:$0xff] }
  0x72   :  { %3338 = vmatpush1.bf16.msra.mxu0 %v4669_v41  ;;  %3379 = vmatpush1.bf16.msra.mxu1 %v4671_v42  ;;  %v278_v41 = vld [vmem:[%s6805_s1 + $0x848] sm:$0xff] }
  0x73   :  { %3339 = vmatprep.subr.bf16.mxu0 %v4734_v43  ;;  %3380 = vmatprep.subr.bf16.mxu1 %v4736_v44  ;;  %v310_v42 = vld [vmem:[%s6805_s1 + $0x948] sm:$0xff]  ;;  %v4673_v43 = vcombine.low %v213_v31, %v245_v32  ;;  %v4675_v44 = vcombine.low %v214_v33, %v246_v34  ;;  %v4614_v31 = vcombine.high %v151_v25, %v183_v26  ;;  %v215_v33 = vld [vmem:[%s6805_s1 + $0x650] sm:$0xff] }
  0x74   :  { %v4740_v46 = vcombine.high %v278_v41, %v310_v42  ;;  %v247_v34 = vld [vmem:[%s6805_s1 + $0x750] sm:$0xff] }
  0x76   :  { %3340 = vmatpush1.bf16.msra.mxu0 %v4733_v49  ;;  %3381 = vmatpush1.bf16.msra.mxu1 %v4735_v50  ;;  %v342_v49 = vld [vmem:[%s6805_s1 + $0xa48] sm:$0xff] }
  0x77   :  { %3341 = vmatprep.subr.bf16.mxu0 %v4798_v51  ;;  %3382 = vmatprep.subr.bf16.mxu1 %v4800_v52  ;;  %v374_v50 = vld [vmem:[%s6805_s1 + $0xb48] sm:$0xff]  ;;  %v4737_v51 = vcombine.low %v277_v39, %v309_v40  ;;  %v4739_v52 = vcombine.low %v278_v41, %v310_v42  ;;  %v4678_v39 = vcombine.high %v215_v33, %v247_v34  ;;  %v279_v41 = vld [vmem:[%s6805_s1 + $0x850] sm:$0xff] }
  0x78   :  { %v4804_v54 = vcombine.high %v342_v49, %v374_v50  ;;  %v311_v42 = vld [vmem:[%s6805_s1 + $0x950] sm:$0xff] }
  0x7a   :  { %3342 = vmatpush1.bf16.msra.mxu0 %v4797_v57  ;;  %3383 = vmatpush1.bf16.msra.mxu1 %v4799_v58  ;;  %v406_v57 = vld [vmem:[%s6805_s1 + $0xc48] sm:$0xff] }
  0x7b   :  { %3343 = vmatprep.subr.bf16.mxu0 %v4862_v59  ;;  %3384 = vmatprep.subr.bf16.mxu1 %v4864_v60  ;;  %v438_v58 = vld [vmem:[%s6805_s1 + $0xd48] sm:$0xff]  ;;  %v4801_v59 = vcombine.low %v341_v47, %v373_v48  ;;  %v4803_v60 = vcombine.low %v342_v49, %v374_v50  ;;  %v4742_v47 = vcombine.high %v279_v41, %v311_v42  ;;  %v343_v49 = vld [vmem:[%s6805_s1 + $0xa50] sm:$0xff] }
  0x7c   :  { %v4868_v62 = vcombine.high %v406_v57, %v438_v58  ;;  %v375_v50 = vld [vmem:[%s6805_s1 + $0xb50] sm:$0xff] }
  0x7e   :  { %3344 = vmatpush1.bf16.msra.mxu0 %v4861_v1  ;;  %3385 = vmatpush1.bf16.msra.mxu1 %v4863_v2  ;;  %v470_v1 = vld [vmem:[%s6805_s1 + $0xe48] sm:$0xff] }
  0x7f   :  { %3345 = vmatprep.subr.bf16.mxu0 %v4926_v4  ;;  %3386 = vmatprep.subr.bf16.mxu1 %v4928_v5  ;;  %v502_v2 = vld [vmem:[%s6805_s1 + $0xf48] sm:$0xff]  ;;  %v4865_v4 = vcombine.low %v405_v55, %v437_v56  ;;  %v4867_v5 = vcombine.low %v406_v57, %v438_v58  ;;  %v4806_v55 = vcombine.high %v343_v49, %v375_v50  ;;  %v407_v57 = vld [vmem:[%s6805_s1 + $0xc50] sm:$0xff] }
  0x80   :  { %v4932_v7 = vcombine.high %v470_v1, %v502_v2  ;;  %v439_v58 = vld [vmem:[%s6805_s1 + $0xd50] sm:$0xff] }
  0x82   :  { %3346 = vmatpush1.bf16.msra.mxu0 %v4925_v10  ;;  %3387 = vmatpush1.bf16.msra.mxu1 %v4927_v11  ;;  %v24_v10 = vld [vmem:[%s6805_s1 + $0x58] sm:$0xff] }
  0x83   :  { %3413 = vmatprep.subr.bf16.mxu0 %v4482_v13  ;;  %3454 = vmatprep.subr.bf16.mxu1 %v4484_v14  ;;  %v56_v11 = vld [vmem:[%s6805_s1 + $0x158] sm:$0xff]  ;;  %v4929_v13 = vcombine.low %v469_v63, %v501_v0  ;;  %v4931_v14 = vcombine.low %v470_v1, %v502_v2  ;;  %v4870_v63 = vcombine.high %v407_v57, %v439_v58  ;;  %v471_v1 = vld [vmem:[%s6805_s1 + $0xe50] sm:$0xff] }
  0x84   :  { %v4488_v16 = vcombine.high %v24_v10, %v56_v11  ;;  %v503_v2 = vld [vmem:[%s6805_s1 + $0xf50] sm:$0xff] }
  0x85   :  { %3364 = vmatmul.mubr.bf16.vlgmr.msra.gmra.mrb[12].mxu0 %v5122_v12  ;;  %3405 = vmatmul.mubr.bf16.vlgmr.msra.gmra.mrb[12].mxu1 %v5122_v12 }
  0x86   :  { %3414 = vmatpush1.bf16.msra.mxu0 %v4481_v19  ;;  %3455 = vmatpush1.bf16.msra.mxu1 %v4483_v20  ;;  %v88_v19 = vld [vmem:[%s6805_s1 + $0x258] sm:$0xff] }
  0x87   :  { %3415 = vmatprep.subr.bf16.mxu0 %v4546_v21  ;;  %3456 = vmatprep.subr.bf16.mxu1 %v4548_v22  ;;  %v120_v20 = vld [vmem:[%s6805_s1 + $0x358] sm:$0xff]  ;;  %v4485_v21 = vcombine.low %v23_v8, %v55_v9  ;;  %v4487_v22 = vcombine.low %v24_v10, %v56_v11  ;;  %v4934_v8 = vcombine.high %v471_v1, %v503_v2  ;;  %v25_v10 = vld [vmem:[%s6805_s1 + $0x60] sm:$0xff] }
  0x88   :  { %3445 = vmatprep.mubr.bf16.mxu0 %v4981_v3  ;;  %3486 = vmatprep.mubr.bf16.mxu1 %v4981_v3  ;;  %v4552_v24 = vcombine.high %v88_v19, %v120_v20  ;;  %v57_v11 = vld [vmem:[%s6805_s1 + $0x160] sm:$0xff] }
  0x8a   :  { %3416 = vmatpush1.bf16.msra.mxu0 %v4545_v27  ;;  %3457 = vmatpush1.bf16.msra.mxu1 %v4547_v28  ;;  %v152_v27 = vld [vmem:[%s6805_s1 + $0x458] sm:$0xff] }
  0x8b   :  { %3417 = vmatprep.subr.bf16.mxu0 %v4610_v29  ;;  %3458 = vmatprep.subr.bf16.mxu1 %v4612_v30  ;;  %v184_v28 = vld [vmem:[%s6805_s1 + $0x558] sm:$0xff]  ;;  %v4549_v29 = vcombine.low %v87_v17, %v119_v18  ;;  %v4551_v30 = vcombine.low %v88_v19, %v120_v20  ;;  %v4490_v17 = vcombine.high %v25_v10, %v57_v11  ;;  %v89_v19 = vld [vmem:[%s6805_s1 + $0x260] sm:$0xff] }
  0x8c   :  { %v4616_v32 = vcombine.high %v152_v27, %v184_v28  ;;  %v121_v20 = vld [vmem:[%s6805_s1 + $0x360] sm:$0xff] }
  0x8e   :  { %3418 = vmatpush1.bf16.msra.mxu0 %v4609_v35  ;;  %3459 = vmatpush1.bf16.msra.mxu1 %v4611_v36  ;;  %v216_v35 = vld [vmem:[%s6805_s1 + $0x658] sm:$0xff] }
  0x8f   :  { %3419 = vmatprep.subr.bf16.mxu0 %v4674_v37  ;;  %3460 = vmatprep.subr.bf16.mxu1 %v4676_v38  ;;  %v248_v36 = vld [vmem:[%s6805_s1 + $0x758] sm:$0xff]  ;;  %v4613_v37 = vcombine.low %v151_v25, %v183_v26  ;;  %v4615_v38 = vcombine.low %v152_v27, %v184_v28  ;;  %v4554_v25 = vcombine.high %v89_v19, %v121_v20  ;;  %v153_v27 = vld [vmem:[%s6805_s1 + $0x460] sm:$0xff] }
  0x90   :  { %v4680_v40 = vcombine.high %v216_v35, %v248_v36  ;;  %v185_v28 = vld [vmem:[%s6805_s1 + $0x560] sm:$0xff] }
  0x92   :  { %3420 = vmatpush1.bf16.msra.mxu0 %v4673_v43  ;;  %3461 = vmatpush1.bf16.msra.mxu1 %v4675_v44  ;;  %v280_v43 = vld [vmem:[%s6805_s1 + $0x858] sm:$0xff] }
  0x93   :  { %3421 = vmatprep.subr.bf16.mxu0 %v4738_v45  ;;  %3462 = vmatprep.subr.bf16.mxu1 %v4740_v46  ;;  %v312_v44 = vld [vmem:[%s6805_s1 + $0x958] sm:$0xff]  ;;  %v4677_v45 = vcombine.low %v215_v33, %v247_v34  ;;  %v4679_v46 = vcombine.low %v216_v35, %v248_v36  ;;  %v4618_v33 = vcombine.high %v153_v27, %v185_v28  ;;  %v217_v35 = vld [vmem:[%s6805_s1 + $0x660] sm:$0xff] }
  0x94   :  { %v4744_v48 = vcombine.high %v280_v43, %v312_v44  ;;  %v249_v36 = vld [vmem:[%s6805_s1 + $0x760] sm:$0xff] }
  0x96   :  { %3422 = vmatpush1.bf16.msra.mxu0 %v4737_v51  ;;  %3463 = vmatpush1.bf16.msra.mxu1 %v4739_v52  ;;  %v344_v51 = vld [vmem:[%s6805_s1 + $0xa58] sm:$0xff] }
  0x97   :  { %3423 = vmatprep.subr.bf16.mxu0 %v4802_v53  ;;  %3464 = vmatprep.subr.bf16.mxu1 %v4804_v54  ;;  %v376_v52 = vld [vmem:[%s6805_s1 + $0xb58] sm:$0xff]  ;;  %v4741_v53 = vcombine.low %v279_v41, %v311_v42  ;;  %v4743_v54 = vcombine.low %v280_v43, %v312_v44  ;;  %v4682_v41 = vcombine.high %v217_v35, %v249_v36  ;;  %v281_v43 = vld [vmem:[%s6805_s1 + $0x860] sm:$0xff] }
  0x98   :  { %v4808_v56 = vcombine.high %v344_v51, %v376_v52  ;;  %v313_v44 = vld [vmem:[%s6805_s1 + $0x960] sm:$0xff] }
  0x9a   :  { %3424 = vmatpush1.bf16.msra.mxu0 %v4801_v59  ;;  %3465 = vmatpush1.bf16.msra.mxu1 %v4803_v60  ;;  %v408_v59 = vld [vmem:[%s6805_s1 + $0xc58] sm:$0xff] }
  0x9b   :  { %3425 = vmatprep.subr.bf16.mxu0 %v4866_v61  ;;  %3466 = vmatprep.subr.bf16.mxu1 %v4868_v62  ;;  %v440_v60 = vld [vmem:[%s6805_s1 + $0xd58] sm:$0xff]  ;;  %v4805_v61 = vcombine.low %v343_v49, %v375_v50  ;;  %v4807_v62 = vcombine.low %v344_v51, %v376_v52  ;;  %v4746_v49 = vcombine.high %v281_v43, %v313_v44  ;;  %v345_v51 = vld [vmem:[%s6805_s1 + $0xa60] sm:$0xff] }
  0x9c   :  { %v4872_v0 = vcombine.high %v408_v59, %v440_v60  ;;  %v377_v52 = vld [vmem:[%s6805_s1 + $0xb60] sm:$0xff] }
  0x9e   :  { %3426 = vmatpush1.bf16.msra.mxu0 %v4865_v4  ;;  %3467 = vmatpush1.bf16.msra.mxu1 %v4867_v5  ;;  %v472_v4 = vld [vmem:[%s6805_s1 + $0xe58] sm:$0xff] }
  0x9f   :  { %3427 = vmatprep.subr.bf16.mxu0 %v4930_v6  ;;  %3468 = vmatprep.subr.bf16.mxu1 %v4932_v7  ;;  %v504_v5 = vld [vmem:[%s6805_s1 + $0xf58] sm:$0xff]  ;;  %v4869_v6 = vcombine.low %v407_v57, %v439_v58  ;;  %v4871_v7 = vcombine.low %v408_v59, %v440_v60  ;;  %v4810_v57 = vcombine.high %v345_v51, %v377_v52  ;;  %v409_v59 = vld [vmem:[%s6805_s1 + $0xc60] sm:$0xff] }
  0xa0   :  { %v4936_v9 = vcombine.high %v472_v4, %v504_v5  ;;  %v441_v60 = vld [vmem:[%s6805_s1 + $0xd60] sm:$0xff] }
  0xa2   :  { %3428 = vmatpush1.bf16.msra.mxu0 %v4929_v13  ;;  %3469 = vmatpush1.bf16.msra.mxu1 %v4931_v14  ;;  %v26_v13 = vld [vmem:[%s6805_s1 + $0x68] sm:$0xff] }
  0xa3   :  { %3495 = vmatprep.subr.bf16.mxu0 %v4486_v15  ;;  %3536 = vmatprep.subr.bf16.mxu1 %v4488_v16  ;;  %v58_v14 = vld [vmem:[%s6805_s1 + $0x168] sm:$0xff]  ;;  %v4933_v15 = vcombine.low %v471_v1, %v503_v2  ;;  %v4935_v16 = vcombine.low %v472_v4, %v504_v5  ;;  %v4874_v1 = vcombine.high %v409_v59, %v441_v60  ;;  %v473_v4 = vld [vmem:[%s6805_s1 + $0xe60] sm:$0xff] }
  0xa4   :  { %v4492_v18 = vcombine.high %v26_v13, %v58_v14  ;;  %v505_v5 = vld [vmem:[%s6805_s1 + $0xf60] sm:$0xff] }
  0xa5   :  { %3446 = vmatmul.mubr.bf16.vlgmr.msra.gmra.mrb[16].mxu0 %v5122_v12  ;;  %3487 = vmatmul.mubr.bf16.vlgmr.msra.gmra.mrb[16].mxu1 %v5122_v12 }
  0xa6   :  { %3496 = vmatpush1.bf16.msra.mxu0 %v4485_v21  ;;  %3537 = vmatpush1.bf16.msra.mxu1 %v4487_v22  ;;  %v90_v21 = vld [vmem:[%s6805_s1 + $0x268] sm:$0xff] }
  0xa7   :  { %3497 = vmatprep.subr.bf16.mxu0 %v4550_v23  ;;  %3538 = vmatprep.subr.bf16.mxu1 %v4552_v24  ;;  %v122_v22 = vld [vmem:[%s6805_s1 + $0x368] sm:$0xff]  ;;  %v4489_v23 = vcombine.low %v25_v10, %v57_v11  ;;  %v4491_v24 = vcombine.low %v26_v13, %v58_v14  ;;  %v4938_v10 = vcombine.high %v473_v4, %v505_v5  ;;  %v27_v13 = vld [vmem:[%s6805_s1 + $0x70] sm:$0xff] }
  0xa8   :  { %3527 = vmatprep.mubr.bf16.mxu0 %v4981_v3  ;;  %3568 = vmatprep.mubr.bf16.mxu1 %v4981_v3  ;;  %v4556_v26 = vcombine.high %v90_v21, %v122_v22  ;;  %v59_v14 = vld [vmem:[%s6805_s1 + $0x170] sm:$0xff] }
  0xaa   :  { %3498 = vmatpush1.bf16.msra.mxu0 %v4549_v29  ;;  %3539 = vmatpush1.bf16.msra.mxu1 %v4551_v30  ;;  %v154_v29 = vld [vmem:[%s6805_s1 + $0x468] sm:$0xff] }
  0xab   :  { %3499 = vmatprep.subr.bf16.mxu0 %v4614_v31  ;;  %3540 = vmatprep.subr.bf16.mxu1 %v4616_v32  ;;  %v186_v30 = vld [vmem:[%s6805_s1 + $0x568] sm:$0xff]  ;;  %v5640_v31 = vld [vmem:[%s6806_s0] sm:$0xf]  ;;  %v4553_v32 = vcombine.low %v89_v19, %v121_v20  ;;  %v4494_v19 = vcombine.high %v27_v13, %v59_v14 }
  0xac   :  { %v4620_v34 = vcombine.high %v154_v29, %v186_v30 }
  0xae   :  { %3500 = vmatpush1.bf16.msra.mxu0 %v4613_v37  ;;  %3541 = vmatpush1.bf16.msra.mxu1 %v4615_v38  ;;  %v218_v37 = vld [vmem:[%s6805_s1 + $0x668] sm:$0xff] }
  0xaf   :  { %3501 = vmatprep.subr.bf16.mxu0 %v4678_v39  ;;  %3542 = vmatprep.subr.bf16.mxu1 %v4680_v40  ;;  %v250_v38 = vld [vmem:[%s6805_s1 + $0x768] sm:$0xff]  ;;  %v4617_v39 = vcombine.low %v153_v27, %v185_v28  ;;  %v4619_v40 = vcombine.low %v154_v29, %v186_v30  ;;  %v155_v29 = vld [vmem:[%s6805_s1 + $0x470] sm:$0xff] }
  0xb0   :  { %v4684_v42 = vcombine.high %v218_v37, %v250_v38  ;;  %v187_v30 = vld [vmem:[%s6805_s1 + $0x570] sm:$0xff] }
  0xb2   :  { %3502 = vmatpush1.bf16.msra.mxu0 %v4677_v45  ;;  %3543 = vmatpush1.bf16.msra.mxu1 %v4679_v46  ;;  %v282_v45 = vld [vmem:[%s6805_s1 + $0x868] sm:$0xff] }
  0xb3   :  { %3503 = vmatprep.subr.bf16.mxu0 %v4742_v47  ;;  %3544 = vmatprep.subr.bf16.mxu1 %v4744_v48  ;;  %v314_v46 = vld [vmem:[%s6805_s1 + $0x968] sm:$0xff]  ;;  %v4681_v47 = vcombine.low %v217_v35, %v249_v36  ;;  %v4683_v48 = vcombine.low %v218_v37, %v250_v38  ;;  %v4622_v35 = vcombine.high %v155_v29, %v187_v30  ;;  %v219_v37 = vld [vmem:[%s6805_s1 + $0x670] sm:$0xff] }
  0xb4   :  { %v4748_v50 = vcombine.high %v282_v45, %v314_v46  ;;  %v251_v38 = vld [vmem:[%s6805_s1 + $0x770] sm:$0xff] }
  0xb6   :  { %3504 = vmatpush1.bf16.msra.mxu0 %v4741_v53  ;;  %3545 = vmatpush1.bf16.msra.mxu1 %v4743_v54  ;;  %v346_v53 = vld [vmem:[%s6805_s1 + $0xa68] sm:$0xff] }
  0xb7   :  { %3505 = vmatprep.subr.bf16.mxu0 %v4806_v55  ;;  %3546 = vmatprep.subr.bf16.mxu1 %v4808_v56  ;;  %v378_v54 = vld [vmem:[%s6805_s1 + $0xb68] sm:$0xff]  ;;  %v4745_v55 = vcombine.low %v281_v43, %v313_v44  ;;  %v4747_v56 = vcombine.low %v282_v45, %v314_v46  ;;  %v4686_v43 = vcombine.high %v219_v37, %v251_v38  ;;  %v283_v45 = vld [vmem:[%s6805_s1 + $0x870] sm:$0xff] }
  0xb8   :  { %v4812_v58 = vcombine.high %v346_v53, %v378_v54  ;;  %v315_v46 = vld [vmem:[%s6805_s1 + $0x970] sm:$0xff] }
  0xba   :  { %3506 = vmatpush1.bf16.msra.mxu0 %v4805_v61  ;;  %3547 = vmatpush1.bf16.msra.mxu1 %v4807_v62  ;;  %v410_v61 = vld [vmem:[%s6805_s1 + $0xc68] sm:$0xff] }
  0xbb   :  { %3507 = vmatprep.subr.bf16.mxu0 %v4870_v63  ;;  %3548 = vmatprep.subr.bf16.mxu1 %v4872_v0  ;;  %v442_v62 = vld [vmem:[%s6805_s1 + $0xd68] sm:$0xff]  ;;  %v4809_v63 = vcombine.low %v345_v51, %v377_v52  ;;  %v4811_v0 = vcombine.low %v346_v53, %v378_v54  ;;  %v4750_v51 = vcombine.high %v283_v45, %v315_v46  ;;  %v347_v53 = vld [vmem:[%s6805_s1 + $0xa70] sm:$0xff] }
  0xbc   :  { %v4876_v2 = vcombine.high %v410_v61, %v442_v62  ;;  %v379_v54 = vld [vmem:[%s6805_s1 + $0xb70] sm:$0xff] }
  0xbe   :  { %3508 = vmatpush1.bf16.msra.mxu0 %v4869_v6  ;;  %3549 = vmatpush1.bf16.msra.mxu1 %v4871_v7  ;;  %v474_v6 = vld [vmem:[%s6805_s1 + $0xe68] sm:$0xff] }
  0xbf   :  { %3509 = vmatprep.subr.bf16.mxu0 %v4934_v8  ;;  %3550 = vmatprep.subr.bf16.mxu1 %v4936_v9  ;;  %v506_v7 = vld [vmem:[%s6805_s1 + $0xf68] sm:$0xff]  ;;  %v4873_v8 = vcombine.low %v409_v59, %v441_v60  ;;  %v4875_v9 = vcombine.low %v410_v61, %v442_v62  ;;  %v4814_v59 = vcombine.high %v347_v53, %v379_v54  ;;  %v411_v61 = vld [vmem:[%s6805_s1 + $0xc70] sm:$0xff] }
  0xc0   :  { %v4940_v11 = vcombine.high %v474_v6, %v506_v7  ;;  %v443_v62 = vld [vmem:[%s6805_s1 + $0xd70] sm:$0xff] }
  0xc2   :  { %3510 = vmatpush1.bf16.msra.mxu0 %v4933_v15  ;;  %3551 = vmatpush1.bf16.msra.mxu1 %v4935_v16  ;;  %v28_v15 = vld [vmem:[%s6805_s1 + $0x78] sm:$0xff] }
  0xc3   :  { %3577 = vmatprep.subr.bf16.mxu0 %v4490_v17  ;;  %3618 = vmatprep.subr.bf16.mxu1 %v4492_v18  ;;  %v60_v16 = vld [vmem:[%s6805_s1 + $0x178] sm:$0xff]  ;;  %v4937_v17 = vcombine.low %v473_v4, %v505_v5  ;;  %v4939_v18 = vcombine.low %v474_v6, %v506_v7  ;;  %v4878_v4 = vcombine.high %v411_v61, %v443_v62  ;;  %v475_v7 = vld [vmem:[%s6805_s1 + $0xe70] sm:$0xff] }
  0xc4   :  { %v4496_v20 = vcombine.high %v28_v15, %v60_v16 }
  0xc5   :  { %3528 = vmatmul.mubr.bf16.vlgmr.msra.gmra.mrb[20].mxu0 %v5122_v12  ;;  %3569 = vmatmul.mubr.bf16.vlgmr.msra.gmra.mrb[20].mxu1 %v5640_v31  ;;  %v4555_v12 = vcombine.low %v90_v21, %v122_v22  ;;  %v91_v21 = vld [vmem:[%s6805_s1 + $0x270] sm:$0xff] }
  0xc6   :  { %3578 = vmatpush1.bf16.msra.mxu0 %v4489_v23  ;;  %3619 = vmatpush1.bf16.msra.mxu1 %v4491_v24  ;;  %v123_v22 = vld [vmem:[%s6805_s1 + $0x370] sm:$0xff]  ;;  %v92_v23 = vld [vmem:[%s6805_s1 + $0x278] sm:$0xff] }
  0xc7   :  { %3579 = vmatprep.subr.bf16.mxu0 %v4554_v25  ;;  %3620 = vmatprep.subr.bf16.mxu1 %v4556_v26  ;;  %v124_v24 = vld [vmem:[%s6805_s1 + $0x378] sm:$0xff]  ;;  %v4493_v25 = vcombine.low %v27_v13, %v59_v14  ;;  %v4495_v26 = vcombine.low %v28_v15, %v60_v16  ;;  %v4558_v27 = vcombine.high %v91_v21, %v123_v22 }
  0xc8   :  { %3609 = vmatprep.mubr.bf16.mxu0 %v4981_v3  ;;  %3650 = vmatprep.mubr.bf16.mxu1 %v4981_v3  ;;  %v4560_v28 = vcombine.high %v92_v23, %v124_v24  ;;  %v508_v13 = vld [vmem:[%s6805_s1 + $0xf78] sm:$0xff]  ;;  %v4877_v16 = vcombine.low %v411_v61, %v443_v62 }
  0xca   :  { %3580 = vmatpush1.bf16.msra.mxu0 %v4553_v32  ;;  %3621 = vmatpush1.bf16.msra.mxu1 %v4555_v12  ;;  %v156_v32 = vld [vmem:[%s6805_s1 + $0x478] sm:$0xff] }
  0xcb   :  { %3581 = vmatprep.subr.bf16.mxu0 %v4618_v33  ;;  %3622 = vmatprep.subr.bf16.mxu1 %v4620_v34  ;;  %v188_v12 = vld [vmem:[%s6805_s1 + $0x578] sm:$0xff]  ;;  %v4557_v33 = vcombine.low %v91_v21, %v123_v22  ;;  %v4559_v34 = vcombine.low %v92_v23, %v124_v24  ;;  %v29_v23 = vld [vmem:[%s6805_s1 + $0x80] sm:$0xff] }
  0xcc   :  { %v4624_v36 = vcombine.high %v156_v32, %v188_v12  ;;  %v61_v24 = vld [vmem:[%s6805_s1 + $0x180] sm:$0xff] }
  0xce   :  { %3582 = vmatpush1.bf16.msra.mxu0 %v4617_v39  ;;  %3623 = vmatpush1.bf16.msra.mxu1 %v4619_v40  ;;  %v220_v39 = vld [vmem:[%s6805_s1 + $0x678] sm:$0xff] }
  0xcf   :  { %3583 = vmatprep.subr.bf16.mxu0 %v4682_v41  ;;  %3624 = vmatprep.subr.bf16.mxu1 %v4684_v42  ;;  %v252_v40 = vld [vmem:[%s6805_s1 + $0x778] sm:$0xff]  ;;  %v4621_v41 = vcombine.low %v155_v29, %v187_v30  ;;  %v4623_v42 = vcombine.low %v156_v32, %v188_v12  ;;  %v4498_v29 = vcombine.high %v29_v23, %v61_v24  ;;  %v93_v32 = vld [vmem:[%s6805_s1 + $0x280] sm:$0xff] }
  0xd0   :  { %v4688_v44 = vcombine.high %v220_v39, %v252_v40  ;;  %v125_v12 = vld [vmem:[%s6805_s1 + $0x380] sm:$0xff] }
  0xd2   :  { %3584 = vmatpush1.bf16.msra.mxu0 %v4681_v47  ;;  %3625 = vmatpush1.bf16.msra.mxu1 %v4683_v48  ;;  %v284_v47 = vld [vmem:[%s6805_s1 + $0x878] sm:$0xff] }
  0xd3   :  { %3585 = vmatprep.subr.bf16.mxu0 %v4746_v49  ;;  %3626 = vmatprep.subr.bf16.mxu1 %v4748_v50  ;;  %v316_v48 = vld [vmem:[%s6805_s1 + $0x978] sm:$0xff]  ;;  %v4685_v49 = vcombine.low %v219_v37, %v251_v38  ;;  %v4687_v50 = vcombine.low %v220_v39, %v252_v40  ;;  %v4562_v37 = vcombine.high %v93_v32, %v125_v12  ;;  %v157_v39 = vld [vmem:[%s6805_s1 + $0x480] sm:$0xff] }
  0xd4   :  { %v4752_v52 = vcombine.high %v284_v47, %v316_v48  ;;  %v189_v40 = vld [vmem:[%s6805_s1 + $0x580] sm:$0xff] }
  0xd6   :  { %3586 = vmatpush1.bf16.msra.mxu0 %v4745_v55  ;;  %3627 = vmatpush1.bf16.msra.mxu1 %v4747_v56  ;;  %v348_v55 = vld [vmem:[%s6805_s1 + $0xa78] sm:$0xff] }
  0xd7   :  { %3587 = vmatprep.subr.bf16.mxu0 %v4810_v57  ;;  %3628 = vmatprep.subr.bf16.mxu1 %v4812_v58  ;;  %v380_v56 = vld [vmem:[%s6805_s1 + $0xb78] sm:$0xff]  ;;  %v4749_v57 = vcombine.low %v283_v45, %v315_v46  ;;  %v4751_v58 = vcombine.low %v284_v47, %v316_v48  ;;  %v4626_v45 = vcombine.high %v157_v39, %v189_v40  ;;  %v221_v47 = vld [vmem:[%s6805_s1 + $0x680] sm:$0xff] }
  0xd8   :  { %v4816_v60 = vcombine.high %v348_v55, %v380_v56  ;;  %v253_v48 = vld [vmem:[%s6805_s1 + $0x780] sm:$0xff] }
  0xda   :  { %3588 = vmatpush1.bf16.msra.mxu0 %v4809_v63  ;;  %3629 = vmatpush1.bf16.msra.mxu1 %v4811_v0  ;;  %v412_v63 = vld [vmem:[%s6805_s1 + $0xc78] sm:$0xff] }
  0xdb   :  { %3589 = vmatprep.subr.bf16.mxu0 %v4874_v1  ;;  %3630 = vmatprep.subr.bf16.mxu1 %v4876_v2  ;;  %v444_v0 = vld [vmem:[%s6805_s1 + $0xd78] sm:$0xff]  ;;  %v4813_v1 = vcombine.low %v347_v53, %v379_v54  ;;  %v4815_v2 = vcombine.low %v348_v55, %v380_v56  ;;  %v4690_v53 = vcombine.high %v221_v47, %v253_v48  ;;  %v285_v55 = vld [vmem:[%s6805_s1 + $0x880] sm:$0xff] }
  0xdc   :  { %v4880_v6 = vcombine.high %v412_v63, %v444_v0  ;;  %v317_v56 = vld [vmem:[%s6805_s1 + $0x980] sm:$0xff] }
  0xdd   :  { %v4754_v61 = vcombine.high %v285_v55, %v317_v56 }
  0xde   :  { %3590 = vmatpush1.bf16.msra.mxu0 %v4873_v8  ;;  %3631 = vmatpush1.bf16.msra.mxu1 %v4875_v9  ;;  %v507_v8 = vld [vmem:[%s6805_s1 + $0xf70] sm:$0xff] }
  0xdf   :  { %3591 = vmatprep.subr.bf16.mxu0 %v4938_v10  ;;  %3632 = vmatprep.subr.bf16.mxu1 %v4940_v11  ;;  %v476_v11 = vld [vmem:[%s6805_s1 + $0xe78] sm:$0xff] }
  0xe0   :  { %v4944_v22 = vcombine.high %v476_v11, %v508_v13 }
  0xe2   :  { %3592 = vmatpush1.bf16.msra.mxu0 %v4937_v17  ;;  %3633 = vmatpush1.bf16.msra.mxu1 %v4939_v18 }
  0xe3   :  { %3659 = vmatprep.subr.bf16.mxu0 %v4494_v19  ;;  %3700 = vmatprep.subr.bf16.mxu1 %v4496_v20  ;;  %v4879_v19 = vcombine.low %v412_v63, %v444_v0  ;;  %v4942_v20 = vcombine.high %v475_v7, %v507_v8  ;;  %v349_v63 = vld [vmem:[%s6805_s1 + $0xa80] sm:$0xff] }
  0xe4   :  { %v381_v0 = vld [vmem:[%s6805_s1 + $0xb80] sm:$0xff] }
  0xe5   :  { %3610 = vmatmul.mubr.bf16.vlgmr.msra.gmra.mrb[24].mxu0 %v5640_v31  ;;  %3651 = vmatmul.mubr.bf16.vlgmr.msra.gmra.mrb[24].mxu1 %v5640_v31 }
  0xe6   :  { %3660 = vmatpush1.bf16.msra.mxu0 %v4493_v25  ;;  %3701 = vmatpush1.bf16.msra.mxu1 %v4495_v26  ;;  %v30_v25 = vld [vmem:[%s6805_s1 + $0x88] sm:$0xff] }
  0xe7   :  { %3661 = vmatprep.subr.bf16.mxu0 %v4558_v27  ;;  %3702 = vmatprep.subr.bf16.mxu1 %v4560_v28  ;;  %v62_v26 = vld [vmem:[%s6805_s1 + $0x188] sm:$0xff]  ;;  %v4941_v27 = vcombine.low %v475_v7, %v507_v8  ;;  %v4943_v28 = vcombine.low %v476_v11, %v508_v13  ;;  %v413_v8 = vld [vmem:[%s6805_s1 + $0xc80] sm:$0xff]  ;;  %v4817_v13 = vcombine.low %v349_v63, %v381_v0 }
  0xe8   :  { %3691 = vmatprep.mubr.bf16.mxu0 %v4981_v3  ;;  %3732 = vmatprep.mubr.bf16.mxu1 %v4981_v3  ;;  %v4500_v30 = vcombine.high %v30_v25, %v62_v26  ;;  %v446_v11 = vld [vmem:[%s6805_s1 + $0xd88] sm:$0xff] }
  0xea   :  { %3662 = vmatpush1.bf16.msra.mxu0 %v4557_v33  ;;  %3703 = vmatpush1.bf16.msra.mxu1 %v4559_v34  ;;  %v94_v33 = vld [vmem:[%s6805_s1 + $0x288] sm:$0xff] }
  0xeb   :  { %3663 = vmatprep.subr.bf16.mxu0 %v4622_v35  ;;  %3704 = vmatprep.subr.bf16.mxu1 %v4624_v36  ;;  %v126_v34 = vld [vmem:[%s6805_s1 + $0x388] sm:$0xff]  ;;  %v4497_v35 = vcombine.low %v29_v23, %v61_v24  ;;  %v4499_v36 = vcombine.low %v30_v25, %v62_v26 }
  0xec   :  { %v4564_v38 = vcombine.high %v94_v33, %v126_v34  ;;  %v510_v23 = vld [vmem:[%s6805_s1 + $0xf88] sm:$0xff] }
  0xee   :  { %3664 = vmatpush1.bf16.msra.mxu0 %v4621_v41  ;;  %3705 = vmatpush1.bf16.msra.mxu1 %v4623_v42  ;;  %v158_v41 = vld [vmem:[%s6805_s1 + $0x488] sm:$0xff] }
  0xef   :  { %3665 = vmatprep.subr.bf16.mxu0 %v4686_v43  ;;  %3706 = vmatprep.subr.bf16.mxu1 %v4688_v44  ;;  %v190_v42 = vld [vmem:[%s6805_s1 + $0x588] sm:$0xff]  ;;  %v4561_v43 = vcombine.low %v93_v32, %v125_v12  ;;  %v4563_v44 = vcombine.low %v94_v33, %v126_v34  ;;  %v31_v33 = vld [vmem:[%s6805_s1 + $0x90] sm:$0xff] }
  0xf0   :  { %v4628_v46 = vcombine.high %v158_v41, %v190_v42  ;;  %v63_v34 = vld [vmem:[%s6805_s1 + $0x190] sm:$0xff] }
  0xf2   :  { %3666 = vmatpush1.bf16.msra.mxu0 %v4685_v49  ;;  %3707 = vmatpush1.bf16.msra.mxu1 %v4687_v50  ;;  %v222_v49 = vld [vmem:[%s6805_s1 + $0x688] sm:$0xff] }
  0xf3   :  { %3667 = vmatprep.subr.bf16.mxu0 %v4750_v51  ;;  %3708 = vmatprep.subr.bf16.mxu1 %v4752_v52  ;;  %v254_v50 = vld [vmem:[%s6805_s1 + $0x788] sm:$0xff]  ;;  %v4625_v51 = vcombine.low %v157_v39, %v189_v40  ;;  %v4627_v52 = vcombine.low %v158_v41, %v190_v42  ;;  %v4502_v39 = vcombine.high %v31_v33, %v63_v34  ;;  %v95_v41 = vld [vmem:[%s6805_s1 + $0x290] sm:$0xff] }
  0xf4   :  { %v4692_v54 = vcombine.high %v222_v49, %v254_v50  ;;  %v127_v42 = vld [vmem:[%s6805_s1 + $0x390] sm:$0xff] }
  0xf6   :  { %3668 = vmatpush1.bf16.msra.mxu0 %v4749_v57  ;;  %3709 = vmatpush1.bf16.msra.mxu1 %v4751_v58  ;;  %v286_v57 = vld [vmem:[%s6805_s1 + $0x888] sm:$0xff] }
  0xf7   :  { %3669 = vmatprep.subr.bf16.mxu0 %v4814_v59  ;;  %3710 = vmatprep.subr.bf16.mxu1 %v4816_v60  ;;  %v318_v58 = vld [vmem:[%s6805_s1 + $0x988] sm:$0xff]  ;;  %v4689_v59 = vcombine.low %v221_v47, %v253_v48  ;;  %v4691_v60 = vcombine.low %v222_v49, %v254_v50  ;;  %v4566_v47 = vcombine.high %v95_v41, %v127_v42  ;;  %v159_v49 = vld [vmem:[%s6805_s1 + $0x490] sm:$0xff] }
  0xf8   :  { %v3119_v5 = vpop.f32.mrb[0].mxu0  ;;  %v3160_v9 = vpop.f32.mrb[0].mxu1  ;;  %v4756_v62 = vcombine.high %v286_v57, %v318_v58  ;;  %v191_v50 = vld [vmem:[%s6805_s1 + $0x590] sm:$0xff] }
  0xf9   :  { %4397 = vst [vmem:[%s6807_s2] sm:$0xff] %v3119_v5  ;;  %v3121_v10 = vpop.f32.mrb[1].mxu0  ;;  %4399 = vst [vmem:[%s6807_s2 + $0x10] sm:$0xff] %v3160_v9  ;;  %v3162_v14 = vpop.f32.mrb[1].mxu1  ;;  %v4755_v5 = vcombine.low %v286_v57, %v318_v58  ;;  %v445_v9 = vld [vmem:[%s6805_s1 + $0xd80] sm:$0xff]  ;;  %v223_v57 = vld [vmem:[%s6805_s1 + $0x690] sm:$0xff] }
  0xfa   :  { %4398 = vst [vmem:[%s6807_s2 + $0x8] sm:$0xff] %v3121_v10  ;;  %v3123_v15 = vpop.f32.mrb[2].mxu0  ;;  %3670 = vmatpush1.bf16.msra.mxu0 %v4813_v1  ;;  %4400 = vst [vmem:[%s6807_s2 + $0x18] sm:$0xff] %v3162_v14  ;;  %v3164_v17 = vpop.f32.mrb[2].mxu1  ;;  %3711 = vmatpush1.bf16.msra.mxu1 %v4815_v2  ;;  %v350_v1 = vld [vmem:[%s6805_s1 + $0xa88] sm:$0xff]  ;;  %v4881_v26 = vcombine.low %v413_v8, %v445_v9  ;;  %v255_v58 = vld [vmem:[%s6805_s1 + $0x790] sm:$0xff] }
  0xfb   :  { %v3124_v18 = vpop.f32.mrb[3].mxu0  ;;  %3671 = vmatprep.subr.bf16.mxu0 %v4878_v4  ;;  %v3165_v21 = vpop.f32.mrb[3].mxu1  ;;  %3712 = vmatprep.subr.bf16.mxu1 %v4880_v6  ;;  %v382_v2 = vld [vmem:[%s6805_s1 + $0xb88] sm:$0xff]  ;;  %v4753_v4 = vcombine.low %v285_v55, %v317_v56  ;;  %v4818_v6 = vcombine.high %v349_v63, %v381_v0  ;;  %v4882_v15 = vcombine.high %v413_v8, %v445_v9 }
  0xfc   :  { %v4820_v7 = vcombine.high %v350_v1, %v382_v2  ;;  %v414_v10 = vld [vmem:[%s6805_s1 + $0xc88] sm:$0xff]  ;;  %v4819_v14 = vcombine.low %v350_v1, %v382_v2  ;;  %v477_v18 = vld [vmem:[%s6805_s1 + $0xe80] sm:$0xff]  ;;  %v4630_v55 = vcombine.high %v159_v49, %v191_v50  ;;  %v4694_v63 = vcombine.high %v223_v57, %v255_v58  ;;  %v287_v1 = vld [vmem:[%s6805_s1 + $0x890] sm:$0xff] }
  0xfd   :  { %v4884_v17 = vcombine.high %v414_v10, %v446_v11  ;;  %v319_v2 = vld [vmem:[%s6805_s1 + $0x990] sm:$0xff] }
  0xfe   :  { %3672 = vmatpush1.bf16.msra.mxu0 %v4877_v16  ;;  %3713 = vmatpush1.bf16.msra.mxu1 %v4879_v19  ;;  %v509_v19 = vld [vmem:[%s6805_s1 + $0xf80] sm:$0xff]  ;;  %v4758_v8 = vcombine.high %v287_v1, %v319_v2 }
  0xff   :  { %3673 = vmatprep.subr.bf16.mxu0 %v4942_v20  ;;  %3714 = vmatprep.subr.bf16.mxu1 %v4944_v22  ;;  %v478_v22 = vld [vmem:[%s6805_s1 + $0xe88] sm:$0xff] }
 0x100   :  { %v4948_v12 = vcombine.high %v478_v22, %v510_v23 }
 0x102   :  { %3674 = vmatpush1.bf16.msra.mxu0 %v4941_v27  ;;  %3715 = vmatpush1.bf16.msra.mxu1 %v4943_v28 }
 0x103   :  { %3741 = vmatprep.subr.bf16.mxu0 %v4498_v29  ;;  %3782 = vmatprep.subr.bf16.mxu1 %v4500_v30  ;;  %v4883_v29 = vcombine.low %v414_v10, %v446_v11  ;;  %v4946_v30 = vcombine.high %v477_v18, %v509_v19  ;;  %v351_v10 = vld [vmem:[%s6805_s1 + $0xa90] sm:$0xff] }
 0x104   :  { %v383_v11 = vld [vmem:[%s6805_s1 + $0xb90] sm:$0xff] }
 0x105   :  { %3692 = vmatmul.mubr.bf16.vlgmr.msra.gmra.mrb[28].mxu0 %v5640_v31  ;;  %3733 = vmatmul.mubr.bf16.vlgmr.msra.gmra.mrb[28].mxu1 %v5640_v31 }
 0x106   :  { %3742 = vmatpush1.bf16.msra.mxu0 %v4497_v35  ;;  %3783 = vmatpush1.bf16.msra.mxu1 %v4499_v36  ;;  %v32_v35 = vld [vmem:[%s6805_s1 + $0x98] sm:$0xff] }
 0x107   :  { %3743 = vmatprep.subr.bf16.mxu0 %v4562_v37  ;;  %3784 = vmatprep.subr.bf16.mxu1 %v4564_v38  ;;  %v64_v36 = vld [vmem:[%s6805_s1 + $0x198] sm:$0xff]  ;;  %v4945_v37 = vcombine.low %v477_v18, %v509_v19  ;;  %v4947_v38 = vcombine.low %v478_v22, %v510_v23  ;;  %v415_v19 = vld [vmem:[%s6805_s1 + $0xc90] sm:$0xff]  ;;  %v4821_v23 = vcombine.low %v351_v10, %v383_v11 }
 0x108   :  { %3773 = vmatprep.mubr.bf16.mxu0 %v4981_v3  ;;  %3814 = vmatprep.mubr.bf16.mxu1 %v4981_v3  ;;  %v4504_v40 = vcombine.high %v32_v35, %v64_v36  ;;  %v448_v22 = vld [vmem:[%s6805_s1 + $0xd98] sm:$0xff] }
 0x10a   :  { %3744 = vmatpush1.bf16.msra.mxu0 %v4561_v43  ;;  %3785 = vmatpush1.bf16.msra.mxu1 %v4563_v44  ;;  %v96_v43 = vld [vmem:[%s6805_s1 + $0x298] sm:$0xff] }
 0x10b   :  { %3745 = vmatprep.subr.bf16.mxu0 %v4626_v45  ;;  %3786 = vmatprep.subr.bf16.mxu1 %v4628_v46  ;;  %v128_v44 = vld [vmem:[%s6805_s1 + $0x398] sm:$0xff]  ;;  %v4501_v45 = vcombine.low %v31_v33, %v63_v34  ;;  %v4503_v46 = vcombine.low %v32_v35, %v64_v36 }
 0x10c   :  { %v4568_v48 = vcombine.high %v96_v43, %v128_v44  ;;  %v512_v33 = vld [vmem:[%s6805_s1 + $0xf98] sm:$0xff] }
 0x10e   :  { %3746 = vmatpush1.bf16.msra.mxu0 %v4625_v51  ;;  %3787 = vmatpush1.bf16.msra.mxu1 %v4627_v52  ;;  %v160_v51 = vld [vmem:[%s6805_s1 + $0x498] sm:$0xff] }
 0x10f   :  { %3747 = vmatprep.subr.bf16.mxu0 %v4690_v53  ;;  %3788 = vmatprep.subr.bf16.mxu1 %v4692_v54  ;;  %v192_v52 = vld [vmem:[%s6805_s1 + $0x598] sm:$0xff]  ;;  %v4565_v53 = vcombine.low %v95_v41, %v127_v42  ;;  %v4567_v54 = vcombine.low %v96_v43, %v128_v44  ;;  %v33_v43 = vld [vmem:[%s6805_s1 + $0xa0] sm:$0xff] }
 0x110   :  { %v4632_v56 = vcombine.high %v160_v51, %v192_v52  ;;  %v65_v44 = vld [vmem:[%s6805_s1 + $0x1a0] sm:$0xff] }
 0x112   :  { %3748 = vmatpush1.bf16.msra.mxu0 %v4689_v59  ;;  %3789 = vmatpush1.bf16.msra.mxu1 %v4691_v60  ;;  %v224_v59 = vld [vmem:[%s6805_s1 + $0x698] sm:$0xff] }
 0x113   :  { %3749 = vmatprep.subr.bf16.mxu0 %v4754_v61  ;;  %3790 = vmatprep.subr.bf16.mxu1 %v4756_v62  ;;  %v256_v60 = vld [vmem:[%s6805_s1 + $0x798] sm:$0xff]  ;;  %v4629_v61 = vcombine.low %v159_v49, %v191_v50  ;;  %v4631_v62 = vcombine.low %v160_v51, %v192_v52  ;;  %v4506_v49 = vcombine.high %v33_v43, %v65_v44  ;;  %v97_v51 = vld [vmem:[%s6805_s1 + $0x2a0] sm:$0xff] }
 0x114   :  { %v4696_v0 = vcombine.high %v224_v59, %v256_v60  ;;  %v129_v52 = vld [vmem:[%s6805_s1 + $0x3a0] sm:$0xff] }
 0x116   :  { %3750 = vmatpush1.bf16.msra.mxu0 %v4753_v4  ;;  %3791 = vmatpush1.bf16.msra.mxu1 %v4755_v5  ;;  %v288_v4 = vld [vmem:[%s6805_s1 + $0x898] sm:$0xff] }
 0x117   :  { %3751 = vmatprep.subr.bf16.mxu0 %v4818_v6  ;;  %3792 = vmatprep.subr.bf16.mxu1 %v4820_v7  ;;  %v320_v5 = vld [vmem:[%s6805_s1 + $0x998] sm:$0xff]  ;;  %v4693_v6 = vcombine.low %v223_v57, %v255_v58  ;;  %v4695_v7 = vcombine.low %v224_v59, %v256_v60  ;;  %v4570_v57 = vcombine.high %v97_v51, %v129_v52  ;;  %v161_v59 = vld [vmem:[%s6805_s1 + $0x4a0] sm:$0xff] }
 0x118   :  { %v3201_v16 = vpop.f32.mrb[4].mxu0  ;;  %v3242_v20 = vpop.f32.mrb[4].mxu1  ;;  %v4760_v9 = vcombine.high %v288_v4, %v320_v5  ;;  %v193_v60 = vld [vmem:[%s6805_s1 + $0x5a0] sm:$0xff] }
 0x119   :  { %4401 = vst [vmem:[%s6807_s2 + $0x20] sm:$0xff] %v3201_v16  ;;  %v3203_v21 = vpop.f32.mrb[5].mxu0  ;;  %4403 = vst [vmem:[%s6807_s2 + $0x30] sm:$0xff] %v3242_v20  ;;  %v3244_v24 = vpop.f32.mrb[5].mxu1  ;;  %v4759_v16 = vcombine.low %v288_v4, %v320_v5  ;;  %v447_v20 = vld [vmem:[%s6805_s1 + $0xd90] sm:$0xff]  ;;  %v225_v4 = vld [vmem:[%s6805_s1 + $0x6a0] sm:$0xff] }
 0x11a   :  { %4402 = vst [vmem:[%s6807_s2 + $0x28] sm:$0xff] %v3203_v21  ;;  %v3205_v25 = vpop.f32.mrb[6].mxu0  ;;  %3752 = vmatpush1.bf16.msra.mxu0 %v4817_v13  ;;  %4404 = vst [vmem:[%s6807_s2 + $0x38] sm:$0xff] %v3244_v24  ;;  %v3246_v27 = vpop.f32.mrb[6].mxu1  ;;  %3793 = vmatpush1.bf16.msra.mxu1 %v4819_v14  ;;  %v352_v13 = vld [vmem:[%s6805_s1 + $0xa98] sm:$0xff]  ;;  %v4885_v36 = vcombine.low %v415_v19, %v447_v20  ;;  %v257_v5 = vld [vmem:[%s6805_s1 + $0x7a0] sm:$0xff] }
 0x11b   :  { %v3206_v28 = vpop.f32.mrb[7].mxu0  ;;  %3753 = vmatprep.subr.bf16.mxu0 %v4882_v15  ;;  %v3247_v32 = vpop.f32.mrb[7].mxu1  ;;  %3794 = vmatprep.subr.bf16.mxu1 %v4884_v17  ;;  %v384_v14 = vld [vmem:[%s6805_s1 + $0xb98] sm:$0xff]  ;;  %v4757_v15 = vcombine.low %v287_v1, %v319_v2  ;;  %v4822_v17 = vcombine.high %v351_v10, %v383_v11  ;;  %v4886_v25 = vcombine.high %v415_v19, %v447_v20  ;;  %v289_v11 = vld [vmem:[%s6805_s1 + $0x8a0] sm:$0xff] }
 0x11c   :  { %v4824_v18 = vcombine.high %v352_v13, %v384_v14  ;;  %v416_v21 = vld [vmem:[%s6805_s1 + $0xc98] sm:$0xff]  ;;  %v4823_v24 = vcombine.low %v352_v13, %v384_v14  ;;  %v479_v28 = vld [vmem:[%s6805_s1 + $0xe90] sm:$0xff]  ;;  %v4634_v1 = vcombine.high %v161_v59, %v193_v60  ;;  %v321_v13 = vld [vmem:[%s6805_s1 + $0x9a0] sm:$0xff] }
 0x11d   :  { %v4888_v27 = vcombine.high %v416_v21, %v448_v22  ;;  %v290_v14 = vld [vmem:[%s6805_s1 + $0x8a8] sm:$0xff]  ;;  %v353_v20 = vld [vmem:[%s6805_s1 + $0xaa0] sm:$0xff] }
 0x11e   :  { %3754 = vmatpush1.bf16.msra.mxu0 %v4881_v26  ;;  %3795 = vmatpush1.bf16.msra.mxu1 %v4883_v29  ;;  %v511_v29 = vld [vmem:[%s6805_s1 + $0xf90] sm:$0xff] }
 0x11f   :  { %3755 = vmatprep.subr.bf16.mxu0 %v4946_v30  ;;  %3796 = vmatprep.subr.bf16.mxu1 %v4948_v12  ;;  %v480_v12 = vld [vmem:[%s6805_s1 + $0xe98] sm:$0xff] }
 0x120   :  { %v4952_v42 = vcombine.high %v480_v12, %v512_v33 }
 0x122   :  { %3756 = vmatpush1.bf16.msra.mxu0 %v4945_v37  ;;  %3797 = vmatpush1.bf16.msra.mxu1 %v4947_v38 }
 0x123   :  { %3823 = vmatprep.subr.bf16.mxu0 %v4502_v39  ;;  %3864 = vmatprep.subr.bf16.mxu1 %v4504_v40  ;;  %v4887_v39 = vcombine.low %v416_v21, %v448_v22  ;;  %v4950_v40 = vcombine.high %v479_v28, %v511_v29  ;;  %v385_v21 = vld [vmem:[%s6805_s1 + $0xba0] sm:$0xff]  ;;  %v354_v22 = vld [vmem:[%s6805_s1 + $0xaa8] sm:$0xff] }
 0x125   :  { %3774 = vmatmul.mubr.bf16.vlgmr.msra.gmra.mrb[32].mxu0 %v5640_v31  ;;  %3815 = vmatmul.mubr.bf16.vlgmr.msra.gmra.mrb[32].mxu1 %v5640_v31 }
 0x126   :  { %3824 = vmatpush1.bf16.msra.mxu0 %v4501_v45  ;;  %3865 = vmatpush1.bf16.msra.mxu1 %v4503_v46  ;;  %v34_v45 = vld [vmem:[%s6805_s1 + $0xa8] sm:$0xff] }
 0x127   :  { %3825 = vmatprep.subr.bf16.mxu0 %v4566_v47  ;;  %3866 = vmatprep.subr.bf16.mxu1 %v4568_v48  ;;  %v66_v46 = vld [vmem:[%s6805_s1 + $0x1a8] sm:$0xff]  ;;  %v4949_v47 = vcombine.low %v479_v28, %v511_v29  ;;  %v4951_v48 = vcombine.low %v480_v12, %v512_v33  ;;  %v417_v28 = vld [vmem:[%s6805_s1 + $0xca0] sm:$0xff]  ;;  %v4825_v12 = vcombine.low %v353_v20, %v385_v21 }
 0x128   :  { %3855 = vmatprep.mubr.bf16.mxu0 %v4981_v3  ;;  %3896 = vmatprep.mubr.bf16.mxu1 %v4981_v3  ;;  %v4508_v50 = vcombine.high %v34_v45, %v66_v46  ;;  %v449_v29 = vld [vmem:[%s6805_s1 + $0xda0] sm:$0xff] }
 0x12a   :  { %3826 = vmatpush1.bf16.msra.mxu0 %v4565_v53  ;;  %3867 = vmatpush1.bf16.msra.mxu1 %v4567_v54  ;;  %v98_v53 = vld [vmem:[%s6805_s1 + $0x2a8] sm:$0xff] }
 0x12b   :  { %3827 = vmatprep.subr.bf16.mxu0 %v4630_v55  ;;  %3868 = vmatprep.subr.bf16.mxu1 %v4632_v56  ;;  %v130_v54 = vld [vmem:[%s6805_s1 + $0x3a8] sm:$0xff]  ;;  %v4505_v55 = vcombine.low %v33_v43, %v65_v44  ;;  %v4507_v56 = vcombine.low %v34_v45, %v66_v46  ;;  %v4889_v45 = vcombine.low %v417_v28, %v449_v29 }
 0x12c   :  { %v4572_v58 = vcombine.high %v98_v53, %v130_v54 }
 0x12e   :  { %3828 = vmatpush1.bf16.msra.mxu0 %v4629_v61  ;;  %3869 = vmatpush1.bf16.msra.mxu1 %v4631_v62  ;;  %v162_v61 = vld [vmem:[%s6805_s1 + $0x4a8] sm:$0xff] }
 0x12f   :  { %3829 = vmatprep.subr.bf16.mxu0 %v4694_v63  ;;  %3870 = vmatprep.subr.bf16.mxu1 %v4696_v0  ;;  %v194_v62 = vld [vmem:[%s6805_s1 + $0x5a8] sm:$0xff]  ;;  %v4569_v63 = vcombine.low %v97_v51, %v129_v52  ;;  %v4571_v0 = vcombine.low %v98_v53, %v130_v54  ;;  %v35_v52 = vld [vmem:[%s6805_s1 + $0xb0] sm:$0xff]  ;;  %v36_v54 = vld [vmem:[%s6805_s1 + $0xb8] sm:$0xff] }
 0x130   :  { %v4636_v2 = vcombine.high %v162_v61, %v194_v62  ;;  %v67_v53 = vld [vmem:[%s6805_s1 + $0x1b0] sm:$0xff] }
 0x132   :  { %3830 = vmatpush1.bf16.msra.mxu0 %v4693_v6  ;;  %3871 = vmatpush1.bf16.msra.mxu1 %v4695_v7  ;;  %v258_v6 = vld [vmem:[%s6805_s1 + $0x7a8] sm:$0xff]  ;;  %v4633_v7 = vcombine.low %v161_v59, %v193_v60  ;;  %v99_v60 = vld [vmem:[%s6805_s1 + $0x2b0] sm:$0xff] }
 0x133   :  { %3831 = vmatprep.subr.bf16.mxu0 %v4758_v8  ;;  %3872 = vmatprep.subr.bf16.mxu1 %v4760_v9  ;;  %v4635_v8 = vcombine.low %v162_v61, %v194_v62  ;;  %v4698_v9 = vcombine.high %v225_v4, %v257_v5  ;;  %v131_v61 = vld [vmem:[%s6805_s1 + $0x3b0] sm:$0xff]  ;;  %v100_v62 = vld [vmem:[%s6805_s1 + $0x2b8] sm:$0xff] }
 0x136   :  { %3832 = vmatpush1.bf16.msra.mxu0 %v4757_v15  ;;  %3873 = vmatpush1.bf16.msra.mxu1 %v4759_v16  ;;  %v322_v15 = vld [vmem:[%s6805_s1 + $0x9a8] sm:$0xff]  ;;  %v4697_v16 = vcombine.low %v225_v4, %v257_v5  ;;  %v163_v5 = vld [vmem:[%s6805_s1 + $0x4b0] sm:$0xff] }
 0x137   :  { %3833 = vmatprep.subr.bf16.mxu0 %v4822_v17  ;;  %3874 = vmatprep.subr.bf16.mxu1 %v4824_v18  ;;  %v4762_v18 = vcombine.high %v289_v11, %v321_v13  ;;  %v4764_v19 = vcombine.high %v290_v14, %v322_v15 }
 0x138   :  { %v3283_v26 = vpop.f32.mrb[8].mxu0  ;;  %v3324_v30 = vpop.f32.mrb[8].mxu1 }
 0x139   :  { %4405 = vst [vmem:[%s6807_s2 + $0x40] sm:$0xff] %v3283_v26  ;;  %v3285_v32 = vpop.f32.mrb[9].mxu0  ;;  %4407 = vst [vmem:[%s6807_s2 + $0x50] sm:$0xff] %v3324_v30  ;;  %v3326_v34 = vpop.f32.mrb[9].mxu1  ;;  %v4826_v26 = vcombine.high %v353_v20, %v385_v21  ;;  %v418_v30 = vld [vmem:[%s6805_s1 + $0xca8] sm:$0xff] }
 0x13a   :  { %4406 = vst [vmem:[%s6807_s2 + $0x48] sm:$0xff] %v3285_v32  ;;  %v3287_v35 = vpop.f32.mrb[10].mxu0  ;;  %3834 = vmatpush1.bf16.msra.mxu0 %v4821_v23  ;;  %4408 = vst [vmem:[%s6807_s2 + $0x58] sm:$0xff] %v3326_v34  ;;  %v3328_v37 = vpop.f32.mrb[10].mxu1  ;;  %3875 = vmatpush1.bf16.msra.mxu1 %v4823_v24  ;;  %v386_v23 = vld [vmem:[%s6805_s1 + $0xba8] sm:$0xff]  ;;  %v4761_v24 = vcombine.low %v289_v11, %v321_v13  ;;  %v4890_v34 = vcombine.high %v417_v28, %v449_v29 }
 0x13b   :  { %v3288_v38 = vpop.f32.mrb[11].mxu0  ;;  %3835 = vmatprep.subr.bf16.mxu0 %v4886_v25  ;;  %v3329_v41 = vpop.f32.mrb[11].mxu1  ;;  %3876 = vmatprep.subr.bf16.mxu1 %v4888_v27  ;;  %v4763_v25 = vcombine.low %v290_v14, %v322_v15  ;;  %v4828_v27 = vcombine.high %v354_v22, %v386_v23  ;;  %v450_v32 = vld [vmem:[%s6805_s1 + $0xda8] sm:$0xff]  ;;  %v4827_v33 = vcombine.low %v354_v22, %v386_v23  ;;  %v481_v37 = vld [vmem:[%s6805_s1 + $0xea0] sm:$0xff]  ;;  %v227_v14 = vld [vmem:[%s6805_s1 + $0x6b0] sm:$0xff] }
 0x13c   :  { %v513_v38 = vld [vmem:[%s6805_s1 + $0xfa0] sm:$0xff]  ;;  %v482_v41 = vld [vmem:[%s6805_s1 + $0xea8] sm:$0xff]  ;;  %v259_v15 = vld [vmem:[%s6805_s1 + $0x7b0] sm:$0xff] }
 0x13d   :  { %v4702_v20 = vcombine.high %v227_v14, %v259_v15  ;;  %v291_v22 = vld [vmem:[%s6805_s1 + $0x8b0] sm:$0xff] }
 0x13e   :  { %3836 = vmatpush1.bf16.msra.mxu0 %v4885_v36  ;;  %3877 = vmatpush1.bf16.msra.mxu1 %v4887_v39  ;;  %v4892_v36 = vcombine.high %v418_v30, %v450_v32  ;;  %v323_v23 = vld [vmem:[%s6805_s1 + $0x9b0] sm:$0xff] }
 0x13f   :  { %3837 = vmatprep.subr.bf16.mxu0 %v4950_v40  ;;  %3878 = vmatprep.subr.bf16.mxu1 %v4952_v42  ;;  %v514_v42 = vld [vmem:[%s6805_s1 + $0xfa8] sm:$0xff]  ;;  %v4766_v28 = vcombine.high %v291_v22, %v323_v23 }
 0x140   :  { %v4956_v51 = vcombine.high %v482_v41, %v514_v42 }
 0x142   :  { %3838 = vmatpush1.bf16.msra.mxu0 %v4949_v47  ;;  %3879 = vmatpush1.bf16.msra.mxu1 %v4951_v48  ;;  %v4891_v48 = vcombine.low %v418_v30, %v450_v32  ;;  %v355_v30 = vld [vmem:[%s6805_s1 + $0xab0] sm:$0xff] }
 0x143   :  { %3905 = vmatprep.subr.bf16.mxu0 %v4506_v49  ;;  %3946 = vmatprep.subr.bf16.mxu1 %v4508_v50  ;;  %v4954_v49 = vcombine.high %v481_v37, %v513_v38  ;;  %v387_v32 = vld [vmem:[%s6805_s1 + $0xbb0] sm:$0xff] }
 0x145   :  { %3856 = vmatmul.mubr.bf16.vlgmr.msra.gmra.mrb[36].mxu0 %v5640_v31  ;;  %3897 = vmatmul.mubr.bf16.vlgmr.msra.gmra.mrb[36].mxu1 %v5640_v31  ;;  %v226_v31 = vld [vmem:[%s6805_s1 + $0x6a8] sm:$0xff] }
 0x146   :  { %3906 = vmatpush1.bf16.msra.mxu0 %v4505_v55  ;;  %3947 = vmatpush1.bf16.msra.mxu1 %v4507_v56  ;;  %v4700_v10 = vcombine.high %v226_v31, %v258_v6  ;;  %v4699_v17 = vcombine.low %v226_v31, %v258_v6  ;;  %v68_v55 = vld [vmem:[%s6805_s1 + $0x1b8] sm:$0xff]  ;;  %v4953_v56 = vcombine.low %v481_v37, %v513_v38  ;;  %v195_v31 = vld [vmem:[%s6805_s1 + $0x5b0] sm:$0xff]  ;;  %v6186_v6 = vld [vmem:[%s6806_s0] sm:$0xf] }
 0x147   :  { %3907 = vmatprep.subr.bf16.mxu0 %v4570_v57  ;;  %3948 = vmatprep.subr.bf16.mxu1 %v4572_v58  ;;  %v4955_v57 = vcombine.low %v482_v41, %v514_v42  ;;  %v4510_v58 = vcombine.high %v35_v52, %v67_v53  ;;  %v4512_v59 = vcombine.high %v36_v54, %v68_v55  ;;  %v419_v38 = vld [vmem:[%s6805_s1 + $0xcb0] sm:$0xff]  ;;  %v452_v41 = vld [vmem:[%s6805_s1 + $0xdb8] sm:$0xff] }
 0x148   :  { %3937 = vmatprep.mubr.bf16.mxu0 %v4981_v3  ;;  %3978 = vmatprep.mubr.bf16.mxu1 %v4981_v3  ;;  %v4638_v11 = vcombine.high %v163_v5, %v195_v31  ;;  %v4829_v42 = vcombine.low %v355_v30, %v387_v32 }
 0x14a   :  { %3908 = vmatpush1.bf16.msra.mxu0 %v4569_v63  ;;  %3949 = vmatpush1.bf16.msra.mxu1 %v4571_v0  ;;  %v132_v63 = vld [vmem:[%s6805_s1 + $0x3b8] sm:$0xff]  ;;  %v4509_v0 = vcombine.low %v35_v52, %v67_v53 }
 0x14b   :  { %3909 = vmatprep.subr.bf16.mxu0 %v4634_v1  ;;  %3950 = vmatprep.subr.bf16.mxu1 %v4636_v2  ;;  %v4511_v1 = vcombine.low %v36_v54, %v68_v55  ;;  %v4574_v2 = vcombine.high %v99_v60, %v131_v61  ;;  %v4576_v4 = vcombine.high %v100_v62, %v132_v63  ;;  %v516_v52 = vld [vmem:[%s6805_s1 + $0xfb8] sm:$0xff] }
 0x14e   :  { %3910 = vmatpush1.bf16.msra.mxu0 %v4633_v7  ;;  %3951 = vmatpush1.bf16.msra.mxu1 %v4635_v8  ;;  %v164_v7 = vld [vmem:[%s6805_s1 + $0x4b8] sm:$0xff] }
 0x14f   :  { %3911 = vmatprep.subr.bf16.mxu0 %v4698_v9  ;;  %3952 = vmatprep.subr.bf16.mxu1 %v4700_v10  ;;  %v196_v8 = vld [vmem:[%s6805_s1 + $0x5b8] sm:$0xff]  ;;  %v4573_v9 = vcombine.low %v99_v60, %v131_v61  ;;  %v4575_v10 = vcombine.low %v100_v62, %v132_v63  ;;  %v37_v62 = vld [vmem:[%s6805_s1 + $0xc0] sm:$0xff] }
 0x150   :  { %v4640_v13 = vcombine.high %v164_v7, %v196_v8  ;;  %v69_v63 = vld [vmem:[%s6805_s1 + $0x1c0] sm:$0xff] }
 0x152   :  { %3912 = vmatpush1.bf16.msra.mxu0 %v4697_v16  ;;  %3953 = vmatpush1.bf16.msra.mxu1 %v4699_v17  ;;  %v228_v16 = vld [vmem:[%s6805_s1 + $0x6b8] sm:$0xff] }
 0x153   :  { %3913 = vmatprep.subr.bf16.mxu0 %v4762_v18  ;;  %3954 = vmatprep.subr.bf16.mxu1 %v4764_v19  ;;  %v260_v17 = vld [vmem:[%s6805_s1 + $0x7b8] sm:$0xff]  ;;  %v4637_v18 = vcombine.low %v163_v5, %v195_v31  ;;  %v4639_v19 = vcombine.low %v164_v7, %v196_v8  ;;  %v4514_v5 = vcombine.high %v37_v62, %v69_v63  ;;  %v101_v7 = vld [vmem:[%s6805_s1 + $0x2c0] sm:$0xff] }
 0x154   :  { %v4704_v21 = vcombine.high %v228_v16, %v260_v17  ;;  %v133_v8 = vld [vmem:[%s6805_s1 + $0x3c0] sm:$0xff] }
 0x156   :  { %3914 = vmatpush1.bf16.msra.mxu0 %v4761_v24  ;;  %3955 = vmatpush1.bf16.msra.mxu1 %v4763_v25  ;;  %v292_v24 = vld [vmem:[%s6805_s1 + $0x8b8] sm:$0xff] }
 0x157   :  { %3915 = vmatprep.subr.bf16.mxu0 %v4826_v26  ;;  %3956 = vmatprep.subr.bf16.mxu1 %v4828_v27  ;;  %v324_v25 = vld [vmem:[%s6805_s1 + $0x9b8] sm:$0xff]  ;;  %v4701_v26 = vcombine.low %v227_v14, %v259_v15  ;;  %v4703_v27 = vcombine.low %v228_v16, %v260_v17  ;;  %v4578_v14 = vcombine.high %v101_v7, %v133_v8  ;;  %v165_v16 = vld [vmem:[%s6805_s1 + $0x4c0] sm:$0xff] }
 0x158   :  { %v3365_v35 = vpop.f32.mrb[12].mxu0  ;;  %v3406_v39 = vpop.f32.mrb[12].mxu1  ;;  %v4768_v29 = vcombine.high %v292_v24, %v324_v25  ;;  %v197_v17 = vld [vmem:[%s6805_s1 + $0x5c0] sm:$0xff] }
 0x159   :  { %4409 = vst [vmem:[%s6807_s2 + $0x60] sm:$0xff] %v3365_v35  ;;  %v3367_v40 = vpop.f32.mrb[13].mxu0  ;;  %4411 = vst [vmem:[%s6807_s2 + $0x70] sm:$0xff] %v3406_v39  ;;  %v3408_v43 = vpop.f32.mrb[13].mxu1  ;;  %v4767_v35 = vcombine.low %v292_v24, %v324_v25  ;;  %v451_v39 = vld [vmem:[%s6805_s1 + $0xdb0] sm:$0xff]  ;;  %v229_v24 = vld [vmem:[%s6805_s1 + $0x6c0] sm:$0xff] }
 0x15a   :  { %4410 = vst [vmem:[%s6807_s2 + $0x68] sm:$0xff] %v3367_v40  ;;  %v3369_v44 = vpop.f32.mrb[14].mxu0  ;;  %3916 = vmatpush1.bf16.msra.mxu0 %v4825_v12  ;;  %4412 = vst [vmem:[%s6807_s2 + $0x78] sm:$0xff] %v3408_v43  ;;  %v3410_v46 = vpop.f32.mrb[14].mxu1  ;;  %3957 = vmatpush1.bf16.msra.mxu1 %v4827_v33  ;;  %v356_v12 = vld [vmem:[%s6805_s1 + $0xab8] sm:$0xff]  ;;  %v4893_v55 = vcombine.low %v419_v38, %v451_v39  ;;  %v261_v25 = vld [vmem:[%s6805_s1 + $0x7c0] sm:$0xff] }
 0x15b   :  { %v3370_v47 = vpop.f32.mrb[15].mxu0  ;;  %3917 = vmatprep.subr.bf16.mxu0 %v4890_v34  ;;  %v3411_v50 = vpop.f32.mrb[15].mxu1  ;;  %3958 = vmatprep.subr.bf16.mxu1 %v4892_v36  ;;  %v388_v33 = vld [vmem:[%s6805_s1 + $0xbb8] sm:$0xff]  ;;  %v4765_v34 = vcombine.low %v291_v22, %v323_v23  ;;  %v4830_v36 = vcombine.high %v355_v30, %v387_v32  ;;  %v4894_v44 = vcombine.high %v419_v38, %v451_v39 }
 0x15c   :  { %v4832_v37 = vcombine.high %v356_v12, %v388_v33  ;;  %v420_v40 = vld [vmem:[%s6805_s1 + $0xcb8] sm:$0xff]  ;;  %v4831_v43 = vcombine.low %v356_v12, %v388_v33  ;;  %v483_v47 = vld [vmem:[%s6805_s1 + $0xeb0] sm:$0xff]  ;;  %v4642_v22 = vcombine.high %v165_v16, %v197_v17  ;;  %v4706_v30 = vcombine.high %v229_v24, %v261_v25  ;;  %v293_v12 = vld [vmem:[%s6805_s1 + $0x8c0] sm:$0xff] }
 0x15d   :  { %v4896_v46 = vcombine.high %v420_v40, %v452_v41  ;;  %v325_v33 = vld [vmem:[%s6805_s1 + $0x9c0] sm:$0xff] }
 0x15e   :  { %3918 = vmatpush1.bf16.msra.mxu0 %v4889_v45  ;;  %3959 = vmatpush1.bf16.msra.mxu1 %v4891_v48  ;;  %v515_v48 = vld [vmem:[%s6805_s1 + $0xfb0] sm:$0xff]  ;;  %v4770_v38 = vcombine.high %v293_v12, %v325_v33 }
 0x15f   :  { %3919 = vmatprep.subr.bf16.mxu0 %v4954_v49  ;;  %3960 = vmatprep.subr.bf16.mxu1 %v4956_v51  ;;  %v484_v51 = vld [vmem:[%s6805_s1 + $0xeb8] sm:$0xff] }
 0x160   :  { %v4960_v61 = vcombine.high %v484_v51, %v516_v52 }
 0x162   :  { %3920 = vmatpush1.bf16.msra.mxu0 %v4953_v56  ;;  %3961 = vmatpush1.bf16.msra.mxu1 %v4955_v57 }
 0x163   :  { %3987 = vmatprep.subr.bf16.mxu0 %v4510_v58  ;;  %4028 = vmatprep.subr.bf16.mxu1 %v4512_v59  ;;  %v4895_v58 = vcombine.low %v420_v40, %v452_v41  ;;  %v4958_v59 = vcombine.high %v483_v47, %v515_v48  ;;  %v357_v40 = vld [vmem:[%s6805_s1 + $0xac0] sm:$0xff] }
 0x164   :  { %v389_v41 = vld [vmem:[%s6805_s1 + $0xbc0] sm:$0xff] }
 0x165   :  { %3938 = vmatmul.mubr.bf16.vlgmr.msra.gmra.mrb[40].mxu0 %v6186_v6  ;;  %3979 = vmatmul.mubr.bf16.vlgmr.msra.gmra.mrb[40].mxu1 %v6186_v6 }
 0x166   :  { %3988 = vmatpush1.bf16.msra.mxu0 %v4509_v0  ;;  %4029 = vmatpush1.bf16.msra.mxu1 %v4511_v1  ;;  %v38_v0 = vld [vmem:[%s6805_s1 + $0xc8] sm:$0xff] }
 0x167   :  { %3989 = vmatprep.subr.bf16.mxu0 %v4574_v2  ;;  %4030 = vmatprep.subr.bf16.mxu1 %v4576_v4  ;;  %v70_v1 = vld [vmem:[%s6805_s1 + $0x1c8] sm:$0xff]  ;;  %v4957_v2 = vcombine.low %v483_v47, %v515_v48  ;;  %v4959_v4 = vcombine.low %v484_v51, %v516_v52  ;;  %v421_v48 = vld [vmem:[%s6805_s1 + $0xcc0] sm:$0xff]  ;;  %v4833_v52 = vcombine.low %v357_v40, %v389_v41 }
 0x168   :  { %4019 = vmatprep.mubr.bf16.mxu0 %v4981_v3  ;;  %4060 = vmatprep.mubr.bf16.mxu1 %v4981_v3  ;;  %v4516_v31 = vcombine.high %v38_v0, %v70_v1  ;;  %v454_v51 = vld [vmem:[%s6805_s1 + $0xdc8] sm:$0xff] }
 0x16a   :  { %3990 = vmatpush1.bf16.msra.mxu0 %v4573_v9  ;;  %4031 = vmatpush1.bf16.msra.mxu1 %v4575_v10  ;;  %v102_v9 = vld [vmem:[%s6805_s1 + $0x2c8] sm:$0xff] }
 0x16b   :  { %3991 = vmatprep.subr.bf16.mxu0 %v4638_v11  ;;  %4032 = vmatprep.subr.bf16.mxu1 %v4640_v13  ;;  %v134_v10 = vld [vmem:[%s6805_s1 + $0x3c8] sm:$0xff]  ;;  %v4513_v11 = vcombine.low %v37_v62, %v69_v63  ;;  %v4515_v13 = vcombine.low %v38_v0, %v70_v1 }
 0x16c   :  { %v4580_v15 = vcombine.high %v102_v9, %v134_v10  ;;  %v518_v62 = vld [vmem:[%s6805_s1 + $0xfc8] sm:$0xff] }
 0x16e   :  { %3992 = vmatpush1.bf16.msra.mxu0 %v4637_v18  ;;  %4033 = vmatpush1.bf16.msra.mxu1 %v4639_v19  ;;  %v166_v18 = vld [vmem:[%s6805_s1 + $0x4c8] sm:$0xff] }
 0x16f   :  { %3993 = vmatprep.subr.bf16.mxu0 %v4702_v20  ;;  %4034 = vmatprep.subr.bf16.mxu1 %v4704_v21  ;;  %v198_v19 = vld [vmem:[%s6805_s1 + $0x5c8] sm:$0xff]  ;;  %v4577_v20 = vcombine.low %v101_v7, %v133_v8  ;;  %v4579_v21 = vcombine.low %v102_v9, %v134_v10  ;;  %v39_v9 = vld [vmem:[%s6805_s1 + $0xd0] sm:$0xff] }
 0x170   :  { %v4644_v23 = vcombine.high %v166_v18, %v198_v19  ;;  %v71_v10 = vld [vmem:[%s6805_s1 + $0x1d0] sm:$0xff] }
 0x172   :  { %3994 = vmatpush1.bf16.msra.mxu0 %v4701_v26  ;;  %4035 = vmatpush1.bf16.msra.mxu1 %v4703_v27  ;;  %v230_v26 = vld [vmem:[%s6805_s1 + $0x6c8] sm:$0xff] }
 0x173   :  { %3995 = vmatprep.subr.bf16.mxu0 %v4766_v28  ;;  %4036 = vmatprep.subr.bf16.mxu1 %v4768_v29  ;;  %v262_v27 = vld [vmem:[%s6805_s1 + $0x7c8] sm:$0xff]  ;;  %v4641_v28 = vcombine.low %v165_v16, %v197_v17  ;;  %v4643_v29 = vcombine.low %v166_v18, %v198_v19  ;;  %v4518_v16 = vcombine.high %v39_v9, %v71_v10  ;;  %v103_v18 = vld [vmem:[%s6805_s1 + $0x2d0] sm:$0xff] }
 0x174   :  { %v4708_v32 = vcombine.high %v230_v26, %v262_v27  ;;  %v135_v19 = vld [vmem:[%s6805_s1 + $0x3d0] sm:$0xff] }
 0x176   :  { %3996 = vmatpush1.bf16.msra.mxu0 %v4765_v34  ;;  %4037 = vmatpush1.bf16.msra.mxu1 %v4767_v35  ;;  %v294_v34 = vld [vmem:[%s6805_s1 + $0x8c8] sm:$0xff] }
 0x177   :  { %3997 = vmatprep.subr.bf16.mxu0 %v4830_v36  ;;  %4038 = vmatprep.subr.bf16.mxu1 %v4832_v37  ;;  %v326_v35 = vld [vmem:[%s6805_s1 + $0x9c8] sm:$0xff]  ;;  %v4705_v36 = vcombine.low %v229_v24, %v261_v25  ;;  %v4707_v37 = vcombine.low %v230_v26, %v262_v27  ;;  %v4582_v24 = vcombine.high %v103_v18, %v135_v19  ;;  %v167_v26 = vld [vmem:[%s6805_s1 + $0x4d0] sm:$0xff] }
 0x178   :  { %v3447_v45 = vpop.f32.mrb[16].mxu0  ;;  %v3488_v49 = vpop.f32.mrb[16].mxu1  ;;  %v4772_v39 = vcombine.high %v294_v34, %v326_v35  ;;  %v199_v27 = vld [vmem:[%s6805_s1 + $0x5d0] sm:$0xff] }
 0x179   :  { %4413 = vst [vmem:[%s6807_s2 + $0x80] sm:$0xff] %v3447_v45  ;;  %v3449_v50 = vpop.f32.mrb[17].mxu0  ;;  %4415 = vst [vmem:[%s6807_s2 + $0x90] sm:$0xff] %v3488_v49  ;;  %v3490_v53 = vpop.f32.mrb[17].mxu1  ;;  %v4771_v45 = vcombine.low %v294_v34, %v326_v35  ;;  %v453_v49 = vld [vmem:[%s6805_s1 + $0xdc0] sm:$0xff]  ;;  %v231_v34 = vld [vmem:[%s6805_s1 + $0x6d0] sm:$0xff] }
 0x17a   :  { %4414 = vst [vmem:[%s6807_s2 + $0x88] sm:$0xff] %v3449_v50  ;;  %v3451_v54 = vpop.f32.mrb[18].mxu0  ;;  %3998 = vmatpush1.bf16.msra.mxu0 %v4829_v42  ;;  %4416 = vst [vmem:[%s6807_s2 + $0x98] sm:$0xff] %v3490_v53  ;;  %v3492_v56 = vpop.f32.mrb[18].mxu1  ;;  %4039 = vmatpush1.bf16.msra.mxu1 %v4831_v43  ;;  %v358_v42 = vld [vmem:[%s6805_s1 + $0xac8] sm:$0xff]  ;;  %v4897_v1 = vcombine.low %v421_v48, %v453_v49  ;;  %v263_v35 = vld [vmem:[%s6805_s1 + $0x7d0] sm:$0xff] }
 0x17b   :  { %v3452_v57 = vpop.f32.mrb[19].mxu0  ;;  %3999 = vmatprep.subr.bf16.mxu0 %v4894_v44  ;;  %v3493_v60 = vpop.f32.mrb[19].mxu1  ;;  %4040 = vmatprep.subr.bf16.mxu1 %v4896_v46  ;;  %v390_v43 = vld [vmem:[%s6805_s1 + $0xbc8] sm:$0xff]  ;;  %v4769_v44 = vcombine.low %v293_v12, %v325_v33  ;;  %v4834_v46 = vcombine.high %v357_v40, %v389_v41  ;;  %v4898_v54 = vcombine.high %v421_v48, %v453_v49 }
 0x17c   :  { %v4836_v47 = vcombine.high %v358_v42, %v390_v43  ;;  %v422_v50 = vld [vmem:[%s6805_s1 + $0xcc8] sm:$0xff]  ;;  %v4835_v53 = vcombine.low %v358_v42, %v390_v43  ;;  %v485_v57 = vld [vmem:[%s6805_s1 + $0xec0] sm:$0xff]  ;;  %v4646_v12 = vcombine.high %v167_v26, %v199_v27  ;;  %v4710_v40 = vcombine.high %v231_v34, %v263_v35  ;;  %v295_v42 = vld [vmem:[%s6805_s1 + $0x8d0] sm:$0xff] }
 0x17d   :  { %v4900_v56 = vcombine.high %v422_v50, %v454_v51  ;;  %v327_v43 = vld [vmem:[%s6805_s1 + $0x9d0] sm:$0xff] }
 0x17e   :  { %4000 = vmatpush1.bf16.msra.mxu0 %v4893_v55  ;;  %4041 = vmatpush1.bf16.msra.mxu1 %v4895_v58  ;;  %v517_v58 = vld [vmem:[%s6805_s1 + $0xfc0] sm:$0xff]  ;;  %v4774_v48 = vcombine.high %v295_v42, %v327_v43 }
 0x17f   :  { %4001 = vmatprep.subr.bf16.mxu0 %v4958_v59  ;;  %4042 = vmatprep.subr.bf16.mxu1 %v4960_v61  ;;  %v486_v61 = vld [vmem:[%s6805_s1 + $0xec8] sm:$0xff] }
 0x180   :  { %v4964_v8 = vcombine.high %v486_v61, %v518_v62 }
 0x182   :  { %4002 = vmatpush1.bf16.msra.mxu0 %v4957_v2  ;;  %4043 = vmatpush1.bf16.msra.mxu1 %v4959_v4 }
 0x183   :  { %4069 = vmatprep.subr.bf16.mxu0 %v4514_v5  ;;  %4110 = vmatprep.subr.bf16.mxu1 %v4516_v31  ;;  %v4899_v5 = vcombine.low %v422_v50, %v454_v51  ;;  %v4962_v31 = vcombine.high %v485_v57, %v517_v58  ;;  %v359_v50 = vld [vmem:[%s6805_s1 + $0xad0] sm:$0xff] }
 0x184   :  { %v391_v51 = vld [vmem:[%s6805_s1 + $0xbd0] sm:$0xff] }
 0x185   :  { %4020 = vmatmul.mubr.bf16.vlgmr.msra.gmra.mrb[44].mxu0 %v6186_v6  ;;  %4061 = vmatmul.mubr.bf16.vlgmr.msra.gmra.mrb[44].mxu1 %v6186_v6 }
 0x186   :  { %4070 = vmatpush1.bf16.msra.mxu0 %v4513_v11  ;;  %4111 = vmatpush1.bf16.msra.mxu1 %v4515_v13  ;;  %v40_v11 = vld [vmem:[%s6805_s1 + $0xd8] sm:$0xff] }
 0x187   :  { %4071 = vmatprep.subr.bf16.mxu0 %v4578_v14  ;;  %4112 = vmatprep.subr.bf16.mxu1 %v4580_v15  ;;  %v72_v13 = vld [vmem:[%s6805_s1 + $0x1d8] sm:$0xff]  ;;  %v4961_v14 = vcombine.low %v485_v57, %v517_v58  ;;  %v4963_v15 = vcombine.low %v486_v61, %v518_v62  ;;  %v423_v58 = vld [vmem:[%s6805_s1 + $0xcd0] sm:$0xff]  ;;  %v4837_v62 = vcombine.low %v359_v50, %v391_v51 }
 0x188   :  { %4101 = vmatprep.mubr.bf16.mxu0 %v4981_v3  ;;  %4142 = vmatprep.mubr.bf16.mxu1 %v4981_v3  ;;  %v4520_v17 = vcombine.high %v40_v11, %v72_v13  ;;  %v456_v61 = vld [vmem:[%s6805_s1 + $0xdd8] sm:$0xff] }
 0x18a   :  { %4072 = vmatpush1.bf16.msra.mxu0 %v4577_v20  ;;  %4113 = vmatpush1.bf16.msra.mxu1 %v4579_v21  ;;  %v104_v20 = vld [vmem:[%s6805_s1 + $0x2d8] sm:$0xff] }
 0x18b   :  { %4073 = vmatprep.subr.bf16.mxu0 %v4642_v22  ;;  %4114 = vmatprep.subr.bf16.mxu1 %v4644_v23  ;;  %v136_v21 = vld [vmem:[%s6805_s1 + $0x3d8] sm:$0xff]  ;;  %v4517_v22 = vcombine.low %v39_v9, %v71_v10  ;;  %v4519_v23 = vcombine.low %v40_v11, %v72_v13 }
 0x18c   :  { %v4584_v25 = vcombine.high %v104_v20, %v136_v21  ;;  %v520_v9 = vld [vmem:[%s6805_s1 + $0xfd8] sm:$0xff] }
 0x18e   :  { %4074 = vmatpush1.bf16.msra.mxu0 %v4641_v28  ;;  %4115 = vmatpush1.bf16.msra.mxu1 %v4643_v29  ;;  %v168_v28 = vld [vmem:[%s6805_s1 + $0x4d8] sm:$0xff] }
 0x18f   :  { %4075 = vmatprep.subr.bf16.mxu0 %v4706_v30  ;;  %4116 = vmatprep.subr.bf16.mxu1 %v4708_v32  ;;  %v200_v29 = vld [vmem:[%s6805_s1 + $0x5d8] sm:$0xff]  ;;  %v4581_v30 = vcombine.low %v103_v18, %v135_v19  ;;  %v4583_v32 = vcombine.low %v104_v20, %v136_v21  ;;  %v41_v20 = vld [vmem:[%s6805_s1 + $0xe0] sm:$0xff] }
 0x190   :  { %v4648_v33 = vcombine.high %v168_v28, %v200_v29  ;;  %v73_v21 = vld [vmem:[%s6805_s1 + $0x1e0] sm:$0xff] }
 0x192   :  { %4076 = vmatpush1.bf16.msra.mxu0 %v4705_v36  ;;  %4117 = vmatpush1.bf16.msra.mxu1 %v4707_v37  ;;  %v232_v36 = vld [vmem:[%s6805_s1 + $0x6d8] sm:$0xff] }
 0x193   :  { %4077 = vmatprep.subr.bf16.mxu0 %v4770_v38  ;;  %4118 = vmatprep.subr.bf16.mxu1 %v4772_v39  ;;  %v264_v37 = vld [vmem:[%s6805_s1 + $0x7d8] sm:$0xff]  ;;  %v4645_v38 = vcombine.low %v167_v26, %v199_v27  ;;  %v4647_v39 = vcombine.low %v168_v28, %v200_v29  ;;  %v4522_v26 = vcombine.high %v41_v20, %v73_v21  ;;  %v105_v28 = vld [vmem:[%s6805_s1 + $0x2e0] sm:$0xff] }
 0x194   :  { %v4712_v41 = vcombine.high %v232_v36, %v264_v37  ;;  %v137_v29 = vld [vmem:[%s6805_s1 + $0x3e0] sm:$0xff] }
 0x196   :  { %4078 = vmatpush1.bf16.msra.mxu0 %v4769_v44  ;;  %4119 = vmatpush1.bf16.msra.mxu1 %v4771_v45  ;;  %v296_v44 = vld [vmem:[%s6805_s1 + $0x8d8] sm:$0xff] }
 0x197   :  { %4079 = vmatprep.subr.bf16.mxu0 %v4834_v46  ;;  %4120 = vmatprep.subr.bf16.mxu1 %v4836_v47  ;;  %v328_v45 = vld [vmem:[%s6805_s1 + $0x9d8] sm:$0xff]  ;;  %v4709_v46 = vcombine.low %v231_v34, %v263_v35  ;;  %v4711_v47 = vcombine.low %v232_v36, %v264_v37  ;;  %v4586_v34 = vcombine.high %v105_v28, %v137_v29  ;;  %v169_v36 = vld [vmem:[%s6805_s1 + $0x4e0] sm:$0xff] }
 0x198   :  { %v3529_v55 = vpop.f32.mrb[20].mxu0  ;;  %v3570_v59 = vpop.f32.mrb[20].mxu1  ;;  %v4776_v49 = vcombine.high %v296_v44, %v328_v45  ;;  %v201_v37 = vld [vmem:[%s6805_s1 + $0x5e0] sm:$0xff] }
 0x199   :  { %4417 = vst [vmem:[%s6807_s2 + $0xa0] sm:$0xff] %v3529_v55  ;;  %v3531_v60 = vpop.f32.mrb[21].mxu0  ;;  %4419 = vst [vmem:[%s6807_s2 + $0xb0] sm:$0xff] %v3570_v59  ;;  %v3572_v63 = vpop.f32.mrb[21].mxu1  ;;  %v4775_v55 = vcombine.low %v296_v44, %v328_v45  ;;  %v455_v59 = vld [vmem:[%s6805_s1 + $0xdd0] sm:$0xff]  ;;  %v233_v44 = vld [vmem:[%s6805_s1 + $0x6e0] sm:$0xff] }
 0x19a   :  { %4418 = vst [vmem:[%s6807_s2 + $0xa8] sm:$0xff] %v3531_v60  ;;  %v3533_v0 = vpop.f32.mrb[22].mxu0  ;;  %4080 = vmatpush1.bf16.msra.mxu0 %v4833_v52  ;;  %4420 = vst [vmem:[%s6807_s2 + $0xb8] sm:$0xff] %v3572_v63  ;;  %v3574_v2 = vpop.f32.mrb[22].mxu1  ;;  %4121 = vmatpush1.bf16.msra.mxu1 %v4835_v53  ;;  %v360_v52 = vld [vmem:[%s6805_s1 + $0xad8] sm:$0xff]  ;;  %v4901_v13 = vcombine.low %v423_v58, %v455_v59  ;;  %v265_v45 = vld [vmem:[%s6805_s1 + $0x7e0] sm:$0xff] }
 0x19b   :  { %v3534_v4 = vpop.f32.mrb[23].mxu0  ;;  %4081 = vmatprep.subr.bf16.mxu0 %v4898_v54  ;;  %v3575_v7 = vpop.f32.mrb[23].mxu1  ;;  %4122 = vmatprep.subr.bf16.mxu1 %v4900_v56  ;;  %v392_v53 = vld [vmem:[%s6805_s1 + $0xbd8] sm:$0xff]  ;;  %v4773_v54 = vcombine.low %v295_v42, %v327_v43  ;;  %v4838_v56 = vcombine.high %v359_v50, %v391_v51  ;;  %v4902_v0 = vcombine.high %v423_v58, %v455_v59 }
 0x19c   :  { %v4840_v57 = vcombine.high %v360_v52, %v392_v53  ;;  %v424_v60 = vld [vmem:[%s6805_s1 + $0xcd8] sm:$0xff]  ;;  %v4839_v63 = vcombine.low %v360_v52, %v392_v53  ;;  %v487_v4 = vld [vmem:[%s6805_s1 + $0xed0] sm:$0xff]  ;;  %v4650_v42 = vcombine.high %v169_v36, %v201_v37  ;;  %v4714_v50 = vcombine.high %v233_v44, %v265_v45  ;;  %v297_v52 = vld [vmem:[%s6805_s1 + $0x8e0] sm:$0xff] }
 0x19d   :  { %v4904_v2 = vcombine.high %v424_v60, %v456_v61  ;;  %v329_v53 = vld [vmem:[%s6805_s1 + $0x9e0] sm:$0xff] }
 0x19e   :  { %4082 = vmatpush1.bf16.msra.mxu0 %v4897_v1  ;;  %4123 = vmatpush1.bf16.msra.mxu1 %v4899_v5  ;;  %v519_v5 = vld [vmem:[%s6805_s1 + $0xfd0] sm:$0xff]  ;;  %v4778_v58 = vcombine.high %v297_v52, %v329_v53 }
 0x19f   :  { %4083 = vmatprep.subr.bf16.mxu0 %v4962_v31  ;;  %4124 = vmatprep.subr.bf16.mxu1 %v4964_v8  ;;  %v488_v8 = vld [vmem:[%s6805_s1 + $0xed8] sm:$0xff] }
 0x1a0   :  { %v4968_v19 = vcombine.high %v488_v8, %v520_v9 }
 0x1a2   :  { %4084 = vmatpush1.bf16.msra.mxu0 %v4961_v14  ;;  %4125 = vmatpush1.bf16.msra.mxu1 %v4963_v15 }
 0x1a3   :  { %4151 = vmatprep.subr.bf16.mxu0 %v4518_v16  ;;  %4192 = vmatprep.subr.bf16.mxu1 %v4520_v17  ;;  %v4903_v16 = vcombine.low %v424_v60, %v456_v61  ;;  %v4966_v17 = vcombine.high %v487_v4, %v519_v5  ;;  %v361_v60 = vld [vmem:[%s6805_s1 + $0xae0] sm:$0xff] }
 0x1a4   :  { %v393_v61 = vld [vmem:[%s6805_s1 + $0xbe0] sm:$0xff] }
 0x1a5   :  { %4102 = vmatmul.mubr.bf16.vlgmr.msra.gmra.mrb[48].mxu0 %v6186_v6  ;;  %4143 = vmatmul.mubr.bf16.vlgmr.msra.gmra.mrb[48].mxu1 %v6186_v6 }
 0x1a6   :  { %4152 = vmatpush1.bf16.msra.mxu0 %v4517_v22  ;;  %4193 = vmatpush1.bf16.msra.mxu1 %v4519_v23  ;;  %v42_v22 = vld [vmem:[%s6805_s1 + $0xe8] sm:$0xff] }
 0x1a7   :  { %4153 = vmatprep.subr.bf16.mxu0 %v4582_v24  ;;  %4194 = vmatprep.subr.bf16.mxu1 %v4584_v25  ;;  %v74_v23 = vld [vmem:[%s6805_s1 + $0x1e8] sm:$0xff]  ;;  %v4965_v24 = vcombine.low %v487_v4, %v519_v5  ;;  %v4967_v25 = vcombine.low %v488_v8, %v520_v9  ;;  %v425_v5 = vld [vmem:[%s6805_s1 + $0xce0] sm:$0xff]  ;;  %v4841_v9 = vcombine.low %v361_v60, %v393_v61 }
 0x1a8   :  { %4183 = vmatprep.mubr.bf16.mxu0 %v4981_v3  ;;  %4224 = vmatprep.mubr.bf16.mxu1 %v4981_v3  ;;  %v4524_v27 = vcombine.high %v42_v22, %v74_v23  ;;  %v458_v8 = vld [vmem:[%s6805_s1 + $0xde8] sm:$0xff] }
 0x1aa   :  { %4154 = vmatpush1.bf16.msra.mxu0 %v4581_v30  ;;  %4195 = vmatpush1.bf16.msra.mxu1 %v4583_v32  ;;  %v106_v30 = vld [vmem:[%s6805_s1 + $0x2e8] sm:$0xff] }
 0x1ab   :  { %4155 = vmatprep.subr.bf16.mxu0 %v4646_v12  ;;  %4196 = vmatprep.subr.bf16.mxu1 %v4648_v33  ;;  %v138_v32 = vld [vmem:[%s6805_s1 + $0x3e8] sm:$0xff]  ;;  %v4521_v12 = vcombine.low %v41_v20, %v73_v21  ;;  %v4523_v33 = vcombine.low %v42_v22, %v74_v23 }
 0x1ac   :  { %v4588_v35 = vcombine.high %v106_v30, %v138_v32  ;;  %v522_v20 = vld [vmem:[%s6805_s1 + $0xfe8] sm:$0xff] }
 0x1ae   :  { %4156 = vmatpush1.bf16.msra.mxu0 %v4645_v38  ;;  %4197 = vmatpush1.bf16.msra.mxu1 %v4647_v39  ;;  %v170_v38 = vld [vmem:[%s6805_s1 + $0x4e8] sm:$0xff] }
 0x1af   :  { %4157 = vmatprep.subr.bf16.mxu0 %v4710_v40  ;;  %4198 = vmatprep.subr.bf16.mxu1 %v4712_v41  ;;  %v202_v39 = vld [vmem:[%s6805_s1 + $0x5e8] sm:$0xff]  ;;  %v4585_v40 = vcombine.low %v105_v28, %v137_v29  ;;  %v4587_v41 = vcombine.low %v106_v30, %v138_v32  ;;  %v43_v30 = vld [vmem:[%s6805_s1 + $0xf0] sm:$0xff] }
 0x1b0   :  { %v4652_v43 = vcombine.high %v170_v38, %v202_v39  ;;  %v75_v32 = vld [vmem:[%s6805_s1 + $0x1f0] sm:$0xff] }
 0x1b2   :  { %4158 = vmatpush1.bf16.msra.mxu0 %v4709_v46  ;;  %4199 = vmatpush1.bf16.msra.mxu1 %v4711_v47  ;;  %v234_v46 = vld [vmem:[%s6805_s1 + $0x6e8] sm:$0xff] }
 0x1b3   :  { %4159 = vmatprep.subr.bf16.mxu0 %v4774_v48  ;;  %4200 = vmatprep.subr.bf16.mxu1 %v4776_v49  ;;  %v266_v47 = vld [vmem:[%s6805_s1 + $0x7e8] sm:$0xff]  ;;  %v4649_v48 = vcombine.low %v169_v36, %v201_v37  ;;  %v4651_v49 = vcombine.low %v170_v38, %v202_v39  ;;  %v4526_v36 = vcombine.high %v43_v30, %v75_v32  ;;  %v107_v38 = vld [vmem:[%s6805_s1 + $0x2f0] sm:$0xff] }
 0x1b4   :  { %v4716_v51 = vcombine.high %v234_v46, %v266_v47  ;;  %v139_v39 = vld [vmem:[%s6805_s1 + $0x3f0] sm:$0xff] }
 0x1b6   :  { %4160 = vmatpush1.bf16.msra.mxu0 %v4773_v54  ;;  %4201 = vmatpush1.bf16.msra.mxu1 %v4775_v55  ;;  %v298_v54 = vld [vmem:[%s6805_s1 + $0x8e8] sm:$0xff] }
 0x1b7   :  { %4161 = vmatprep.subr.bf16.mxu0 %v4838_v56  ;;  %4202 = vmatprep.subr.bf16.mxu1 %v4840_v57  ;;  %v330_v55 = vld [vmem:[%s6805_s1 + $0x9e8] sm:$0xff]  ;;  %v4713_v56 = vcombine.low %v233_v44, %v265_v45  ;;  %v4715_v57 = vcombine.low %v234_v46, %v266_v47  ;;  %v4590_v44 = vcombine.high %v107_v38, %v139_v39  ;;  %v171_v46 = vld [vmem:[%s6805_s1 + $0x4f0] sm:$0xff] }
 0x1b8   :  { %v3611_v1 = vpop.f32.mrb[24].mxu0  ;;  %v3652_v31 = vpop.f32.mrb[24].mxu1  ;;  %v4780_v59 = vcombine.high %v298_v54, %v330_v55  ;;  %v203_v47 = vld [vmem:[%s6805_s1 + $0x5f0] sm:$0xff] }
 0x1b9   :  { %4421 = vst [vmem:[%s6807_s2 + $0xc0] sm:$0xff] %v3611_v1  ;;  %v3613_v7 = vpop.f32.mrb[25].mxu0  ;;  %4423 = vst [vmem:[%s6807_s2 + $0xd0] sm:$0xff] %v3652_v31  ;;  %v3654_v10 = vpop.f32.mrb[25].mxu1  ;;  %v4779_v1 = vcombine.low %v298_v54, %v330_v55  ;;  %v457_v31 = vld [vmem:[%s6805_s1 + $0xde0] sm:$0xff]  ;;  %v235_v54 = vld [vmem:[%s6805_s1 + $0x6f0] sm:$0xff] }
 0x1ba   :  { %4422 = vst [vmem:[%s6807_s2 + $0xc8] sm:$0xff] %v3613_v7  ;;  %v3615_v11 = vpop.f32.mrb[26].mxu0  ;;  %4162 = vmatpush1.bf16.msra.mxu0 %v4837_v62  ;;  %4424 = vst [vmem:[%s6807_s2 + $0xd8] sm:$0xff] %v3654_v10  ;;  %v3656_v14 = vpop.f32.mrb[26].mxu1  ;;  %4203 = vmatpush1.bf16.msra.mxu1 %v4839_v63  ;;  %v362_v62 = vld [vmem:[%s6805_s1 + $0xae8] sm:$0xff]  ;;  %v4905_v23 = vcombine.low %v425_v5, %v457_v31  ;;  %v267_v55 = vld [vmem:[%s6805_s1 + $0x7f0] sm:$0xff] }
 0x1bb   :  { %v3616_v15 = vpop.f32.mrb[27].mxu0  ;;  %4163 = vmatprep.subr.bf16.mxu0 %v4902_v0  ;;  %v3657_v18 = vpop.f32.mrb[27].mxu1  ;;  %4204 = vmatprep.subr.bf16.mxu1 %v4904_v2  ;;  %v394_v63 = vld [vmem:[%s6805_s1 + $0xbe8] sm:$0xff]  ;;  %v4777_v0 = vcombine.low %v297_v52, %v329_v53  ;;  %v4842_v2 = vcombine.high %v361_v60, %v393_v61  ;;  %v4906_v11 = vcombine.high %v425_v5, %v457_v31  ;;  %v299_v61 = vld [vmem:[%s6805_s1 + $0x8f0] sm:$0xff] }
 0x1bc   :  { %v4844_v4 = vcombine.high %v362_v62, %v394_v63  ;;  %v426_v7 = vld [vmem:[%s6805_s1 + $0xce8] sm:$0xff]  ;;  %v4843_v10 = vcombine.low %v362_v62, %v394_v63  ;;  %v489_v15 = vld [vmem:[%s6805_s1 + $0xee0] sm:$0xff]  ;;  %v4654_v52 = vcombine.high %v171_v46, %v203_v47  ;;  %v331_v62 = vld [vmem:[%s6805_s1 + $0x9f0] sm:$0xff] }
 0x1bd   :  { %v4908_v14 = vcombine.high %v426_v7, %v458_v8  ;;  %v332_v63 = vld [vmem:[%s6805_s1 + $0x9f8] sm:$0xff]  ;;  %v363_v5 = vld [vmem:[%s6805_s1 + $0xaf0] sm:$0xff] }
 0x1be   :  { %4164 = vmatpush1.bf16.msra.mxu0 %v4901_v13  ;;  %4205 = vmatpush1.bf16.msra.mxu1 %v4903_v16  ;;  %v521_v16 = vld [vmem:[%s6805_s1 + $0xfe0] sm:$0xff]  ;;  %v395_v31 = vld [vmem:[%s6805_s1 + $0xbf0] sm:$0xff] }
 0x1bf   :  { %4165 = vmatprep.subr.bf16.mxu0 %v4966_v17  ;;  %4206 = vmatprep.subr.bf16.mxu1 %v4968_v19  ;;  %v490_v19 = vld [vmem:[%s6805_s1 + $0xee8] sm:$0xff] }
 0x1c0   :  { %v4972_v29 = vcombine.high %v490_v19, %v522_v20 }
 0x1c2   :  { %4166 = vmatpush1.bf16.msra.mxu0 %v4965_v24  ;;  %4207 = vmatpush1.bf16.msra.mxu1 %v4967_v25 }
 0x1c3   :  { %4233 = vmatprep.subr.bf16.mxu0 %v4522_v26  ;;  %4274 = vmatprep.subr.bf16.mxu1 %v4524_v27  ;;  %v4907_v26 = vcombine.low %v426_v7, %v458_v8  ;;  %v4970_v27 = vcombine.high %v489_v15, %v521_v16  ;;  %v364_v7 = vld [vmem:[%s6805_s1 + $0xaf8] sm:$0xff] }
 0x1c4   :  { %v396_v8 = vld [vmem:[%s6805_s1 + $0xbf8] sm:$0xff] }
 0x1c5   :  { %4184 = vmatmul.mubr.bf16.vlgmr.msra.gmra.mrb[52].mxu0 %v6186_v6  ;;  %4225 = vmatmul.mubr.bf16.vlgmr.msra.gmra.mrb[52].mxu1 %v6186_v6 }
 0x1c6   :  { %4234 = vmatpush1.bf16.msra.mxu0 %v4521_v12  ;;  %4275 = vmatpush1.bf16.msra.mxu1 %v4523_v33  ;;  %v44_v12 = vld [vmem:[%s6805_s1 + $0xf8] sm:$0xff] }
 0x1c7   :  { %4235 = vmatprep.subr.bf16.mxu0 %v4586_v34  ;;  %4276 = vmatprep.subr.bf16.mxu1 %v4588_v35  ;;  %v76_v33 = vld [vmem:[%s6805_s1 + $0x1f8] sm:$0xff]  ;;  %v4969_v34 = vcombine.low %v489_v15, %v521_v16  ;;  %v4971_v35 = vcombine.low %v490_v19, %v522_v20  ;;  %v459_v15 = vld [vmem:[%s6805_s1 + $0xdf0] sm:$0xff]  ;;  %v4847_v19 = vcombine.low %v364_v7, %v396_v8 }
 0x1c8   :  { %4265 = vmatprep.mubr.bf16.mxu0 %v4981_v3  ;;  %4306 = vmatprep.mubr.bf16.mxu1 %v4981_v3  ;;  %v4528_v37 = vcombine.high %v44_v12, %v76_v33  ;;  %v428_v16 = vld [vmem:[%s6805_s1 + $0xcf8] sm:$0xff] }
 0x1ca   :  { %4236 = vmatpush1.bf16.msra.mxu0 %v4585_v40  ;;  %4277 = vmatpush1.bf16.msra.mxu1 %v4587_v41  ;;  %v108_v40 = vld [vmem:[%s6805_s1 + $0x2f8] sm:$0xff] }
 0x1cb   :  { %4237 = vmatprep.subr.bf16.mxu0 %v4650_v42  ;;  %4278 = vmatprep.subr.bf16.mxu1 %v4652_v43  ;;  %v140_v41 = vld [vmem:[%s6805_s1 + $0x3f8] sm:$0xff]  ;;  %v4525_v42 = vcombine.low %v43_v30, %v75_v32  ;;  %v4527_v43 = vcombine.low %v44_v12, %v76_v33 }
 0x1cc   :  { %v4592_v45 = vcombine.high %v108_v40, %v140_v41 }
 0x1ce   :  { %4238 = vmatpush1.bf16.msra.mxu0 %v4649_v48  ;;  %4279 = vmatpush1.bf16.msra.mxu1 %v4651_v49  ;;  %v172_v48 = vld [vmem:[%s6805_s1 + $0x4f8] sm:$0xff] }
 0x1cf   :  { %4239 = vmatprep.subr.bf16.mxu0 %v4714_v50  ;;  %4280 = vmatprep.subr.bf16.mxu1 %v4716_v51  ;;  %v204_v49 = vld [vmem:[%s6805_s1 + $0x5f8] sm:$0xff]  ;;  %v4589_v50 = vcombine.low %v107_v38, %v139_v39  ;;  %v4591_v51 = vcombine.low %v108_v40, %v140_v41  ;;  %v4980_v40 = vld [vmem:[%s6806_s0] sm:$0xf] }
 0x1d0   :  { %v4656_v53 = vcombine.high %v172_v48, %v204_v49 }
 0x1d2   :  { %4240 = vmatpush1.bf16.msra.mxu0 %v4713_v56  ;;  %4281 = vmatpush1.bf16.msra.mxu1 %v4715_v57  ;;  %v268_v56 = vld [vmem:[%s6805_s1 + $0x7f8] sm:$0xff]  ;;  %v4653_v57 = vcombine.low %v171_v46, %v203_v47 }
 0x1d3   :  { %4241 = vmatprep.subr.bf16.mxu0 %v4778_v58  ;;  %4282 = vmatprep.subr.bf16.mxu1 %v4780_v59  ;;  %v4655_v58 = vcombine.low %v172_v48, %v204_v49  ;;  %v4718_v59 = vcombine.high %v235_v54, %v267_v55 }
 0x1d6   :  { %4242 = vmatpush1.bf16.msra.mxu0 %v4777_v0  ;;  %4283 = vmatpush1.bf16.msra.mxu1 %v4779_v1  ;;  %v4717_v0 = vcombine.low %v235_v54, %v267_v55 }
 0x1d7   :  { %4243 = vmatprep.subr.bf16.mxu0 %v4842_v2  ;;  %4284 = vmatprep.subr.bf16.mxu1 %v4844_v4  ;;  %v4782_v2 = vcombine.high %v299_v61, %v331_v62 }
 0x1d8   :  { %v3693_v13 = vpop.f32.mrb[28].mxu0  ;;  %v3734_v17 = vpop.f32.mrb[28].mxu1 }
 0x1d9   :  { %4425 = vst [vmem:[%s6807_s2 + $0xe0] sm:$0xff] %v3693_v13  ;;  %v3695_v18 = vpop.f32.mrb[29].mxu0  ;;  %4427 = vst [vmem:[%s6807_s2 + $0xf0] sm:$0xff] %v3734_v17  ;;  %v3736_v21 = vpop.f32.mrb[29].mxu1  ;;  %v4848_v13 = vcombine.high %v364_v7, %v396_v8  ;;  %v460_v17 = vld [vmem:[%s6805_s1 + $0xdf8] sm:$0xff] }
 0x1da   :  { %4426 = vst [vmem:[%s6807_s2 + $0xe8] sm:$0xff] %v3695_v18  ;;  %v3697_v22 = vpop.f32.mrb[30].mxu0  ;;  %4244 = vmatpush1.bf16.msra.mxu0 %v4841_v9  ;;  %4428 = vst [vmem:[%s6807_s2 + $0xf8] sm:$0xff] %v3736_v21  ;;  %v3738_v24 = vpop.f32.mrb[30].mxu1  ;;  %4285 = vmatpush1.bf16.msra.mxu1 %v4843_v10  ;;  %v4781_v9 = vcombine.low %v299_v61, %v331_v62  ;;  %v4845_v18 = vcombine.low %v363_v5, %v395_v31 }
 0x1db   :  { %v3698_v25 = vpop.f32.mrb[31].mxu0  ;;  %4245 = vmatprep.subr.bf16.mxu0 %v4906_v11  ;;  %v3739_v28 = vpop.f32.mrb[31].mxu1  ;;  %4286 = vmatprep.subr.bf16.mxu1 %v4908_v14  ;;  %v4846_v11 = vcombine.high %v363_v5, %v395_v31  ;;  %v427_v14 = vld [vmem:[%s6805_s1 + $0xcf0] sm:$0xff]  ;;  %v4912_v22 = vcombine.high %v428_v16, %v460_v17 }
 0x1dc   :  { %v4910_v20 = vcombine.high %v427_v14, %v459_v15  ;;  %v523_v24 = vld [vmem:[%s6805_s1 + $0xff0] sm:$0xff]  ;;  %v524_v28 = vld [vmem:[%s6805_s1 + $0xff8] sm:$0xff]  ;;  %v4909_v32 = vcombine.low %v427_v14, %v459_v15 }
 0x1de   :  { %4246 = vmatpush1.bf16.msra.mxu0 %v4905_v23  ;;  %4287 = vmatpush1.bf16.msra.mxu1 %v4907_v26  ;;  %v491_v23 = vld [vmem:[%s6805_s1 + $0xef0] sm:$0xff] }
 0x1df   :  { %4247 = vmatprep.subr.bf16.mxu0 %v4970_v27  ;;  %4288 = vmatprep.subr.bf16.mxu1 %v4972_v29  ;;  %v492_v27 = vld [vmem:[%s6805_s1 + $0xef8] sm:$0xff]  ;;  %v4973_v38 = vcombine.low %v491_v23, %v523_v24 }
 0x1e0   :  { %v4975_v39 = vcombine.low %v492_v27, %v524_v28 }
 0x1e2   :  { %4248 = vmatpush1.bf16.msra.mxu0 %v4969_v34  ;;  %4289 = vmatpush1.bf16.msra.mxu1 %v4971_v35  ;;  %v4911_v34 = vcombine.low %v428_v16, %v460_v17  ;;  %v4974_v35 = vcombine.high %v491_v23, %v523_v24 }
 0x1e3   :  { %4315 = vmatprep.subr.bf16.mxu0 %v4526_v36  ;;  %4356 = vmatprep.subr.bf16.mxu1 %v4528_v37  ;;  %v4976_v37 = vcombine.high %v492_v27, %v524_v28 }
 0x1e5   :  { %4266 = vmatmul.mubr.bf16.vlgmr.msra.gmra.mrb[56].mxu0 %v6186_v6  ;;  %4307 = vmatmul.mubr.bf16.vlgmr.msra.gmra.mrb[56].mxu1 %v6186_v6  ;;  %v236_v6 = vld [vmem:[%s6805_s1 + $0x6f8] sm:$0xff] }
 0x1e6   :  { %4316 = vmatpush1.bf16.msra.mxu0 %v4525_v42  ;;  %4357 = vmatpush1.bf16.msra.mxu1 %v4527_v43  ;;  %v4720_v60 = vcombine.high %v236_v6, %v268_v56  ;;  %v4719_v1 = vcombine.low %v236_v6, %v268_v56 }
 0x1e7   :  { %4317 = vmatprep.subr.bf16.mxu0 %v4590_v44  ;;  %4358 = vmatprep.subr.bf16.mxu1 %v4592_v45 }
 0x1e8   :  { %4347 = vmatprep.mubr.bf16.mxu0 %v4981_v3  ;;  %4388 = vmatprep.mubr.bf16.mxu1 %v4981_v3  ;;  %v300_v3 = vld [vmem:[%s6805_s1 + $0x8f8] sm:$0xff] }
 0x1e9   :  { %v4784_v4 = vcombine.high %v300_v3, %v332_v63  ;;  %v4783_v10 = vcombine.low %v300_v3, %v332_v63 }
 0x1ea   :  { %4318 = vmatpush1.bf16.msra.mxu0 %v4589_v50  ;;  %4359 = vmatpush1.bf16.msra.mxu1 %v4591_v51 }
 0x1eb   :  { %4319 = vmatprep.subr.bf16.mxu0 %v4654_v52  ;;  %4360 = vmatprep.subr.bf16.mxu1 %v4656_v53 }
 0x1ee   :  { %4320 = vmatpush1.bf16.msra.mxu0 %v4653_v57  ;;  %4361 = vmatpush1.bf16.msra.mxu1 %v4655_v58 }
 0x1ef   :  { %4321 = vmatprep.subr.bf16.mxu0 %v4718_v59  ;;  %4362 = vmatprep.subr.bf16.mxu1 %v4720_v60 }
 0x1f2   :  { %4322 = vmatpush1.bf16.msra.mxu0 %v4717_v0  ;;  %4363 = vmatpush1.bf16.msra.mxu1 %v4719_v1 }
 0x1f3   :  { %4323 = vmatprep.subr.bf16.mxu0 %v4782_v2  ;;  %4364 = vmatprep.subr.bf16.mxu1 %v4784_v4 }
 0x1f6   :  { %4324 = vmatpush1.bf16.msra.mxu0 %v4781_v9  ;;  %4365 = vmatpush1.bf16.msra.mxu1 %v4783_v10 }
 0x1f7   :  { %4325 = vmatprep.subr.bf16.mxu0 %v4846_v11  ;;  %4366 = vmatprep.subr.bf16.mxu1 %v4848_v13 }
 0x1f8   :  { %v3775_v21 = vpop.f32.mrb[32].mxu0  ;;  %v3816_v25 = vpop.f32.mrb[32].mxu1 }
 0x1f9   :  { %4429 = vst [vmem:[%s6807_s2 + $0x100] sm:$0xff] %v3775_v21  ;;  %v3777_v26 = vpop.f32.mrb[33].mxu0  ;;  %4431 = vst [vmem:[%s6807_s2 + $0x110] sm:$0xff] %v3816_v25  ;;  %v3818_v29 = vpop.f32.mrb[33].mxu1 }
 0x1fa   :  { %4430 = vst [vmem:[%s6807_s2 + $0x108] sm:$0xff] %v3777_v26  ;;  %v3779_v30 = vpop.f32.mrb[34].mxu0  ;;  %4326 = vmatpush1.bf16.msra.mxu0 %v4845_v18  ;;  %4432 = vst [vmem:[%s6807_s2 + $0x118] sm:$0xff] %v3818_v29  ;;  %v3820_v12 = vpop.f32.mrb[34].mxu1  ;;  %4367 = vmatpush1.bf16.msra.mxu1 %v4847_v19 }
 0x1fb   :  { %v3780_v33 = vpop.f32.mrb[35].mxu0  ;;  %4327 = vmatprep.subr.bf16.mxu0 %v4910_v20  ;;  %v3821_v36 = vpop.f32.mrb[35].mxu1  ;;  %4368 = vmatprep.subr.bf16.mxu1 %v4912_v22 }
 0x1fe   :  { %4328 = vmatpush1.bf16.msra.mxu0 %v4909_v32  ;;  %4369 = vmatpush1.bf16.msra.mxu1 %v4911_v34 }
 0x1ff   :  { %4329 = vmatprep.subr.bf16.mxu0 %v4974_v35  ;;  %4370 = vmatprep.subr.bf16.mxu1 %v4976_v37 }
 0x202   :  { %4330 = vmatpush1.bf16.msra.mxu0 %v4973_v38  ;;  %4371 = vmatpush1.bf16.msra.mxu1 %v4975_v39 }
 0x205   :  { %4348 = vmatmul.mubr.bf16.vlgmr.msra.gmra.mrb[60].mxu0 %v4980_v40  ;;  %4389 = vmatmul.mubr.bf16.vlgmr.msra.gmra.mrb[60].mxu1 %v4980_v40 }
 0x218   :  { %v3857_v41 = vpop.f32.mrb[36].mxu0  ;;  %v3898_v42 = vpop.f32.mrb[36].mxu1 }
 0x219   :  { %4433 = vst [vmem:[%s6807_s2 + $0x120] sm:$0xff] %v3857_v41  ;;  %v3859_v43 = vpop.f32.mrb[37].mxu0  ;;  %4435 = vst [vmem:[%s6807_s2 + $0x130] sm:$0xff] %v3898_v42  ;;  %v3900_v44 = vpop.f32.mrb[37].mxu1 }
 0x21a   :  { %4434 = vst [vmem:[%s6807_s2 + $0x128] sm:$0xff] %v3859_v43  ;;  %v3861_v45 = vpop.f32.mrb[38].mxu0  ;;  %4436 = vst [vmem:[%s6807_s2 + $0x138] sm:$0xff] %v3900_v44  ;;  %v3902_v46 = vpop.f32.mrb[38].mxu1 }
 0x21b   :  { %v3862_v47 = vpop.f32.mrb[39].mxu0  ;;  %v3903_v48 = vpop.f32.mrb[39].mxu1 }
 0x238   :  { %v3939_v49 = vpop.f32.mrb[40].mxu0  ;;  %v3980_v50 = vpop.f32.mrb[40].mxu1 }
 0x239   :  { %4437 = vst [vmem:[%s6807_s2 + $0x140] sm:$0xff] %v3939_v49  ;;  %v3941_v51 = vpop.f32.mrb[41].mxu0  ;;  %4439 = vst [vmem:[%s6807_s2 + $0x150] sm:$0xff] %v3980_v50  ;;  %v3982_v52 = vpop.f32.mrb[41].mxu1 }
 0x23a   :  { %4438 = vst [vmem:[%s6807_s2 + $0x148] sm:$0xff] %v3941_v51  ;;  %v3943_v53 = vpop.f32.mrb[42].mxu0  ;;  %4440 = vst [vmem:[%s6807_s2 + $0x158] sm:$0xff] %v3982_v52  ;;  %v3984_v54 = vpop.f32.mrb[42].mxu1 }
 0x23b   :  { %v3944_v55 = vpop.f32.mrb[43].mxu0  ;;  %v3985_v6 = vpop.f32.mrb[43].mxu1 }
 0x258   :  { %v4021_v56 = vpop.f32.mrb[44].mxu0  ;;  %v4062_v57 = vpop.f32.mrb[44].mxu1 }
 0x259   :  { %4441 = vst [vmem:[%s6807_s2 + $0x160] sm:$0xff] %v4021_v56  ;;  %v4023_v58 = vpop.f32.mrb[45].mxu0  ;;  %4443 = vst [vmem:[%s6807_s2 + $0x170] sm:$0xff] %v4062_v57  ;;  %v4064_v59 = vpop.f32.mrb[45].mxu1 }
 0x25a   :  { %4442 = vst [vmem:[%s6807_s2 + $0x168] sm:$0xff] %v4023_v58  ;;  %v4025_v60 = vpop.f32.mrb[46].mxu0  ;;  %4444 = vst [vmem:[%s6807_s2 + $0x178] sm:$0xff] %v4064_v59  ;;  %v4066_v61 = vpop.f32.mrb[46].mxu1 }
 0x25b   :  { %v4026_v62 = vpop.f32.mrb[47].mxu0  ;;  %v4067_v3 = vpop.f32.mrb[47].mxu1 }
 0x278   :  { %v4103_v63 = vpop.f32.mrb[48].mxu0  ;;  %v4144_v0 = vpop.f32.mrb[48].mxu1 }
 0x279   :  { %4445 = vst [vmem:[%s6807_s2 + $0x180] sm:$0xff] %v4103_v63  ;;  %v4105_v1 = vpop.f32.mrb[49].mxu0  ;;  %4447 = vst [vmem:[%s6807_s2 + $0x190] sm:$0xff] %v4144_v0  ;;  %v4146_v2 = vpop.f32.mrb[49].mxu1 }
 0x27a   :  { %4446 = vst [vmem:[%s6807_s2 + $0x188] sm:$0xff] %v4105_v1  ;;  %v4107_v4 = vpop.f32.mrb[50].mxu0  ;;  %4448 = vst [vmem:[%s6807_s2 + $0x198] sm:$0xff] %v4146_v2  ;;  %v4148_v5 = vpop.f32.mrb[50].mxu1 }
 0x27b   :  { %v4108_v31 = vpop.f32.mrb[51].mxu0  ;;  %v4149_v7 = vpop.f32.mrb[51].mxu1 }
 0x298   :  { %v4185_v8 = vpop.f32.mrb[52].mxu0  ;;  %v4226_v9 = vpop.f32.mrb[52].mxu1 }
 0x299   :  { %4449 = vst [vmem:[%s6807_s2 + $0x1a0] sm:$0xff] %v4185_v8  ;;  %v4187_v10 = vpop.f32.mrb[53].mxu0  ;;  %4451 = vst [vmem:[%s6807_s2 + $0x1b0] sm:$0xff] %v4226_v9  ;;  %v4228_v11 = vpop.f32.mrb[53].mxu1 }
 0x29a   :  { %4450 = vst [vmem:[%s6807_s2 + $0x1a8] sm:$0xff] %v4187_v10  ;;  %v4189_v13 = vpop.f32.mrb[54].mxu0  ;;  %4452 = vst [vmem:[%s6807_s2 + $0x1b8] sm:$0xff] %v4228_v11  ;;  %v4230_v14 = vpop.f32.mrb[54].mxu1 }
 0x29b   :  { %v4190_v15 = vpop.f32.mrb[55].mxu0  ;;  %v4231_v16 = vpop.f32.mrb[55].mxu1 }
 0x2b8   :  { %v4267_v17 = vpop.f32.mrb[56].mxu0  ;;  %v4308_v18 = vpop.f32.mrb[56].mxu1 }
 0x2b9   :  { %4453 = vst [vmem:[%s6807_s2 + $0x1c0] sm:$0xff] %v4267_v17  ;;  %v4269_v19 = vpop.f32.mrb[57].mxu0  ;;  %4455 = vst [vmem:[%s6807_s2 + $0x1d0] sm:$0xff] %v4308_v18  ;;  %v4310_v20 = vpop.f32.mrb[57].mxu1 }
 0x2ba   :  { %4454 = vst [vmem:[%s6807_s2 + $0x1c8] sm:$0xff] %v4269_v19  ;;  %v4271_v21 = vpop.f32.mrb[58].mxu0  ;;  %4456 = vst [vmem:[%s6807_s2 + $0x1d8] sm:$0xff] %v4310_v20  ;;  %v4312_v22 = vpop.f32.mrb[58].mxu1 }
 0x2bb   :  { %v4272_v23 = vpop.f32.mrb[59].mxu0  ;;  %v4313_v24 = vpop.f32.mrb[59].mxu1 }
 0x2d8   :  { %v4349_v25 = vpop.f32.mrb[60].mxu0  ;;  %v4390_v26 = vpop.f32.mrb[60].mxu1 }
 0x2d9   :  { %4457 = vst [vmem:[%s6807_s2 + $0x1e0] sm:$0xff] %v4349_v25  ;;  %v4351_v27 = vpop.f32.mrb[61].mxu0  ;;  %4459 = vst [vmem:[%s6807_s2 + $0x1f0] sm:$0xff] %v4390_v26  ;;  %v4392_v28 = vpop.f32.mrb[61].mxu1 }
 0x2da   :  { %4458 = vst [vmem:[%s6807_s2 + $0x1e8] sm:$0xff] %v4351_v27  ;;  %v4353_v29 = vpop.f32.mrb[62].mxu0  ;;  %4460 = vst [vmem:[%s6807_s2 + $0x1f8] sm:$0xff] %v4392_v28  ;;  %v4394_v30 = vpop.f32.mrb[62].mxu1 }
 0x2db   :  { %v4354_v32 = vpop.f32.mrb[63].mxu0  ;;  %v4395_v12 = vpop.f32.mrb[63].mxu1 }

// kernel: generator_forward.11
= control target key start
LH: loop header
LB: loop body
LE: loop exit
PB: predicated region body
PF: predicated region fallthrough
CT: control target
= control target key end

     0   :  { %s3283_s9 = smov 0   ;;  %s3285_s10 = smov 0   ;;  %s3674_s0 = inlined_call_operand.vmem [shape: bf16[4,32,2048], index: 0, kind: input, shape index: {}]   ;;  %s3675_s1 = inlined_call_operand.vmem [shape: bf16[4,2048,256], index: 1, kind: input, shape index: {}]   ;;  %s3676_s2 = inlined_call_operand.vmem [shape: f32[4,32,256], index: 2, kind: output, shape index: {}]  }
   0x1   :  { %s3287_s11 = smov 0  }
   0x2 LB: > { %s24_s12 = sadd.s32 1, %s3262_s10  ;;  %p2480_p0 = scmp.ge.s32.totalorder %s3266_s11, 1  ;;  %s3266_s11 = sphi %s3287_s11, %s12_s11   ;;  %s3262_s10 = sphi %s3285_s10, %s3678_s10   ;;  %s3258_s9 = sphi %s3283_s9, %s3677_s9  }
   0x3   : > { %p26_p1 = scmp.ge.s32.totalorder %s24_s12, 4  ;;  %p144_p2 = scmp.lt.s32.totalorder %s3266_s11, 5 }
   0x5   : > { %s3680_s12 = smov (%p26_p1, %s24_s12), 0  ;;  %p145_p3 = pnand %p2480_p0, %p144_p2 }
   0x6   : > { %p182_p4 = scmp.lt.s32.totalorder (!%p145_p3), %s3258_s9, 3 }
   0x7   : > { %148 = sbr.rel (%p145_p3) target bundleno = 501 (0x1f5), region = 28 }
   0xe   : > { %s3682_s9 = smov (!%p182_p4, %s3258_s9), 3 }
   0xf   : > { %s2778_s13 = sshll.u32 %s3682_s9, 11  ;;  %s2777_s17 = sshll.u32 %s3682_s9, 8 }
  0x10   : > { %s3307_s16 = scalar_lea.vmem %s3675_s1, %s2778_s13  ;;  %s3357_s20 = scalar_lea.vmem %s3674_s0, %s2777_s17 }
  0x11   : > { %v2860_v0 = vld [vmem:[%s3307_s16 + $0x4] ss:$8 sps:$4 sm:$0xff]   ;;  %v2864_v2 = vld [vmem:[%s3307_s16] ss:$8 sps:$4 sm:$0xff]   ;;  %v2866_v4 = vld [vmem:[%s3307_s16 + $0x14] ss:$8 sps:$4 sm:$0xff]  }
  0x12   : > { %v2862_v1 = vld [vmem:[%s3307_s16 + $0x404] ss:$8 sps:$4 sm:$0xff]   ;;  %1936 = vmatprep.subr.bf16.mxu1 %v2860_v0  ;;  %v2865_v3 = vld [vmem:[%s3307_s16 + $0x400] ss:$8 sps:$4 sm:$0xff]   ;;  %v2868_v5 = vld [vmem:[%s3307_s16 + $0x414] ss:$8 sps:$4 sm:$0xff]  }
  0x13   : > { %2148 = vmatprep.subr.bf16.mxu0 %v2862_v1  ;;  %1937 = vmatpush1.bf16.msra.mxu1 %v2864_v2  ;;  %v2870_v6 = vld [vmem:[%s3307_s16 + $0x10] ss:$8 sps:$4 sm:$0xff]   ;;  %v2872_v8 = vld [vmem:[%s3307_s16 + $0x24] ss:$8 sps:$4 sm:$0xff]   ;;  %v2876_v10 = vld [vmem:[%s3307_s16 + $0x20] ss:$8 sps:$4 sm:$0xff]  }
  0x14   : > { %2149 = vmatpush1.bf16.msra.mxu0 %v2865_v3  ;;  %1938 = vmatprep.subr.bf16.mxu1 %v2866_v4  ;;  %v2871_v7 = vld [vmem:[%s3307_s16 + $0x410] ss:$8 sps:$4 sm:$0xff]   ;;  %v2874_v9 = vld [vmem:[%s3307_s16 + $0x424] ss:$8 sps:$4 sm:$0xff]   ;;  %v2877_v11 = vld [vmem:[%s3307_s16 + $0x420] ss:$8 sps:$4 sm:$0xff]  }
  0x15   : > { %2150 = vmatprep.subr.bf16.mxu0 %v2868_v5  ;;  %v2878_v12 = vld [vmem:[%s3307_s16 + $0x34] ss:$8 sps:$4 sm:$0xff]   ;;  %v2882_v14 = vld [vmem:[%s3307_s16 + $0x30] ss:$8 sps:$4 sm:$0xff]   ;;  %v2884_v16 = vld [vmem:[%s3307_s16 + $0x44] ss:$8 sps:$4 sm:$0xff]  }
  0x16   : > { %v2880_v13 = vld [vmem:[%s3307_s16 + $0x434] ss:$8 sps:$4 sm:$0xff]   ;;  %v2883_v15 = vld [vmem:[%s3307_s16 + $0x430] ss:$8 sps:$4 sm:$0xff]   ;;  %v2886_v17 = vld [vmem:[%s3307_s16 + $0x444] ss:$8 sps:$4 sm:$0xff]  }
  0x17   : > { %1939 = vmatpush1.bf16.msra.mxu1 %v2870_v6  ;;  %v2888_v18 = vld [vmem:[%s3307_s16 + $0x40] ss:$8 sps:$4 sm:$0xff]   ;;  %v2890_v20 = vld [vmem:[%s3307_s16 + $0x54] ss:$8 sps:$4 sm:$0xff]   ;;  %v2894_v22 = vld [vmem:[%s3307_s16 + $0x50] ss:$8 sps:$4 sm:$0xff]  }
  0x18   : > { %2151 = vmatpush1.bf16.msra.mxu0 %v2871_v7  ;;  %1940 = vmatprep.subr.bf16.mxu1 %v2872_v8  ;;  %v2889_v19 = vld [vmem:[%s3307_s16 + $0x440] ss:$8 sps:$4 sm:$0xff]   ;;  %v2892_v21 = vld [vmem:[%s3307_s16 + $0x454] ss:$8 sps:$4 sm:$0xff]   ;;  %v2895_v23 = vld [vmem:[%s3307_s16 + $0x450] ss:$8 sps:$4 sm:$0xff]  }
  0x19   : > { %2152 = vmatprep.subr.bf16.mxu0 %v2874_v9  ;;  %v2896_v24 = vld [vmem:[%s3307_s16 + $0x64] ss:$8 sps:$4 sm:$0xff]   ;;  %v2900_v26 = vld [vmem:[%s3307_s16 + $0x60] ss:$8 sps:$4 sm:$0xff]   ;;  %v2902_v28 = vld [vmem:[%s3307_s16 + $0x74] ss:$8 sps:$4 sm:$0xff]  }
  0x1a   : > { %v2898_v25 = vld [vmem:[%s3307_s16 + $0x464] ss:$8 sps:$4 sm:$0xff]   ;;  %v2901_v27 = vld [vmem:[%s3307_s16 + $0x460] ss:$8 sps:$4 sm:$0xff]   ;;  %v2904_v29 = vld [vmem:[%s3307_s16 + $0x474] ss:$8 sps:$4 sm:$0xff]  }
  0x1b   : > { %1941 = vmatpush1.bf16.msra.mxu1 %v2876_v10  ;;  %v2906_v30 = vld [vmem:[%s3307_s16 + $0x70] ss:$8 sps:$4 sm:$0xff]   ;;  %v2908_v32 = vld [vmem:[%s3307_s16 + $0x84] ss:$8 sps:$4 sm:$0xff]   ;;  %v2912_v34 = vld [vmem:[%s3307_s16 + $0x80] ss:$8 sps:$4 sm:$0xff]  }
  0x1c   : > { %2153 = vmatpush1.bf16.msra.mxu0 %v2877_v11  ;;  %1942 = vmatprep.subr.bf16.mxu1 %v2878_v12  ;;  %v2907_v31 = vld [vmem:[%s3307_s16 + $0x470] ss:$8 sps:$4 sm:$0xff]   ;;  %v2910_v33 = vld [vmem:[%s3307_s16 + $0x484] ss:$8 sps:$4 sm:$0xff]   ;;  %v2913_v35 = vld [vmem:[%s3307_s16 + $0x480] ss:$8 sps:$4 sm:$0xff]  }
  0x1d   : > { %2154 = vmatprep.subr.bf16.mxu0 %v2880_v13  ;;  %v2914_v36 = vld [vmem:[%s3307_s16 + $0x94] ss:$8 sps:$4 sm:$0xff]   ;;  %v2918_v38 = vld [vmem:[%s3307_s16 + $0x90] ss:$8 sps:$4 sm:$0xff]   ;;  %v2920_v40 = vld [vmem:[%s3307_s16 + $0xa4] ss:$8 sps:$4 sm:$0xff]  }
  0x1e   : > { %v2916_v37 = vld [vmem:[%s3307_s16 + $0x494] ss:$8 sps:$4 sm:$0xff]   ;;  %v2919_v39 = vld [vmem:[%s3307_s16 + $0x490] ss:$8 sps:$4 sm:$0xff]   ;;  %v2922_v41 = vld [vmem:[%s3307_s16 + $0x4a4] ss:$8 sps:$4 sm:$0xff]  }
  0x1f   : > { %1943 = vmatpush1.bf16.msra.mxu1 %v2882_v14  ;;  %v2924_v42 = vld [vmem:[%s3307_s16 + $0xa0] ss:$8 sps:$4 sm:$0xff]   ;;  %v2926_v44 = vld [vmem:[%s3307_s16 + $0xb4] ss:$8 sps:$4 sm:$0xff]   ;;  %v2930_v46 = vld [vmem:[%s3307_s16 + $0xb0] ss:$8 sps:$4 sm:$0xff]  }
  0x20   : > { %2155 = vmatpush1.bf16.msra.mxu0 %v2883_v15  ;;  %1944 = vmatprep.subr.bf16.mxu1 %v2884_v16  ;;  %v2925_v43 = vld [vmem:[%s3307_s16 + $0x4a0] ss:$8 sps:$4 sm:$0xff]   ;;  %v2928_v45 = vld [vmem:[%s3307_s16 + $0x4b4] ss:$8 sps:$4 sm:$0xff]   ;;  %v2931_v47 = vld [vmem:[%s3307_s16 + $0x4b0] ss:$8 sps:$4 sm:$0xff]  }
  0x21   : > { %2156 = vmatprep.subr.bf16.mxu0 %v2886_v17  ;;  %v208_v48 = vld [vmem:[%s3357_s20] sm:$0xff]  ;;  %v2938_v58 = vld [vmem:[%s3307_s16 + $0xd4] ss:$8 sps:$4 sm:$0xff]   ;;  %v2942_v60 = vld [vmem:[%s3307_s16 + $0xd0] ss:$8 sps:$4 sm:$0xff]   ;;  %s2779_s21 = sshll.u32 %s3682_s9, 6 }
  0x22   : > { %v216_v49 = vld [vmem:[%s3357_s20 + $0x40] sm:$0xff]  ;;  %v2940_v59 = vld [vmem:[%s3307_s16 + $0x4d4] ss:$8 sps:$4 sm:$0xff]   ;;  %v2943_v61 = vld [vmem:[%s3307_s16 + $0x4d0] ss:$8 sps:$4 sm:$0xff]   ;;  %s3655_s24 = scalar_lea.vmem %s3676_s2, %s2779_s21 }
  0x23   : > { %1945 = vmatpush1.bf16.msra.mxu1 %v2888_v18  ;;  %v2932_v50 = vld [vmem:[%s3307_s16 + $0xc4] ss:$8 sps:$4 sm:$0xff]   ;;  %v2488_v52 = vcombine.high %v208_v48, %v216_v49  ;;  %v2936_v56 = vld [vmem:[%s3307_s16 + $0xc0] ss:$8 sps:$4 sm:$0xff]   ;;  %v2950_v2 = vld [vmem:[%s3307_s16 + $0xf4] ss:$8 sps:$4 sm:$0xff]   ;;  %v2487_v8 = vcombine.low %v208_v48, %v216_v49 }
  0x24   : > { %2157 = vmatpush1.bf16.msra.mxu0 %v2889_v19  ;;  %1946 = vmatprep.subr.bf16.mxu1 %v2890_v20  ;;  %v2934_v51 = vld [vmem:[%s3307_s16 + $0x4c4] ss:$8 sps:$4 sm:$0xff]   ;;  %v2937_v57 = vld [vmem:[%s3307_s16 + $0x4c0] ss:$8 sps:$4 sm:$0xff]   ;;  %v2952_v3 = vld [vmem:[%s3307_s16 + $0x4f4] ss:$8 sps:$4 sm:$0xff]  }
  0x25   : > { %2158 = vmatprep.subr.bf16.mxu0 %v2892_v21  ;;  %v212_v53 = vld [vmem:[%s3357_s20 + $0x20] sm:$0xff]  ;;  %1968 = vmatprep.mubr.bf16.mxu1 %v2488_v52  ;;  %v2954_v4 = vld [vmem:[%s3307_s16 + $0xf0] ss:$8 sps:$4 sm:$0xff]   ;;  %v2964_v12 = vld [vmem:[%s3307_s16 + $0x114] ss:$8 sps:$4 sm:$0xff]  }
  0x26   : > { %v220_v54 = vld [vmem:[%s3357_s20 + $0x60] sm:$0xff]  ;;  %v2955_v5 = vld [vmem:[%s3307_s16 + $0x4f0] ss:$8 sps:$4 sm:$0xff]   ;;  %v2967_v13 = vld [vmem:[%s3307_s16 + $0x514] ss:$8 sps:$4 sm:$0xff]  }
  0x27   : > { %1947 = vmatpush1.bf16.msra.mxu1 %v2894_v22  ;;  %v2496_v55 = vcombine.high %v212_v53, %v220_v54  ;;  %v2944_v62 = vld [vmem:[%s3307_s16 + $0xe4] ss:$8 sps:$4 sm:$0xff]   ;;  %v2948_v0 = vld [vmem:[%s3307_s16 + $0xe0] ss:$8 sps:$4 sm:$0xff]   ;;  %v2495_v10 = vcombine.low %v212_v53, %v220_v54  ;;  %v2962_v14 = vld [vmem:[%s3307_s16 + $0x110] ss:$8 sps:$4 sm:$0xff]  }
  0x28   : > { %2159 = vmatpush1.bf16.msra.mxu0 %v2895_v23  ;;  %1948 = vmatprep.subr.bf16.mxu1 %v2896_v24  ;;  %v2946_v63 = vld [vmem:[%s3307_s16 + $0x4e4] ss:$8 sps:$4 sm:$0xff]   ;;  %v2949_v1 = vld [vmem:[%s3307_s16 + $0x4e0] ss:$8 sps:$4 sm:$0xff]   ;;  %v2965_v15 = vld [vmem:[%s3307_s16 + $0x510] ss:$8 sps:$4 sm:$0xff]  }
  0x29   : > { %2160 = vmatprep.subr.bf16.mxu0 %v2898_v25  ;;  %2180 = vmatprep.mubr.bf16.mxu0 %v2496_v55  ;;  %v2958_v6 = vld [vmem:[%s3307_s16 + $0x104] ss:$8 sps:$4 sm:$0xff]   ;;  %v2956_v9 = vld [vmem:[%s3307_s16 + $0x100] ss:$8 sps:$4 sm:$0xff]   ;;  %v2976_v20 = vld [vmem:[%s3307_s16 + $0x134] ss:$8 sps:$4 sm:$0xff]  }
  0x2a   : > { %v2961_v7 = vld [vmem:[%s3307_s16 + $0x504] ss:$8 sps:$4 sm:$0xff]   ;;  %v2959_v11 = vld [vmem:[%s3307_s16 + $0x500] ss:$8 sps:$4 sm:$0xff]   ;;  %v2979_v21 = vld [vmem:[%s3307_s16 + $0x534] ss:$8 sps:$4 sm:$0xff]  }
  0x2b   : > { %1949 = vmatpush1.bf16.msra.mxu1 %v2900_v26  ;;  %v2970_v16 = vld [vmem:[%s3307_s16 + $0x124] ss:$8 sps:$4 sm:$0xff]   ;;  %v2968_v18 = vld [vmem:[%s3307_s16 + $0x120] ss:$8 sps:$4 sm:$0xff]   ;;  %v2974_v22 = vld [vmem:[%s3307_s16 + $0x130] ss:$8 sps:$4 sm:$0xff]  }
  0x2c   : > { %2161 = vmatpush1.bf16.msra.mxu0 %v2901_v27  ;;  %1950 = vmatprep.subr.bf16.mxu1 %v2902_v28  ;;  %v2973_v17 = vld [vmem:[%s3307_s16 + $0x524] ss:$8 sps:$4 sm:$0xff]   ;;  %v2971_v19 = vld [vmem:[%s3307_s16 + $0x520] ss:$8 sps:$4 sm:$0xff]   ;;  %v2977_v23 = vld [vmem:[%s3307_s16 + $0x530] ss:$8 sps:$4 sm:$0xff]  }
  0x2d   : > { %2162 = vmatprep.subr.bf16.mxu0 %v2904_v29  ;;  %v2982_v24 = vld [vmem:[%s3307_s16 + $0x144] ss:$8 sps:$4 sm:$0xff]   ;;  %v2980_v26 = vld [vmem:[%s3307_s16 + $0x140] ss:$8 sps:$4 sm:$0xff]   ;;  %v2988_v28 = vld [vmem:[%s3307_s16 + $0x154] ss:$8 sps:$4 sm:$0xff]  }
  0x2e   : > { %v2985_v25 = vld [vmem:[%s3307_s16 + $0x544] ss:$8 sps:$4 sm:$0xff]   ;;  %v2983_v27 = vld [vmem:[%s3307_s16 + $0x540] ss:$8 sps:$4 sm:$0xff]   ;;  %v2991_v29 = vld [vmem:[%s3307_s16 + $0x554] ss:$8 sps:$4 sm:$0xff]  }
  0x2f   : > { %1951 = vmatpush1.bf16.msra.mxu1 %v2906_v30  ;;  %v224_v30 = vld [vmem:[%s3357_s20 + $0x80] sm:$0xff]  ;;  %v3426_v49 = vld [vmem:[%s3357_s20 + $0x28] sm:$0xff]  ;;  %v3001_v52 = vld [vmem:[%s3307_s16 + $0x570] ss:$8 sps:$4 sm:$0xff]  }
  0x30   : > { %2163 = vmatpush1.bf16.msra.mxu0 %v2907_v31  ;;  %1952 = vmatprep.subr.bf16.mxu1 %v2908_v32  ;;  %v232_v31 = vld [vmem:[%s3357_s20 + $0xc0] sm:$0xff]  ;;  %v2986_v32 = vld [vmem:[%s3307_s16 + $0x150] ss:$8 sps:$4 sm:$0xff]  }
  0x31   : > { %2164 = vmatprep.subr.bf16.mxu0 %v2910_v33  ;;  %v2504_v33 = vcombine.high %v224_v30, %v232_v31  ;;  %v3006_v54 = vld [vmem:[%s3307_s16 + $0x184] ss:$8 sps:$4 sm:$0xff]  }
  0x32   : > { %v3009_v55 = vld [vmem:[%s3307_s16 + $0x584] ss:$8 sps:$4 sm:$0xff]  }
  0x33   : > { %1953 = vmatpush1.bf16.msra.mxu1 %v2912_v34  ;;  %v2989_v34 = vld [vmem:[%s3307_s16 + $0x550] ss:$8 sps:$4 sm:$0xff]  }
  0x34   : > { %2165 = vmatpush1.bf16.msra.mxu0 %v2913_v35  ;;  %1954 = vmatprep.subr.bf16.mxu1 %v2914_v36  ;;  %v228_v35 = vld [vmem:[%s3357_s20 + $0xa0] sm:$0xff] }
  0x35   : > { %2166 = vmatprep.subr.bf16.mxu0 %v2916_v37  ;;  %v236_v36 = vld [vmem:[%s3357_s20 + $0xe0] sm:$0xff]  ;;  %v2503_v37 = vcombine.low %v224_v30, %v232_v31  ;;  %v3060_v30 = vld [vmem:[%s3307_s16 + $0x214] ss:$8 sps:$4 sm:$0xff]  }
  0x36   : > { %v3063_v31 = vld [vmem:[%s3307_s16 + $0x614] ss:$8 sps:$4 sm:$0xff]  }
  0x37   : > { %1955 = vmatpush1.bf16.msra.mxu1 %v2918_v38  ;;  %v2994_v38 = vld [vmem:[%s3307_s16 + $0x164] ss:$8 sps:$4 sm:$0xff]  }
  0x38   : > { %2167 = vmatpush1.bf16.msra.mxu0 %v2919_v39  ;;  %1956 = vmatprep.subr.bf16.mxu1 %v2920_v40  ;;  %v2512_v39 = vcombine.high %v228_v35, %v236_v36  ;;  %v2511_v40 = vcombine.low %v228_v35, %v236_v36  ;;  %v3058_v36 = vld [vmem:[%s3307_s16 + $0x210] ss:$8 sps:$4 sm:$0xff]  }
  0x39   : > { %2168 = vmatprep.subr.bf16.mxu0 %v2922_v41  ;;  %v2997_v41 = vld [vmem:[%s3307_s16 + $0x564] ss:$8 sps:$4 sm:$0xff]  }
  0x3b   : > { %1957 = vmatpush1.bf16.msra.mxu1 %v2924_v42  ;;  %v2992_v42 = vld [vmem:[%s3307_s16 + $0x160] ss:$8 sps:$4 sm:$0xff]  }
  0x3c   : > { %2169 = vmatpush1.bf16.msra.mxu0 %v2925_v43  ;;  %1958 = vmatprep.subr.bf16.mxu1 %v2926_v44  ;;  %v2995_v43 = vld [vmem:[%s3307_s16 + $0x560] ss:$8 sps:$4 sm:$0xff]  }
  0x3d   : > { %2170 = vmatprep.subr.bf16.mxu0 %v2928_v45  ;;  %v3416_v44 = vld [vmem:[%s3357_s20 + $0x8] sm:$0xff] }
  0x3e   : > { %v3419_v45 = vld [vmem:[%s3357_s20 + $0x48] sm:$0xff] }
  0x3f   : > { %1959 = vmatpush1.bf16.msra.mxu1 %v2930_v46  ;;  %v3000_v46 = vld [vmem:[%s3307_s16 + $0x174] ss:$8 sps:$4 sm:$0xff]   ;;  %v2490_v48 = vcombine.high %v3416_v44, %v3419_v45 }
  0x40   : > { %2171 = vmatpush1.bf16.msra.mxu0 %v2931_v47  ;;  %1960 = vmatprep.subr.bf16.mxu1 %v2932_v50  ;;  %v3003_v47 = vld [vmem:[%s3307_s16 + $0x574] ss:$8 sps:$4 sm:$0xff]   ;;  %v3429_v50 = vld [vmem:[%s3357_s20 + $0x68] sm:$0xff] }
  0x41   : > { %2172 = vmatprep.subr.bf16.mxu0 %v2934_v51  ;;  %v2998_v51 = vld [vmem:[%s3307_s16 + $0x170] ss:$8 sps:$4 sm:$0xff]   ;;  %v2498_v53 = vcombine.high %v3426_v49, %v3429_v50 }
  0x43   : > { %1961 = vmatpush1.bf16.msra.mxu1 %v2936_v56  ;;  %v3004_v56 = vld [vmem:[%s3307_s16 + $0x180] ss:$8 sps:$4 sm:$0xff]  }
  0x44   : > { %2173 = vmatpush1.bf16.msra.mxu0 %v2937_v57  ;;  %1962 = vmatprep.subr.bf16.mxu1 %v2938_v58  ;;  %v3007_v57 = vld [vmem:[%s3307_s16 + $0x580] ss:$8 sps:$4 sm:$0xff]   ;;  %v3012_v58 = vld [vmem:[%s3307_s16 + $0x194] ss:$8 sps:$4 sm:$0xff]  }
  0x45   : > { %2174 = vmatprep.subr.bf16.mxu0 %v2940_v59  ;;  %v3015_v59 = vld [vmem:[%s3307_s16 + $0x594] ss:$8 sps:$4 sm:$0xff]  }
  0x47   : > { %1963 = vmatpush1.bf16.msra.mxu1 %v2942_v60  ;;  %v3010_v60 = vld [vmem:[%s3307_s16 + $0x190] ss:$8 sps:$4 sm:$0xff]  }
  0x48   : > { %2175 = vmatpush1.bf16.msra.mxu0 %v2943_v61  ;;  %1964 = vmatprep.subr.bf16.mxu1 %v2944_v62  ;;  %v3013_v61 = vld [vmem:[%s3307_s16 + $0x590] ss:$8 sps:$4 sm:$0xff]   ;;  %v3018_v62 = vld [vmem:[%s3307_s16 + $0x1a4] ss:$8 sps:$4 sm:$0xff]  }
  0x49   : > { %2176 = vmatprep.subr.bf16.mxu0 %v2946_v63  ;;  %v3021_v63 = vld [vmem:[%s3307_s16 + $0x5a4] ss:$8 sps:$4 sm:$0xff]  }
  0x4b   : > { %1965 = vmatpush1.bf16.msra.mxu1 %v2948_v0  ;;  %v3016_v0 = vld [vmem:[%s3307_s16 + $0x1a0] ss:$8 sps:$4 sm:$0xff]  }
  0x4c   : > { %2177 = vmatpush1.bf16.msra.mxu0 %v2949_v1  ;;  %1966 = vmatprep.subr.bf16.mxu1 %v2950_v2  ;;  %v3019_v1 = vld [vmem:[%s3307_s16 + $0x5a0] ss:$8 sps:$4 sm:$0xff]   ;;  %v3024_v2 = vld [vmem:[%s3307_s16 + $0x1b4] ss:$8 sps:$4 sm:$0xff]  }
  0x4d   : > { %2178 = vmatprep.subr.bf16.mxu0 %v2952_v3  ;;  %v3027_v3 = vld [vmem:[%s3307_s16 + $0x5b4] ss:$8 sps:$4 sm:$0xff]  }
  0x4f   : > { %1967 = vmatpush1.bf16.msra.mxu1 %v2954_v4  ;;  %v3022_v4 = vld [vmem:[%s3307_s16 + $0x1b0] ss:$8 sps:$4 sm:$0xff]  }
  0x50   : > { %2179 = vmatpush1.bf16.msra.mxu0 %v2955_v5  ;;  %1989 = vmatprep.subr.bf16.mxu1 %v2958_v6  ;;  %v3025_v5 = vld [vmem:[%s3307_s16 + $0x5b0] ss:$8 sps:$4 sm:$0xff]   ;;  %v3030_v6 = vld [vmem:[%s3307_s16 + $0x1c4] ss:$8 sps:$4 sm:$0xff]  }
  0x51   : > { %2201 = vmatprep.subr.bf16.mxu0 %v2961_v7  ;;  %v3033_v7 = vld [vmem:[%s3307_s16 + $0x5c4] ss:$8 sps:$4 sm:$0xff]  }
  0x52   : > { %1969 = vmatmul.mubr.bf16.vlgmr.msra.gmra.mrb[0].mxu1 %v2487_v8  ;;  %v3028_v8 = vld [vmem:[%s3307_s16 + $0x1c0] ss:$8 sps:$4 sm:$0xff]  }
  0x53   : > { %2181 = vmatmul.mubr.bf16.vlgmr.msra.gmra.mrb[0].mxu0 %v2495_v10  ;;  %1990 = vmatpush1.bf16.msra.mxu1 %v2956_v9  ;;  %v3031_v9 = vld [vmem:[%s3307_s16 + $0x5c0] ss:$8 sps:$4 sm:$0xff]   ;;  %v3036_v10 = vld [vmem:[%s3307_s16 + $0x1d4] ss:$8 sps:$4 sm:$0xff]  }
  0x54   : > { %2202 = vmatpush1.bf16.msra.mxu0 %v2959_v11  ;;  %1991 = vmatprep.subr.bf16.mxu1 %v2964_v12  ;;  %v3039_v11 = vld [vmem:[%s3307_s16 + $0x5d4] ss:$8 sps:$4 sm:$0xff]   ;;  %v3034_v12 = vld [vmem:[%s3307_s16 + $0x1d0] ss:$8 sps:$4 sm:$0xff]  }
  0x55   : > { %2203 = vmatprep.subr.bf16.mxu0 %v2967_v13  ;;  %1978 = vmatprep.mubr.bf16.mxu1 %v2504_v33  ;;  %v3037_v13 = vld [vmem:[%s3307_s16 + $0x5d0] ss:$8 sps:$4 sm:$0xff]   ;;  %v237_v33 = vld [vmem:[%s3357_s20 + $0xe8] sm:$0xff] }
  0x56   : > { %2190 = vmatprep.mubr.bf16.mxu0 %v2512_v39  ;;  %v3069_v39 = vld [vmem:[%s3307_s16 + $0x624] ss:$8 sps:$4 sm:$0xff]  }
  0x57   : > { %1992 = vmatpush1.bf16.msra.mxu1 %v2962_v14  ;;  %v3042_v14 = vld [vmem:[%s3307_s16 + $0x1e4] ss:$8 sps:$4 sm:$0xff]  }
  0x58   : > { %2204 = vmatpush1.bf16.msra.mxu0 %v2965_v15  ;;  %1993 = vmatprep.subr.bf16.mxu1 %v2970_v16  ;;  %v3045_v15 = vld [vmem:[%s3307_s16 + $0x5e4] ss:$8 sps:$4 sm:$0xff]   ;;  %v3040_v16 = vld [vmem:[%s3307_s16 + $0x1e0] ss:$8 sps:$4 sm:$0xff]  }
  0x59   : > { %2205 = vmatprep.subr.bf16.mxu0 %v2973_v17  ;;  %v3043_v17 = vld [vmem:[%s3307_s16 + $0x5e0] ss:$8 sps:$4 sm:$0xff]  }
  0x5a   : > { %1979 = vmatmul.mubr.bf16.gmra.mrb[4].mxu1 %v2503_v37  ;;  %v3061_v37 = vld [vmem:[%s3307_s16 + $0x610] ss:$8 sps:$4 sm:$0xff]  }
  0x5b   : > { %1994 = vmatpush1.bf16.msra.mxu1 %v2968_v18  ;;  %2191 = vmatmul.mubr.bf16.gmra.mrb[4].mxu0 %v2511_v40  ;;  %v3048_v18 = vld [vmem:[%s3307_s16 + $0x1f4] ss:$8 sps:$4 sm:$0xff]   ;;  %v3064_v40 = vld [vmem:[%s3307_s16 + $0x220] ss:$8 sps:$4 sm:$0xff]  }
  0x5c   : > { %2206 = vmatpush1.bf16.msra.mxu0 %v2971_v19  ;;  %1995 = vmatprep.subr.bf16.mxu1 %v2976_v20  ;;  %v3051_v19 = vld [vmem:[%s3307_s16 + $0x5f4] ss:$8 sps:$4 sm:$0xff]   ;;  %v3046_v20 = vld [vmem:[%s3307_s16 + $0x1f0] ss:$8 sps:$4 sm:$0xff]  }
  0x5d   : > { %2207 = vmatprep.subr.bf16.mxu0 %v2979_v21  ;;  %2021 = vmatprep.mubr.bf16.mxu1 %v2490_v48  ;;  %v3049_v21 = vld [vmem:[%s3307_s16 + $0x5f0] ss:$8 sps:$4 sm:$0xff]   ;;  %v3072_v48 = vld [vmem:[%s3307_s16 + $0x234] ss:$8 sps:$4 sm:$0xff]  }
  0x5e   : > { %2233 = vmatprep.mubr.bf16.mxu0 %v2498_v53  ;;  %v3073_v53 = vld [vmem:[%s3307_s16 + $0x630] ss:$8 sps:$4 sm:$0xff]  }
  0x5f   : > { %1996 = vmatpush1.bf16.msra.mxu1 %v2974_v22  ;;  %v3054_v22 = vld [vmem:[%s3307_s16 + $0x204] ss:$8 sps:$4 sm:$0xff]  }
  0x60   : > { %2208 = vmatpush1.bf16.msra.mxu0 %v2977_v23  ;;  %1997 = vmatprep.subr.bf16.mxu1 %v2982_v24  ;;  %v3057_v23 = vld [vmem:[%s3307_s16 + $0x604] ss:$8 sps:$4 sm:$0xff]   ;;  %v3052_v24 = vld [vmem:[%s3307_s16 + $0x200] ss:$8 sps:$4 sm:$0xff]  }
  0x61   : > { %2209 = vmatprep.subr.bf16.mxu0 %v2985_v25  ;;  %v3055_v25 = vld [vmem:[%s3307_s16 + $0x600] ss:$8 sps:$4 sm:$0xff]  }
  0x63   : > { %1998 = vmatpush1.bf16.msra.mxu1 %v2980_v26  ;;  %v225_v26 = vld [vmem:[%s3357_s20 + $0x88] sm:$0xff] }
  0x64   : > { %2210 = vmatpush1.bf16.msra.mxu0 %v2983_v27  ;;  %1999 = vmatprep.subr.bf16.mxu1 %v2988_v28  ;;  %v2489_v27 = vcombine.low %v3416_v44, %v3419_v45  ;;  %v2497_v28 = vcombine.low %v3426_v49, %v3429_v50  ;;  %v3491_v45 = vld [vmem:[%s3357_s20 + $0x50] sm:$0xff] }
  0x65   : > { %2211 = vmatprep.subr.bf16.mxu0 %v2991_v29  ;;  %v233_v29 = vld [vmem:[%s3357_s20 + $0xc8] sm:$0xff]  ;;  %v3075_v49 = vld [vmem:[%s3307_s16 + $0x634] ss:$8 sps:$4 sm:$0xff]  }
  0x67   : > { %2000 = vmatpush1.bf16.msra.mxu1 %v2986_v32  ;;  %v229_v32 = vld [vmem:[%s3357_s20 + $0xa8] sm:$0xff] }
  0x68   : > { %2212 = vmatpush1.bf16.msra.mxu0 %v2989_v34  ;;  %2001 = vmatprep.subr.bf16.mxu1 %v2994_v38  ;;  %v2506_v34 = vcombine.high %v225_v26, %v233_v29  ;;  %v2514_v35 = vcombine.high %v229_v32, %v237_v33  ;;  %v3066_v38 = vld [vmem:[%s3307_s16 + $0x224] ss:$8 sps:$4 sm:$0xff]   ;;  %v2513_v44 = vcombine.low %v229_v32, %v237_v33  ;;  %v3136_v32 = vld [vmem:[%s3307_s16 + $0x2e0] ss:$8 sps:$4 sm:$0xff]  }
  0x69   : > { %2213 = vmatprep.subr.bf16.mxu0 %v2997_v41  ;;  %v3067_v41 = vld [vmem:[%s3307_s16 + $0x620] ss:$8 sps:$4 sm:$0xff]  }
  0x6a   : > { %v3139_v33 = vld [vmem:[%s3307_s16 + $0x6e0] ss:$8 sps:$4 sm:$0xff]  }
  0x6b   : > { %2002 = vmatpush1.bf16.msra.mxu1 %v2992_v42  ;;  %v3488_v42 = vld [vmem:[%s3357_s20 + $0x10] sm:$0xff] }
  0x6c   : > { %2214 = vmatpush1.bf16.msra.mxu0 %v2995_v43  ;;  %2003 = vmatprep.subr.bf16.mxu1 %v3000_v46  ;;  %v2505_v43 = vcombine.low %v225_v26, %v233_v29  ;;  %v3494_v46 = vld [vmem:[%s3357_s20 + $0x30] sm:$0xff]  ;;  %v2492_v50 = vcombine.high %v3488_v42, %v3491_v45 }
  0x6d   : > { %2215 = vmatprep.subr.bf16.mxu0 %v3003_v47  ;;  %v3497_v47 = vld [vmem:[%s3357_s20 + $0x70] sm:$0xff] }
  0x6e   : > { %v3132_v26 = vld [vmem:[%s3307_s16 + $0x2d4] ss:$8 sps:$4 sm:$0xff]   ;;  %v3133_v29 = vld [vmem:[%s3307_s16 + $0x6d0] ss:$8 sps:$4 sm:$0xff]  }
  0x6f   : > { %2004 = vmatpush1.bf16.msra.mxu1 %v2998_v51  ;;  %v2500_v51 = vcombine.high %v3494_v46, %v3497_v47 }
  0x70   : > { %2216 = vmatpush1.bf16.msra.mxu0 %v3001_v52  ;;  %2005 = vmatprep.subr.bf16.mxu1 %v3006_v54  ;;  %v3070_v52 = vld [vmem:[%s3307_s16 + $0x230] ss:$8 sps:$4 sm:$0xff]   ;;  %v3078_v54 = vld [vmem:[%s3307_s16 + $0x244] ss:$8 sps:$4 sm:$0xff]  }
  0x71   : > { %2217 = vmatprep.subr.bf16.mxu0 %v3009_v55  ;;  %v3081_v55 = vld [vmem:[%s3307_s16 + $0x644] ss:$8 sps:$4 sm:$0xff]  }
  0x73   : > { %2006 = vmatpush1.bf16.msra.mxu1 %v3004_v56  ;;  %v3076_v56 = vld [vmem:[%s3307_s16 + $0x240] ss:$8 sps:$4 sm:$0xff]  }
  0x74   : > { %2218 = vmatpush1.bf16.msra.mxu0 %v3007_v57  ;;  %2007 = vmatprep.subr.bf16.mxu1 %v3012_v58  ;;  %v3079_v57 = vld [vmem:[%s3307_s16 + $0x640] ss:$8 sps:$4 sm:$0xff]   ;;  %v3084_v58 = vld [vmem:[%s3307_s16 + $0x254] ss:$8 sps:$4 sm:$0xff]  }
  0x75   : > { %2219 = vmatprep.subr.bf16.mxu0 %v3015_v59  ;;  %v3087_v59 = vld [vmem:[%s3307_s16 + $0x654] ss:$8 sps:$4 sm:$0xff]  }
  0x77   : > { %2008 = vmatpush1.bf16.msra.mxu1 %v3010_v60  ;;  %v3082_v60 = vld [vmem:[%s3307_s16 + $0x250] ss:$8 sps:$4 sm:$0xff]  }
  0x78   : > { %2220 = vmatpush1.bf16.msra.mxu0 %v3013_v61  ;;  %2009 = vmatprep.subr.bf16.mxu1 %v3018_v62  ;;  %v3085_v61 = vld [vmem:[%s3307_s16 + $0x650] ss:$8 sps:$4 sm:$0xff]   ;;  %v3090_v62 = vld [vmem:[%s3307_s16 + $0x264] ss:$8 sps:$4 sm:$0xff]  }
  0x79   : > { %2221 = vmatprep.subr.bf16.mxu0 %v3021_v63  ;;  %v3093_v63 = vld [vmem:[%s3307_s16 + $0x664] ss:$8 sps:$4 sm:$0xff]  }
  0x7b   : > { %2010 = vmatpush1.bf16.msra.mxu1 %v3016_v0  ;;  %v3088_v0 = vld [vmem:[%s3307_s16 + $0x260] ss:$8 sps:$4 sm:$0xff]  }
  0x7c   : > { %2222 = vmatpush1.bf16.msra.mxu0 %v3019_v1  ;;  %2011 = vmatprep.subr.bf16.mxu1 %v3024_v2  ;;  %v3091_v1 = vld [vmem:[%s3307_s16 + $0x660] ss:$8 sps:$4 sm:$0xff]   ;;  %v3096_v2 = vld [vmem:[%s3307_s16 + $0x274] ss:$8 sps:$4 sm:$0xff]  }
  0x7d   : > { %2223 = vmatprep.subr.bf16.mxu0 %v3027_v3  ;;  %v3099_v3 = vld [vmem:[%s3307_s16 + $0x674] ss:$8 sps:$4 sm:$0xff]  }
  0x7f   : > { %2012 = vmatpush1.bf16.msra.mxu1 %v3022_v4  ;;  %v3094_v4 = vld [vmem:[%s3307_s16 + $0x270] ss:$8 sps:$4 sm:$0xff]  }
  0x80   : > { %2224 = vmatpush1.bf16.msra.mxu0 %v3025_v5  ;;  %2013 = vmatprep.subr.bf16.mxu1 %v3030_v6  ;;  %v3097_v5 = vld [vmem:[%s3307_s16 + $0x670] ss:$8 sps:$4 sm:$0xff]   ;;  %v3102_v6 = vld [vmem:[%s3307_s16 + $0x284] ss:$8 sps:$4 sm:$0xff]  }
  0x81   : > { %2225 = vmatprep.subr.bf16.mxu0 %v3033_v7  ;;  %v3105_v7 = vld [vmem:[%s3307_s16 + $0x684] ss:$8 sps:$4 sm:$0xff]  }
  0x83   : > { %2014 = vmatpush1.bf16.msra.mxu1 %v3028_v8  ;;  %v3100_v8 = vld [vmem:[%s3307_s16 + $0x280] ss:$8 sps:$4 sm:$0xff]  }
  0x84   : > { %2226 = vmatpush1.bf16.msra.mxu0 %v3031_v9  ;;  %2015 = vmatprep.subr.bf16.mxu1 %v3036_v10  ;;  %v3103_v9 = vld [vmem:[%s3307_s16 + $0x680] ss:$8 sps:$4 sm:$0xff]   ;;  %v3108_v10 = vld [vmem:[%s3307_s16 + $0x294] ss:$8 sps:$4 sm:$0xff]  }
  0x85   : > { %2227 = vmatprep.subr.bf16.mxu0 %v3039_v11  ;;  %v3111_v11 = vld [vmem:[%s3307_s16 + $0x694] ss:$8 sps:$4 sm:$0xff]  }
  0x87   : > { %2016 = vmatpush1.bf16.msra.mxu1 %v3034_v12  ;;  %v3106_v12 = vld [vmem:[%s3307_s16 + $0x290] ss:$8 sps:$4 sm:$0xff]  }
  0x88   : > { %2228 = vmatpush1.bf16.msra.mxu0 %v3037_v13  ;;  %2017 = vmatprep.subr.bf16.mxu1 %v3042_v14  ;;  %v3109_v13 = vld [vmem:[%s3307_s16 + $0x690] ss:$8 sps:$4 sm:$0xff]   ;;  %v3114_v14 = vld [vmem:[%s3307_s16 + $0x2a4] ss:$8 sps:$4 sm:$0xff]  }
  0x89   : > { %2229 = vmatprep.subr.bf16.mxu0 %v3045_v15  ;;  %v3117_v15 = vld [vmem:[%s3307_s16 + $0x6a4] ss:$8 sps:$4 sm:$0xff]  }
  0x8b   : > { %2018 = vmatpush1.bf16.msra.mxu1 %v3040_v16  ;;  %v3112_v16 = vld [vmem:[%s3307_s16 + $0x2a0] ss:$8 sps:$4 sm:$0xff]  }
  0x8c   : > { %2230 = vmatpush1.bf16.msra.mxu0 %v3043_v17  ;;  %2019 = vmatprep.subr.bf16.mxu1 %v3048_v18  ;;  %v3115_v17 = vld [vmem:[%s3307_s16 + $0x6a0] ss:$8 sps:$4 sm:$0xff]   ;;  %v3120_v18 = vld [vmem:[%s3307_s16 + $0x2b4] ss:$8 sps:$4 sm:$0xff]  }
  0x8d   : > { %2231 = vmatprep.subr.bf16.mxu0 %v3051_v19  ;;  %v3123_v19 = vld [vmem:[%s3307_s16 + $0x6b4] ss:$8 sps:$4 sm:$0xff]  }
  0x8f   : > { %2020 = vmatpush1.bf16.msra.mxu1 %v3046_v20  ;;  %v3118_v20 = vld [vmem:[%s3307_s16 + $0x2b0] ss:$8 sps:$4 sm:$0xff]  }
  0x90   : > { %2232 = vmatpush1.bf16.msra.mxu0 %v3049_v21  ;;  %2042 = vmatprep.subr.bf16.mxu1 %v3054_v22  ;;  %v3121_v21 = vld [vmem:[%s3307_s16 + $0x6b0] ss:$8 sps:$4 sm:$0xff]   ;;  %v3126_v22 = vld [vmem:[%s3307_s16 + $0x2c4] ss:$8 sps:$4 sm:$0xff]  }
  0x91   : > { %2254 = vmatprep.subr.bf16.mxu0 %v3057_v23  ;;  %v3129_v23 = vld [vmem:[%s3307_s16 + $0x6c4] ss:$8 sps:$4 sm:$0xff]  }
  0x92   : > { %2022 = vmatmul.mubr.bf16.vlgmr.msra.gmra.mrb[0].mxu1 %v2489_v27  ;;  %v3135_v27 = vld [vmem:[%s3307_s16 + $0x6d4] ss:$8 sps:$4 sm:$0xff]  }
  0x93   : > { %2234 = vmatmul.mubr.bf16.vlgmr.msra.gmra.mrb[0].mxu0 %v2497_v28  ;;  %2043 = vmatpush1.bf16.msra.mxu1 %v3052_v24  ;;  %v3124_v24 = vld [vmem:[%s3307_s16 + $0x2c0] ss:$8 sps:$4 sm:$0xff]   ;;  %v3130_v28 = vld [vmem:[%s3307_s16 + $0x2d0] ss:$8 sps:$4 sm:$0xff]  }
  0x94   : > { %2255 = vmatpush1.bf16.msra.mxu0 %v3055_v25  ;;  %2044 = vmatprep.subr.bf16.mxu1 %v3060_v30  ;;  %v3127_v25 = vld [vmem:[%s3307_s16 + $0x6c0] ss:$8 sps:$4 sm:$0xff]   ;;  %v3138_v30 = vld [vmem:[%s3307_s16 + $0x2e4] ss:$8 sps:$4 sm:$0xff]  }
  0x95   : > { %2256 = vmatprep.subr.bf16.mxu0 %v3063_v31  ;;  %2031 = vmatprep.mubr.bf16.mxu1 %v2506_v34  ;;  %v3141_v31 = vld [vmem:[%s3307_s16 + $0x6e4] ss:$8 sps:$4 sm:$0xff]   ;;  %v3144_v34 = vld [vmem:[%s3307_s16 + $0x2f4] ss:$8 sps:$4 sm:$0xff]  }
  0x96   : > { %2243 = vmatprep.mubr.bf16.mxu0 %v2514_v35  ;;  %v3147_v35 = vld [vmem:[%s3307_s16 + $0x6f4] ss:$8 sps:$4 sm:$0xff]  }
  0x97   : > { %2045 = vmatpush1.bf16.msra.mxu1 %v3058_v36  ;;  %v3142_v36 = vld [vmem:[%s3307_s16 + $0x2f0] ss:$8 sps:$4 sm:$0xff]  }
  0x98   : > { %2257 = vmatpush1.bf16.msra.mxu0 %v3061_v37  ;;  %2046 = vmatprep.subr.bf16.mxu1 %v3066_v38  ;;  %v3145_v37 = vld [vmem:[%s3307_s16 + $0x6f0] ss:$8 sps:$4 sm:$0xff]   ;;  %v3150_v38 = vld [vmem:[%s3307_s16 + $0x304] ss:$8 sps:$4 sm:$0xff]  }
  0x99   : > { %2258 = vmatprep.subr.bf16.mxu0 %v3069_v39  ;;  %v3153_v39 = vld [vmem:[%s3307_s16 + $0x704] ss:$8 sps:$4 sm:$0xff]  }
  0x9a   : > { %2032 = vmatmul.mubr.bf16.gmra.mrb[4].mxu1 %v2505_v43  ;;  %v2499_v43 = vcombine.low %v3494_v46, %v3497_v47  ;;  %v3154_v46 = vld [vmem:[%s3307_s16 + $0x310] ss:$8 sps:$4 sm:$0xff]  }
  0x9b   : > { %2244 = vmatmul.mubr.bf16.gmra.mrb[4].mxu0 %v2513_v44  ;;  %2047 = vmatpush1.bf16.msra.mxu1 %v3064_v40  ;;  %v226_v40 = vld [vmem:[%s3357_s20 + $0x90] sm:$0xff] }
  0x9c   : > { %2259 = vmatpush1.bf16.msra.mxu0 %v3067_v41  ;;  %2048 = vmatprep.subr.bf16.mxu1 %v3072_v48  ;;  %v2491_v41 = vcombine.low %v3488_v42, %v3491_v45  ;;  %v234_v44 = vld [vmem:[%s3357_s20 + $0xd0] sm:$0xff] }
  0x9d   : > { %2260 = vmatprep.subr.bf16.mxu0 %v3075_v49  ;;  %2074 = vmatprep.mubr.bf16.mxu1 %v2492_v50  ;;  %v230_v48 = vld [vmem:[%s3357_s20 + $0xb0] sm:$0xff]  ;;  %v3148_v50 = vld [vmem:[%s3307_s16 + $0x300] ss:$8 sps:$4 sm:$0xff]   ;;  %v2508_v42 = vcombine.high %v226_v40, %v234_v44 }
  0x9e   : > { %2286 = vmatprep.mubr.bf16.mxu0 %v2500_v51  ;;  %v238_v49 = vld [vmem:[%s3357_s20 + $0xf0] sm:$0xff]  ;;  %v3151_v51 = vld [vmem:[%s3307_s16 + $0x700] ss:$8 sps:$4 sm:$0xff]  }
  0x9f   : > { %2049 = vmatpush1.bf16.msra.mxu1 %v3070_v52  ;;  %v3156_v52 = vld [vmem:[%s3307_s16 + $0x314] ss:$8 sps:$4 sm:$0xff]   ;;  %v2516_v45 = vcombine.high %v230_v48, %v238_v49  ;;  %v3157_v47 = vld [vmem:[%s3307_s16 + $0x710] ss:$8 sps:$4 sm:$0xff]  }
  0xa0   : > { %2261 = vmatpush1.bf16.msra.mxu0 %v3073_v53  ;;  %2050 = vmatprep.subr.bf16.mxu1 %v3078_v54  ;;  %v3159_v53 = vld [vmem:[%s3307_s16 + $0x714] ss:$8 sps:$4 sm:$0xff]   ;;  %v3162_v54 = vld [vmem:[%s3307_s16 + $0x324] ss:$8 sps:$4 sm:$0xff]  }
  0xa1   : > { %2262 = vmatprep.subr.bf16.mxu0 %v3081_v55  ;;  %v3165_v55 = vld [vmem:[%s3307_s16 + $0x724] ss:$8 sps:$4 sm:$0xff]  }
  0xa3   : > { %2051 = vmatpush1.bf16.msra.mxu1 %v3076_v56  ;;  %v3574_v56 = vld [vmem:[%s3357_s20 + $0x18] sm:$0xff] }
  0xa4   : > { %2263 = vmatpush1.bf16.msra.mxu0 %v3079_v57  ;;  %2052 = vmatprep.subr.bf16.mxu1 %v3084_v58  ;;  %v2507_v57 = vcombine.low %v226_v40, %v234_v44  ;;  %v2515_v58 = vcombine.low %v230_v48, %v238_v49  ;;  %v3220_v40 = vld [vmem:[%s3307_s16 + $0x3c0] ss:$8 sps:$4 sm:$0xff]   ;;  %v3231_v44 = vld [vmem:[%s3307_s16 + $0x7d4] ss:$8 sps:$4 sm:$0xff]   ;;  %v3226_v48 = vld [vmem:[%s3307_s16 + $0x3d0] ss:$8 sps:$4 sm:$0xff]  }
  0xa5   : > { %2264 = vmatprep.subr.bf16.mxu0 %v3087_v59  ;;  %v3577_v59 = vld [vmem:[%s3357_s20 + $0x58] sm:$0xff] }
  0xa6   : > { %v3229_v49 = vld [vmem:[%s3307_s16 + $0x7d0] ss:$8 sps:$4 sm:$0xff]  }
  0xa7   : > { %2053 = vmatpush1.bf16.msra.mxu1 %v3082_v60  ;;  %v3580_v60 = vld [vmem:[%s3357_s20 + $0x38] sm:$0xff] }
  0xa8   : > { %2265 = vmatpush1.bf16.msra.mxu0 %v3085_v61  ;;  %2054 = vmatprep.subr.bf16.mxu1 %v3090_v62  ;;  %v3583_v61 = vld [vmem:[%s3357_s20 + $0x78] sm:$0xff]  ;;  %v3160_v62 = vld [vmem:[%s3307_s16 + $0x320] ss:$8 sps:$4 sm:$0xff]  }
  0xa9   : > { %2266 = vmatprep.subr.bf16.mxu0 %v3093_v63  ;;  %v3163_v63 = vld [vmem:[%s3307_s16 + $0x720] ss:$8 sps:$4 sm:$0xff]  }
  0xab   : > { %2055 = vmatpush1.bf16.msra.mxu1 %v3088_v0  ;;  %v3168_v0 = vld [vmem:[%s3307_s16 + $0x334] ss:$8 sps:$4 sm:$0xff]  }
  0xac   : > { %2267 = vmatpush1.bf16.msra.mxu0 %v3091_v1  ;;  %2056 = vmatprep.subr.bf16.mxu1 %v3096_v2  ;;  %v3171_v1 = vld [vmem:[%s3307_s16 + $0x734] ss:$8 sps:$4 sm:$0xff]   ;;  %v2494_v2 = vcombine.high %v3574_v56, %v3577_v59 }
  0xad   : > { %2268 = vmatprep.subr.bf16.mxu0 %v3099_v3  ;;  %v2502_v3 = vcombine.high %v3580_v60, %v3583_v61 }
  0xaf   : > { %2057 = vmatpush1.bf16.msra.mxu1 %v3094_v4  ;;  %v3166_v4 = vld [vmem:[%s3307_s16 + $0x330] ss:$8 sps:$4 sm:$0xff]  }
  0xb0   : > { %2269 = vmatpush1.bf16.msra.mxu0 %v3097_v5  ;;  %2058 = vmatprep.subr.bf16.mxu1 %v3102_v6  ;;  %v3169_v5 = vld [vmem:[%s3307_s16 + $0x730] ss:$8 sps:$4 sm:$0xff]   ;;  %v3174_v6 = vld [vmem:[%s3307_s16 + $0x344] ss:$8 sps:$4 sm:$0xff]  }
  0xb1   : > { %2270 = vmatprep.subr.bf16.mxu0 %v3105_v7  ;;  %v3177_v7 = vld [vmem:[%s3307_s16 + $0x744] ss:$8 sps:$4 sm:$0xff]  }
  0xb3   : > { %2059 = vmatpush1.bf16.msra.mxu1 %v3100_v8  ;;  %v3172_v8 = vld [vmem:[%s3307_s16 + $0x340] ss:$8 sps:$4 sm:$0xff]  }
  0xb4   : > { %2271 = vmatpush1.bf16.msra.mxu0 %v3103_v9  ;;  %2060 = vmatprep.subr.bf16.mxu1 %v3108_v10  ;;  %v3175_v9 = vld [vmem:[%s3307_s16 + $0x740] ss:$8 sps:$4 sm:$0xff]   ;;  %v3180_v10 = vld [vmem:[%s3307_s16 + $0x354] ss:$8 sps:$4 sm:$0xff]  }
  0xb5   : > { %2272 = vmatprep.subr.bf16.mxu0 %v3111_v11  ;;  %v3183_v11 = vld [vmem:[%s3307_s16 + $0x754] ss:$8 sps:$4 sm:$0xff]  }
  0xb7   : > { %2061 = vmatpush1.bf16.msra.mxu1 %v3106_v12  ;;  %v3178_v12 = vld [vmem:[%s3307_s16 + $0x350] ss:$8 sps:$4 sm:$0xff]  }
  0xb8   : > { %2273 = vmatpush1.bf16.msra.mxu0 %v3109_v13  ;;  %2062 = vmatprep.subr.bf16.mxu1 %v3114_v14  ;;  %v3181_v13 = vld [vmem:[%s3307_s16 + $0x750] ss:$8 sps:$4 sm:$0xff]   ;;  %v3186_v14 = vld [vmem:[%s3307_s16 + $0x364] ss:$8 sps:$4 sm:$0xff]  }
  0xb9   : > { %2274 = vmatprep.subr.bf16.mxu0 %v3117_v15  ;;  %v3189_v15 = vld [vmem:[%s3307_s16 + $0x764] ss:$8 sps:$4 sm:$0xff]  }
  0xbb   : > { %2063 = vmatpush1.bf16.msra.mxu1 %v3112_v16  ;;  %v3184_v16 = vld [vmem:[%s3307_s16 + $0x360] ss:$8 sps:$4 sm:$0xff]  }
  0xbc   : > { %2275 = vmatpush1.bf16.msra.mxu0 %v3115_v17  ;;  %2064 = vmatprep.subr.bf16.mxu1 %v3120_v18  ;;  %v3187_v17 = vld [vmem:[%s3307_s16 + $0x760] ss:$8 sps:$4 sm:$0xff]   ;;  %v3192_v18 = vld [vmem:[%s3307_s16 + $0x374] ss:$8 sps:$4 sm:$0xff]  }
  0xbd   : > { %2276 = vmatprep.subr.bf16.mxu0 %v3123_v19  ;;  %v3195_v19 = vld [vmem:[%s3307_s16 + $0x774] ss:$8 sps:$4 sm:$0xff]  }
  0xbf   : > { %2065 = vmatpush1.bf16.msra.mxu1 %v3118_v20  ;;  %v3190_v20 = vld [vmem:[%s3307_s16 + $0x370] ss:$8 sps:$4 sm:$0xff]  }
  0xc0   : > { %2277 = vmatpush1.bf16.msra.mxu0 %v3121_v21  ;;  %2066 = vmatprep.subr.bf16.mxu1 %v3126_v22  ;;  %v3193_v21 = vld [vmem:[%s3307_s16 + $0x770] ss:$8 sps:$4 sm:$0xff]   ;;  %v3198_v22 = vld [vmem:[%s3307_s16 + $0x384] ss:$8 sps:$4 sm:$0xff]  }
  0xc1   : > { %2278 = vmatprep.subr.bf16.mxu0 %v3129_v23  ;;  %v3201_v23 = vld [vmem:[%s3307_s16 + $0x784] ss:$8 sps:$4 sm:$0xff]  }
  0xc3   : > { %2067 = vmatpush1.bf16.msra.mxu1 %v3124_v24  ;;  %v3196_v24 = vld [vmem:[%s3307_s16 + $0x380] ss:$8 sps:$4 sm:$0xff]  }
  0xc4   : > { %2279 = vmatpush1.bf16.msra.mxu0 %v3127_v25  ;;  %2068 = vmatprep.subr.bf16.mxu1 %v3132_v26  ;;  %v3199_v25 = vld [vmem:[%s3307_s16 + $0x780] ss:$8 sps:$4 sm:$0xff]   ;;  %v3204_v26 = vld [vmem:[%s3307_s16 + $0x394] ss:$8 sps:$4 sm:$0xff]  }
  0xc5   : > { %2280 = vmatprep.subr.bf16.mxu0 %v3135_v27  ;;  %v3207_v27 = vld [vmem:[%s3307_s16 + $0x794] ss:$8 sps:$4 sm:$0xff]  }
  0xc7   : > { %2069 = vmatpush1.bf16.msra.mxu1 %v3130_v28  ;;  %v3202_v28 = vld [vmem:[%s3307_s16 + $0x390] ss:$8 sps:$4 sm:$0xff]  }
  0xc8   : > { %2281 = vmatpush1.bf16.msra.mxu0 %v3133_v29  ;;  %2070 = vmatprep.subr.bf16.mxu1 %v3138_v30  ;;  %v3205_v29 = vld [vmem:[%s3307_s16 + $0x790] ss:$8 sps:$4 sm:$0xff]   ;;  %v3210_v30 = vld [vmem:[%s3307_s16 + $0x3a4] ss:$8 sps:$4 sm:$0xff]  }
  0xc9   : > { %2282 = vmatprep.subr.bf16.mxu0 %v3141_v31  ;;  %v3213_v31 = vld [vmem:[%s3307_s16 + $0x7a4] ss:$8 sps:$4 sm:$0xff]  }
  0xcb   : > { %2071 = vmatpush1.bf16.msra.mxu1 %v3136_v32  ;;  %v3208_v32 = vld [vmem:[%s3307_s16 + $0x3a0] ss:$8 sps:$4 sm:$0xff]  }
  0xcc   : > { %2283 = vmatpush1.bf16.msra.mxu0 %v3139_v33  ;;  %2072 = vmatprep.subr.bf16.mxu1 %v3144_v34  ;;  %v3211_v33 = vld [vmem:[%s3307_s16 + $0x7a0] ss:$8 sps:$4 sm:$0xff]   ;;  %v3216_v34 = vld [vmem:[%s3307_s16 + $0x3b4] ss:$8 sps:$4 sm:$0xff]  }
  0xcd   : > { %2284 = vmatprep.subr.bf16.mxu0 %v3147_v35  ;;  %v3219_v35 = vld [vmem:[%s3307_s16 + $0x7b4] ss:$8 sps:$4 sm:$0xff]  }
  0xcf   : > { %2073 = vmatpush1.bf16.msra.mxu1 %v3142_v36  ;;  %v3214_v36 = vld [vmem:[%s3307_s16 + $0x3b0] ss:$8 sps:$4 sm:$0xff]  }
  0xd0   : > { %2285 = vmatpush1.bf16.msra.mxu0 %v3145_v37  ;;  %2095 = vmatprep.subr.bf16.mxu1 %v3150_v38  ;;  %v3217_v37 = vld [vmem:[%s3307_s16 + $0x7b0] ss:$8 sps:$4 sm:$0xff]   ;;  %v3222_v38 = vld [vmem:[%s3307_s16 + $0x3c4] ss:$8 sps:$4 sm:$0xff]  }
  0xd1   : > { %2307 = vmatprep.subr.bf16.mxu0 %v3153_v39  ;;  %v3225_v39 = vld [vmem:[%s3307_s16 + $0x7c4] ss:$8 sps:$4 sm:$0xff]  }
  0xd2   : > { %2075 = vmatmul.mubr.bf16.vlgmr.msra.gmra.mrb[0].mxu1 %v2491_v41  ;;  %v3223_v41 = vld [vmem:[%s3307_s16 + $0x7c0] ss:$8 sps:$4 sm:$0xff]  }
  0xd3   : > { %2287 = vmatmul.mubr.bf16.vlgmr.msra.gmra.mrb[0].mxu0 %v2499_v43  ;;  %2096 = vmatpush1.bf16.msra.mxu1 %v3148_v50  ;;  %v3228_v43 = vld [vmem:[%s3307_s16 + $0x3d4] ss:$8 sps:$4 sm:$0xff]   ;;  %v3234_v50 = vld [vmem:[%s3307_s16 + $0x3e4] ss:$8 sps:$4 sm:$0xff]  }
  0xd4   : > { %2308 = vmatpush1.bf16.msra.mxu0 %v3151_v51  ;;  %2097 = vmatprep.subr.bf16.mxu1 %v3156_v52  ;;  %v3237_v51 = vld [vmem:[%s3307_s16 + $0x7e4] ss:$8 sps:$4 sm:$0xff]   ;;  %v3232_v52 = vld [vmem:[%s3307_s16 + $0x3e0] ss:$8 sps:$4 sm:$0xff]  }
  0xd5   : > { %2309 = vmatprep.subr.bf16.mxu0 %v3159_v53  ;;  %2084 = vmatprep.mubr.bf16.mxu1 %v2508_v42  ;;  %v3235_v53 = vld [vmem:[%s3307_s16 + $0x7e0] ss:$8 sps:$4 sm:$0xff]   ;;  %v3240_v42 = vld [vmem:[%s3307_s16 + $0x3f4] ss:$8 sps:$4 sm:$0xff]  }
  0xd6   : > { %2296 = vmatprep.mubr.bf16.mxu0 %v2516_v45  ;;  %v3243_v45 = vld [vmem:[%s3307_s16 + $0x7f4] ss:$8 sps:$4 sm:$0xff]  }
  0xd7   : > { %2098 = vmatpush1.bf16.msra.mxu1 %v3154_v46  ;;  %v3238_v46 = vld [vmem:[%s3307_s16 + $0x3f0] ss:$8 sps:$4 sm:$0xff]  }
  0xd8   : > { %2310 = vmatpush1.bf16.msra.mxu0 %v3157_v47  ;;  %2099 = vmatprep.subr.bf16.mxu1 %v3162_v54  ;;  %v3241_v47 = vld [vmem:[%s3307_s16 + $0x7f0] ss:$8 sps:$4 sm:$0xff]  }
  0xd9   : > { %2311 = vmatprep.subr.bf16.mxu0 %v3165_v55  ;;  %v227_v54 = vld [vmem:[%s3357_s20 + $0x98] sm:$0xff] }
  0xda   : > { %2085 = vmatmul.mubr.bf16.gmra.mrb[4].mxu1 %v2507_v57  ;;  %v235_v55 = vld [vmem:[%s3357_s20 + $0xd8] sm:$0xff] }
  0xdb   : > { %2297 = vmatmul.mubr.bf16.gmra.mrb[4].mxu0 %v2515_v58  ;;  %2100 = vmatpush1.bf16.msra.mxu1 %v3160_v62  ;;  %v231_v57 = vld [vmem:[%s3357_s20 + $0xb8] sm:$0xff]  ;;  %v2493_v62 = vcombine.low %v3574_v56, %v3577_v59 }
  0xdc   : > { %2312 = vmatpush1.bf16.msra.mxu0 %v3163_v63  ;;  %2101 = vmatprep.subr.bf16.mxu1 %v3168_v0  ;;  %v239_v58 = vld [vmem:[%s3357_s20 + $0xf8] sm:$0xff]  ;;  %v2501_v63 = vcombine.low %v3580_v60, %v3583_v61  ;;  %v2510_v0 = vcombine.high %v227_v54, %v235_v55 }
  0xdd   : > { %2313 = vmatprep.subr.bf16.mxu0 %v3171_v1  ;;  %2127 = vmatprep.mubr.bf16.mxu1 %v2494_v2  ;;  %v2518_v1 = vcombine.high %v231_v57, %v239_v58  ;;  %v2509_v2 = vcombine.low %v227_v54, %v235_v55 }
  0xde   : > { %2339 = vmatprep.mubr.bf16.mxu0 %v2502_v3  ;;  %v2517_v3 = vcombine.low %v231_v57, %v239_v58 }
  0xdf   : > { %2102 = vmatpush1.bf16.msra.mxu1 %v3166_v4 }
  0xe0   : > { %2314 = vmatpush1.bf16.msra.mxu0 %v3169_v5  ;;  %2103 = vmatprep.subr.bf16.mxu1 %v3174_v6 }
  0xe1   : > { %2315 = vmatprep.subr.bf16.mxu0 %v3177_v7 }
  0xe3   : > { %2104 = vmatpush1.bf16.msra.mxu1 %v3172_v8 }
  0xe4   : > { %2316 = vmatpush1.bf16.msra.mxu0 %v3175_v9  ;;  %2105 = vmatprep.subr.bf16.mxu1 %v3180_v10 }
  0xe5   : > { %2317 = vmatprep.subr.bf16.mxu0 %v3183_v11 }
  0xe7   : > { %2106 = vmatpush1.bf16.msra.mxu1 %v3178_v12 }
  0xe8   : > { %2318 = vmatpush1.bf16.msra.mxu0 %v3181_v13  ;;  %2107 = vmatprep.subr.bf16.mxu1 %v3186_v14 }
  0xe9   : > { %2319 = vmatprep.subr.bf16.mxu0 %v3189_v15 }
  0xeb   : > { %2108 = vmatpush1.bf16.msra.mxu1 %v3184_v16 }
  0xec   : > { %2320 = vmatpush1.bf16.msra.mxu0 %v3187_v17  ;;  %2109 = vmatprep.subr.bf16.mxu1 %v3192_v18 }
  0xed   : > { %2321 = vmatprep.subr.bf16.mxu0 %v3195_v19 }
  0xef   : > { %2110 = vmatpush1.bf16.msra.mxu1 %v3190_v20 }
  0xf0   : > { %2322 = vmatpush1.bf16.msra.mxu0 %v3193_v21  ;;  %2111 = vmatprep.subr.bf16.mxu1 %v3198_v22 }
  0xf1   : > { %2323 = vmatprep.subr.bf16.mxu0 %v3201_v23 }
  0xf3   : > { %2112 = vmatpush1.bf16.msra.mxu1 %v3196_v24 }
  0xf4   : > { %2324 = vmatpush1.bf16.msra.mxu0 %v3199_v25  ;;  %2113 = vmatprep.subr.bf16.mxu1 %v3204_v26 }
  0xf5   : > { %2325 = vmatprep.subr.bf16.mxu0 %v3207_v27 }
  0xf7   : > { %2114 = vmatpush1.bf16.msra.mxu1 %v3202_v28 }
  0xf8   : > { %2326 = vmatpush1.bf16.msra.mxu0 %v3205_v29  ;;  %2115 = vmatprep.subr.bf16.mxu1 %v3210_v30 }
  0xf9   : > { %2327 = vmatprep.subr.bf16.mxu0 %v3213_v31 }
  0xfb   : > { %2116 = vmatpush1.bf16.msra.mxu1 %v3208_v32 }
  0xfc   : > { %2328 = vmatpush1.bf16.msra.mxu0 %v3211_v33  ;;  %2117 = vmatprep.subr.bf16.mxu1 %v3216_v34 }
  0xfd   : > { %2329 = vmatprep.subr.bf16.mxu0 %v3219_v35 }
  0xff   : > { %2118 = vmatpush1.bf16.msra.mxu1 %v3214_v36 }
 0x100   : > { %2330 = vmatpush1.bf16.msra.mxu0 %v3217_v37  ;;  %2119 = vmatprep.subr.bf16.mxu1 %v3222_v38 }
 0x101   : > { %2331 = vmatprep.subr.bf16.mxu0 %v3225_v39 }
 0x103   : > { %2120 = vmatpush1.bf16.msra.mxu1 %v3220_v40 }
 0x104   : > { %2332 = vmatpush1.bf16.msra.mxu0 %v3223_v41  ;;  %2121 = vmatprep.subr.bf16.mxu1 %v3228_v43 }
 0x105   : > { %2333 = vmatprep.subr.bf16.mxu0 %v3231_v44 }
 0x107   : > { %2122 = vmatpush1.bf16.msra.mxu1 %v3226_v48 }
 0x108   : > { %2334 = vmatpush1.bf16.msra.mxu0 %v3229_v49  ;;  %2123 = vmatprep.subr.bf16.mxu1 %v3234_v50 }
 0x109   : > { %2335 = vmatprep.subr.bf16.mxu0 %v3237_v51 }
 0x10b   : > { %2124 = vmatpush1.bf16.msra.mxu1 %v3232_v52 }
 0x10c   : > { %2336 = vmatpush1.bf16.msra.mxu0 %v3235_v53  ;;  %2125 = vmatprep.subr.bf16.mxu1 %v3240_v42 }
 0x10d   : > { %2337 = vmatprep.subr.bf16.mxu0 %v3243_v45 }
 0x10f   : > { %2126 = vmatpush1.bf16.msra.mxu1 %v3238_v46 }
 0x110   : > { %2338 = vmatpush1.bf16.msra.mxu0 %v3241_v47 }
 0x112   : > { %2128 = vmatmul.mubr.bf16.vlgmr.msra.gmra.mrb[0].mxu1 %v2493_v62 }
 0x113   : > { %2340 = vmatmul.mubr.bf16.vlgmr.msra.gmra.mrb[0].mxu0 %v2501_v63  ;;  %2137 = vmatprep.mubr.bf16.mxu1 %v2510_v0 }
 0x114   : > { %2349 = vmatprep.mubr.bf16.mxu0 %v2518_v1 }
 0x11a   : > { %2138 = vmatmul.mubr.bf16.gmra.mrb[4].mxu1 %v2509_v2 }
 0x11b   : > { %2350 = vmatmul.mubr.bf16.gmra.mrb[4].mxu0 %v2517_v3 }
 0x1e5   : > { %v2129_v4 = vpop.f32.mrb[0].mxu1 }
 0x1e6   : > { %v2341_v56 = vpop.f32.mrb[0].mxu0  ;;  %v2131_v60 = vpop.f32.mrb[1].mxu1 }
 0x1e7   : > { %v2780_v59 = vadd.f32 %v2341_v56, %v2129_v4  ;;  %v2343_v61 = vpop.f32.mrb[1].mxu0  ;;  %v2133_v6 = vpop.f32.mrb[2].mxu1 }
 0x1e8   : > { %v2781_v5 = vadd.f32 %v2343_v61, %v2131_v60  ;;  %v2345_v7 = vpop.f32.mrb[2].mxu0  ;;  %v2135_v9 = vpop.f32.mrb[3].mxu1 }
 0x1e9   : > { %2360 = vst [vmem:[%s3655_s24] sm:$0xff] %v2780_v59  ;;  %v2782_v8 = vadd.f32 %v2345_v7, %v2133_v6  ;;  %v2347_v10 = vpop.f32.mrb[3].mxu0 }
 0x1ea   : > { %2361 = vst [vmem:[%s3655_s24 + $0x8] sm:$0xff] %v2781_v5  ;;  %v2783_v11 = vadd.f32 %v2347_v10, %v2135_v9 }
 0x1eb   : > { %2362 = vst [vmem:[%s3655_s24 + $0x10] sm:$0xff] %v2782_v8 }
 0x1ec   : > { %2363 = vst [vmem:[%s3655_s24 + $0x18] sm:$0xff] %v2783_v11 }
 0x1ed   : > { %v2139_v12 = vpop.f32.mrb[4].mxu1 }
 0x1ee   : > { %v2351_v13 = vpop.f32.mrb[4].mxu0  ;;  %v2141_v15 = vpop.f32.mrb[5].mxu1 }
 0x1ef   : > { %v2784_v14 = vadd.f32 %v2351_v13, %v2139_v12  ;;  %v2353_v16 = vpop.f32.mrb[5].mxu0  ;;  %v2143_v18 = vpop.f32.mrb[6].mxu1 }
 0x1f0   : > { %v2785_v17 = vadd.f32 %v2353_v16, %v2141_v15  ;;  %v2355_v19 = vpop.f32.mrb[6].mxu0  ;;  %v2145_v21 = vpop.f32.mrb[7].mxu1 }
 0x1f1   : > { %2364 = vst [vmem:[%s3655_s24 + $0x20] sm:$0xff] %v2784_v14  ;;  %v2786_v20 = vadd.f32 %v2355_v19, %v2143_v18  ;;  %v2357_v22 = vpop.f32.mrb[7].mxu0 }
 0x1f2   : > { %2365 = vst [vmem:[%s3655_s24 + $0x28] sm:$0xff] %v2785_v17  ;;  %v2787_v23 = vadd.f32 %v2357_v22, %v2145_v21 }
 0x1f3   : > { %2366 = vst [vmem:[%s3655_s24 + $0x30] sm:$0xff] %v2786_v20 }
 0x1f4   : > { %2367 = vst [vmem:[%s3655_s24 + $0x38] sm:$0xff] %v2787_v23 }
 0x1f5 PF: > { %s12_s11 = sadd.s32 1, %s3266_s11   ;;  %s3677_s9 = smov %s3262_s10 }
 0x1f6   : > { %p9_p5 = scmp.ge.s32.totalorder %s12_s11, 6   ;;  %s3678_s10 = smov %s3680_s12 }
 0x1f8   :  { %11 = sbr.rel (!%p9_p5) target bundleno = 2 (0x2), region = 61 }

// kernel: generator_forward.12
= control target key start
LH: loop header
LB: loop body
LE: loop exit
PB: predicated region body
PF: predicated region fallthrough
CT: control target
= control target key end

     0   :  { %s780_s12 = smov 0   ;;  %s782_s13 = smov 0   ;;  %s1179_s0 = inlined_call_operand.vmem [shape: f32[128,256], index: 0, kind: input, shape index: {}]   ;;  %s1180_s1 = inlined_call_operand.vmem [shape: f32[1,256], index: 1, kind: input, shape index: {}]   ;;  %s1181_s2 = inlined_call_operand.vmem [shape: f32[1,256], index: 2, kind: input, shape index: {}]   ;;  %s1182_s3 = inlined_call_operand.vmem [shape: f32[128,256], index: 3, kind: output, shape index: {}]  }
   0x1   :  { %s784_s14 = smov 0  }
   0x2 LB: > { %s25_s15 = sadd.s32 1, %s752_s13  ;;  %p695_p0 = scmp.ge.s32.totalorder %s756_s14, 1  ;;  %s756_s14 = sphi %s784_s14, %s13_s14   ;;  %s752_s13 = sphi %s782_s13, %s1184_s13   ;;  %s748_s12 = sphi %s780_s12, %s1183_s12  }
   0x3   : > { %p27_p1 = scmp.ge.s32.totalorder %s25_s15, 2  ;;  %p153_p2 = scmp.lt.s32.totalorder %s756_s14, 3 }
   0x5   : > { %s1186_s15 = smov (%p27_p1, %s25_s15), 0  ;;  %p154_p3 = pnand %p695_p0, %p153_p2 }
   0x6   : > { %p196_p4 = scmp.eq.s32.totalorder (!%p154_p3), %s748_s12, 0 }
   0x7   : > { %157 = sbr.rel (%p154_p3) target bundleno = 148 (0x94), region = 32 }
   0xe   : > { %201 = sbr.rel (!%p196_p4) target bundleno = 21 (0x15), region = 36  ;;  %v202_v0 = vlaneseq (%p196_p4)  ;;  %v758_v1 = vmov (%p196_p4), 0.0  }
  0x10   : > { %vm204_vm0 = vcmp.lt.s32.totalorder (%p196_p4), %v202_v0, 256 }
  0x11   : > { %206 = vst.msk [vmem:[#allocation2] sm:$0x3] (%p196_p4), %vm204_vm0, %v758_v1  ;;  %207 = vst.msk [vmem:[#allocation3] sm:$0x3] (%p196_p4), %vm204_vm0, %v758_v1 }
  0x15 PF: > { %p697_p5 = scmp.ne.s32.totalorder %s748_s12, 0 }
  0x16   : > { %v211_v2 = vld [vmem:[%s1179_s0] sm:$0xff] (!%p697_p5)  ;;  %v213_v3 = vld [vmem:[%s1179_s0 + $0x10] sm:$0xff] (!%p697_p5)  ;;  %v212_v4 = vld [vmem:[%s1179_s0 + $0x8] sm:$0xff] (!%p697_p5) }
  0x17   : > { %210 = sbr.rel (%p697_p5) target bundleno = 77 (0x4d), region = 40  ;;  %v214_v5 = vld [vmem:[%s1179_s0 + $0x18] sm:$0xff] (!%p697_p5)  ;;  %v244_v6 = vadd.f32 (!%p697_p5), %v213_v3, %v211_v2  ;;  %v215_v7 = vld [vmem:[%s1179_s0 + $0x20] sm:$0xff] (!%p697_p5)  ;;  %v216_v9 = vld [vmem:[%s1179_s0 + $0x28] sm:$0xff] (!%p697_p5)  ;;  %v311_v21 = vmul.f32 (!%p697_p5), %v211_v2, %v211_v2  ;;  %v312_v24 = vmul.f32 (!%p697_p5), %v212_v4, %v212_v4  ;;  %v313_v25 = vmul.f32 (!%p697_p5), %v213_v3, %v213_v3 }
  0x18   : > { %v265_v8 = vadd.f32 (!%p697_p5), %v214_v5, %v212_v4  ;;  %v217_v11 = vld [vmem:[%s1179_s0 + $0x30] sm:$0xff] (!%p697_p5)  ;;  %v218_v13 = vld [vmem:[%s1179_s0 + $0x38] sm:$0xff] (!%p697_p5)  ;;  %v219_v15 = vld [vmem:[%s1179_s0 + $0x40] sm:$0xff] (!%p697_p5)  ;;  %v314_v26 = vmul.f32 (!%p697_p5), %v214_v5, %v214_v5  ;;  %v315_v31 = vmul.f32 (!%p697_p5), %v215_v7, %v215_v7  ;;  %v316_v32 = vmul.f32 (!%p697_p5), %v216_v9, %v216_v9 }
  0x19   : > { %v245_v10 = vadd.f32 (!%p697_p5), %v244_v6, %v215_v7  ;;  %v220_v17 = vld [vmem:[%s1179_s0 + $0x48] sm:$0xff] (!%p697_p5)  ;;  %v221_v19 = vld [vmem:[%s1179_s0 + $0x50] sm:$0xff] (!%p697_p5)  ;;  %v222_v22 = vld [vmem:[%s1179_s0 + $0x58] sm:$0xff] (!%p697_p5)  ;;  %v317_v35 = vmul.f32 (!%p697_p5), %v217_v11, %v217_v11  ;;  %v318_v38 = vmul.f32 (!%p697_p5), %v218_v13, %v218_v13  ;;  %v343_v39 = vadd.f32 (!%p697_p5), %v313_v25, %v311_v21 }
  0x1a   : > { %v266_v12 = vadd.f32 (!%p697_p5), %v265_v8, %v216_v9  ;;  %v223_v27 = vld [vmem:[%s1179_s0 + $0x60] sm:$0xff] (!%p697_p5)  ;;  %v224_v29 = vld [vmem:[%s1179_s0 + $0x68] sm:$0xff] (!%p697_p5)  ;;  %v225_v33 = vld [vmem:[%s1179_s0 + $0x70] sm:$0xff] (!%p697_p5)  ;;  %v364_v40 = vadd.f32 (!%p697_p5), %v314_v26, %v312_v24  ;;  %v319_v43 = vmul.f32 (!%p697_p5), %v219_v15, %v219_v15  ;;  %v320_v46 = vmul.f32 (!%p697_p5), %v220_v17, %v220_v17 }
  0x1b   : > { %v246_v14 = vadd.f32 (!%p697_p5), %v245_v10, %v217_v11  ;;  %v226_v36 = vld [vmem:[%s1179_s0 + $0x78] sm:$0xff] (!%p697_p5)  ;;  %v227_v41 = vld [vmem:[%s1179_s0 + $0x80] sm:$0xff] (!%p697_p5)  ;;  %v228_v44 = vld [vmem:[%s1179_s0 + $0x88] sm:$0xff] (!%p697_p5)  ;;  %v344_v47 = vadd.f32 (!%p697_p5), %v343_v39, %v315_v31  ;;  %v321_v51 = vmul.f32 (!%p697_p5), %v221_v19, %v221_v19  ;;  %v322_v54 = vmul.f32 (!%p697_p5), %v222_v22, %v222_v22 }
  0x1c   : > { %v267_v16 = vadd.f32 (!%p697_p5), %v266_v12, %v218_v13  ;;  %v365_v48 = vadd.f32 (!%p697_p5), %v364_v40, %v316_v32  ;;  %v229_v49 = vld [vmem:[%s1179_s0 + $0x90] sm:$0xff] (!%p697_p5)  ;;  %v230_v52 = vld [vmem:[%s1179_s0 + $0x98] sm:$0xff] (!%p697_p5)  ;;  %v231_v57 = vld [vmem:[%s1179_s0 + $0xa0] sm:$0xff] (!%p697_p5)  ;;  %v323_v59 = vmul.f32 (!%p697_p5), %v223_v27, %v223_v27  ;;  %v324_v62 = vmul.f32 (!%p697_p5), %v224_v29, %v224_v29 }
  0x1d   : > { %v247_v18 = vadd.f32 (!%p697_p5), %v246_v14, %v219_v15  ;;  %v345_v55 = vadd.f32 (!%p697_p5), %v344_v47, %v317_v35  ;;  %v232_v60 = vld [vmem:[%s1179_s0 + $0xa8] sm:$0xff] (!%p697_p5)  ;;  %v233_v1 = vld [vmem:[%s1179_s0 + $0xb0] sm:$0xff] (!%p697_p5)  ;;  %v325_v3 = vmul.f32 (!%p697_p5), %v225_v33, %v225_v33  ;;  %v234_v4 = vld [vmem:[%s1179_s0 + $0xb8] sm:$0xff] (!%p697_p5)  ;;  %v326_v6 = vmul.f32 (!%p697_p5), %v226_v36, %v226_v36 }
  0x1e   : > { %v268_v20 = vadd.f32 %v267_v16, %v220_v17  ;;  %v366_v56 = vadd.f32 %v365_v48, %v318_v38  ;;  %v235_v9 = vld [vmem:[%s1179_s0 + $0xc0] sm:$0xff]  ;;  %v327_v11 = vmul.f32 %v227_v41, %v227_v41  ;;  %v236_v12 = vld [vmem:[%s1179_s0 + $0xc8] sm:$0xff]  ;;  %v328_v14 = vmul.f32 %v228_v44, %v228_v44  ;;  %v237_v17 = vld [vmem:[%s1179_s0 + $0xd0] sm:$0xff] }
  0x1f   : > { %v248_v23 = vadd.f32 %v247_v18, %v221_v19  ;;  %v346_v63 = vadd.f32 %v345_v55, %v319_v43  ;;  %v329_v19 = vmul.f32 %v229_v49, %v229_v49  ;;  %v239_v25 = vld [vmem:[%s1179_s0 + $0xe0] sm:$0xff]  ;;  %v333_v35 = vmul.f32 %v233_v1, %v233_v1 }
  0x20   : > { %v269_v28 = vadd.f32 %v268_v20, %v222_v22  ;;  %v367_v0 = vadd.f32 %v366_v56, %v320_v46  ;;  %v238_v20 = vld [vmem:[%s1179_s0 + $0xd8] sm:$0xff]  ;;  %v330_v22 = vmul.f32 %v230_v52, %v230_v52  ;;  %v334_v38 = vmul.f32 %v234_v4, %v234_v4 }
  0x21   : > { %v249_v30 = vadd.f32 %v248_v23, %v223_v27  ;;  %v347_v7 = vadd.f32 %v346_v63, %v321_v51  ;;  %v331_v27 = vmul.f32 %v231_v57, %v231_v57  ;;  %v337_v48 = vmul.f32 %v237_v17, %v237_v17 }
  0x22   : > { %v270_v34 = vadd.f32 %v269_v28, %v224_v29  ;;  %v368_v8 = vadd.f32 %v367_v0, %v322_v54  ;;  %v240_v28 = vld [vmem:[%s1179_s0 + $0xe8] sm:$0xff]  ;;  %v759_v54 = vmov 1966171168   ;;  %v292_v56 = vlaneseq }
  0x23   : > { %v250_v37 = vadd.f32 %v249_v30, %v225_v33  ;;  %v348_v15 = vadd.f32 %v347_v7, %v323_v59  ;;  %v332_v30 = vmul.f32 %v232_v60, %v232_v60  ;;  %v241_v33 = vld [vmem:[%s1179_s0 + $0xf0] sm:$0xff]  ;;  %v290_v55 = vunpack.c.l.s4 %v759_v54 }
  0x24   : > { %v271_v42 = vadd.f32 %v270_v34, %v226_v36  ;;  %v369_v16 = vadd.f32 %v368_v8, %v324_v62  ;;  %v242_v36 = vld [vmem:[%s1179_s0 + $0xf8] sm:$0xff]  ;;  %v340_v59 = vmul.f32 %v240_v28, %v240_v28  ;;  %v341_v63 = vmul.f32 %v241_v33, %v241_v33 }
  0x25   : > { %v251_v45 = vadd.f32 %v250_v37, %v227_v41  ;;  %v349_v23 = vadd.f32 %v348_v15, %v325_v3  ;;  %vm307_vm1 = vcmp.lt.s32.totalorder %v292_v56, 256 }
  0x26   : > { %v272_v50 = vadd.f32 %v271_v42, %v228_v44  ;;  %v370_v24 = vadd.f32 %v369_v16, %v326_v6  ;;  %v335_v42 = vmul.f32 %v235_v9, %v235_v9  ;;  %v336_v44 = vmul.f32 %v236_v12, %v236_v12 }
  0x27   : > { %v252_v53 = vadd.f32 %v251_v45, %v229_v49  ;;  %v350_v31 = vadd.f32 %v349_v23, %v327_v11  ;;  %v293_v6 = vshrl.u32 %v292_v56, 7 }
  0x28   : > { %v273_v58 = vadd.f32 %v272_v50, %v230_v52  ;;  %v371_v32 = vadd.f32 %v370_v24, %v328_v14  ;;  %v338_v50 = vmul.f32 %v238_v20, %v238_v20 }
  0x29   : > { %v253_v61 = vadd.f32 %v252_v53, %v231_v57  ;;  %v351_v39 = vadd.f32 %v350_v31, %v329_v19  ;;  %v339_v57 = vmul.f32 %v239_v25, %v239_v25 }
  0x2a   : > { %v274_v2 = vadd.f32 %v273_v58, %v232_v60  ;;  %v372_v40 = vadd.f32 %v371_v32, %v330_v22  ;;  %v243_v22 = vld [vmem:[#allocation2] sm:$0x3] }
  0x2b   : > { %v254_v5 = vadd.f32 %v253_v61, %v233_v1  ;;  %v352_v45 = vadd.f32 %v351_v39, %v331_v27  ;;  %v342_v1 = vmul.f32 %v242_v36, %v242_v36 }
  0x2c   : > { %v275_v10 = vadd.f32 %v274_v2, %v234_v4  ;;  %v373_v46 = vadd.f32 %v372_v40, %v332_v30 }
  0x2d   : > { %v255_v13 = vadd.f32 %v254_v5, %v235_v9  ;;  %v353_v51 = vadd.f32 %v352_v45, %v333_v35  ;;  %v291_v5 = vunpack.c.0.s8 %v290_v55  ;;  %v310_v35 = vld [vmem:[#allocation3] sm:$0x3] }
  0x2e   : > { %v276_v18 = vadd.f32 %v275_v10, %v236_v12  ;;  %v374_v52 = vadd.f32 %v373_v46, %v334_v38 }
  0x2f   : > { %v256_v21 = vadd.f32 %v255_v13, %v237_v17  ;;  %v354_v60 = vadd.f32 %v353_v51, %v335_v42  ;;  %v294_v15 = vsub.s32 %v291_v5, %v293_v6 }
  0x30   : > { %v277_v26 = vadd.f32 %v276_v18, %v238_v20  ;;  %v375_v61 = vadd.f32 %v374_v52, %v336_v44 }
  0x31   : > { %v257_v29 = vadd.f32 %v256_v21, %v239_v25  ;;  %v355_v2 = vadd.f32 %v354_v60, %v337_v48 }
  0x32   : > { %v278_v34 = vadd.f32 %v277_v26, %v240_v28  ;;  %v376_v3 = vadd.f32 %v375_v61, %v338_v50 }
  0x33   : > { %v258_v37 = vadd.f32 %v257_v29, %v241_v33  ;;  %v356_v8 = vadd.f32 %v355_v2, %v339_v57 }
  0x34   : > { %v279_v41 = vadd.f32 %v278_v34, %v242_v36  ;;  %v377_v9 = vadd.f32 %v376_v3, %v340_v59 }
  0x35   : > { %v259_v43 = vrot.slane %v258_v37, 4  ;;  %v357_v12 = vadd.f32 %v356_v8, %v341_v63 }
  0x36   : > { %v280_v47 = vrot.slane %v279_v41, 4  ;;  %v378_v13 = vadd.f32 %v377_v9, %v342_v1 }
  0x37   : > { %v260_v49 = vadd.f32 %v259_v43, %v258_v37  ;;  %v358_v16 = vrot.slane %v357_v12, 4 }
  0x38   : > { %v281_v53 = vadd.f32 %v280_v47, %v279_v41  ;;  %v379_v17 = vrot.slane %v378_v13, 4 }
  0x39   : > { %v261_v58 = vrot.slane %v260_v49, 2  ;;  %v359_v19 = vadd.f32 %v358_v16, %v357_v12 }
  0x3a   : > { %v282_v62 = vrot.slane %v281_v53, 2  ;;  %v380_v20 = vadd.f32 %v379_v17, %v378_v13 }
  0x3b   : > { %v262_v0 = vadd.f32 %v261_v58, %v260_v49  ;;  %v360_v23 = vrot.slane %v359_v19, 2 }
  0x3c   : > { %v283_v4 = vadd.f32 %v282_v62, %v281_v53  ;;  %v381_v24 = vrot.slane %v380_v20, 2 }
  0x3d   : > { %v263_v7 = vrot.slane %v262_v0, 1  ;;  %v361_v26 = vadd.f32 %v360_v23, %v359_v19 }
  0x3e   : > { %v284_v10 = vrot.slane %v283_v4, 1  ;;  %v382_v27 = vadd.f32 %v381_v24, %v380_v20 }
  0x3f   : > { %v264_v11 = vadd.f32 %v263_v7, %v262_v0  ;;  %v362_v29 = vrot.slane %v361_v26, 1 }
  0x40   : > { %v285_v14 = vadd.f32 %v284_v10, %v283_v4  ;;  %v383_v30 = vrot.slane %v382_v27, 1 }
  0x41   : > { %v363_v31 = vadd.f32 %v362_v29, %v361_v26 }
  0x42   : > { %v288_v18 = vcombine.low %v264_v11, %v285_v14  ;;  %v384_v32 = vadd.f32 %v383_v30, %v382_v27 }
  0x44   : > { %v295_v21 = vrot.slane %v288_v18, %v294_v15  ;;  %v387_v33 = vcombine.low %v363_v31, %v384_v32 }
  0x46   : > { %v302_v25 = vrot.slane %v295_v21, %v294_v15  ;;  %v394_v34 = vrot.slane %v387_v33, %v294_v15 }
  0x48   : > { %v304_v28 = vadd.f32 %v302_v25, %v243_v22  ;;  %v401_v36 = vrot.slane %v394_v34, %v294_v15 }
  0x4a   : > { %309 = vst.msk [vmem:[#allocation2] sm:$0x3] %vm307_vm1, %v304_v28  ;;  %v403_v37 = vadd.f32 %v401_v36, %v310_v35 }
  0x4c   : > { %404 = vst.msk [vmem:[#allocation3] sm:$0x3] %vm307_vm1, %v403_v37 }
  0x4d PF: > { %p405_p6 = scmp.eq.s32.totalorder %s748_s12, 1 }
  0x4e   : > { %v420_v45 = vlaneseq (%p405_p6)  ;;  %v418_v46 = vld [vmem:[%s1180_s1] sm:$0x3] (%p405_p6) }
  0x4f   : > { %409 = sbr.rel (!%p405_p6) target bundleno = 108 (0x6c), region = 44  ;;  %v425_v49 = vld [vmem:[%s1181_s2] sm:$0x3] (%p405_p6) }
  0x50   : > { %vm422_vm2 = vcmp.lt.s32.totalorder (%p405_p6), %v420_v45, 256 }
  0x51   : > { %v410_v38 = vld [vmem:[#allocation2] sm:$0x3] (%p405_p6) }
  0x52   : > { %v411_v40 = vmul.f32 (%p405_p6), 0.0078125, %v410_v38 }
  0x53   : > { %v412_v39 = vld [vmem:[#allocation3] sm:$0x3] (%p405_p6) }
  0x54   : > { %v413_v41 = vmul.f32 (%p405_p6), 0.0078125, %v412_v39  ;;  %v414_v42 = vmul.f32 (%p405_p6), %v411_v40, %v411_v40 }
  0x56   : > { %v415_v43 = vsub.f32 %v413_v41, %v414_v42 }
  0x58   : > { %v416_v44 = vadd.f32 1e-05, %v415_v43 }
  0x5a   : > { %732 = vrsqrt.f32 %v416_v44 }
  0x64   : > { %v733_v47 = vpop.eup %732 }
  0x65   : > { %v419_v48 = vmul.f32 %v733_v47, %v418_v46 }
  0x67   : > { %424 = vst.msk [vmem:[#allocation4] ss:$2 sm:$0x3] %vm422_vm2, %v419_v48  ;;  %v426_v50 = vmul.f32 %v419_v48, %v411_v40 }
  0x69   : > { %v427_v51 = vsub.f32 %v425_v49, %v426_v50 }
  0x6b   : > { %429 = vst.msk [vmem:[#allocation4 + $0x1] ss:$2 sm:$0x3] %vm422_vm2, %v427_v51 }
  0x6c PF: > { %p699_p7 = scmp.ne.s32.totalorder %s748_s12, 1 }
  0x6d   : > { %v467_v52 = vlaneseq (!%p699_p7)  ;;  %v433_v56 = vld [vmem:[%s1179_s0] sm:$0xff] (!%p699_p7)  ;;  %v434_v58 = vld [vmem:[%s1179_s0 + $0x8] sm:$0xff] (!%p699_p7)  ;;  %v435_v60 = vld [vmem:[%s1179_s0 + $0x10] sm:$0xff] (!%p699_p7) }
  0x6e   : > { %432 = sbr.rel (%p699_p7) target bundleno = 148 (0x94), region = 48  ;;  %v465_v54 = vld [vmem:[#allocation4] ss:$2 sm:$0x3] (!%p699_p7)  ;;  %v436_v61 = vld [vmem:[%s1179_s0 + $0x18] sm:$0xff] (!%p699_p7)  ;;  %v438_v3 = vld [vmem:[%s1179_s0 + $0x28] sm:$0xff] (!%p699_p7) }
  0x6f   : > { %v468_v53 = vshrl.u32 (!%p699_p7), %v467_v52, 7  ;;  %v437_v62 = vld [vmem:[%s1179_s0 + $0x20] sm:$0xff] (!%p699_p7)  ;;  %v439_v4 = vld [vmem:[%s1179_s0 + $0x30] sm:$0xff] (!%p699_p7)  ;;  %v440_v5 = vld [vmem:[%s1179_s0 + $0x38] sm:$0xff] (!%p699_p7) }
  0x70   : > { %v441_v18 = vld [vmem:[%s1179_s0 + $0x40] sm:$0xff] (!%p699_p7)  ;;  %v442_v19 = vld [vmem:[%s1179_s0 + $0x48] sm:$0xff] (!%p699_p7)  ;;  %v443_v20 = vld [vmem:[%s1179_s0 + $0x50] sm:$0xff] (!%p699_p7) }
  0x71   : > { %v469_v57 = vsub.s32 (!%p699_p7), 0, %v468_v53  ;;  %v473_v59 = vsub.s32 (!%p699_p7), 1, %v468_v53  ;;  %v444_v25 = vld [vmem:[%s1179_s0 + $0x58] sm:$0xff] (!%p699_p7)  ;;  %v445_v26 = vld [vmem:[%s1179_s0 + $0x60] sm:$0xff] (!%p699_p7)  ;;  %v446_v27 = vld [vmem:[%s1179_s0 + $0x68] sm:$0xff] (!%p699_p7) }
  0x72   : > { %v510_v55 = vld [vmem:[#allocation4 + $0x1] ss:$2 sm:$0x3] (!%p699_p7)  ;;  %v447_v32 = vld [vmem:[%s1179_s0 + $0x70] sm:$0xff] (!%p699_p7)  ;;  %v448_v33 = vld [vmem:[%s1179_s0 + $0x78] sm:$0xff] (!%p699_p7) }
  0x73   : > { %v921_v63 = vrot.slane (!%p699_p7), %v465_v54, %v469_v57  ;;  %v923_v0 = vrot.slane (!%p699_p7), %v510_v55, %v469_v57  ;;  %v925_v1 = vrot.slane (!%p699_p7), %v465_v54, %v473_v59  ;;  %v927_v2 = vrot.slane (!%p699_p7), %v510_v55, %v473_v59  ;;  %v449_v50 = vld [vmem:[%s1179_s0 + $0x80] sm:$0xff] (!%p699_p7)  ;;  %v450_v51 = vld [vmem:[%s1179_s0 + $0x88] sm:$0xff] (!%p699_p7)  ;;  %v451_v52 = vld [vmem:[%s1179_s0 + $0x90] sm:$0xff] (!%p699_p7) }
  0x74   : > { %v452_v57 = vld [vmem:[%s1179_s0 + $0x98] sm:$0xff] (!%p699_p7)  ;;  %v454_v59 = vld [vmem:[%s1179_s0 + $0xa8] sm:$0xff] (!%p699_p7) }
  0x75   : > { %v477_v6 = vmul.f32 %v921_v63, %v433_v56  ;;  %v478_v7 = vmul.f32 %v925_v1, %v434_v58  ;;  %v479_v8 = vmul.f32 %v921_v63, %v435_v60  ;;  %v480_v9 = vmul.f32 %v925_v1, %v436_v61  ;;  %v453_v58 = vld [vmem:[%s1179_s0 + $0xa0] sm:$0xff] }
  0x76   : > { %v481_v10 = vmul.f32 %v921_v63, %v437_v62  ;;  %v482_v11 = vmul.f32 %v925_v1, %v438_v3  ;;  %v483_v12 = vmul.f32 %v921_v63, %v439_v4  ;;  %v484_v13 = vmul.f32 %v925_v1, %v440_v5  ;;  %v455_v4 = vld [vmem:[%s1179_s0 + $0xb0] sm:$0xff]  ;;  %v456_v5 = vld [vmem:[%s1179_s0 + $0xb8] sm:$0xff] }
  0x77   : > { %v522_v14 = vadd.f32 %v923_v0, %v477_v6  ;;  %v523_v15 = vadd.f32 %v927_v2, %v478_v7  ;;  %v524_v16 = vadd.f32 %v923_v0, %v479_v8  ;;  %v525_v17 = vadd.f32 %v927_v2, %v480_v9 }
  0x78   : > { %v526_v21 = vadd.f32 %v923_v0, %v481_v10  ;;  %v527_v22 = vadd.f32 %v927_v2, %v482_v11  ;;  %v528_v23 = vadd.f32 %v923_v0, %v483_v12  ;;  %v529_v24 = vadd.f32 %v927_v2, %v484_v13 }
  0x79   : > { %v554_v28 = vmax.f32 %v522_v14, 0.0  ;;  %v555_v29 = vmax.f32 %v523_v15, 0.0  ;;  %v556_v30 = vmax.f32 %v524_v16, 0.0  ;;  %v557_v31 = vmax.f32 %v525_v17, 0.0 }
  0x7a   : > { %v558_v34 = vmax.f32 %v526_v21, 0.0  ;;  %v559_v35 = vmax.f32 %v527_v22, 0.0  ;;  %v560_v36 = vmax.f32 %v528_v23, 0.0  ;;  %v561_v37 = vmax.f32 %v529_v24, 0.0  ;;  %v457_v22 = vld [vmem:[%s1179_s0 + $0xc0] sm:$0xff]  ;;  %v458_v23 = vld [vmem:[%s1179_s0 + $0xc8] sm:$0xff] }
  0x7b   : > { %586 = vst [vmem:[%s1182_s3] sm:$0xff] %v554_v28  ;;  %587 = vst [vmem:[%s1182_s3 + $0x8] sm:$0xff] %v555_v29  ;;  %v485_v38 = vmul.f32 %v921_v63, %v441_v18  ;;  %v486_v39 = vmul.f32 %v925_v1, %v442_v19  ;;  %v487_v40 = vmul.f32 %v921_v63, %v443_v20  ;;  %v459_v24 = vld [vmem:[%s1179_s0 + $0xd0] sm:$0xff]  ;;  %v460_v29 = vld [vmem:[%s1179_s0 + $0xd8] sm:$0xff] }
  0x7c   : > { %588 = vst [vmem:[%s1182_s3 + $0x10] sm:$0xff] %v556_v30  ;;  %589 = vst [vmem:[%s1182_s3 + $0x18] sm:$0xff] %v557_v31  ;;  %v488_v41 = vmul.f32 %v925_v1, %v444_v25  ;;  %v489_v42 = vmul.f32 %v921_v63, %v445_v26  ;;  %v490_v43 = vmul.f32 %v925_v1, %v446_v27  ;;  %v461_v30 = vld [vmem:[%s1179_s0 + $0xe0] sm:$0xff]  ;;  %v462_v31 = vld [vmem:[%s1179_s0 + $0xe8] sm:$0xff] }
  0x7d   : > { %590 = vst [vmem:[%s1182_s3 + $0x20] sm:$0xff] %v558_v34  ;;  %591 = vst [vmem:[%s1182_s3 + $0x28] sm:$0xff] %v559_v35  ;;  %v491_v44 = vmul.f32 %v921_v63, %v447_v32  ;;  %v492_v45 = vmul.f32 %v925_v1, %v448_v33  ;;  %v530_v46 = vadd.f32 %v923_v0, %v485_v38 }
  0x7e   : > { %592 = vst [vmem:[%s1182_s3 + $0x30] sm:$0xff] %v560_v36  ;;  %593 = vst [vmem:[%s1182_s3 + $0x38] sm:$0xff] %v561_v37  ;;  %v531_v47 = vadd.f32 %v927_v2, %v486_v39  ;;  %v532_v48 = vadd.f32 %v923_v0, %v487_v40  ;;  %v533_v49 = vadd.f32 %v927_v2, %v488_v41  ;;  %v463_v36 = vld [vmem:[%s1179_s0 + $0xf0] sm:$0xff]  ;;  %v464_v37 = vld [vmem:[%s1179_s0 + $0xf8] sm:$0xff] }
  0x7f   : > { %v534_v53 = vadd.f32 %v923_v0, %v489_v42  ;;  %v535_v54 = vadd.f32 %v927_v2, %v490_v43  ;;  %v536_v55 = vadd.f32 %v923_v0, %v491_v44  ;;  %v537_v56 = vadd.f32 %v927_v2, %v492_v45 }
  0x80   : > { %v562_v60 = vmax.f32 %v530_v46, 0.0  ;;  %v563_v61 = vmax.f32 %v531_v47, 0.0  ;;  %v564_v62 = vmax.f32 %v532_v48, 0.0  ;;  %v565_v3 = vmax.f32 %v533_v49, 0.0 }
  0x81   : > { %v566_v6 = vmax.f32 %v534_v53, 0.0  ;;  %v567_v7 = vmax.f32 %v535_v54, 0.0  ;;  %v568_v8 = vmax.f32 %v536_v55, 0.0  ;;  %v569_v9 = vmax.f32 %v537_v56, 0.0 }
  0x82   : > { %594 = vst [vmem:[%s1182_s3 + $0x40] sm:$0xff] %v562_v60  ;;  %595 = vst [vmem:[%s1182_s3 + $0x48] sm:$0xff] %v563_v61  ;;  %v493_v10 = vmul.f32 %v921_v63, %v449_v50  ;;  %v494_v11 = vmul.f32 %v925_v1, %v450_v51  ;;  %v495_v12 = vmul.f32 %v921_v63, %v451_v52 }
  0x83   : > { %596 = vst [vmem:[%s1182_s3 + $0x50] sm:$0xff] %v564_v62  ;;  %597 = vst [vmem:[%s1182_s3 + $0x58] sm:$0xff] %v565_v3  ;;  %v496_v13 = vmul.f32 %v925_v1, %v452_v57  ;;  %v497_v14 = vmul.f32 %v921_v63, %v453_v58  ;;  %v498_v15 = vmul.f32 %v925_v1, %v454_v59 }
  0x84   : > { %598 = vst [vmem:[%s1182_s3 + $0x60] sm:$0xff] %v566_v6  ;;  %599 = vst [vmem:[%s1182_s3 + $0x68] sm:$0xff] %v567_v7  ;;  %v499_v16 = vmul.f32 %v921_v63, %v455_v4  ;;  %v500_v17 = vmul.f32 %v925_v1, %v456_v5  ;;  %v538_v18 = vadd.f32 %v923_v0, %v493_v10 }
  0x85   : > { %600 = vst [vmem:[%s1182_s3 + $0x70] sm:$0xff] %v568_v8  ;;  %601 = vst [vmem:[%s1182_s3 + $0x78] sm:$0xff] %v569_v9  ;;  %v539_v19 = vadd.f32 %v927_v2, %v494_v11  ;;  %v540_v20 = vadd.f32 %v923_v0, %v495_v12  ;;  %v541_v21 = vadd.f32 %v927_v2, %v496_v13 }
  0x86   : > { %v542_v25 = vadd.f32 %v923_v0, %v497_v14  ;;  %v543_v26 = vadd.f32 %v927_v2, %v498_v15  ;;  %v544_v27 = vadd.f32 %v923_v0, %v499_v16  ;;  %v545_v28 = vadd.f32 %v927_v2, %v500_v17 }
  0x87   : > { %v570_v32 = vmax.f32 %v538_v18, 0.0  ;;  %v571_v33 = vmax.f32 %v539_v19, 0.0  ;;  %v572_v34 = vmax.f32 %v540_v20, 0.0  ;;  %v573_v35 = vmax.f32 %v541_v21, 0.0 }
  0x88   : > { %v574_v38 = vmax.f32 %v542_v25, 0.0  ;;  %v575_v39 = vmax.f32 %v543_v26, 0.0  ;;  %v576_v40 = vmax.f32 %v544_v27, 0.0  ;;  %v577_v41 = vmax.f32 %v545_v28, 0.0 }
  0x89   : > { %602 = vst [vmem:[%s1182_s3 + $0x80] sm:$0xff] %v570_v32  ;;  %603 = vst [vmem:[%s1182_s3 + $0x88] sm:$0xff] %v571_v33  ;;  %v501_v42 = vmul.f32 %v921_v63, %v457_v22  ;;  %v502_v43 = vmul.f32 %v925_v1, %v458_v23  ;;  %v503_v44 = vmul.f32 %v921_v63, %v459_v24 }
  0x8a   : > { %604 = vst [vmem:[%s1182_s3 + $0x90] sm:$0xff] %v572_v34  ;;  %605 = vst [vmem:[%s1182_s3 + $0x98] sm:$0xff] %v573_v35  ;;  %v504_v45 = vmul.f32 %v925_v1, %v460_v29  ;;  %v505_v46 = vmul.f32 %v921_v63, %v461_v30  ;;  %v506_v47 = vmul.f32 %v925_v1, %v462_v31 }
  0x8b   : > { %606 = vst [vmem:[%s1182_s3 + $0xa0] sm:$0xff] %v574_v38  ;;  %607 = vst [vmem:[%s1182_s3 + $0xa8] sm:$0xff] %v575_v39  ;;  %v507_v48 = vmul.f32 %v921_v63, %v463_v36  ;;  %v508_v49 = vmul.f32 %v925_v1, %v464_v37  ;;  %v546_v50 = vadd.f32 %v923_v0, %v501_v42 }
  0x8c   : > { %608 = vst [vmem:[%s1182_s3 + $0xb0] sm:$0xff] %v576_v40  ;;  %609 = vst [vmem:[%s1182_s3 + $0xb8] sm:$0xff] %v577_v41  ;;  %v547_v51 = vadd.f32 %v927_v2, %v502_v43  ;;  %v548_v52 = vadd.f32 %v923_v0, %v503_v44  ;;  %v549_v53 = vadd.f32 %v927_v2, %v504_v45 }
  0x8d   : > { %v550_v54 = vadd.f32 %v923_v0, %v505_v46  ;;  %v551_v55 = vadd.f32 %v927_v2, %v506_v47  ;;  %v552_v56 = vadd.f32 %v923_v0, %v507_v48  ;;  %v553_v57 = vadd.f32 %v927_v2, %v508_v49 }
  0x8e   : > { %v578_v58 = vmax.f32 %v546_v50, 0.0  ;;  %v579_v63 = vmax.f32 %v547_v51, 0.0  ;;  %v580_v59 = vmax.f32 %v548_v52, 0.0  ;;  %v581_v1 = vmax.f32 %v549_v53, 0.0 }
  0x8f   : > { %v582_v60 = vmax.f32 %v550_v54, 0.0  ;;  %v583_v61 = vmax.f32 %v551_v55, 0.0  ;;  %v584_v62 = vmax.f32 %v552_v56, 0.0  ;;  %v585_v3 = vmax.f32 %v553_v57, 0.0 }
  0x90   : > { %610 = vst [vmem:[%s1182_s3 + $0xc0] sm:$0xff] %v578_v58  ;;  %611 = vst [vmem:[%s1182_s3 + $0xc8] sm:$0xff] %v579_v63 }
  0x91   : > { %612 = vst [vmem:[%s1182_s3 + $0xd0] sm:$0xff] %v580_v59  ;;  %613 = vst [vmem:[%s1182_s3 + $0xd8] sm:$0xff] %v581_v1 }
  0x92   : > { %614 = vst [vmem:[%s1182_s3 + $0xe0] sm:$0xff] %v582_v60  ;;  %615 = vst [vmem:[%s1182_s3 + $0xe8] sm:$0xff] %v583_v61 }
  0x93   : > { %616 = vst [vmem:[%s1182_s3 + $0xf0] sm:$0xff] %v584_v62  ;;  %617 = vst [vmem:[%s1182_s3 + $0xf8] sm:$0xff] %v585_v3 }
  0x94 PF: > { %s13_s14 = sadd.s32 1, %s756_s14   ;;  %s1183_s12 = smov %s752_s13 }
  0x95   : > { %p10_p8 = scmp.ge.s32.totalorder %s13_s14, 4   ;;  %s1184_s13 = smov %s1186_s15 }
  0x97   :  { %12 = sbr.rel (!%p10_p8) target bundleno = 2 (0x2), region = 80 }

// kernel: generator_forward.13
= control target key start
LH: loop header
LB: loop body
LE: loop exit
PB: predicated region body
PF: predicated region fallthrough
CT: control target
= control target key end

     0   :  { %s2136_s9 = smov 0   ;;  %s2138_s10 = smov 0   ;;  %s2378_s0 = inlined_call_operand.vmem [shape: bf16[4,128,1024], index: 0, kind: input, shape index: {}]   ;;  %s2379_s1 = inlined_call_operand.vmem [shape: bf16[4,1024,128], index: 1, kind: input, shape index: {}]   ;;  %s2380_s2 = inlined_call_operand.vmem [shape: f32[4,128,128], index: 2, kind: output, shape index: {}]  }
   0x1   :  { %s2140_s11 = smov 0  }
   0x2 LB: > { %s24_s12 = sadd.s32 1, %s2115_s10  ;;  %p1613_p0 = scmp.ge.s32.totalorder %s2119_s11, 1  ;;  %s2119_s11 = sphi %s2140_s11, %s12_s11   ;;  %s2115_s10 = sphi %s2138_s10, %s2382_s10   ;;  %s2111_s9 = sphi %s2136_s9, %s2381_s9  }
   0x3   : > { %p26_p1 = scmp.ge.s32.totalorder %s24_s12, 4  ;;  %p144_p2 = scmp.lt.s32.totalorder %s2119_s11, 5 }
   0x5   : > { %s2384_s12 = smov (%p26_p1, %s24_s12), 0  ;;  %p145_p3 = pnand %p1613_p0, %p144_p2 }
   0x6   : > { %p181_p4 = scmp.lt.s32.totalorder (!%p145_p3), %s2111_s9, 3 }
   0x7   : > { %148 = sbr.rel (%p145_p3) target bundleno = 393 (0x189), region = 28 }
   0xe   : > { %s2386_s9 = smov (!%p181_p4, %s2111_s9), 3 }
   0xf   : > { %s1750_s13 = sshll.u32 %s2386_s9, 9  ;;  %s1752_s20 = sshll.u32 %s2386_s9, 7 }
  0x10   : > { %s2162_s16 = scalar_lea.vmem %s2379_s1, %s1750_s13  ;;  %s2199_s19 = scalar_lea.vmem %s2378_s0, %s1750_s13 }
  0x11   : > { %v2033_v0 = vld [vmem:[%s2162_s16 + $0x40] sm:$0xff]   ;;  %v2037_v4 = vld [vmem:[%s2162_s16 + $0x48] sm:$0xff]   ;;  %v2041_v8 = vld [vmem:[%s2162_s16 + $0x50] sm:$0xff]   ;;  %s2336_s23 = scalar_lea.vmem %s2380_s2, %s1752_s20 }
  0x12   : > { %v2034_v1 = vld [vmem:[%s2162_s16 + $0xc0] sm:$0xff]   ;;  %1753 = vmatprep.subr.bf16.mxu0 %v2033_v0  ;;  %v2038_v5 = vld [vmem:[%s2162_s16 + $0xc8] sm:$0xff]   ;;  %v2042_v9 = vld [vmem:[%s2162_s16 + $0xd0] sm:$0xff]  }
  0x13   : > { %v2035_v2 = vld [vmem:[%s2162_s16] sm:$0xff]   ;;  %1817 = vmatprep.subr.bf16.mxu1 %v2034_v1  ;;  %v2039_v6 = vld [vmem:[%s2162_s16 + $0x8] sm:$0xff]   ;;  %v2043_v10 = vld [vmem:[%s2162_s16 + $0x10] sm:$0xff]  }
  0x14   : > { %v2036_v3 = vld [vmem:[%s2162_s16 + $0x80] sm:$0xff]   ;;  %1754 = vmatpush3.bf16.msra.mxu0 %v2035_v2  ;;  %v2040_v7 = vld [vmem:[%s2162_s16 + $0x88] sm:$0xff]   ;;  %v2044_v11 = vld [vmem:[%s2162_s16 + $0x90] sm:$0xff]  }
  0x15   : > { %1818 = vmatpush3.bf16.msra.mxu1 %v2036_v3  ;;  %1755 = vmatprep.subr.bf16.mxu0 %v2037_v4  ;;  %v2045_v12 = vld [vmem:[%s2162_s16 + $0x58] sm:$0xff]   ;;  %v2049_v16 = vld [vmem:[%s2162_s16 + $0x60] sm:$0xff]   ;;  %v2053_v20 = vld [vmem:[%s2162_s16 + $0x68] sm:$0xff]  }
  0x16   : > { %1819 = vmatprep.subr.bf16.mxu1 %v2038_v5  ;;  %v2046_v13 = vld [vmem:[%s2162_s16 + $0xd8] sm:$0xff]   ;;  %v2050_v17 = vld [vmem:[%s2162_s16 + $0xe0] sm:$0xff]   ;;  %v2054_v21 = vld [vmem:[%s2162_s16 + $0xe8] sm:$0xff]  }
  0x17   : > { %v2047_v14 = vld [vmem:[%s2162_s16 + $0x18] sm:$0xff]   ;;  %v2051_v18 = vld [vmem:[%s2162_s16 + $0x20] sm:$0xff]   ;;  %v2055_v22 = vld [vmem:[%s2162_s16 + $0x28] sm:$0xff]  }
  0x18   : > { %1756 = vmatpush3.bf16.msra.mxu0 %v2039_v6  ;;  %v2048_v15 = vld [vmem:[%s2162_s16 + $0x98] sm:$0xff]   ;;  %v2052_v19 = vld [vmem:[%s2162_s16 + $0xa0] sm:$0xff]   ;;  %v2056_v23 = vld [vmem:[%s2162_s16 + $0xa8] sm:$0xff]  }
  0x19   : > { %1820 = vmatpush3.bf16.msra.mxu1 %v2040_v7  ;;  %1757 = vmatprep.subr.bf16.mxu0 %v2041_v8  ;;  %v2057_v24 = vld [vmem:[%s2162_s16 + $0x70] sm:$0xff]   ;;  %v2061_v28 = vld [vmem:[%s2162_s16 + $0x78] sm:$0xff]   ;;  %v207_v32 = vld [vmem:[%s2199_s19] sm:$0xff] }
  0x1a   : > { %1821 = vmatprep.subr.bf16.mxu1 %v2042_v9  ;;  %v2058_v25 = vld [vmem:[%s2162_s16 + $0xf0] sm:$0xff]   ;;  %v2062_v29 = vld [vmem:[%s2162_s16 + $0xf8] sm:$0xff]   ;;  %v211_v33 = vld [vmem:[%s2199_s19 + $0x20] sm:$0xff] }
  0x1b   : > { %v2059_v26 = vld [vmem:[%s2162_s16 + $0x30] sm:$0xff]   ;;  %v2063_v30 = vld [vmem:[%s2162_s16 + $0x38] sm:$0xff]   ;;  %v208_v34 = vld [vmem:[%s2199_s19 + $0x8] sm:$0xff]  ;;  %v1620_v35 = vcombine.low %v207_v32, %v211_v33  ;;  %v1621_v36 = vcombine.high %v207_v32, %v211_v33 }
  0x1c   : > { %1758 = vmatpush3.bf16.msra.mxu0 %v2043_v10  ;;  %v2060_v27 = vld [vmem:[%s2162_s16 + $0xb0] sm:$0xff]   ;;  %v2064_v31 = vld [vmem:[%s2162_s16 + $0xb8] sm:$0xff]   ;;  %v212_v37 = vld [vmem:[%s2199_s19 + $0x28] sm:$0xff] }
  0x1d   : > { %1822 = vmatpush3.bf16.msra.mxu1 %v2044_v11  ;;  %1759 = vmatprep.subr.bf16.mxu0 %v2045_v12  ;;  %v1622_v38 = vcombine.low %v208_v34, %v212_v37  ;;  %v1623_v39 = vcombine.high %v208_v34, %v212_v37  ;;  %v2065_v40 = vld [vmem:[%s2162_s16 + $0x140] sm:$0xff]   ;;  %v216_v47 = vld [vmem:[%s2199_s19 + $0x48] sm:$0xff]  ;;  %v2073_v62 = vld [vmem:[%s2162_s16 + $0x150] sm:$0xff]  }
  0x1e   : > { %1823 = vmatprep.subr.bf16.mxu1 %v2046_v13  ;;  %1135 = vmatprep.mubr.bf16.mxu0 %v1621_v36  ;;  %v2066_v41 = vld [vmem:[%s2162_s16 + $0x100] sm:$0xff]   ;;  %v220_v48 = vld [vmem:[%s2199_s19 + $0x68] sm:$0xff]  ;;  %v2074_v63 = vld [vmem:[%s2162_s16 + $0x110] sm:$0xff]  }
  0x1f   : > { %1232 = vmatprep.mubr.bf16.mxu1 %v1623_v39  ;;  %v2067_v42 = vld [vmem:[%s2162_s16 + $0x1c0] sm:$0xff]   ;;  %v1631_v49 = vcombine.high %v216_v47, %v220_v48  ;;  %v2069_v50 = vld [vmem:[%s2162_s16 + $0x148] sm:$0xff]   ;;  %v1630_v53 = vcombine.low %v216_v47, %v220_v48  ;;  %v2075_v0 = vld [vmem:[%s2162_s16 + $0x1d0] sm:$0xff]  }
  0x20   : > { %1760 = vmatpush3.bf16.msra.mxu0 %v2047_v14  ;;  %v2068_v43 = vld [vmem:[%s2162_s16 + $0x180] sm:$0xff]   ;;  %v2070_v52 = vld [vmem:[%s2162_s16 + $0x108] sm:$0xff]   ;;  %v2076_v1 = vld [vmem:[%s2162_s16 + $0x190] sm:$0xff]  }
  0x21   : > { %1824 = vmatpush3.bf16.msra.mxu1 %v2048_v15  ;;  %1761 = vmatprep.subr.bf16.mxu0 %v2049_v16  ;;  %v215_v44 = vld [vmem:[%s2199_s19 + $0x40] sm:$0xff]  ;;  %v2071_v54 = vld [vmem:[%s2162_s16 + $0x1c8] sm:$0xff]   ;;  %v2077_v10 = vld [vmem:[%s2162_s16 + $0x158] sm:$0xff]  }
  0x22   : > { %1825 = vmatprep.subr.bf16.mxu1 %v2050_v17  ;;  %v219_v45 = vld [vmem:[%s2199_s19 + $0x60] sm:$0xff]  ;;  %v2072_v55 = vld [vmem:[%s2162_s16 + $0x188] sm:$0xff]   ;;  %v2078_v11 = vld [vmem:[%s2162_s16 + $0x118] sm:$0xff]  }
  0x23   : > { %v1629_v46 = vcombine.high %v215_v44, %v219_v45  ;;  %v1628_v51 = vcombine.low %v215_v44, %v219_v45  ;;  %v223_v56 = vld [vmem:[%s2199_s19 + $0x80] sm:$0xff]  ;;  %v224_v58 = vld [vmem:[%s2199_s19 + $0x88] sm:$0xff]  ;;  %v2079_v12 = vld [vmem:[%s2162_s16 + $0x1d8] sm:$0xff]  }
  0x24   : > { %1762 = vmatpush3.bf16.msra.mxu0 %v2051_v18  ;;  %v227_v57 = vld [vmem:[%s2199_s19 + $0xa0] sm:$0xff]  ;;  %v228_v59 = vld [vmem:[%s2199_s19 + $0xa8] sm:$0xff]  ;;  %v2080_v13 = vld [vmem:[%s2162_s16 + $0x198] sm:$0xff]  }
  0x25   : > { %1826 = vmatpush3.bf16.msra.mxu1 %v2052_v19  ;;  %1763 = vmatprep.subr.bf16.mxu0 %v2053_v20  ;;  %v1637_v60 = vcombine.high %v223_v56, %v227_v57  ;;  %v1639_v61 = vcombine.high %v224_v58, %v228_v59  ;;  %v1636_v2 = vcombine.low %v223_v56, %v227_v57  ;;  %v231_v3 = vld [vmem:[%s2199_s19 + $0xc0] sm:$0xff]  ;;  %v232_v5 = vld [vmem:[%s2199_s19 + $0xc8] sm:$0xff]  ;;  %v2090_v39 = vld [vmem:[%s2162_s16 + $0x130] sm:$0xff]  }
  0x26   : > { %1827 = vmatprep.subr.bf16.mxu1 %v2054_v21  ;;  %v235_v4 = vld [vmem:[%s2199_s19 + $0xe0] sm:$0xff]  ;;  %v1638_v6 = vcombine.low %v224_v58, %v228_v59  ;;  %v236_v8 = vld [vmem:[%s2199_s19 + $0xe8] sm:$0xff]  ;;  %v2094_v48 = vld [vmem:[%s2162_s16 + $0x138] sm:$0xff]  }
  0x27   : > { %v1645_v7 = vcombine.high %v231_v3, %v235_v4  ;;  %v1647_v9 = vcombine.high %v232_v5, %v236_v8  ;;  %v239_v14 = vld [vmem:[%s2199_s19 + $0x100] sm:$0xff]  ;;  %v240_v16 = vld [vmem:[%s2199_s19 + $0x108] sm:$0xff]  ;;  %v1644_v19 = vcombine.low %v231_v3, %v235_v4  ;;  %v1646_v21 = vcombine.low %v232_v5, %v236_v8  ;;  %v218_v8 = vld [vmem:[%s2199_s19 + $0x58] sm:$0xff] }
  0x28   : > { %1764 = vmatpush3.bf16.msra.mxu0 %v2055_v22  ;;  %v243_v15 = vld [vmem:[%s2199_s19 + $0x120] sm:$0xff]  ;;  %v244_v17 = vld [vmem:[%s2199_s19 + $0x128] sm:$0xff] }
  0x29   : > { %1828 = vmatpush3.bf16.msra.mxu1 %v2056_v23  ;;  %1765 = vmatprep.subr.bf16.mxu0 %v2057_v24  ;;  %v2081_v18 = vld [vmem:[%s2162_s16 + $0x160] sm:$0xff]   ;;  %v1653_v22 = vcombine.high %v239_v14, %v243_v15  ;;  %v1655_v24 = vcombine.high %v240_v16, %v244_v17  ;;  %v2087_v32 = vld [vmem:[%s2162_s16 + $0x1e8] sm:$0xff]   ;;  %v1652_v34 = vcombine.low %v239_v14, %v243_v15  ;;  %v225_v14 = vld [vmem:[%s2199_s19 + $0x90] sm:$0xff] }
  0x2a   : > { %1829 = vmatprep.subr.bf16.mxu1 %v2058_v25  ;;  %v2082_v20 = vld [vmem:[%s2162_s16 + $0x120] sm:$0xff]   ;;  %v2088_v33 = vld [vmem:[%s2162_s16 + $0x1a8] sm:$0xff]   ;;  %v229_v15 = vld [vmem:[%s2199_s19 + $0xb0] sm:$0xff] }
  0x2b   : > { %v2083_v23 = vld [vmem:[%s2162_s16 + $0x1e0] sm:$0xff]   ;;  %v256_v44 = vld [vmem:[%s2199_s19 + $0x188] sm:$0xff] }
  0x2c   : > { %1766 = vmatpush3.bf16.msra.mxu0 %v2059_v26  ;;  %v2084_v25 = vld [vmem:[%s2162_s16 + $0x1a0] sm:$0xff]   ;;  %v260_v45 = vld [vmem:[%s2199_s19 + $0x1a8] sm:$0xff] }
  0x2d   : > { %1830 = vmatpush3.bf16.msra.mxu1 %v2060_v27  ;;  %1767 = vmatprep.subr.bf16.mxu0 %v2061_v28  ;;  %v247_v26 = vld [vmem:[%s2199_s19 + $0x140] sm:$0xff]  ;;  %v2085_v28 = vld [vmem:[%s2162_s16 + $0x168] sm:$0xff]   ;;  %v1670_v59 = vcombine.low %v256_v44, %v260_v45 }
  0x2e   : > { %1831 = vmatprep.subr.bf16.mxu1 %v2062_v29  ;;  %v251_v27 = vld [vmem:[%s2199_s19 + $0x160] sm:$0xff]  ;;  %v248_v29 = vld [vmem:[%s2199_s19 + $0x148] sm:$0xff] }
  0x2f   : > { %v1661_v36 = vcombine.high %v247_v26, %v251_v27  ;;  %v1660_v47 = vcombine.low %v247_v26, %v251_v27  ;;  %v264_v56 = vld [vmem:[%s2199_s19 + $0x1c8] sm:$0xff]  ;;  %v1640_v26 = vcombine.low %v225_v14, %v229_v15 }
  0x30   : > { %1768 = vmatpush3.bf16.msra.mxu0 %v2063_v30  ;;  %v252_v30 = vld [vmem:[%s2199_s19 + $0x168] sm:$0xff] }
  0x31   : > { %1832 = vmatpush3.bf16.msra.mxu1 %v2064_v31  ;;  %1881 = vmatprep.subr.bf16.mxu0 %v2065_v40  ;;  %v2086_v31 = vld [vmem:[%s2162_s16 + $0x128] sm:$0xff]   ;;  %v1663_v37 = vcombine.high %v248_v29, %v252_v30  ;;  %v2091_v40 = vld [vmem:[%s2162_s16 + $0x1f0] sm:$0xff]  }
  0x32   : > { %1945 = vmatprep.subr.bf16.mxu1 %v2067_v42  ;;  %v259_v42 = vld [vmem:[%s2199_s19 + $0x1a0] sm:$0xff]  ;;  %v268_v57 = vld [vmem:[%s2199_s19 + $0x1e8] sm:$0xff] }
  0x33   : > { %1136 = vmatmul.mubr.bf16.vlgmr.msra.gmra.mrb[0].mxu0 %v1620_v35  ;;  %v1654_v35 = vcombine.low %v240_v16, %v244_v17  ;;  %v1678_v3 = vcombine.low %v264_v56, %v268_v57  ;;  %v226_v16 = vld [vmem:[%s2199_s19 + $0x98] sm:$0xff] }
  0x34   : > { %1233 = vmatmul.mubr.bf16.vlgmr.msra.gmra.mrb[0].mxu1 %v1622_v38  ;;  %1882 = vmatpush3.bf16.msra.mxu0 %v2066_v41  ;;  %v2089_v38 = vld [vmem:[%s2162_s16 + $0x170] sm:$0xff]   ;;  %v255_v41 = vld [vmem:[%s2199_s19 + $0x180] sm:$0xff]  ;;  %v230_v17 = vld [vmem:[%s2199_s19 + $0xb8] sm:$0xff] }
  0x35   : > { %1946 = vmatpush3.bf16.msra.mxu1 %v2068_v43  ;;  %1143 = vmatprep.mubr.bf16.mxu0 %v1629_v46  ;;  %v2092_v43 = vld [vmem:[%s2162_s16 + $0x1b0] sm:$0xff]   ;;  %v2093_v46 = vld [vmem:[%s2162_s16 + $0x178] sm:$0xff]   ;;  %v1668_v58 = vcombine.low %v255_v41, %v259_v42  ;;  %v1642_v27 = vcombine.low %v226_v16, %v230_v17 }
  0x36   : > { %1240 = vmatprep.mubr.bf16.mxu1 %v1631_v49  ;;  %1883 = vmatprep.subr.bf16.mxu0 %v2069_v50  ;;  %v1662_v49 = vcombine.low %v248_v29, %v252_v30  ;;  %v1669_v50 = vcombine.high %v255_v41, %v259_v42  ;;  %v241_v30 = vld [vmem:[%s2199_s19 + $0x110] sm:$0xff]  ;;  %v254_v41 = vld [vmem:[%s2199_s19 + $0x178] sm:$0xff] }
  0x37   : > { %1947 = vmatprep.subr.bf16.mxu1 %v2071_v54  ;;  %v263_v54 = vld [vmem:[%s2199_s19 + $0x1c0] sm:$0xff] }
  0x38   : > { %1884 = vmatpush3.bf16.msra.mxu0 %v2070_v52  ;;  %v1671_v52 = vcombine.high %v256_v44, %v260_v45 }
  0x39   : > { %1948 = vmatpush3.bf16.msra.mxu1 %v2072_v55  ;;  %1885 = vmatprep.subr.bf16.mxu0 %v2073_v62  ;;  %v267_v55 = vld [vmem:[%s2199_s19 + $0x1e0] sm:$0xff]  ;;  %v209_v62 = vld [vmem:[%s2199_s19 + $0x10] sm:$0xff] }
  0x3a   : > { %1949 = vmatprep.subr.bf16.mxu1 %v2075_v0  ;;  %v210_v0 = vld [vmem:[%s2199_s19 + $0x18] sm:$0xff] }
  0x3b   : > { %1144 = vmatmul.mubr.bf16.gmra.mrb[4].mxu0 %v1628_v51  ;;  %v2095_v51 = vld [vmem:[%s2162_s16 + $0x1f8] sm:$0xff]  }
  0x3c   : > { %1241 = vmatmul.mubr.bf16.gmra.mrb[4].mxu1 %v1630_v53  ;;  %1151 = vmatprep.mubr.bf16.mxu0 %v1637_v60  ;;  %v2096_v53 = vld [vmem:[%s2162_s16 + $0x1b8] sm:$0xff]   ;;  %v1677_v60 = vcombine.high %v263_v54, %v267_v55 }
  0x3d   : > { %1248 = vmatprep.mubr.bf16.mxu1 %v1639_v61  ;;  %1886 = vmatpush3.bf16.msra.mxu0 %v2074_v63  ;;  %v1679_v61 = vcombine.high %v264_v56, %v268_v57  ;;  %v213_v63 = vld [vmem:[%s2199_s19 + $0x30] sm:$0xff]  ;;  %v266_v56 = vld [vmem:[%s2199_s19 + $0x1d8] sm:$0xff] }
  0x3e   : > { %1950 = vmatpush3.bf16.msra.mxu1 %v2076_v1  ;;  %1887 = vmatprep.subr.bf16.mxu0 %v2077_v10  ;;  %v214_v1 = vld [vmem:[%s2199_s19 + $0x38] sm:$0xff]  ;;  %v1625_v4 = vcombine.high %v209_v62, %v213_v63  ;;  %v1624_v10 = vcombine.low %v209_v62, %v213_v63 }
  0x3f   : > { %1951 = vmatprep.subr.bf16.mxu1 %v2079_v12  ;;  %v1627_v5 = vcombine.high %v210_v0, %v214_v1  ;;  %v270_v57 = vld [vmem:[%s2199_s19 + $0x1f8] sm:$0xff] }
  0x40   : > { %v1682_v63 = vcombine.low %v266_v56, %v270_v57 }
  0x41   : > { %1888 = vmatpush3.bf16.msra.mxu0 %v2078_v11  ;;  %v1626_v11 = vcombine.low %v210_v0, %v214_v1 }
  0x42   : > { %1952 = vmatpush3.bf16.msra.mxu1 %v2080_v13  ;;  %1889 = vmatprep.subr.bf16.mxu0 %v2081_v18 }
  0x43   : > { %1152 = vmatmul.mubr.bf16.gmra.mrb[8].mxu0 %v1636_v2  ;;  %1953 = vmatprep.subr.bf16.mxu1 %v2083_v23  ;;  %v1676_v2 = vcombine.low %v263_v54, %v267_v55  ;;  %v237_v23 = vld [vmem:[%s2199_s19 + $0xf0] sm:$0xff] }
  0x44   : > { %1249 = vmatmul.mubr.bf16.gmra.mrb[8].mxu1 %v1638_v6  ;;  %1159 = vmatprep.mubr.bf16.mxu0 %v1645_v7  ;;  %v217_v6 = vld [vmem:[%s2199_s19 + $0x50] sm:$0xff] }
  0x45   : > { %1256 = vmatprep.mubr.bf16.mxu1 %v1647_v9  ;;  %1890 = vmatpush3.bf16.msra.mxu0 %v2082_v20  ;;  %v221_v7 = vld [vmem:[%s2199_s19 + $0x70] sm:$0xff]  ;;  %v222_v9 = vld [vmem:[%s2199_s19 + $0x78] sm:$0xff]  ;;  %v1641_v20 = vcombine.high %v225_v14, %v229_v15 }
  0x46   : > { %1954 = vmatpush3.bf16.msra.mxu1 %v2084_v25  ;;  %1891 = vmatprep.subr.bf16.mxu0 %v2085_v28  ;;  %v1633_v12 = vcombine.high %v217_v6, %v221_v7  ;;  %v1635_v13 = vcombine.high %v218_v8, %v222_v9  ;;  %v1632_v18 = vcombine.low %v217_v6, %v221_v7  ;;  %v238_v25 = vld [vmem:[%s2199_s19 + $0xf8] sm:$0xff]  ;;  %v265_v54 = vld [vmem:[%s2199_s19 + $0x1d0] sm:$0xff] }
  0x47   : > { %1955 = vmatprep.subr.bf16.mxu1 %v2087_v32  ;;  %v242_v32 = vld [vmem:[%s2199_s19 + $0x118] sm:$0xff]  ;;  %v269_v55 = vld [vmem:[%s2199_s19 + $0x1f0] sm:$0xff] }
  0x48   : > { %v1680_v62 = vcombine.low %v265_v54, %v269_v55 }
  0x49   : > { %1892 = vmatpush3.bf16.msra.mxu0 %v2086_v31  ;;  %v245_v31 = vld [vmem:[%s2199_s19 + $0x130] sm:$0xff] }
  0x4a   : > { %1956 = vmatpush3.bf16.msra.mxu1 %v2088_v33  ;;  %1893 = vmatprep.subr.bf16.mxu0 %v2089_v38  ;;  %v246_v33 = vld [vmem:[%s2199_s19 + $0x138] sm:$0xff]  ;;  %v249_v38 = vld [vmem:[%s2199_s19 + $0x150] sm:$0xff]  ;;  %v1656_v42 = vcombine.low %v241_v30, %v245_v31 }
  0x4b   : > { %1160 = vmatmul.mubr.bf16.gmra.mrb[12].mxu0 %v1644_v19  ;;  %1957 = vmatprep.subr.bf16.mxu1 %v2091_v40  ;;  %v1634_v19 = vcombine.low %v218_v8, %v222_v9  ;;  %v250_v40 = vld [vmem:[%s2199_s19 + $0x158] sm:$0xff] }
  0x4c   : > { %1257 = vmatmul.mubr.bf16.gmra.mrb[12].mxu1 %v1646_v21  ;;  %1167 = vmatprep.mubr.bf16.mxu0 %v1653_v22  ;;  %v1643_v21 = vcombine.high %v226_v16, %v230_v17  ;;  %v233_v22 = vld [vmem:[%s2199_s19 + $0xd0] sm:$0xff]  ;;  %v1667_v45 = vcombine.high %v250_v40, %v254_v41 }
  0x4d   : > { %1264 = vmatprep.mubr.bf16.mxu1 %v1655_v24  ;;  %1894 = vmatpush3.bf16.msra.mxu0 %v2090_v39  ;;  %v234_v24 = vld [vmem:[%s2199_s19 + $0xd8] sm:$0xff]  ;;  %v1649_v28 = vcombine.high %v233_v22, %v237_v23  ;;  %v253_v39 = vld [vmem:[%s2199_s19 + $0x170] sm:$0xff] }
  0x4e   : > { %1958 = vmatpush3.bf16.msra.mxu1 %v2092_v43  ;;  %1895 = vmatprep.subr.bf16.mxu0 %v2093_v46  ;;  %v1651_v29 = vcombine.high %v234_v24, %v238_v25  ;;  %v1658_v43 = vcombine.low %v242_v32, %v246_v33  ;;  %v1665_v44 = vcombine.high %v249_v38, %v253_v39  ;;  %v257_v46 = vld [vmem:[%s2199_s19 + $0x190] sm:$0xff] }
  0x4f   : > { %1959 = vmatprep.subr.bf16.mxu1 %v2095_v51  ;;  %v1666_v51 = vcombine.low %v250_v40, %v254_v41 }
  0x51   : > { %1896 = vmatpush3.bf16.msra.mxu0 %v2094_v48  ;;  %v258_v48 = vld [vmem:[%s2199_s19 + $0x198] sm:$0xff] }
  0x52   : > { %1960 = vmatpush3.bf16.msra.mxu1 %v2096_v53 }
  0x53   : > { %1168 = vmatmul.mubr.bf16.gmra.mrb[16].mxu0 %v1652_v34  ;;  %v1648_v34 = vcombine.low %v233_v22, %v237_v23 }
  0x54   : > { %1265 = vmatmul.mubr.bf16.gmra.mrb[16].mxu1 %v1654_v35  ;;  %1175 = vmatprep.mubr.bf16.mxu0 %v1661_v36  ;;  %v1650_v35 = vcombine.low %v234_v24, %v238_v25  ;;  %v1657_v36 = vcombine.high %v241_v30, %v245_v31 }
  0x55   : > { %1272 = vmatprep.mubr.bf16.mxu1 %v1663_v37  ;;  %v1659_v37 = vcombine.high %v242_v32, %v246_v33 }
  0x5b   : > { %1176 = vmatmul.mubr.bf16.gmra.mrb[20].mxu0 %v1660_v47  ;;  %v261_v47 = vld [vmem:[%s2199_s19 + $0x1b0] sm:$0xff] }
  0x5c   : > { %1273 = vmatmul.mubr.bf16.gmra.mrb[20].mxu1 %v1662_v49  ;;  %1183 = vmatprep.mubr.bf16.mxu0 %v1669_v50  ;;  %v262_v49 = vld [vmem:[%s2199_s19 + $0x1b8] sm:$0xff]  ;;  %v1664_v50 = vcombine.low %v249_v38, %v253_v39 }
  0x5d   : > { %1280 = vmatprep.mubr.bf16.mxu1 %v1671_v52  ;;  %v1673_v52 = vcombine.high %v257_v46, %v261_v47  ;;  %v1675_v53 = vcombine.high %v258_v48, %v262_v49 }
  0x63   : > { %1184 = vmatmul.mubr.bf16.gmra.mrb[24].mxu0 %v1668_v58  ;;  %v1672_v58 = vcombine.low %v257_v46, %v261_v47 }
  0x64   : > { %1281 = vmatmul.mubr.bf16.gmra.mrb[24].mxu1 %v1670_v59  ;;  %1191 = vmatprep.mubr.bf16.mxu0 %v1677_v60  ;;  %v1674_v59 = vcombine.low %v258_v48, %v262_v49  ;;  %v1681_v60 = vcombine.high %v265_v54, %v269_v55 }
  0x65   : > { %1288 = vmatprep.mubr.bf16.mxu1 %v1679_v61  ;;  %v1683_v61 = vcombine.high %v266_v56, %v270_v57 }
  0x6b   : > { %1192 = vmatmul.mubr.bf16.gmra.mrb[28].mxu0 %v1676_v2 }
  0x6c   : > { %1289 = vmatmul.mubr.bf16.gmra.mrb[28].mxu1 %v1678_v3  ;;  %1329 = vmatprep.mubr.bf16.mxu0 %v1625_v4 }
  0x6d   : > { %1426 = vmatprep.mubr.bf16.mxu1 %v1627_v5 }
  0x73   : > { %1330 = vmatmul.mubr.bf16.vlgmr.msra.gmra.mrb[32].mxu0 %v1624_v10 }
  0x74   : > { %1427 = vmatmul.mubr.bf16.vlgmr.msra.gmra.mrb[32].mxu1 %v1626_v11  ;;  %1337 = vmatprep.mubr.bf16.mxu0 %v1633_v12 }
  0x75   : > { %1434 = vmatprep.mubr.bf16.mxu1 %v1635_v13 }
  0x7b   : > { %1338 = vmatmul.mubr.bf16.gmra.mrb[36].mxu0 %v1632_v18 }
  0x7c   : > { %1435 = vmatmul.mubr.bf16.gmra.mrb[36].mxu1 %v1634_v19  ;;  %1345 = vmatprep.mubr.bf16.mxu0 %v1641_v20 }
  0x7d   : > { %1442 = vmatprep.mubr.bf16.mxu1 %v1643_v21 }
  0x83   : > { %1346 = vmatmul.mubr.bf16.gmra.mrb[40].mxu0 %v1640_v26 }
  0x84   : > { %1443 = vmatmul.mubr.bf16.gmra.mrb[40].mxu1 %v1642_v27  ;;  %1353 = vmatprep.mubr.bf16.mxu0 %v1649_v28 }
  0x85   : > { %1450 = vmatprep.mubr.bf16.mxu1 %v1651_v29 }
  0x8b   : > { %1354 = vmatmul.mubr.bf16.gmra.mrb[44].mxu0 %v1648_v34 }
  0x8c   : > { %1451 = vmatmul.mubr.bf16.gmra.mrb[44].mxu1 %v1650_v35  ;;  %1361 = vmatprep.mubr.bf16.mxu0 %v1657_v36 }
  0x8d   : > { %1458 = vmatprep.mubr.bf16.mxu1 %v1659_v37 }
  0x93   : > { %1362 = vmatmul.mubr.bf16.gmra.mrb[48].mxu0 %v1656_v42 }
  0x94   : > { %1459 = vmatmul.mubr.bf16.gmra.mrb[48].mxu1 %v1658_v43  ;;  %1369 = vmatprep.mubr.bf16.mxu0 %v1665_v44 }
  0x95   : > { %1466 = vmatprep.mubr.bf16.mxu1 %v1667_v45 }
  0x9b   : > { %1370 = vmatmul.mubr.bf16.gmra.mrb[52].mxu0 %v1664_v50 }
  0x9c   : > { %1467 = vmatmul.mubr.bf16.gmra.mrb[52].mxu1 %v1666_v51  ;;  %1377 = vmatprep.mubr.bf16.mxu0 %v1673_v52 }
  0x9d   : > { %1474 = vmatprep.mubr.bf16.mxu1 %v1675_v53 }
  0xa3   : > { %1378 = vmatmul.mubr.bf16.gmra.mrb[56].mxu0 %v1672_v58 }
  0xa4   : > { %1475 = vmatmul.mubr.bf16.gmra.mrb[56].mxu1 %v1674_v59  ;;  %1385 = vmatprep.mubr.bf16.mxu0 %v1681_v60 }
  0xa5   : > { %1482 = vmatprep.mubr.bf16.mxu1 %v1683_v61 }
  0xab   : > { %1386 = vmatmul.mubr.bf16.gmra.mrb[60].mxu0 %v1680_v62 }
  0xac   : > { %1483 = vmatmul.mubr.bf16.gmra.mrb[60].mxu1 %v1682_v63 }
 0x106   : > { %v1769_v0 = vpop.f32.mrb[0].mxu0 }
 0x107   : > { %v1833_v1 = vpop.f32.mrb[0].mxu1  ;;  %v1770_v2 = vpop.f32.mrb[1].mxu0 }
 0x108   : > { %v1771_v3 = vadd.f32 %v1770_v2, %v1769_v0  ;;  %v1834_v4 = vpop.f32.mrb[1].mxu1  ;;  %v1772_v5 = vpop.f32.mrb[2].mxu0 }
 0x109   : > { %v1835_v6 = vadd.f32 %v1834_v4, %v1833_v1  ;;  %v1836_v7 = vpop.f32.mrb[2].mxu1  ;;  %v1773_v8 = vpop.f32.mrb[3].mxu0 }
 0x10a   : > { %v1774_v9 = vadd.f32 %v1773_v8, %v1772_v5  ;;  %v1837_v10 = vpop.f32.mrb[3].mxu1 }
 0x10b   : > { %v2299_v11 = vadd.f32 %v1835_v6, %v1771_v3  ;;  %v1838_v12 = vadd.f32 %v1837_v10, %v1836_v7 }
 0x10d   : > { %v2301_v13 = vadd.f32 %v1838_v12, %v1774_v9 }
 0x10e   : > { %v1775_v14 = vpop.f32.mrb[4].mxu0 }
 0x10f   : > { %v1839_v15 = vpop.f32.mrb[4].mxu1  ;;  %v1776_v16 = vpop.f32.mrb[5].mxu0 }
 0x110   : > { %v1777_v17 = vadd.f32 %v1776_v16, %v1775_v14  ;;  %v1840_v18 = vpop.f32.mrb[5].mxu1  ;;  %v1778_v19 = vpop.f32.mrb[6].mxu0 }
 0x111   : > { %v1841_v20 = vadd.f32 %v1840_v18, %v1839_v15  ;;  %v1842_v21 = vpop.f32.mrb[6].mxu1  ;;  %v1779_v22 = vpop.f32.mrb[7].mxu0 }
 0x112   : > { %v1780_v23 = vadd.f32 %v1779_v22, %v1778_v19  ;;  %v1843_v24 = vpop.f32.mrb[7].mxu1 }
 0x113   : > { %v2303_v25 = vadd.f32 %v1841_v20, %v1777_v17  ;;  %v1844_v26 = vadd.f32 %v1843_v24, %v1842_v21 }
 0x115   : > { %v2305_v27 = vadd.f32 %v1844_v26, %v1780_v23 }
 0x116   : > { %v1781_v28 = vpop.f32.mrb[8].mxu0 }
 0x117   : > { %v1845_v29 = vpop.f32.mrb[8].mxu1  ;;  %v1782_v30 = vpop.f32.mrb[9].mxu0 }
 0x118   : > { %v1783_v31 = vadd.f32 %v1782_v30, %v1781_v28  ;;  %v1846_v32 = vpop.f32.mrb[9].mxu1  ;;  %v1784_v33 = vpop.f32.mrb[10].mxu0 }
 0x119   : > { %v1847_v34 = vadd.f32 %v1846_v32, %v1845_v29  ;;  %v1848_v35 = vpop.f32.mrb[10].mxu1  ;;  %v1785_v36 = vpop.f32.mrb[11].mxu0 }
 0x11a   : > { %v1786_v37 = vadd.f32 %v1785_v36, %v1784_v33  ;;  %v1849_v38 = vpop.f32.mrb[11].mxu1 }
 0x11b   : > { %v2307_v39 = vadd.f32 %v1847_v34, %v1783_v31  ;;  %v1850_v40 = vadd.f32 %v1849_v38, %v1848_v35 }
 0x11d   : > { %v2309_v41 = vadd.f32 %v1850_v40, %v1786_v37 }
 0x11e   : > { %v1787_v42 = vpop.f32.mrb[12].mxu0 }
 0x11f   : > { %v1851_v43 = vpop.f32.mrb[12].mxu1  ;;  %v1788_v44 = vpop.f32.mrb[13].mxu0 }
 0x120   : > { %v1789_v45 = vadd.f32 %v1788_v44, %v1787_v42  ;;  %v1852_v46 = vpop.f32.mrb[13].mxu1  ;;  %v1790_v47 = vpop.f32.mrb[14].mxu0 }
 0x121   : > { %v1853_v48 = vadd.f32 %v1852_v46, %v1851_v43  ;;  %v1854_v49 = vpop.f32.mrb[14].mxu1  ;;  %v1791_v50 = vpop.f32.mrb[15].mxu0 }
 0x122   : > { %v1792_v51 = vadd.f32 %v1791_v50, %v1790_v47  ;;  %v1855_v52 = vpop.f32.mrb[15].mxu1 }
 0x123   : > { %v2311_v53 = vadd.f32 %v1853_v48, %v1789_v45  ;;  %v1856_v54 = vadd.f32 %v1855_v52, %v1854_v49 }
 0x125   : > { %v2313_v55 = vadd.f32 %v1856_v54, %v1792_v51 }
 0x126   : > { %v1793_v56 = vpop.f32.mrb[16].mxu0 }
 0x127   : > { %v1857_v57 = vpop.f32.mrb[16].mxu1  ;;  %v1794_v58 = vpop.f32.mrb[17].mxu0 }
 0x128   : > { %v1795_v59 = vadd.f32 %v1794_v58, %v1793_v56  ;;  %v1858_v60 = vpop.f32.mrb[17].mxu1  ;;  %v1796_v61 = vpop.f32.mrb[18].mxu0 }
 0x129   : > { %v1859_v62 = vadd.f32 %v1858_v60, %v1857_v57  ;;  %v1860_v63 = vpop.f32.mrb[18].mxu1  ;;  %v1797_v0 = vpop.f32.mrb[19].mxu0 }
 0x12a   : > { %v1798_v1 = vadd.f32 %v1797_v0, %v1796_v61  ;;  %v1861_v2 = vpop.f32.mrb[19].mxu1 }
 0x12b   : > { %v2315_v3 = vadd.f32 %v1859_v62, %v1795_v59  ;;  %v1862_v4 = vadd.f32 %v1861_v2, %v1860_v63 }
 0x12d   : > { %v2317_v5 = vadd.f32 %v1862_v4, %v1798_v1 }
 0x12e   : > { %v1799_v6 = vpop.f32.mrb[20].mxu0 }
 0x12f   : > { %v1863_v7 = vpop.f32.mrb[20].mxu1  ;;  %v1800_v8 = vpop.f32.mrb[21].mxu0 }
 0x130   : > { %v1801_v9 = vadd.f32 %v1800_v8, %v1799_v6  ;;  %v1864_v10 = vpop.f32.mrb[21].mxu1  ;;  %v1802_v12 = vpop.f32.mrb[22].mxu0 }
 0x131   : > { %v1865_v14 = vadd.f32 %v1864_v10, %v1863_v7  ;;  %v1866_v15 = vpop.f32.mrb[22].mxu1  ;;  %v1803_v16 = vpop.f32.mrb[23].mxu0 }
 0x132   : > { %v1804_v17 = vadd.f32 %v1803_v16, %v1802_v12  ;;  %v1867_v18 = vpop.f32.mrb[23].mxu1 }
 0x133   : > { %v2319_v19 = vadd.f32 %v1865_v14, %v1801_v9  ;;  %v1868_v20 = vadd.f32 %v1867_v18, %v1866_v15 }
 0x135   : > { %v2321_v21 = vadd.f32 %v1868_v20, %v1804_v17 }
 0x136   : > { %v1805_v22 = vpop.f32.mrb[24].mxu0 }
 0x137   : > { %v1869_v23 = vpop.f32.mrb[24].mxu1  ;;  %v1806_v24 = vpop.f32.mrb[25].mxu0 }
 0x138   : > { %v1807_v26 = vadd.f32 %v1806_v24, %v1805_v22  ;;  %v1870_v28 = vpop.f32.mrb[25].mxu1  ;;  %v1808_v29 = vpop.f32.mrb[26].mxu0 }
 0x139   : > { %v1871_v30 = vadd.f32 %v1870_v28, %v1869_v23  ;;  %v1872_v31 = vpop.f32.mrb[26].mxu1  ;;  %v1809_v32 = vpop.f32.mrb[27].mxu0 }
 0x13a   : > { %v1810_v33 = vadd.f32 %v1809_v32, %v1808_v29  ;;  %v1873_v34 = vpop.f32.mrb[27].mxu1 }
 0x13b   : > { %v2323_v35 = vadd.f32 %v1871_v30, %v1807_v26  ;;  %v1874_v36 = vadd.f32 %v1873_v34, %v1872_v31 }
 0x13d   : > { %v2325_v37 = vadd.f32 %v1874_v36, %v1810_v33 }
 0x13e   : > { %v1811_v38 = vpop.f32.mrb[28].mxu0 }
 0x13f   : > { %v1875_v40 = vpop.f32.mrb[28].mxu1  ;;  %v1812_v42 = vpop.f32.mrb[29].mxu0 }
 0x140   : > { %v1813_v43 = vadd.f32 %v1812_v42, %v1811_v38  ;;  %v1876_v44 = vpop.f32.mrb[29].mxu1  ;;  %v1814_v45 = vpop.f32.mrb[30].mxu0 }
 0x141   : > { %v1877_v46 = vadd.f32 %v1876_v44, %v1875_v40  ;;  %v1878_v47 = vpop.f32.mrb[30].mxu1  ;;  %v1815_v48 = vpop.f32.mrb[31].mxu0 }
 0x142   : > { %v1816_v49 = vadd.f32 %v1815_v48, %v1814_v45  ;;  %v1879_v50 = vpop.f32.mrb[31].mxu1 }
 0x143   : > { %v2327_v51 = vadd.f32 %v1877_v46, %v1813_v43  ;;  %v1880_v52 = vadd.f32 %v1879_v50, %v1878_v47 }
 0x145   : > { %v2329_v54 = vadd.f32 %v1880_v52, %v1816_v49 }
 0x146   : > { %v1897_v56 = vpop.f32.mrb[32].mxu0 }
 0x147   : > { %v1961_v57 = vpop.f32.mrb[32].mxu1  ;;  %v1898_v58 = vpop.f32.mrb[33].mxu0 }
 0x148   : > { %v1899_v59 = vadd.f32 %v1898_v58, %v1897_v56  ;;  %v1962_v60 = vpop.f32.mrb[33].mxu1  ;;  %v1900_v61 = vpop.f32.mrb[34].mxu0 }
 0x149   : > { %v1963_v62 = vadd.f32 %v1962_v60, %v1961_v57  ;;  %v1964_v63 = vpop.f32.mrb[34].mxu1  ;;  %v1901_v0 = vpop.f32.mrb[35].mxu0 }
 0x14a   : > { %v1332_v1 = vadd.f32 %v1899_v59, %v2299_v11  ;;  %v1902_v2 = vadd.f32 %v1901_v0, %v1900_v61  ;;  %v1965_v4 = vpop.f32.mrb[35].mxu1 }
 0x14b   : > { %v1966_v6 = vadd.f32 %v1965_v4, %v1964_v63 }
 0x14c   : > { %v1429_v7 = vadd.f32 %v1963_v62, %v1332_v1  ;;  %v1335_v8 = vadd.f32 %v1902_v2, %v2301_v13 }
 0x14e   : > { %1491 = vst [vmem:[%s2336_s23] sm:$0xff] %v1429_v7  ;;  %v1432_v9 = vadd.f32 %v1966_v6, %v1335_v8  ;;  %v1903_v10 = vpop.f32.mrb[36].mxu0 }
 0x14f   : > { %v1967_v12 = vpop.f32.mrb[36].mxu1  ;;  %v1904_v14 = vpop.f32.mrb[37].mxu0 }
 0x150   : > { %1492 = vst [vmem:[%s2336_s23 + $0x8] sm:$0xff] %v1432_v9  ;;  %v1905_v11 = vadd.f32 %v1904_v14, %v1903_v10  ;;  %v1968_v15 = vpop.f32.mrb[37].mxu1  ;;  %v1906_v16 = vpop.f32.mrb[38].mxu0 }
 0x151   : > { %v1969_v17 = vadd.f32 %v1968_v15, %v1967_v12  ;;  %v1970_v18 = vpop.f32.mrb[38].mxu1  ;;  %v1907_v20 = vpop.f32.mrb[39].mxu0 }
 0x152   : > { %v1340_v22 = vadd.f32 %v1905_v11, %v2303_v25  ;;  %v1908_v23 = vadd.f32 %v1907_v20, %v1906_v16  ;;  %v1971_v24 = vpop.f32.mrb[39].mxu1 }
 0x153   : > { %v1972_v26 = vadd.f32 %v1971_v24, %v1970_v18 }
 0x154   : > { %v1437_v13 = vadd.f32 %v1969_v17, %v1340_v22  ;;  %v1343_v28 = vadd.f32 %v1908_v23, %v2305_v27 }
 0x156   : > { %1493 = vst [vmem:[%s2336_s23 + $0x10] sm:$0xff] %v1437_v13  ;;  %v1440_v29 = vadd.f32 %v1972_v26, %v1343_v28  ;;  %v1909_v30 = vpop.f32.mrb[40].mxu0 }
 0x157   : > { %v1973_v31 = vpop.f32.mrb[40].mxu1  ;;  %v1910_v32 = vpop.f32.mrb[41].mxu0 }
 0x158   : > { %1494 = vst [vmem:[%s2336_s23 + $0x18] sm:$0xff] %v1440_v29  ;;  %v1911_v33 = vadd.f32 %v1910_v32, %v1909_v30  ;;  %v1974_v34 = vpop.f32.mrb[41].mxu1  ;;  %v1912_v36 = vpop.f32.mrb[42].mxu0 }
 0x159   : > { %v1975_v38 = vadd.f32 %v1974_v34, %v1973_v31  ;;  %v1976_v40 = vpop.f32.mrb[42].mxu1  ;;  %v1913_v25 = vpop.f32.mrb[43].mxu0 }
 0x15a   : > { %v1348_v42 = vadd.f32 %v1911_v33, %v2307_v39  ;;  %v1914_v43 = vadd.f32 %v1913_v25, %v1912_v36  ;;  %v1977_v44 = vpop.f32.mrb[43].mxu1 }
 0x15b   : > { %v1978_v45 = vadd.f32 %v1977_v44, %v1976_v40 }
 0x15c   : > { %v1445_v27 = vadd.f32 %v1975_v38, %v1348_v42  ;;  %v1351_v46 = vadd.f32 %v1914_v43, %v2309_v41 }
 0x15e   : > { %1495 = vst [vmem:[%s2336_s23 + $0x20] sm:$0xff] %v1445_v27  ;;  %v1448_v47 = vadd.f32 %v1978_v45, %v1351_v46  ;;  %v1915_v48 = vpop.f32.mrb[44].mxu0 }
 0x15f   : > { %v1979_v49 = vpop.f32.mrb[44].mxu1  ;;  %v1916_v50 = vpop.f32.mrb[45].mxu0 }
 0x160   : > { %1496 = vst [vmem:[%s2336_s23 + $0x28] sm:$0xff] %v1448_v47  ;;  %v1917_v52 = vadd.f32 %v1916_v50, %v1915_v48  ;;  %v1980_v56 = vpop.f32.mrb[45].mxu1  ;;  %v1918_v57 = vpop.f32.mrb[46].mxu0 }
 0x161   : > { %v1981_v58 = vadd.f32 %v1980_v56, %v1979_v49  ;;  %v1982_v59 = vpop.f32.mrb[46].mxu1  ;;  %v1919_v39 = vpop.f32.mrb[47].mxu0 }
 0x162   : > { %v1356_v60 = vadd.f32 %v1917_v52, %v2311_v53  ;;  %v1920_v61 = vadd.f32 %v1919_v39, %v1918_v57  ;;  %v1983_v62 = vpop.f32.mrb[47].mxu1 }
 0x163   : > { %v1984_v63 = vadd.f32 %v1983_v62, %v1982_v59 }
 0x164   : > { %v1453_v41 = vadd.f32 %v1981_v58, %v1356_v60  ;;  %v1359_v0 = vadd.f32 %v1920_v61, %v2313_v55 }
 0x166   : > { %1497 = vst [vmem:[%s2336_s23 + $0x30] sm:$0xff] %v1453_v41  ;;  %v1456_v1 = vadd.f32 %v1984_v63, %v1359_v0  ;;  %v1921_v2 = vpop.f32.mrb[48].mxu0 }
 0x167   : > { %v1985_v4 = vpop.f32.mrb[48].mxu1  ;;  %v1922_v6 = vpop.f32.mrb[49].mxu0 }
 0x168   : > { %1498 = vst [vmem:[%s2336_s23 + $0x38] sm:$0xff] %v1456_v1  ;;  %v1923_v7 = vadd.f32 %v1922_v6, %v1921_v2  ;;  %v1986_v8 = vpop.f32.mrb[49].mxu1  ;;  %v1924_v9 = vpop.f32.mrb[50].mxu0 }
 0x169   : > { %v1987_v10 = vadd.f32 %v1986_v8, %v1985_v4  ;;  %v1988_v12 = vpop.f32.mrb[50].mxu1  ;;  %v1925_v53 = vpop.f32.mrb[51].mxu0 }
 0x16a   : > { %v1364_v14 = vadd.f32 %v1923_v7, %v2315_v3  ;;  %v1926_v11 = vadd.f32 %v1925_v53, %v1924_v9  ;;  %v1989_v15 = vpop.f32.mrb[51].mxu1 }
 0x16b   : > { %v1990_v16 = vadd.f32 %v1989_v15, %v1988_v12 }
 0x16c   : > { %v1461_v55 = vadd.f32 %v1987_v10, %v1364_v14  ;;  %v1367_v17 = vadd.f32 %v1926_v11, %v2317_v5 }
 0x16e   : > { %1499 = vst [vmem:[%s2336_s23 + $0x40] sm:$0xff] %v1461_v55  ;;  %v1464_v18 = vadd.f32 %v1990_v16, %v1367_v17  ;;  %v1927_v20 = vpop.f32.mrb[52].mxu0 }
 0x16f   : > { %v1991_v22 = vpop.f32.mrb[52].mxu1  ;;  %v1928_v23 = vpop.f32.mrb[53].mxu0 }
 0x170   : > { %1500 = vst [vmem:[%s2336_s23 + $0x48] sm:$0xff] %v1464_v18  ;;  %v1929_v24 = vadd.f32 %v1928_v23, %v1927_v20  ;;  %v1992_v26 = vpop.f32.mrb[53].mxu1  ;;  %v1930_v13 = vpop.f32.mrb[54].mxu0 }
 0x171   : > { %v1993_v28 = vadd.f32 %v1992_v26, %v1991_v22  ;;  %v1994_v29 = vpop.f32.mrb[54].mxu1  ;;  %v1931_v3 = vpop.f32.mrb[55].mxu0 }
 0x172   : > { %v1372_v30 = vadd.f32 %v1929_v24, %v2319_v19  ;;  %v1932_v31 = vadd.f32 %v1931_v3, %v1930_v13  ;;  %v1995_v32 = vpop.f32.mrb[55].mxu1 }
 0x173   : > { %v1996_v33 = vadd.f32 %v1995_v32, %v1994_v29 }
 0x174   : > { %v1469_v5 = vadd.f32 %v1993_v28, %v1372_v30  ;;  %v1375_v34 = vadd.f32 %v1932_v31, %v2321_v21 }
 0x176   : > { %1501 = vst [vmem:[%s2336_s23 + $0x50] sm:$0xff] %v1469_v5  ;;  %v1472_v36 = vadd.f32 %v1996_v33, %v1375_v34  ;;  %v1933_v38 = vpop.f32.mrb[56].mxu0 }
 0x177   : > { %v1997_v40 = vpop.f32.mrb[56].mxu1  ;;  %v1934_v25 = vpop.f32.mrb[57].mxu0 }
 0x178   : > { %1502 = vst [vmem:[%s2336_s23 + $0x58] sm:$0xff] %v1472_v36  ;;  %v1935_v42 = vadd.f32 %v1934_v25, %v1933_v38  ;;  %v1998_v43 = vpop.f32.mrb[57].mxu1  ;;  %v1936_v44 = vpop.f32.mrb[58].mxu0 }
 0x179   : > { %v1999_v45 = vadd.f32 %v1998_v43, %v1997_v40  ;;  %v2000_v27 = vpop.f32.mrb[58].mxu1  ;;  %v1937_v19 = vpop.f32.mrb[59].mxu0 }
 0x17a   : > { %v1380_v46 = vadd.f32 %v1935_v42, %v2323_v35  ;;  %v1938_v47 = vadd.f32 %v1937_v19, %v1936_v44  ;;  %v2001_v48 = vpop.f32.mrb[59].mxu1 }
 0x17b   : > { %v2002_v49 = vadd.f32 %v2001_v48, %v2000_v27 }
 0x17c   : > { %v1477_v21 = vadd.f32 %v1999_v45, %v1380_v46  ;;  %v1383_v50 = vadd.f32 %v1938_v47, %v2325_v37 }
 0x17e   : > { %1503 = vst [vmem:[%s2336_s23 + $0x60] sm:$0xff] %v1477_v21  ;;  %v1480_v52 = vadd.f32 %v2002_v49, %v1383_v50  ;;  %v1939_v56 = vpop.f32.mrb[60].mxu0 }
 0x17f   : > { %v2003_v57 = vpop.f32.mrb[60].mxu1  ;;  %v1940_v58 = vpop.f32.mrb[61].mxu0 }
 0x180   : > { %1504 = vst [vmem:[%s2336_s23 + $0x68] sm:$0xff] %v1480_v52  ;;  %v1941_v59 = vadd.f32 %v1940_v58, %v1939_v56  ;;  %v2004_v39 = vpop.f32.mrb[61].mxu1  ;;  %v1942_v60 = vpop.f32.mrb[62].mxu0 }
 0x181   : > { %v2005_v61 = vadd.f32 %v2004_v39, %v2003_v57  ;;  %v2006_v62 = vpop.f32.mrb[62].mxu1  ;;  %v1943_v35 = vpop.f32.mrb[63].mxu0 }
 0x182   : > { %v1388_v63 = vadd.f32 %v1941_v59, %v2327_v51  ;;  %v1944_v41 = vadd.f32 %v1943_v35, %v1942_v60  ;;  %v2007_v0 = vpop.f32.mrb[63].mxu1 }
 0x183   : > { %v2008_v1 = vadd.f32 %v2007_v0, %v2006_v62 }
 0x184   : > { %v1485_v37 = vadd.f32 %v2005_v61, %v1388_v63  ;;  %v1391_v2 = vadd.f32 %v1944_v41, %v2329_v54 }
 0x186   : > { %1505 = vst [vmem:[%s2336_s23 + $0x70] sm:$0xff] %v1485_v37  ;;  %v1488_v4 = vadd.f32 %v2008_v1, %v1391_v2 }
 0x188   : > { %1506 = vst [vmem:[%s2336_s23 + $0x78] sm:$0xff] %v1488_v4 }
 0x189 PF: > { %s12_s11 = sadd.s32 1, %s2119_s11   ;;  %s2381_s9 = smov %s2115_s10 }
 0x18a   : > { %p9_p5 = scmp.ge.s32.totalorder %s12_s11, 6   ;;  %s2382_s10 = smov %s2384_s12 }
 0x18c   :  { %11 = sbr.rel (!%p9_p5) target bundleno = 2 (0x2), region = 61 }

// kernel: generator_forward.14
= control target key start
LH: loop header
LB: loop body
LE: loop exit
PB: predicated region body
PF: predicated region fallthrough
CT: control target
= control target key end

     0   :  { %s987_s12 = smov 0   ;;  %s989_s13 = smov 0   ;;  %s1734_s0 = inlined_call_operand.vmem [shape: f32[512,128], index: 0, kind: input, shape index: {}]   ;;  %s1735_s1 = inlined_call_operand.vmem [shape: f32[1,128], index: 1, kind: input, shape index: {}]   ;;  %s1736_s2 = inlined_call_operand.vmem [shape: f32[1,128], index: 2, kind: input, shape index: {}]   ;;  %s1737_s3 = inlined_call_operand.vmem [shape: f32[512,128], index: 3, kind: output, shape index: {}]  }
   0x1   :  { %s991_s14 = smov 0  }
   0x2 LB: > { %s25_s15 = sadd.s32 1, %s960_s13  ;;  %p902_p0 = scmp.ge.s32.totalorder %s964_s14, 1  ;;  %s964_s14 = sphi %s991_s14, %s13_s14   ;;  %s960_s13 = sphi %s989_s13, %s1739_s13   ;;  %s956_s12 = sphi %s987_s12, %s1738_s12  }
   0x3   : > { %p27_p1 = scmp.ge.s32.totalorder %s25_s15, 2  ;;  %p152_p2 = scmp.lt.s32.totalorder %s964_s14, 3 }
   0x5   : > { %s1741_s15 = smov (%p27_p1, %s25_s15), 0  ;;  %p153_p3 = pnand %p902_p0, %p152_p2 }
   0x6   : > { %p191_p4 = scmp.eq.s32.totalorder (!%p153_p3), %s956_s12, 0 }
   0x7   : > { %156 = sbr.rel (%p153_p3) target bundleno = 255 (0xff), region = 32 }
   0xe   : > { %196 = sbr.rel (!%p191_p4) target bundleno = 21 (0x15), region = 36  ;;  %v966_v0 = vmov (%p191_p4), 0.0  }
   0xf   : > { %197 = vst [vmem:[#allocation2] sm:$0x1] (%p191_p4), %v966_v0  ;;  %198 = vst [vmem:[#allocation3] sm:$0x1] (%p191_p4), %v966_v0 }
  0x15 PF: > { %p904_p5 = scmp.ne.s32.totalorder %s956_s12, 0 }
  0x16   : > { %v202_v1 = vld [vmem:[%s1734_s0] sm:$0xff] (!%p904_p5)  ;;  %v203_v2 = vld [vmem:[%s1734_s0 + $0x8] sm:$0xff] (!%p904_p5)  ;;  %v204_v3 = vld [vmem:[%s1734_s0 + $0x10] sm:$0xff] (!%p904_p5) }
  0x17   : > { %201 = sbr.rel (%p904_p5) target bundleno = 166 (0xa6), region = 40  ;;  %v205_v4 = vld [vmem:[%s1734_s0 + $0x18] sm:$0xff] (!%p904_p5)  ;;  %v267_v5 = vadd.f32 (!%p904_p5), %v203_v2, %v202_v1  ;;  %v339_v6 = vmul.f32 (!%p904_p5), %v202_v1, %v202_v1  ;;  %v340_v7 = vmul.f32 (!%p904_p5), %v203_v2, %v203_v2  ;;  %v341_v8 = vmul.f32 (!%p904_p5), %v204_v3, %v204_v3  ;;  %v206_v9 = vld [vmem:[%s1734_s0 + $0x20] sm:$0xff] (!%p904_p5)  ;;  %v207_v13 = vld [vmem:[%s1734_s0 + $0x28] sm:$0xff] (!%p904_p5) }
  0x18   : > { %v342_v11 = vmul.f32 (!%p904_p5), %v205_v4, %v205_v4  ;;  %v343_v15 = vmul.f32 (!%p904_p5), %v206_v9, %v206_v9  ;;  %v208_v17 = vld [vmem:[%s1734_s0 + $0x30] sm:$0xff] (!%p904_p5)  ;;  %v344_v19 = vmul.f32 (!%p904_p5), %v207_v13, %v207_v13  ;;  %v209_v21 = vld [vmem:[%s1734_s0 + $0x38] sm:$0xff] (!%p904_p5)  ;;  %v210_v25 = vld [vmem:[%s1734_s0 + $0x40] sm:$0xff] (!%p904_p5) }
  0x19   : > { %v268_v10 = vadd.f32 (!%p904_p5), %v267_v5, %v204_v3  ;;  %v403_v12 = vadd.f32 (!%p904_p5), %v340_v7, %v339_v6  ;;  %v345_v23 = vmul.f32 (!%p904_p5), %v208_v17, %v208_v17  ;;  %v346_v27 = vmul.f32 (!%p904_p5), %v209_v21, %v209_v21  ;;  %v211_v29 = vld [vmem:[%s1734_s0 + $0x48] sm:$0xff] (!%p904_p5)  ;;  %v212_v33 = vld [vmem:[%s1734_s0 + $0x50] sm:$0xff] (!%p904_p5)  ;;  %v213_v37 = vld [vmem:[%s1734_s0 + $0x58] sm:$0xff] (!%p904_p5) }
  0x1a   : > { %v347_v31 = vmul.f32 (!%p904_p5), %v210_v25, %v210_v25  ;;  %v348_v35 = vmul.f32 (!%p904_p5), %v211_v29, %v211_v29  ;;  %v349_v39 = vmul.f32 (!%p904_p5), %v212_v33, %v212_v33  ;;  %v214_v41 = vld [vmem:[%s1734_s0 + $0x60] sm:$0xff] (!%p904_p5)  ;;  %v350_v43 = vmul.f32 (!%p904_p5), %v213_v37, %v213_v37  ;;  %v215_v45 = vld [vmem:[%s1734_s0 + $0x68] sm:$0xff] (!%p904_p5)  ;;  %v216_v49 = vld [vmem:[%s1734_s0 + $0x70] sm:$0xff] (!%p904_p5) }
  0x1b   : > { %v269_v14 = vadd.f32 (!%p904_p5), %v268_v10, %v205_v4  ;;  %v404_v16 = vadd.f32 (!%p904_p5), %v403_v12, %v341_v8  ;;  %v351_v47 = vmul.f32 (!%p904_p5), %v214_v41, %v214_v41  ;;  %v352_v51 = vmul.f32 (!%p904_p5), %v215_v45, %v215_v45  ;;  %v217_v53 = vld [vmem:[%s1734_s0 + $0x78] sm:$0xff] (!%p904_p5)  ;;  %v218_v57 = vld [vmem:[%s1734_s0 + $0x80] sm:$0xff] (!%p904_p5)  ;;  %v219_v61 = vld [vmem:[%s1734_s0 + $0x88] sm:$0xff] (!%p904_p5) }
  0x1c   : > { %v353_v55 = vmul.f32 (!%p904_p5), %v216_v49, %v216_v49  ;;  %v354_v59 = vmul.f32 (!%p904_p5), %v217_v53, %v217_v53  ;;  %v355_v63 = vmul.f32 (!%p904_p5), %v218_v57, %v218_v57  ;;  %v220_v1 = vld [vmem:[%s1734_s0 + $0x90] sm:$0xff] (!%p904_p5)  ;;  %v356_v3 = vmul.f32 (!%p904_p5), %v219_v61, %v219_v61  ;;  %v221_v5 = vld [vmem:[%s1734_s0 + $0x98] sm:$0xff] (!%p904_p5) }
  0x1d   : > { %v270_v18 = vadd.f32 (!%p904_p5), %v269_v14, %v206_v9  ;;  %v405_v20 = vadd.f32 (!%p904_p5), %v404_v16, %v342_v11  ;;  %v357_v7 = vmul.f32 (!%p904_p5), %v220_v1, %v220_v1  ;;  %v222_v9 = vld [vmem:[%s1734_s0 + $0xa0] sm:$0xff] (!%p904_p5)  ;;  %v358_v11 = vmul.f32 (!%p904_p5), %v221_v5, %v221_v5 }
  0x1f   : > { %v271_v22 = vadd.f32 %v270_v18, %v207_v13  ;;  %v406_v24 = vadd.f32 %v405_v20, %v343_v15  ;;  %v223_v13 = vld [vmem:[%s1734_s0 + $0xa8] sm:$0xff]  ;;  %v359_v15 = vmul.f32 %v222_v9, %v222_v9 }
  0x21   : > { %v272_v26 = vadd.f32 %v271_v22, %v208_v17  ;;  %v407_v28 = vadd.f32 %v406_v24, %v344_v19  ;;  %v224_v17 = vld [vmem:[%s1734_s0 + $0xb0] sm:$0xff]  ;;  %v360_v19 = vmul.f32 %v223_v13, %v223_v13 }
  0x23   : > { %v273_v30 = vadd.f32 %v272_v26, %v209_v21  ;;  %v408_v32 = vadd.f32 %v407_v28, %v345_v23  ;;  %v225_v21 = vld [vmem:[%s1734_s0 + $0xb8] sm:$0xff]  ;;  %v361_v23 = vmul.f32 %v224_v17, %v224_v17 }
  0x25   : > { %v274_v34 = vadd.f32 %v273_v30, %v210_v25  ;;  %v409_v36 = vadd.f32 %v408_v32, %v346_v27  ;;  %v226_v25 = vld [vmem:[%s1734_s0 + $0xc0] sm:$0xff]  ;;  %v362_v27 = vmul.f32 %v225_v21, %v225_v21 }
  0x27   : > { %v275_v38 = vadd.f32 %v274_v34, %v211_v29  ;;  %v410_v40 = vadd.f32 %v409_v36, %v347_v31  ;;  %v227_v29 = vld [vmem:[%s1734_s0 + $0xc8] sm:$0xff]  ;;  %v363_v31 = vmul.f32 %v226_v25, %v226_v25 }
  0x29   : > { %v276_v42 = vadd.f32 %v275_v38, %v212_v33  ;;  %v411_v44 = vadd.f32 %v410_v40, %v348_v35  ;;  %v228_v33 = vld [vmem:[%s1734_s0 + $0xd0] sm:$0xff]  ;;  %v364_v35 = vmul.f32 %v227_v29, %v227_v29 }
  0x2b   : > { %v277_v46 = vadd.f32 %v276_v42, %v213_v37  ;;  %v412_v48 = vadd.f32 %v411_v44, %v349_v39  ;;  %v229_v37 = vld [vmem:[%s1734_s0 + $0xd8] sm:$0xff]  ;;  %v365_v39 = vmul.f32 %v228_v33, %v228_v33 }
  0x2d   : > { %v278_v50 = vadd.f32 %v277_v46, %v214_v41  ;;  %v413_v52 = vadd.f32 %v412_v48, %v350_v43  ;;  %v230_v41 = vld [vmem:[%s1734_s0 + $0xe0] sm:$0xff]  ;;  %v366_v43 = vmul.f32 %v229_v37, %v229_v37 }
  0x2f   : > { %v279_v54 = vadd.f32 %v278_v50, %v215_v45  ;;  %v414_v56 = vadd.f32 %v413_v52, %v351_v47  ;;  %v231_v45 = vld [vmem:[%s1734_s0 + $0xe8] sm:$0xff]  ;;  %v367_v47 = vmul.f32 %v230_v41, %v230_v41 }
  0x31   : > { %v280_v58 = vadd.f32 %v279_v54, %v216_v49  ;;  %v415_v60 = vadd.f32 %v414_v56, %v352_v51  ;;  %v232_v49 = vld [vmem:[%s1734_s0 + $0xf0] sm:$0xff]  ;;  %v368_v51 = vmul.f32 %v231_v45, %v231_v45 }
  0x33   : > { %v281_v62 = vadd.f32 %v280_v58, %v217_v53  ;;  %v416_v0 = vadd.f32 %v415_v60, %v353_v55  ;;  %v233_v53 = vld [vmem:[%s1734_s0 + $0xf8] sm:$0xff]  ;;  %v369_v55 = vmul.f32 %v232_v49, %v232_v49 }
  0x35   : > { %v282_v2 = vadd.f32 %v281_v62, %v218_v57  ;;  %v417_v4 = vadd.f32 %v416_v0, %v354_v59  ;;  %v234_v57 = vld [vmem:[%s1734_s0 + $0x100] sm:$0xff]  ;;  %v370_v59 = vmul.f32 %v233_v53, %v233_v53 }
  0x37   : > { %v283_v6 = vadd.f32 %v282_v2, %v219_v61  ;;  %v418_v8 = vadd.f32 %v417_v4, %v355_v63  ;;  %v235_v61 = vld [vmem:[%s1734_s0 + $0x108] sm:$0xff]  ;;  %v371_v63 = vmul.f32 %v234_v57, %v234_v57 }
  0x39   : > { %v284_v10 = vadd.f32 %v283_v6, %v220_v1  ;;  %v419_v12 = vadd.f32 %v418_v8, %v356_v3  ;;  %v236_v1 = vld [vmem:[%s1734_s0 + $0x110] sm:$0xff]  ;;  %v372_v3 = vmul.f32 %v235_v61, %v235_v61 }
  0x3b   : > { %v285_v14 = vadd.f32 %v284_v10, %v221_v5  ;;  %v420_v16 = vadd.f32 %v419_v12, %v357_v7  ;;  %v237_v5 = vld [vmem:[%s1734_s0 + $0x118] sm:$0xff]  ;;  %v373_v7 = vmul.f32 %v236_v1, %v236_v1 }
  0x3d   : > { %v286_v18 = vadd.f32 %v285_v14, %v222_v9  ;;  %v421_v20 = vadd.f32 %v420_v16, %v358_v11  ;;  %v238_v9 = vld [vmem:[%s1734_s0 + $0x120] sm:$0xff]  ;;  %v374_v11 = vmul.f32 %v237_v5, %v237_v5 }
  0x3f   : > { %v287_v22 = vadd.f32 %v286_v18, %v223_v13  ;;  %v422_v24 = vadd.f32 %v421_v20, %v359_v15  ;;  %v239_v13 = vld [vmem:[%s1734_s0 + $0x128] sm:$0xff]  ;;  %v375_v15 = vmul.f32 %v238_v9, %v238_v9 }
  0x41   : > { %v288_v26 = vadd.f32 %v287_v22, %v224_v17  ;;  %v423_v28 = vadd.f32 %v422_v24, %v360_v19  ;;  %v240_v17 = vld [vmem:[%s1734_s0 + $0x130] sm:$0xff]  ;;  %v376_v19 = vmul.f32 %v239_v13, %v239_v13 }
  0x43   : > { %v289_v30 = vadd.f32 %v288_v26, %v225_v21  ;;  %v424_v32 = vadd.f32 %v423_v28, %v361_v23  ;;  %v241_v21 = vld [vmem:[%s1734_s0 + $0x138] sm:$0xff]  ;;  %v377_v23 = vmul.f32 %v240_v17, %v240_v17 }
  0x45   : > { %v290_v34 = vadd.f32 %v289_v30, %v226_v25  ;;  %v425_v36 = vadd.f32 %v424_v32, %v362_v27  ;;  %v242_v25 = vld [vmem:[%s1734_s0 + $0x140] sm:$0xff]  ;;  %v378_v27 = vmul.f32 %v241_v21, %v241_v21 }
  0x47   : > { %v291_v38 = vadd.f32 %v290_v34, %v227_v29  ;;  %v426_v40 = vadd.f32 %v425_v36, %v363_v31  ;;  %v243_v29 = vld [vmem:[%s1734_s0 + $0x148] sm:$0xff]  ;;  %v379_v31 = vmul.f32 %v242_v25, %v242_v25 }
  0x49   : > { %v292_v42 = vadd.f32 %v291_v38, %v228_v33  ;;  %v427_v44 = vadd.f32 %v426_v40, %v364_v35  ;;  %v244_v33 = vld [vmem:[%s1734_s0 + $0x150] sm:$0xff]  ;;  %v380_v35 = vmul.f32 %v243_v29, %v243_v29 }
  0x4b   : > { %v293_v46 = vadd.f32 %v292_v42, %v229_v37  ;;  %v428_v48 = vadd.f32 %v427_v44, %v365_v39  ;;  %v245_v37 = vld [vmem:[%s1734_s0 + $0x158] sm:$0xff]  ;;  %v381_v39 = vmul.f32 %v244_v33, %v244_v33 }
  0x4d   : > { %v294_v50 = vadd.f32 %v293_v46, %v230_v41  ;;  %v429_v52 = vadd.f32 %v428_v48, %v366_v43  ;;  %v246_v41 = vld [vmem:[%s1734_s0 + $0x160] sm:$0xff]  ;;  %v382_v43 = vmul.f32 %v245_v37, %v245_v37 }
  0x4f   : > { %v295_v54 = vadd.f32 %v294_v50, %v231_v45  ;;  %v430_v56 = vadd.f32 %v429_v52, %v367_v47  ;;  %v247_v45 = vld [vmem:[%s1734_s0 + $0x168] sm:$0xff]  ;;  %v383_v47 = vmul.f32 %v246_v41, %v246_v41 }
  0x51   : > { %v296_v58 = vadd.f32 %v295_v54, %v232_v49  ;;  %v431_v60 = vadd.f32 %v430_v56, %v368_v51  ;;  %v248_v49 = vld [vmem:[%s1734_s0 + $0x170] sm:$0xff]  ;;  %v384_v51 = vmul.f32 %v247_v45, %v247_v45 }
  0x53   : > { %v297_v62 = vadd.f32 %v296_v58, %v233_v53  ;;  %v432_v0 = vadd.f32 %v431_v60, %v369_v55  ;;  %v249_v53 = vld [vmem:[%s1734_s0 + $0x178] sm:$0xff]  ;;  %v385_v55 = vmul.f32 %v248_v49, %v248_v49 }
  0x55   : > { %v298_v2 = vadd.f32 %v297_v62, %v234_v57  ;;  %v433_v4 = vadd.f32 %v432_v0, %v370_v59  ;;  %v250_v57 = vld [vmem:[%s1734_s0 + $0x180] sm:$0xff]  ;;  %v386_v59 = vmul.f32 %v249_v53, %v249_v53 }
  0x57   : > { %v299_v6 = vadd.f32 %v298_v2, %v235_v61  ;;  %v434_v8 = vadd.f32 %v433_v4, %v371_v63  ;;  %v251_v61 = vld [vmem:[%s1734_s0 + $0x188] sm:$0xff]  ;;  %v387_v63 = vmul.f32 %v250_v57, %v250_v57 }
  0x59   : > { %v300_v10 = vadd.f32 %v299_v6, %v236_v1  ;;  %v435_v12 = vadd.f32 %v434_v8, %v372_v3  ;;  %v252_v1 = vld [vmem:[%s1734_s0 + $0x190] sm:$0xff]  ;;  %v388_v3 = vmul.f32 %v251_v61, %v251_v61 }
  0x5b   : > { %v301_v14 = vadd.f32 %v300_v10, %v237_v5  ;;  %v436_v16 = vadd.f32 %v435_v12, %v373_v7  ;;  %v253_v5 = vld [vmem:[%s1734_s0 + $0x198] sm:$0xff]  ;;  %v389_v7 = vmul.f32 %v252_v1, %v252_v1 }
  0x5d   : > { %v302_v18 = vadd.f32 %v301_v14, %v238_v9  ;;  %v437_v20 = vadd.f32 %v436_v16, %v374_v11  ;;  %v254_v9 = vld [vmem:[%s1734_s0 + $0x1a0] sm:$0xff]  ;;  %v390_v11 = vmul.f32 %v253_v5, %v253_v5 }
  0x5f   : > { %v303_v22 = vadd.f32 %v302_v18, %v239_v13  ;;  %v438_v24 = vadd.f32 %v437_v20, %v375_v15  ;;  %v255_v13 = vld [vmem:[%s1734_s0 + $0x1a8] sm:$0xff]  ;;  %v391_v15 = vmul.f32 %v254_v9, %v254_v9 }
  0x61   : > { %v304_v26 = vadd.f32 %v303_v22, %v240_v17  ;;  %v439_v28 = vadd.f32 %v438_v24, %v376_v19  ;;  %v256_v17 = vld [vmem:[%s1734_s0 + $0x1b0] sm:$0xff]  ;;  %v392_v19 = vmul.f32 %v255_v13, %v255_v13 }
  0x63   : > { %v305_v30 = vadd.f32 %v304_v26, %v241_v21  ;;  %v440_v32 = vadd.f32 %v439_v28, %v377_v23  ;;  %v257_v21 = vld [vmem:[%s1734_s0 + $0x1b8] sm:$0xff]  ;;  %v393_v23 = vmul.f32 %v256_v17, %v256_v17 }
  0x65   : > { %v306_v34 = vadd.f32 %v305_v30, %v242_v25  ;;  %v441_v36 = vadd.f32 %v440_v32, %v378_v27  ;;  %v258_v25 = vld [vmem:[%s1734_s0 + $0x1c0] sm:$0xff]  ;;  %v394_v27 = vmul.f32 %v257_v21, %v257_v21 }
  0x67   : > { %v307_v38 = vadd.f32 %v306_v34, %v243_v29  ;;  %v442_v40 = vadd.f32 %v441_v36, %v379_v31  ;;  %v259_v29 = vld [vmem:[%s1734_s0 + $0x1c8] sm:$0xff]  ;;  %v395_v31 = vmul.f32 %v258_v25, %v258_v25 }
  0x69   : > { %v308_v42 = vadd.f32 %v307_v38, %v244_v33  ;;  %v443_v44 = vadd.f32 %v442_v40, %v380_v35  ;;  %v260_v33 = vld [vmem:[%s1734_s0 + $0x1d0] sm:$0xff]  ;;  %v396_v35 = vmul.f32 %v259_v29, %v259_v29 }
  0x6b   : > { %v309_v46 = vadd.f32 %v308_v42, %v245_v37  ;;  %v444_v48 = vadd.f32 %v443_v44, %v381_v39  ;;  %v261_v37 = vld [vmem:[%s1734_s0 + $0x1d8] sm:$0xff]  ;;  %v397_v39 = vmul.f32 %v260_v33, %v260_v33 }
  0x6d   : > { %v310_v50 = vadd.f32 %v309_v46, %v246_v41  ;;  %v445_v52 = vadd.f32 %v444_v48, %v382_v43  ;;  %v262_v41 = vld [vmem:[%s1734_s0 + $0x1e0] sm:$0xff]  ;;  %v398_v43 = vmul.f32 %v261_v37, %v261_v37 }
  0x6f   : > { %v311_v54 = vadd.f32 %v310_v50, %v247_v45  ;;  %v446_v56 = vadd.f32 %v445_v52, %v383_v47  ;;  %v263_v45 = vld [vmem:[%s1734_s0 + $0x1e8] sm:$0xff]  ;;  %v399_v47 = vmul.f32 %v262_v41, %v262_v41 }
  0x71   : > { %v312_v58 = vadd.f32 %v311_v54, %v248_v49  ;;  %v447_v60 = vadd.f32 %v446_v56, %v384_v51  ;;  %v264_v49 = vld [vmem:[%s1734_s0 + $0x1f0] sm:$0xff]  ;;  %v400_v51 = vmul.f32 %v263_v45, %v263_v45 }
  0x73   : > { %v313_v62 = vadd.f32 %v312_v58, %v249_v53  ;;  %v448_v0 = vadd.f32 %v447_v60, %v385_v55  ;;  %v265_v53 = vld [vmem:[%s1734_s0 + $0x1f8] sm:$0xff]  ;;  %v401_v55 = vmul.f32 %v264_v49, %v264_v49 }
  0x74   : > { %v402_v58 = vmul.f32 %v265_v53, %v265_v53 }
  0x75   : > { %v314_v2 = vadd.f32 %v313_v62, %v250_v57  ;;  %v449_v4 = vadd.f32 %v448_v0, %v386_v59 }
  0x77   : > { %v315_v6 = vadd.f32 %v314_v2, %v251_v61  ;;  %v450_v8 = vadd.f32 %v449_v4, %v387_v63 }
  0x79   : > { %v316_v10 = vadd.f32 %v315_v6, %v252_v1  ;;  %v451_v12 = vadd.f32 %v450_v8, %v388_v3 }
  0x7b   : > { %v317_v14 = vadd.f32 %v316_v10, %v253_v5  ;;  %v452_v16 = vadd.f32 %v451_v12, %v389_v7  ;;  %v266_v7 = vld [vmem:[#allocation2] sm:$0x1]  ;;  %v338_v12 = vld [vmem:[#allocation3] sm:$0x1] }
  0x7d   : > { %v318_v18 = vadd.f32 %v317_v14, %v254_v9  ;;  %v453_v20 = vadd.f32 %v452_v16, %v390_v11 }
  0x7f   : > { %v319_v22 = vadd.f32 %v318_v18, %v255_v13  ;;  %v454_v24 = vadd.f32 %v453_v20, %v391_v15 }
  0x81   : > { %v320_v26 = vadd.f32 %v319_v22, %v256_v17  ;;  %v455_v28 = vadd.f32 %v454_v24, %v392_v19 }
  0x83   : > { %v321_v30 = vadd.f32 %v320_v26, %v257_v21  ;;  %v456_v32 = vadd.f32 %v455_v28, %v393_v23 }
  0x85   : > { %v322_v34 = vadd.f32 %v321_v30, %v258_v25  ;;  %v457_v36 = vadd.f32 %v456_v32, %v394_v27 }
  0x87   : > { %v323_v38 = vadd.f32 %v322_v34, %v259_v29  ;;  %v458_v40 = vadd.f32 %v457_v36, %v395_v31 }
  0x89   : > { %v324_v42 = vadd.f32 %v323_v38, %v260_v33  ;;  %v459_v44 = vadd.f32 %v458_v40, %v396_v35 }
  0x8b   : > { %v325_v46 = vadd.f32 %v324_v42, %v261_v37  ;;  %v460_v48 = vadd.f32 %v459_v44, %v397_v39 }
  0x8d   : > { %v326_v50 = vadd.f32 %v325_v46, %v262_v41  ;;  %v461_v52 = vadd.f32 %v460_v48, %v398_v43 }
  0x8f   : > { %v327_v54 = vadd.f32 %v326_v50, %v263_v45  ;;  %v462_v56 = vadd.f32 %v461_v52, %v399_v47 }
  0x91   : > { %v328_v57 = vadd.f32 %v327_v54, %v264_v49  ;;  %v463_v59 = vadd.f32 %v462_v56, %v400_v51 }
  0x93   : > { %v329_v60 = vadd.f32 %v328_v57, %v265_v53  ;;  %v464_v61 = vadd.f32 %v463_v59, %v401_v55 }
  0x95   : > { %v330_v62 = vrot.slane %v329_v60, 4  ;;  %v465_v63 = vadd.f32 %v464_v61, %v402_v58 }
  0x97   : > { %v331_v0 = vadd.f32 %v330_v62, %v329_v60  ;;  %v466_v1 = vrot.slane %v465_v63, 4 }
  0x99   : > { %v332_v2 = vrot.slane %v331_v0, 2  ;;  %v467_v3 = vadd.f32 %v466_v1, %v465_v63 }
  0x9b   : > { %v333_v4 = vadd.f32 %v332_v2, %v331_v0  ;;  %v468_v5 = vrot.slane %v467_v3, 2 }
  0x9d   : > { %v334_v6 = vrot.slane %v333_v4, 1  ;;  %v469_v8 = vadd.f32 %v468_v5, %v467_v3 }
  0x9f   : > { %v335_v9 = vadd.f32 %v334_v6, %v333_v4  ;;  %v470_v10 = vrot.slane %v469_v8, 1 }
  0xa1   : > { %v336_v11 = vadd.f32 %v335_v9, %v266_v7  ;;  %v471_v13 = vadd.f32 %v470_v10, %v469_v8 }
  0xa3   : > { %337 = vst [vmem:[#allocation2] sm:$0x1] %v336_v11  ;;  %v472_v14 = vadd.f32 %v471_v13, %v338_v12 }
  0xa5   : > { %473 = vst [vmem:[#allocation3] sm:$0x1] %v472_v14 }
  0xa6 PF: > { %p474_p6 = scmp.eq.s32.totalorder %s956_s12, 1 }
  0xa7   : > { %v487_v22 = vld [vmem:[%s1735_s1] sm:$0x1] (%p474_p6) }
  0xa8   : > { %478 = sbr.rel (!%p474_p6) target bundleno = 197 (0xc5), region = 44  ;;  %v490_v25 = vld [vmem:[%s1736_s2] sm:$0x1] (%p474_p6) }
  0xaa   : > { %v479_v15 = vld [vmem:[#allocation2] sm:$0x1] (%p474_p6) }
  0xab   : > { %v480_v17 = vmul.f32 (%p474_p6), 0.001953125, %v479_v15 }
  0xac   : > { %v481_v16 = vld [vmem:[#allocation3] sm:$0x1] (%p474_p6) }
  0xad   : > { %v482_v18 = vmul.f32 (%p474_p6), 0.001953125, %v481_v16  ;;  %v483_v19 = vmul.f32 (%p474_p6), %v480_v17, %v480_v17 }
  0xaf   : > { %v484_v20 = vsub.f32 %v482_v18, %v483_v19 }
  0xb1   : > { %v485_v21 = vadd.f32 1e-05, %v484_v20 }
  0xb3   : > { %940 = vrsqrt.f32 %v485_v21 }
  0xbd   : > { %v941_v23 = vpop.eup %940 }
  0xbe   : > { %v488_v24 = vmul.f32 %v941_v23, %v487_v22 }
  0xc0   : > { %489 = vst [vmem:[#allocation4] sm:$0x1] %v488_v24  ;;  %v491_v26 = vmul.f32 %v488_v24, %v480_v17 }
  0xc2   : > { %v492_v27 = vsub.f32 %v490_v25, %v491_v26 }
  0xc4   : > { %493 = vst [vmem:[#allocation4 + $0x1] sm:$0x1] %v492_v27 }
  0xc5 PF: > { %p906_p7 = scmp.ne.s32.totalorder %s956_s12, 1 }
  0xc6   : > { %v497_v28 = vld [vmem:[%s1734_s0] sm:$0xff] (!%p906_p7)  ;;  %v498_v32 = vld [vmem:[%s1734_s0 + $0x8] sm:$0xff] (!%p906_p7)  ;;  %v499_v33 = vld [vmem:[%s1734_s0 + $0x10] sm:$0xff] (!%p906_p7) }
  0xc7   : > { %496 = sbr.rel (%p906_p7) target bundleno = 255 (0xff), region = 48  ;;  %v1212_v29 = vld [vmem:[#allocation4] ss:$0 sm:$0xff] (!%p906_p7)  ;;  %v500_v34 = vld [vmem:[%s1734_s0 + $0x18] sm:$0xff] (!%p906_p7)  ;;  %v502_v39 = vld [vmem:[%s1734_s0 + $0x28] sm:$0xff] (!%p906_p7) }
  0xc8   : > { %v566_v31 = vmul.f32 (!%p906_p7), %v1212_v29, %v497_v28  ;;  %v567_v35 = vmul.f32 (!%p906_p7), %v1212_v29, %v498_v32  ;;  %v568_v36 = vmul.f32 (!%p906_p7), %v1212_v29, %v499_v33  ;;  %v569_v37 = vmul.f32 (!%p906_p7), %v1212_v29, %v500_v34  ;;  %v501_v38 = vld [vmem:[%s1734_s0 + $0x20] sm:$0xff] (!%p906_p7)  ;;  %v503_v40 = vld [vmem:[%s1734_s0 + $0x30] sm:$0xff] (!%p906_p7)  ;;  %v504_v45 = vld [vmem:[%s1734_s0 + $0x38] sm:$0xff] (!%p906_p7) }
  0xc9   : > { %v570_v42 = vmul.f32 (!%p906_p7), %v1212_v29, %v501_v38  ;;  %v571_v43 = vmul.f32 (!%p906_p7), %v1212_v29, %v502_v39  ;;  %v572_v44 = vmul.f32 (!%p906_p7), %v1212_v29, %v503_v40  ;;  %v573_v49 = vmul.f32 (!%p906_p7), %v1212_v29, %v504_v45  ;;  %v505_v50 = vld [vmem:[%s1734_s0 + $0x40] sm:$0xff] (!%p906_p7)  ;;  %v506_v55 = vld [vmem:[%s1734_s0 + $0x48] sm:$0xff] (!%p906_p7)  ;;  %v507_v56 = vld [vmem:[%s1734_s0 + $0x50] sm:$0xff] (!%p906_p7) }
  0xca   : > { %v508_v57 = vld [vmem:[%s1734_s0 + $0x58] sm:$0xff] (!%p906_p7)  ;;  %v509_v62 = vld [vmem:[%s1734_s0 + $0x60] sm:$0xff] (!%p906_p7)  ;;  %v510_v63 = vld [vmem:[%s1734_s0 + $0x68] sm:$0xff] (!%p906_p7)  ;;  %v574_v4 = vmul.f32 (!%p906_p7), %v1212_v29, %v505_v50  ;;  %v575_v7 = vmul.f32 (!%p906_p7), %v1212_v29, %v506_v55  ;;  %v576_v8 = vmul.f32 (!%p906_p7), %v1212_v29, %v507_v56 }
  0xcb   : > { %v1214_v30 = vld [vmem:[#allocation4 + $0x1] ss:$0 sm:$0xff] (!%p906_p7)  ;;  %v511_v0 = vld [vmem:[%s1734_s0 + $0x70] sm:$0xff] (!%p906_p7)  ;;  %v512_v5 = vld [vmem:[%s1734_s0 + $0x78] sm:$0xff] (!%p906_p7)  ;;  %v577_v9 = vmul.f32 (!%p906_p7), %v1212_v29, %v508_v57  ;;  %v578_v11 = vmul.f32 (!%p906_p7), %v1212_v29, %v509_v62  ;;  %v579_v12 = vmul.f32 (!%p906_p7), %v1212_v29, %v510_v63 }
  0xcc   : > { %v635_v41 = vadd.f32 (!%p906_p7), %v1214_v30, %v566_v31  ;;  %v636_v46 = vadd.f32 (!%p906_p7), %v1214_v30, %v567_v35  ;;  %v637_v47 = vadd.f32 (!%p906_p7), %v1214_v30, %v568_v36  ;;  %v638_v48 = vadd.f32 (!%p906_p7), %v1214_v30, %v569_v37  ;;  %v513_v18 = vld [vmem:[%s1734_s0 + $0x80] sm:$0xff] (!%p906_p7)  ;;  %v514_v23 = vld [vmem:[%s1734_s0 + $0x88] sm:$0xff] (!%p906_p7)  ;;  %v515_v24 = vld [vmem:[%s1734_s0 + $0x90] sm:$0xff] (!%p906_p7) }
  0xcd   : > { %v639_v52 = vadd.f32 (!%p906_p7), %v1214_v30, %v570_v42  ;;  %v640_v53 = vadd.f32 (!%p906_p7), %v1214_v30, %v571_v43  ;;  %v641_v54 = vadd.f32 (!%p906_p7), %v1214_v30, %v572_v44  ;;  %v642_v61 = vadd.f32 (!%p906_p7), %v1214_v30, %v573_v49  ;;  %v516_v25 = vld [vmem:[%s1734_s0 + $0x98] sm:$0xff] (!%p906_p7)  ;;  %v517_v32 = vld [vmem:[%s1734_s0 + $0xa0] sm:$0xff] (!%p906_p7)  ;;  %v518_v33 = vld [vmem:[%s1734_s0 + $0xa8] sm:$0xff] (!%p906_p7) }
  0xce   : > { %v699_v51 = vmax.f32 %v635_v41, 0.0  ;;  %v700_v58 = vmax.f32 %v636_v46, 0.0  ;;  %v701_v59 = vmax.f32 %v637_v47, 0.0  ;;  %v702_v60 = vmax.f32 %v638_v48, 0.0  ;;  %v519_v34 = vld [vmem:[%s1734_s0 + $0xb0] sm:$0xff]  ;;  %v520_v39 = vld [vmem:[%s1734_s0 + $0xb8] sm:$0xff] }
  0xcf   : > { %v703_v1 = vmax.f32 %v639_v52, 0.0  ;;  %v704_v2 = vmax.f32 %v640_v53, 0.0  ;;  %v705_v3 = vmax.f32 %v641_v54, 0.0  ;;  %v706_v6 = vmax.f32 %v642_v61, 0.0  ;;  %v521_v52 = vld [vmem:[%s1734_s0 + $0xc0] sm:$0xff]  ;;  %v522_v57 = vld [vmem:[%s1734_s0 + $0xc8] sm:$0xff] }
  0xd0   : > { %763 = vst [vmem:[%s1737_s3] sm:$0xff] %v699_v51  ;;  %764 = vst [vmem:[%s1737_s3 + $0x8] sm:$0xff] %v700_v58  ;;  %v643_v10 = vadd.f32 %v1214_v30, %v574_v4  ;;  %v580_v13 = vmul.f32 %v1212_v29, %v511_v0  ;;  %v644_v14 = vadd.f32 %v1214_v30, %v575_v7  ;;  %v523_v58 = vld [vmem:[%s1734_s0 + $0xd0] sm:$0xff]  ;;  %v525_v0 = vld [vmem:[%s1734_s0 + $0xe0] sm:$0xff] }
  0xd1   : > { %765 = vst [vmem:[%s1737_s3 + $0x10] sm:$0xff] %v701_v59  ;;  %766 = vst [vmem:[%s1737_s3 + $0x18] sm:$0xff] %v702_v60  ;;  %v645_v15 = vadd.f32 %v1214_v30, %v576_v8  ;;  %v646_v16 = vadd.f32 %v1214_v30, %v577_v9  ;;  %v581_v17 = vmul.f32 %v1212_v29, %v512_v5  ;;  %v524_v59 = vld [vmem:[%s1734_s0 + $0xd8] sm:$0xff] }
  0xd2   : > { %767 = vst [vmem:[%s1737_s3 + $0x20] sm:$0xff] %v703_v1  ;;  %768 = vst [vmem:[%s1737_s3 + $0x28] sm:$0xff] %v704_v2  ;;  %v707_v19 = vmax.f32 %v643_v10, 0.0  ;;  %v647_v20 = vadd.f32 %v1214_v30, %v578_v11  ;;  %v648_v21 = vadd.f32 %v1214_v30, %v579_v12  ;;  %v649_v22 = vadd.f32 %v1214_v30, %v580_v13  ;;  %v526_v1 = vld [vmem:[%s1734_s0 + $0xe8] sm:$0xff]  ;;  %v527_v2 = vld [vmem:[%s1734_s0 + $0xf0] sm:$0xff] }
  0xd3   : > { %769 = vst [vmem:[%s1737_s3 + $0x30] sm:$0xff] %v705_v3  ;;  %770 = vst [vmem:[%s1737_s3 + $0x38] sm:$0xff] %v706_v6  ;;  %v708_v26 = vmax.f32 %v644_v14, 0.0  ;;  %v709_v27 = vmax.f32 %v645_v15, 0.0  ;;  %v710_v28 = vmax.f32 %v646_v16, 0.0  ;;  %v650_v31 = vadd.f32 %v1214_v30, %v581_v17  ;;  %v528_v7 = vld [vmem:[%s1734_s0 + $0xf8] sm:$0xff] }
  0xd4   : > { %771 = vst [vmem:[%s1737_s3 + $0x40] sm:$0xff] %v707_v19  ;;  %v711_v35 = vmax.f32 %v647_v20, 0.0  ;;  %v712_v36 = vmax.f32 %v648_v21, 0.0  ;;  %v713_v37 = vmax.f32 %v649_v22, 0.0  ;;  %v582_v38 = vmul.f32 %v1212_v29, %v513_v18  ;;  %v529_v20 = vld [vmem:[%s1734_s0 + $0x100] sm:$0xff] }
  0xd5   : > { %772 = vst [vmem:[%s1737_s3 + $0x48] sm:$0xff] %v708_v26  ;;  %773 = vst [vmem:[%s1737_s3 + $0x50] sm:$0xff] %v709_v27  ;;  %v714_v40 = vmax.f32 %v650_v31, 0.0  ;;  %v583_v41 = vmul.f32 %v1212_v29, %v514_v23  ;;  %v584_v42 = vmul.f32 %v1212_v29, %v515_v24  ;;  %v585_v43 = vmul.f32 %v1212_v29, %v516_v25  ;;  %v530_v25 = vld [vmem:[%s1734_s0 + $0x108] sm:$0xff]  ;;  %v531_v26 = vld [vmem:[%s1734_s0 + $0x110] sm:$0xff] }
  0xd6   : > { %774 = vst [vmem:[%s1737_s3 + $0x58] sm:$0xff] %v710_v28  ;;  %775 = vst [vmem:[%s1737_s3 + $0x60] sm:$0xff] %v711_v35  ;;  %v651_v44 = vadd.f32 %v1214_v30, %v582_v38  ;;  %v586_v45 = vmul.f32 %v1212_v29, %v517_v32  ;;  %v587_v46 = vmul.f32 %v1212_v29, %v518_v33  ;;  %v532_v27 = vld [vmem:[%s1734_s0 + $0x118] sm:$0xff]  ;;  %v534_v35 = vld [vmem:[%s1734_s0 + $0x128] sm:$0xff] }
  0xd7   : > { %776 = vst [vmem:[%s1737_s3 + $0x68] sm:$0xff] %v712_v36  ;;  %777 = vst [vmem:[%s1737_s3 + $0x70] sm:$0xff] %v713_v37  ;;  %v588_v47 = vmul.f32 %v1212_v29, %v519_v34  ;;  %v652_v48 = vadd.f32 %v1214_v30, %v583_v41  ;;  %v653_v49 = vadd.f32 %v1214_v30, %v584_v42  ;;  %v533_v34 = vld [vmem:[%s1734_s0 + $0x120] sm:$0xff]  ;;  %v535_v36 = vld [vmem:[%s1734_s0 + $0x130] sm:$0xff] }
  0xd8   : > { %778 = vst [vmem:[%s1737_s3 + $0x78] sm:$0xff] %v714_v40  ;;  %v654_v50 = vadd.f32 %v1214_v30, %v585_v43  ;;  %v589_v51 = vmul.f32 %v1212_v29, %v520_v39  ;;  %v715_v53 = vmax.f32 %v651_v44, 0.0  ;;  %v655_v54 = vadd.f32 %v1214_v30, %v586_v45  ;;  %v536_v41 = vld [vmem:[%s1734_s0 + $0x138] sm:$0xff] }
  0xd9   : > { %v656_v55 = vadd.f32 %v1214_v30, %v587_v46  ;;  %v657_v56 = vadd.f32 %v1214_v30, %v588_v47  ;;  %v716_v60 = vmax.f32 %v652_v48, 0.0  ;;  %v717_v61 = vmax.f32 %v653_v49, 0.0 }
  0xda   : > { %v718_v62 = vmax.f32 %v654_v50, 0.0  ;;  %v658_v63 = vadd.f32 %v1214_v30, %v589_v51  ;;  %779 = vst [vmem:[%s1737_s3 + $0x80] sm:$0xff] %v715_v53  ;;  %v719_v3 = vmax.f32 %v655_v54, 0.0  ;;  %v590_v6 = vmul.f32 %v1212_v29, %v521_v52  ;;  %v537_v54 = vld [vmem:[%s1734_s0 + $0x140] sm:$0xff] }
  0xdb   : > { %v720_v4 = vmax.f32 %v656_v55, 0.0  ;;  %v721_v5 = vmax.f32 %v657_v56, 0.0  ;;  %780 = vst [vmem:[%s1737_s3 + $0x88] sm:$0xff] %v716_v60  ;;  %781 = vst [vmem:[%s1737_s3 + $0x90] sm:$0xff] %v717_v61  ;;  %v591_v9 = vmul.f32 %v1212_v29, %v522_v57  ;;  %v592_v10 = vmul.f32 %v1212_v29, %v523_v58  ;;  %v539_v60 = vld [vmem:[%s1734_s0 + $0x150] sm:$0xff]  ;;  %v540_v61 = vld [vmem:[%s1734_s0 + $0x158] sm:$0xff] }
  0xdc   : > { %782 = vst [vmem:[%s1737_s3 + $0x98] sm:$0xff] %v718_v62  ;;  %v722_v8 = vmax.f32 %v658_v63, 0.0  ;;  %v593_v11 = vmul.f32 %v1212_v29, %v524_v59  ;;  %783 = vst [vmem:[%s1737_s3 + $0xa0] sm:$0xff] %v719_v3  ;;  %v659_v12 = vadd.f32 %v1214_v30, %v590_v6  ;;  %v594_v13 = vmul.f32 %v1212_v29, %v525_v0  ;;  %v538_v59 = vld [vmem:[%s1734_s0 + $0x148] sm:$0xff] }
  0xdd   : > { %784 = vst [vmem:[%s1737_s3 + $0xa8] sm:$0xff] %v720_v4  ;;  %785 = vst [vmem:[%s1737_s3 + $0xb0] sm:$0xff] %v721_v5  ;;  %v595_v14 = vmul.f32 %v1212_v29, %v526_v1  ;;  %v596_v15 = vmul.f32 %v1212_v29, %v527_v2  ;;  %v660_v16 = vadd.f32 %v1214_v30, %v591_v9  ;;  %v541_v2 = vld [vmem:[%s1734_s0 + $0x160] sm:$0xff]  ;;  %v542_v3 = vld [vmem:[%s1734_s0 + $0x168] sm:$0xff] }
  0xde   : > { %786 = vst [vmem:[%s1737_s3 + $0xb8] sm:$0xff] %v722_v8  ;;  %v661_v17 = vadd.f32 %v1214_v30, %v592_v10  ;;  %v662_v18 = vadd.f32 %v1214_v30, %v593_v11  ;;  %v597_v19 = vmul.f32 %v1212_v29, %v528_v7  ;;  %v723_v21 = vmax.f32 %v659_v12, 0.0  ;;  %v543_v4 = vld [vmem:[%s1734_s0 + $0x170] sm:$0xff]  ;;  %v544_v9 = vld [vmem:[%s1734_s0 + $0x178] sm:$0xff] }
  0xdf   : > { %v663_v22 = vadd.f32 %v1214_v30, %v594_v13  ;;  %v664_v23 = vadd.f32 %v1214_v30, %v595_v14  ;;  %v665_v24 = vadd.f32 %v1214_v30, %v596_v15  ;;  %v724_v28 = vmax.f32 %v660_v16, 0.0 }
  0xe0   : > { %v725_v31 = vmax.f32 %v661_v17, 0.0  ;;  %v726_v32 = vmax.f32 %v662_v18, 0.0  ;;  %v666_v33 = vadd.f32 %v1214_v30, %v597_v19  ;;  %787 = vst [vmem:[%s1737_s3 + $0xc0] sm:$0xff] %v723_v21  ;;  %v598_v40 = vmul.f32 %v1212_v29, %v529_v20 }
  0xe1   : > { %v727_v37 = vmax.f32 %v663_v22, 0.0  ;;  %v728_v38 = vmax.f32 %v664_v23, 0.0  ;;  %v729_v39 = vmax.f32 %v665_v24, 0.0  ;;  %788 = vst [vmem:[%s1737_s3 + $0xc8] sm:$0xff] %v724_v28  ;;  %v599_v43 = vmul.f32 %v1212_v29, %v530_v25  ;;  %v545_v22 = vld [vmem:[%s1734_s0 + $0x180] sm:$0xff]  ;;  %v547_v28 = vld [vmem:[%s1734_s0 + $0x190] sm:$0xff] }
  0xe2   : > { %789 = vst [vmem:[%s1737_s3 + $0xd0] sm:$0xff] %v725_v31  ;;  %790 = vst [vmem:[%s1737_s3 + $0xd8] sm:$0xff] %v726_v32  ;;  %v730_v42 = vmax.f32 %v666_v33, 0.0  ;;  %v600_v44 = vmul.f32 %v1212_v29, %v531_v26  ;;  %v601_v45 = vmul.f32 %v1212_v29, %v532_v27  ;;  %v667_v46 = vadd.f32 %v1214_v30, %v598_v40  ;;  %v546_v27 = vld [vmem:[%s1734_s0 + $0x188] sm:$0xff]  ;;  %v548_v31 = vld [vmem:[%s1734_s0 + $0x198] sm:$0xff] }
  0xe3   : > { %791 = vst [vmem:[%s1737_s3 + $0xe0] sm:$0xff] %v727_v37  ;;  %792 = vst [vmem:[%s1737_s3 + $0xe8] sm:$0xff] %v728_v38  ;;  %v602_v47 = vmul.f32 %v1212_v29, %v533_v34  ;;  %v603_v48 = vmul.f32 %v1212_v29, %v534_v35  ;;  %v604_v49 = vmul.f32 %v1212_v29, %v535_v36  ;;  %v549_v36 = vld [vmem:[%s1734_s0 + $0x1a0] sm:$0xff]  ;;  %v550_v37 = vld [vmem:[%s1734_s0 + $0x1a8] sm:$0xff] }
  0xe4   : > { %793 = vst [vmem:[%s1737_s3 + $0xf0] sm:$0xff] %v729_v39  ;;  %794 = vst [vmem:[%s1737_s3 + $0xf8] sm:$0xff] %v730_v42  ;;  %v668_v50 = vadd.f32 %v1214_v30, %v599_v43  ;;  %v669_v51 = vadd.f32 %v1214_v30, %v600_v44  ;;  %v670_v52 = vadd.f32 %v1214_v30, %v601_v45  ;;  %v731_v55 = vmax.f32 %v667_v46, 0.0  ;;  %v551_v38 = vld [vmem:[%s1734_s0 + $0x1b0] sm:$0xff]  ;;  %v552_v43 = vld [vmem:[%s1734_s0 + $0x1b8] sm:$0xff] }
  0xe5   : > { %v605_v53 = vmul.f32 %v1212_v29, %v536_v41  ;;  %v671_v56 = vadd.f32 %v1214_v30, %v602_v47  ;;  %v672_v57 = vadd.f32 %v1214_v30, %v603_v48  ;;  %v673_v58 = vadd.f32 %v1214_v30, %v604_v49 }
  0xe6   : > { %v732_v62 = vmax.f32 %v668_v50, 0.0  ;;  %v733_v63 = vmax.f32 %v669_v51, 0.0  ;;  %v734_v0 = vmax.f32 %v670_v52, 0.0  ;;  %795 = vst [vmem:[%s1737_s3 + $0x100] sm:$0xff] %v731_v55  ;;  %v606_v8 = vmul.f32 %v1212_v29, %v537_v54 }
  0xe7   : > { %v674_v1 = vadd.f32 %v1214_v30, %v605_v53  ;;  %v735_v5 = vmax.f32 %v671_v56, 0.0  ;;  %v736_v6 = vmax.f32 %v672_v57, 0.0  ;;  %v737_v7 = vmax.f32 %v673_v58, 0.0  ;;  %v553_v56 = vld [vmem:[%s1734_s0 + $0x1c0] sm:$0xff] }
  0xe8   : > { %796 = vst [vmem:[%s1737_s3 + $0x108] sm:$0xff] %v732_v62  ;;  %797 = vst [vmem:[%s1737_s3 + $0x110] sm:$0xff] %v733_v63  ;;  %v607_v11 = vmul.f32 %v1212_v29, %v538_v59  ;;  %v608_v12 = vmul.f32 %v1212_v29, %v539_v60  ;;  %v609_v13 = vmul.f32 %v1212_v29, %v540_v61  ;;  %v554_v61 = vld [vmem:[%s1734_s0 + $0x1c8] sm:$0xff]  ;;  %v555_v62 = vld [vmem:[%s1734_s0 + $0x1d0] sm:$0xff] }
  0xe9   : > { %798 = vst [vmem:[%s1737_s3 + $0x118] sm:$0xff] %v734_v0  ;;  %v738_v10 = vmax.f32 %v674_v1, 0.0  ;;  %799 = vst [vmem:[%s1737_s3 + $0x120] sm:$0xff] %v735_v5  ;;  %v675_v14 = vadd.f32 %v1214_v30, %v606_v8  ;;  %v610_v15 = vmul.f32 %v1212_v29, %v541_v2  ;;  %v611_v16 = vmul.f32 %v1212_v29, %v542_v3  ;;  %v556_v63 = vld [vmem:[%s1734_s0 + $0x1d8] sm:$0xff]  ;;  %v558_v5 = vld [vmem:[%s1734_s0 + $0x1e8] sm:$0xff] }
  0xea   : > { %800 = vst [vmem:[%s1737_s3 + $0x128] sm:$0xff] %v736_v6  ;;  %801 = vst [vmem:[%s1737_s3 + $0x130] sm:$0xff] %v737_v7  ;;  %v612_v17 = vmul.f32 %v1212_v29, %v543_v4  ;;  %v676_v18 = vadd.f32 %v1214_v30, %v607_v11  ;;  %v677_v19 = vadd.f32 %v1214_v30, %v608_v12  ;;  %v557_v4 = vld [vmem:[%s1734_s0 + $0x1e0] sm:$0xff]  ;;  %v559_v6 = vld [vmem:[%s1734_s0 + $0x1f0] sm:$0xff] }
  0xeb   : > { %802 = vst [vmem:[%s1737_s3 + $0x138] sm:$0xff] %v738_v10  ;;  %v678_v20 = vadd.f32 %v1214_v30, %v609_v13  ;;  %v613_v21 = vmul.f32 %v1212_v29, %v544_v9  ;;  %v739_v23 = vmax.f32 %v675_v14, 0.0  ;;  %v679_v24 = vadd.f32 %v1214_v30, %v610_v15  ;;  %v560_v11 = vld [vmem:[%s1734_s0 + $0x1f8] sm:$0xff] }
  0xec   : > { %v680_v25 = vadd.f32 %v1214_v30, %v611_v16  ;;  %v681_v26 = vadd.f32 %v1214_v30, %v612_v17  ;;  %v740_v32 = vmax.f32 %v676_v18, 0.0  ;;  %v741_v33 = vmax.f32 %v677_v19, 0.0 }
  0xed   : > { %v742_v34 = vmax.f32 %v678_v20, 0.0  ;;  %v682_v35 = vadd.f32 %v1214_v30, %v613_v21  ;;  %803 = vst [vmem:[%s1737_s3 + $0x140] sm:$0xff] %v739_v23  ;;  %v743_v39 = vmax.f32 %v679_v24, 0.0  ;;  %v614_v42 = vmul.f32 %v1212_v29, %v545_v22 }
  0xee   : > { %v744_v40 = vmax.f32 %v680_v25, 0.0  ;;  %v745_v41 = vmax.f32 %v681_v26, 0.0  ;;  %804 = vst [vmem:[%s1737_s3 + $0x148] sm:$0xff] %v740_v32  ;;  %805 = vst [vmem:[%s1737_s3 + $0x150] sm:$0xff] %v741_v33  ;;  %v615_v45 = vmul.f32 %v1212_v29, %v546_v27  ;;  %v616_v46 = vmul.f32 %v1212_v29, %v547_v28 }
  0xef   : > { %806 = vst [vmem:[%s1737_s3 + $0x158] sm:$0xff] %v742_v34  ;;  %v746_v44 = vmax.f32 %v682_v35, 0.0  ;;  %v617_v47 = vmul.f32 %v1212_v29, %v548_v31  ;;  %807 = vst [vmem:[%s1737_s3 + $0x160] sm:$0xff] %v743_v39  ;;  %v683_v48 = vadd.f32 %v1214_v30, %v614_v42  ;;  %v618_v49 = vmul.f32 %v1212_v29, %v549_v36 }
  0xf0   : > { %808 = vst [vmem:[%s1737_s3 + $0x168] sm:$0xff] %v744_v40  ;;  %809 = vst [vmem:[%s1737_s3 + $0x170] sm:$0xff] %v745_v41  ;;  %v619_v50 = vmul.f32 %v1212_v29, %v550_v37  ;;  %v620_v51 = vmul.f32 %v1212_v29, %v551_v38  ;;  %v684_v52 = vadd.f32 %v1214_v30, %v615_v45 }
  0xf1   : > { %810 = vst [vmem:[%s1737_s3 + $0x178] sm:$0xff] %v746_v44  ;;  %v685_v53 = vadd.f32 %v1214_v30, %v616_v46  ;;  %v686_v54 = vadd.f32 %v1214_v30, %v617_v47  ;;  %v621_v55 = vmul.f32 %v1212_v29, %v552_v43  ;;  %v747_v57 = vmax.f32 %v683_v48, 0.0 }
  0xf2   : > { %v687_v58 = vadd.f32 %v1214_v30, %v618_v49  ;;  %v688_v59 = vadd.f32 %v1214_v30, %v619_v50  ;;  %v689_v60 = vadd.f32 %v1214_v30, %v620_v51  ;;  %v748_v0 = vmax.f32 %v684_v52, 0.0 }
  0xf3   : > { %v749_v1 = vmax.f32 %v685_v53, 0.0  ;;  %v750_v2 = vmax.f32 %v686_v54, 0.0  ;;  %v690_v3 = vadd.f32 %v1214_v30, %v621_v55  ;;  %811 = vst [vmem:[%s1737_s3 + $0x180] sm:$0xff] %v747_v57  ;;  %v622_v10 = vmul.f32 %v1212_v29, %v553_v56 }
  0xf4   : > { %v751_v7 = vmax.f32 %v687_v58, 0.0  ;;  %v752_v8 = vmax.f32 %v688_v59, 0.0  ;;  %v753_v9 = vmax.f32 %v689_v60, 0.0  ;;  %812 = vst [vmem:[%s1737_s3 + $0x188] sm:$0xff] %v748_v0  ;;  %v623_v13 = vmul.f32 %v1212_v29, %v554_v61 }
  0xf5   : > { %813 = vst [vmem:[%s1737_s3 + $0x190] sm:$0xff] %v749_v1  ;;  %814 = vst [vmem:[%s1737_s3 + $0x198] sm:$0xff] %v750_v2  ;;  %v754_v12 = vmax.f32 %v690_v3, 0.0  ;;  %v624_v14 = vmul.f32 %v1212_v29, %v555_v62  ;;  %v625_v15 = vmul.f32 %v1212_v29, %v556_v63  ;;  %v691_v16 = vadd.f32 %v1214_v30, %v622_v10 }
  0xf6   : > { %815 = vst [vmem:[%s1737_s3 + $0x1a0] sm:$0xff] %v751_v7  ;;  %816 = vst [vmem:[%s1737_s3 + $0x1a8] sm:$0xff] %v752_v8  ;;  %v626_v17 = vmul.f32 %v1212_v29, %v557_v4  ;;  %v627_v18 = vmul.f32 %v1212_v29, %v558_v5  ;;  %v628_v19 = vmul.f32 %v1212_v29, %v559_v6 }
  0xf7   : > { %817 = vst [vmem:[%s1737_s3 + $0x1b0] sm:$0xff] %v753_v9  ;;  %818 = vst [vmem:[%s1737_s3 + $0x1b8] sm:$0xff] %v754_v12  ;;  %v692_v20 = vadd.f32 %v1214_v30, %v623_v13  ;;  %v693_v21 = vadd.f32 %v1214_v30, %v624_v14  ;;  %v694_v22 = vadd.f32 %v1214_v30, %v625_v15  ;;  %v755_v24 = vmax.f32 %v691_v16, 0.0 }
  0xf8   : > { %v629_v23 = vmul.f32 %v1212_v29, %v560_v11  ;;  %v695_v25 = vadd.f32 %v1214_v30, %v626_v17  ;;  %v696_v26 = vadd.f32 %v1214_v30, %v627_v18  ;;  %v697_v27 = vadd.f32 %v1214_v30, %v628_v19 }
  0xf9   : > { %v756_v28 = vmax.f32 %v692_v20, 0.0  ;;  %v757_v31 = vmax.f32 %v693_v21, 0.0  ;;  %v758_v32 = vmax.f32 %v694_v22, 0.0  ;;  %819 = vst [vmem:[%s1737_s3 + $0x1c0] sm:$0xff] %v755_v24 }
  0xfa   : > { %v698_v33 = vadd.f32 %v1214_v30, %v629_v23  ;;  %v759_v34 = vmax.f32 %v695_v25, 0.0  ;;  %v760_v35 = vmax.f32 %v696_v26, 0.0  ;;  %v761_v36 = vmax.f32 %v697_v27, 0.0 }
  0xfb   : > { %820 = vst [vmem:[%s1737_s3 + $0x1c8] sm:$0xff] %v756_v28  ;;  %821 = vst [vmem:[%s1737_s3 + $0x1d0] sm:$0xff] %v757_v31 }
  0xfc   : > { %822 = vst [vmem:[%s1737_s3 + $0x1d8] sm:$0xff] %v758_v32  ;;  %v762_v29 = vmax.f32 %v698_v33, 0.0  ;;  %823 = vst [vmem:[%s1737_s3 + $0x1e0] sm:$0xff] %v759_v34 }
  0xfd   : > { %824 = vst [vmem:[%s1737_s3 + $0x1e8] sm:$0xff] %v760_v35  ;;  %825 = vst [vmem:[%s1737_s3 + $0x1f0] sm:$0xff] %v761_v36 }
  0xfe   : > { %826 = vst [vmem:[%s1737_s3 + $0x1f8] sm:$0xff] %v762_v29 }
  0xff PF: > { %s13_s14 = sadd.s32 1, %s964_s14   ;;  %s1738_s12 = smov %s960_s13 }
 0x100   : > { %p10_p8 = scmp.ge.s32.totalorder %s13_s14, 4   ;;  %s1739_s13 = smov %s1741_s15 }
 0x102   :  { %12 = sbr.rel (!%p10_p8) target bundleno = 2 (0x2), region = 78 }

// kernel: generator_forward.15
= control target key start
LH: loop header
LB: loop body
LE: loop exit
PB: predicated region body
PF: predicated region fallthrough
CT: control target
= control target key end

     0   :  { %s1867_s9 = smov 0   ;;  %s1869_s10 = smov 0   ;;  %s2102_s0 = inlined_call_operand.vmem [shape: bf16[4,512,512], index: 0, kind: input, shape index: {}]   ;;  %s2103_s1 = inlined_call_operand.vmem [shape: bf16[4,512,64], index: 1, kind: input, shape index: {}]   ;;  %s2104_s2 = inlined_call_operand.vmem [shape: f32[4,512,64], index: 2, kind: output, shape index: {}]  }
   0x1   :  { %s1871_s11 = smov 0   ;;  %s1873_s12 = smov 0  }
   0x2   :  { %s1875_s13 = smov 0  }
   0x3 LB: > { %s21_s14 = sadd.s32 1, %s1842_s11  ;;  %s24_s15 = sadd.s32 1, %s1846_s12  ;;  %s1850_s13 = sphi %s1875_s13, %s12_s13   ;;  %s1846_s12 = sphi %s1873_s12, %s2108_s12   ;;  %s1842_s11 = sphi %s1871_s11, %s2107_s11   ;;  %s1838_s10 = sphi %s1869_s10, %s2106_s10   ;;  %s1834_s9 = sphi %s1867_s9, %s2105_s9  }
   0x4   : > { %p22_p0 = scmp.ge.s32.totalorder %s21_s14, 2  ;;  %p1311_p1 = scmp.ge.s32.totalorder %s1850_s13, 1 }
   0x5   : > { %p144_p2 = scmp.lt.s32.totalorder %s1850_s13, 9 }
   0x6   : > { %s2110_s14 = smov (%p22_p0, %s21_s14), 0  ;;  %s2112_s15 = smov (!%p22_p0, %s24_s15), %s1846_s12 }
   0x7   : > { %p145_p3 = pnand %p1311_p1, %p144_p2  ;;  %p26_p4 = scmp.ge.s32.totalorder %s2112_s15, 4 }
   0x8   : > { %p181_p5 = scmp.lt.s32.totalorder (!%p145_p3), %s1838_s10, 3  ;;  %s1312_s20 = sshll.u32 (!%p145_p3), %s1834_s9, 5  ;;  %vm1169_vm0 = vcmask (!%p145_p3), 523264  }
   0x9   : > { %s2114_s15 = smov (%p26_p4, %s2112_s15), 0  ;;  %148 = sbr.rel (%p145_p3) target bundleno = 394 (0x18a), region = 28 }
   0xa   : > { %p183_p6 = scmp.lt.s32.totalorder (!%p145_p3), %s1312_s20, 63 }
  0x10   : > { %s2116_s10 = smov (!%p181_p5, %s1838_s10), 3  ;;  %s2118_s20 = smov (!%p183_p6, %s1312_s20), 63 }
  0x11   : > { %s1314_s16 = sshll.u32 %s2116_s10, 8  ;;  %s1313_s21 = sshll.u32 %s2118_s20, 2 }
  0x12   : > { %s1907_s19 = scalar_lea.vmem %s2103_s1, %s1314_s16  ;;  %s187_s22 = sadd.s32 %s1314_s16, %s1313_s21 }
  0x13   : > { %v1684_v0 = vld [vmem:[%s1907_s19 + $0x40] sm:$0xff]   ;;  %v1688_v4 = vld [vmem:[%s1907_s19 + $0x48] sm:$0xff]   ;;  %v1692_v8 = vld [vmem:[%s1907_s19 + $0x50] sm:$0xff]   ;;  %s1315_s23 = sshll.u32 %s187_s22, 2  ;;  %s1319_s27 = sshll.u32 %s2116_s10, 6 }
  0x14   : > { %v1685_v1 = vld [vmem:[%s1907_s19 + $0xc0] sm:$0xff]   ;;  %1420 = vmatprep.subr.bf16.mxu0 %v1684_v0  ;;  %v1689_v5 = vld [vmem:[%s1907_s19 + $0xc8] sm:$0xff]   ;;  %v1693_v9 = vld [vmem:[%s1907_s19 + $0xd0] sm:$0xff]   ;;  %s1948_s26 = scalar_lea.vmem %s2102_s0, %s1315_s23  ;;  %s202_s28 = sadd.s32 %s1319_s27, %s2118_s20 }
  0x15   : > { %v1686_v2 = vld [vmem:[%s1907_s19] sm:$0xff]   ;;  %1532 = vmatprep.subr.bf16.mxu1 %v1685_v1  ;;  %v1690_v6 = vld [vmem:[%s1907_s19 + $0x8] sm:$0xff]   ;;  %v1694_v10 = vld [vmem:[%s1907_s19 + $0x10] sm:$0xff]   ;;  %s1320_s29 = sshll.u32 %s202_s28, 3 }
  0x16   : > { %v1687_v3 = vld [vmem:[%s1907_s19 + $0x80] sm:$0xff]   ;;  %1421 = vmatpush3.bf16.msra.mxu0 %v1686_v2  ;;  %v1691_v7 = vld [vmem:[%s1907_s19 + $0x88] sm:$0xff]   ;;  %v1695_v11 = vld [vmem:[%s1907_s19 + $0x90] sm:$0xff]   ;;  %s2021_s4 = scalar_lea.vmem %s2104_s2, %s1320_s29 }
  0x17   : > { %1533 = vmatpush3.bf16.msra.mxu1 %v1687_v3  ;;  %1422 = vmatprep.subr.bf16.mxu0 %v1688_v4  ;;  %v1696_v12 = vld [vmem:[%s1907_s19 + $0x58] sm:$0xff]   ;;  %v1700_v16 = vld [vmem:[%s1907_s19 + $0x60] sm:$0xff]   ;;  %v1704_v20 = vld [vmem:[%s1907_s19 + $0x68] sm:$0xff]  }
  0x18   : > { %1534 = vmatprep.subr.bf16.mxu1 %v1689_v5  ;;  %v1697_v13 = vld [vmem:[%s1907_s19 + $0xd8] sm:$0xff]   ;;  %v1701_v17 = vld [vmem:[%s1907_s19 + $0xe0] sm:$0xff]   ;;  %v1705_v21 = vld [vmem:[%s1907_s19 + $0xe8] sm:$0xff]  }
  0x19   : > { %v1698_v14 = vld [vmem:[%s1907_s19 + $0x18] sm:$0xff]   ;;  %v1702_v18 = vld [vmem:[%s1907_s19 + $0x20] sm:$0xff]   ;;  %v1706_v22 = vld [vmem:[%s1907_s19 + $0x28] sm:$0xff]  }
  0x1a   : > { %1423 = vmatpush3.bf16.msra.mxu0 %v1690_v6  ;;  %v1699_v15 = vld [vmem:[%s1907_s19 + $0x98] sm:$0xff]   ;;  %v1703_v19 = vld [vmem:[%s1907_s19 + $0xa0] sm:$0xff]   ;;  %v1707_v23 = vld [vmem:[%s1907_s19 + $0xa8] sm:$0xff]  }
  0x1b   : > { %1535 = vmatpush3.bf16.msra.mxu1 %v1691_v7  ;;  %1424 = vmatprep.subr.bf16.mxu0 %v1692_v8  ;;  %v1708_v24 = vld [vmem:[%s1907_s19 + $0x70] sm:$0xff]   ;;  %v1712_v28 = vld [vmem:[%s1907_s19 + $0x78] sm:$0xff]  }
  0x1c   : > { %1536 = vmatprep.subr.bf16.mxu1 %v1693_v9  ;;  %v1709_v25 = vld [vmem:[%s1907_s19 + $0xf0] sm:$0xff]   ;;  %v1713_v29 = vld [vmem:[%s1907_s19 + $0xf8] sm:$0xff]  }
  0x1d   : > { %v1710_v26 = vld [vmem:[%s1907_s19 + $0x30] sm:$0xff]   ;;  %v1714_v30 = vld [vmem:[%s1907_s19 + $0x38] sm:$0xff]  }
  0x1e   : > { %1425 = vmatpush3.bf16.msra.mxu0 %v1694_v10  ;;  %v1711_v27 = vld [vmem:[%s1907_s19 + $0xb0] sm:$0xff]   ;;  %v1715_v31 = vld [vmem:[%s1907_s19 + $0xb8] sm:$0xff]  }
  0x1f   : > { %1537 = vmatpush3.bf16.msra.mxu1 %v1695_v11  ;;  %1426 = vmatprep.subr.bf16.mxu0 %v1696_v12  ;;  %v1716_v32 = vld [vmem:[%s1948_s26] ss:$16 sps:$4 sm:$0xff]   ;;  %v1718_v33 = vld [vmem:[%s1948_s26 + $0x4] ss:$16 sps:$4 sm:$0xff]   ;;  %v1719_v34 = vld [vmem:[%s1948_s26 + $0x8] ss:$16 sps:$4 sm:$0xff]  }
  0x20   : > { %1538 = vmatprep.subr.bf16.mxu1 %v1697_v13  ;;  %v1721_v35 = vld [vmem:[%s1948_s26 + $0xc] ss:$16 sps:$4 sm:$0xff]   ;;  %879 = vmatprep.mubr.bf16.mxu0 %v1718_v33  ;;  %v1722_v36 = vld [vmem:[%s1948_s26 + $0x24] ss:$16 sps:$4 sm:$0xff]   ;;  %v1726_v38 = vld [vmem:[%s1948_s26 + $0x20] ss:$16 sps:$4 sm:$0xff]  }
  0x21   : > { %1040 = vmatprep.mubr.bf16.mxu1 %v1721_v35  ;;  %v1724_v37 = vld [vmem:[%s1948_s26 + $0x2c] ss:$16 sps:$4 sm:$0xff]   ;;  %v1727_v39 = vld [vmem:[%s1948_s26 + $0x28] ss:$16 sps:$4 sm:$0xff]   ;;  %v1728_v40 = vld [vmem:[%s1948_s26 + $0x44] ss:$16 sps:$4 sm:$0xff]  }
  0x22   : > { %1427 = vmatpush3.bf16.msra.mxu0 %v1698_v14  ;;  %v1730_v41 = vld [vmem:[%s1948_s26 + $0x4c] ss:$16 sps:$4 sm:$0xff]   ;;  %v1732_v42 = vld [vmem:[%s1948_s26 + $0x40] ss:$16 sps:$4 sm:$0xff]   ;;  %v1733_v43 = vld [vmem:[%s1948_s26 + $0x48] ss:$16 sps:$4 sm:$0xff]  }
  0x23   : > { %1539 = vmatpush3.bf16.msra.mxu1 %v1699_v15  ;;  %1428 = vmatprep.subr.bf16.mxu0 %v1700_v16  ;;  %v1734_v44 = vld [vmem:[%s1948_s26 + $0x64] ss:$16 sps:$4 sm:$0xff]   ;;  %v1736_v45 = vld [vmem:[%s1948_s26 + $0x6c] ss:$16 sps:$4 sm:$0xff]   ;;  %v1738_v46 = vld [vmem:[%s1948_s26 + $0x60] ss:$16 sps:$4 sm:$0xff]  }
  0x24   : > { %1540 = vmatprep.subr.bf16.mxu1 %v1701_v17  ;;  %v1739_v47 = vld [vmem:[%s1948_s26 + $0x68] ss:$16 sps:$4 sm:$0xff]   ;;  %v1740_v48 = vld [vmem:[%s1948_s26 + $0x84] ss:$16 sps:$4 sm:$0xff]   ;;  %v1742_v49 = vld [vmem:[%s1948_s26 + $0x8c] ss:$16 sps:$4 sm:$0xff]  }
  0x25   : > { %v1744_v50 = vld [vmem:[%s1948_s26 + $0x80] ss:$16 sps:$4 sm:$0xff]   ;;  %v1745_v51 = vld [vmem:[%s1948_s26 + $0x88] ss:$16 sps:$4 sm:$0xff]   ;;  %v1746_v52 = vld [vmem:[%s1948_s26 + $0xa4] ss:$16 sps:$4 sm:$0xff]  }
  0x26   : > { %1429 = vmatpush3.bf16.msra.mxu0 %v1702_v18  ;;  %v1748_v53 = vld [vmem:[%s1948_s26 + $0xac] ss:$16 sps:$4 sm:$0xff]   ;;  %v1750_v54 = vld [vmem:[%s1948_s26 + $0xa0] ss:$16 sps:$4 sm:$0xff]   ;;  %v1751_v55 = vld [vmem:[%s1948_s26 + $0xa8] ss:$16 sps:$4 sm:$0xff]  }
  0x27   : > { %1541 = vmatpush3.bf16.msra.mxu1 %v1703_v19  ;;  %1430 = vmatprep.subr.bf16.mxu0 %v1704_v20  ;;  %v1752_v56 = vld [vmem:[%s1948_s26 + $0xc4] ss:$16 sps:$4 sm:$0xff]   ;;  %v1754_v57 = vld [vmem:[%s1948_s26 + $0xcc] ss:$16 sps:$4 sm:$0xff]   ;;  %v1756_v58 = vld [vmem:[%s1948_s26 + $0xc0] ss:$16 sps:$4 sm:$0xff]  }
  0x28   : > { %1542 = vmatprep.subr.bf16.mxu1 %v1705_v21  ;;  %v1757_v59 = vld [vmem:[%s1948_s26 + $0xc8] ss:$16 sps:$4 sm:$0xff]   ;;  %v1758_v60 = vld [vmem:[%s1948_s26 + $0xe4] ss:$16 sps:$4 sm:$0xff]   ;;  %v1760_v61 = vld [vmem:[%s1948_s26 + $0xec] ss:$16 sps:$4 sm:$0xff]  }
  0x29   : > { %v1762_v62 = vld [vmem:[%s1948_s26 + $0xe0] ss:$16 sps:$4 sm:$0xff]   ;;  %v1763_v63 = vld [vmem:[%s1948_s26 + $0xe8] ss:$16 sps:$4 sm:$0xff]   ;;  %v1764_v0 = vld [vmem:[%s1948_s26 + $0x104] ss:$16 sps:$4 sm:$0xff]  }
  0x2a   : > { %1431 = vmatpush3.bf16.msra.mxu0 %v1706_v22  ;;  %v1766_v1 = vld [vmem:[%s1948_s26 + $0x10c] ss:$16 sps:$4 sm:$0xff]   ;;  %v1768_v2 = vld [vmem:[%s1948_s26 + $0x100] ss:$16 sps:$4 sm:$0xff]   ;;  %v1769_v3 = vld [vmem:[%s1948_s26 + $0x108] ss:$16 sps:$4 sm:$0xff]  }
  0x2b   : > { %1543 = vmatpush3.bf16.msra.mxu1 %v1707_v23  ;;  %1432 = vmatprep.subr.bf16.mxu0 %v1708_v24  ;;  %v1770_v4 = vld [vmem:[%s1948_s26 + $0x124] ss:$16 sps:$4 sm:$0xff]   ;;  %v1772_v5 = vld [vmem:[%s1948_s26 + $0x12c] ss:$16 sps:$4 sm:$0xff]   ;;  %v1774_v6 = vld [vmem:[%s1948_s26 + $0x120] ss:$16 sps:$4 sm:$0xff]  }
  0x2c   : > { %1544 = vmatprep.subr.bf16.mxu1 %v1709_v25  ;;  %v1775_v7 = vld [vmem:[%s1948_s26 + $0x128] ss:$16 sps:$4 sm:$0xff]   ;;  %v1776_v8 = vld [vmem:[%s1948_s26 + $0x144] ss:$16 sps:$4 sm:$0xff]   ;;  %v1778_v9 = vld [vmem:[%s1948_s26 + $0x14c] ss:$16 sps:$4 sm:$0xff]  }
  0x2d   : > { %v1780_v10 = vld [vmem:[%s1948_s26 + $0x140] ss:$16 sps:$4 sm:$0xff]   ;;  %v1781_v11 = vld [vmem:[%s1948_s26 + $0x148] ss:$16 sps:$4 sm:$0xff]   ;;  %v1782_v12 = vld [vmem:[%s1948_s26 + $0x164] ss:$16 sps:$4 sm:$0xff]  }
  0x2e   : > { %1433 = vmatpush3.bf16.msra.mxu0 %v1710_v26  ;;  %v1784_v13 = vld [vmem:[%s1948_s26 + $0x16c] ss:$16 sps:$4 sm:$0xff]   ;;  %v1786_v14 = vld [vmem:[%s1948_s26 + $0x160] ss:$16 sps:$4 sm:$0xff]   ;;  %v1787_v15 = vld [vmem:[%s1948_s26 + $0x168] ss:$16 sps:$4 sm:$0xff]  }
  0x2f   : > { %1545 = vmatpush3.bf16.msra.mxu1 %v1711_v27  ;;  %1434 = vmatprep.subr.bf16.mxu0 %v1712_v28  ;;  %v1788_v16 = vld [vmem:[%s1948_s26 + $0x184] ss:$16 sps:$4 sm:$0xff]   ;;  %v1790_v17 = vld [vmem:[%s1948_s26 + $0x18c] ss:$16 sps:$4 sm:$0xff]   ;;  %v1792_v18 = vld [vmem:[%s1948_s26 + $0x180] ss:$16 sps:$4 sm:$0xff]  }
  0x30   : > { %1546 = vmatprep.subr.bf16.mxu1 %v1713_v29  ;;  %v1793_v19 = vld [vmem:[%s1948_s26 + $0x188] ss:$16 sps:$4 sm:$0xff]   ;;  %v1794_v20 = vld [vmem:[%s1948_s26 + $0x1a4] ss:$16 sps:$4 sm:$0xff]   ;;  %v1796_v21 = vld [vmem:[%s1948_s26 + $0x1ac] ss:$16 sps:$4 sm:$0xff]  }
  0x31   : > { %v1798_v22 = vld [vmem:[%s1948_s26 + $0x1a0] ss:$16 sps:$4 sm:$0xff]   ;;  %v1799_v23 = vld [vmem:[%s1948_s26 + $0x1a8] ss:$16 sps:$4 sm:$0xff]   ;;  %v1800_v24 = vld [vmem:[%s1948_s26 + $0x1c4] ss:$16 sps:$4 sm:$0xff]  }
  0x32   : > { %1435 = vmatpush3.bf16.msra.mxu0 %v1714_v30  ;;  %v1802_v25 = vld [vmem:[%s1948_s26 + $0x1cc] ss:$16 sps:$4 sm:$0xff]   ;;  %v1804_v26 = vld [vmem:[%s1948_s26 + $0x1c0] ss:$16 sps:$4 sm:$0xff]   ;;  %v1805_v27 = vld [vmem:[%s1948_s26 + $0x1c8] ss:$16 sps:$4 sm:$0xff]  }
  0x33   : > { %1547 = vmatpush3.bf16.msra.mxu1 %v1715_v31  ;;  %v1806_v28 = vld [vmem:[%s1948_s26 + $0x1e4] ss:$16 sps:$4 sm:$0xff]   ;;  %v1808_v29 = vld [vmem:[%s1948_s26 + $0x1ec] ss:$16 sps:$4 sm:$0xff]   ;;  %v1810_v30 = vld [vmem:[%s1948_s26 + $0x1e0] ss:$16 sps:$4 sm:$0xff]  }
  0x34   : > { %v1811_v31 = vld [vmem:[%s1948_s26 + $0x1e8] ss:$16 sps:$4 sm:$0xff]  }
  0x35   : > { %880 = vmatmul.mubr.bf16.vlgmr.msra.gmra.mrb[0].mxu0 %v1716_v32 }
  0x36   : > { %1041 = vmatmul.mubr.bf16.vlgmr.msra.gmra.mrb[0].mxu1 %v1719_v34  ;;  %887 = vmatprep.mubr.bf16.mxu0 %v1722_v36 }
  0x37   : > { %1048 = vmatprep.mubr.bf16.mxu1 %v1724_v37 }
  0x3d   : > { %888 = vmatmul.mubr.bf16.gmra.mrb[4].mxu0 %v1726_v38 }
  0x3e   : > { %1049 = vmatmul.mubr.bf16.gmra.mrb[4].mxu1 %v1727_v39  ;;  %895 = vmatprep.mubr.bf16.mxu0 %v1728_v40 }
  0x3f   : > { %1056 = vmatprep.mubr.bf16.mxu1 %v1730_v41 }
  0x45   : > { %896 = vmatmul.mubr.bf16.gmra.mrb[8].mxu0 %v1732_v42 }
  0x46   : > { %1057 = vmatmul.mubr.bf16.gmra.mrb[8].mxu1 %v1733_v43  ;;  %903 = vmatprep.mubr.bf16.mxu0 %v1734_v44 }
  0x47   : > { %1064 = vmatprep.mubr.bf16.mxu1 %v1736_v45 }
  0x4d   : > { %904 = vmatmul.mubr.bf16.gmra.mrb[12].mxu0 %v1738_v46 }
  0x4e   : > { %1065 = vmatmul.mubr.bf16.gmra.mrb[12].mxu1 %v1739_v47  ;;  %911 = vmatprep.mubr.bf16.mxu0 %v1740_v48 }
  0x4f   : > { %1072 = vmatprep.mubr.bf16.mxu1 %v1742_v49 }
  0x55   : > { %912 = vmatmul.mubr.bf16.gmra.mrb[16].mxu0 %v1744_v50 }
  0x56   : > { %1073 = vmatmul.mubr.bf16.gmra.mrb[16].mxu1 %v1745_v51  ;;  %919 = vmatprep.mubr.bf16.mxu0 %v1746_v52 }
  0x57   : > { %1080 = vmatprep.mubr.bf16.mxu1 %v1748_v53 }
  0x5d   : > { %920 = vmatmul.mubr.bf16.gmra.mrb[20].mxu0 %v1750_v54 }
  0x5e   : > { %1081 = vmatmul.mubr.bf16.gmra.mrb[20].mxu1 %v1751_v55  ;;  %927 = vmatprep.mubr.bf16.mxu0 %v1752_v56 }
  0x5f   : > { %1088 = vmatprep.mubr.bf16.mxu1 %v1754_v57 }
  0x65   : > { %928 = vmatmul.mubr.bf16.gmra.mrb[24].mxu0 %v1756_v58 }
  0x66   : > { %1089 = vmatmul.mubr.bf16.gmra.mrb[24].mxu1 %v1757_v59  ;;  %935 = vmatprep.mubr.bf16.mxu0 %v1758_v60 }
  0x67   : > { %1096 = vmatprep.mubr.bf16.mxu1 %v1760_v61 }
  0x6d   : > { %936 = vmatmul.mubr.bf16.gmra.mrb[28].mxu0 %v1762_v62 }
  0x6e   : > { %1097 = vmatmul.mubr.bf16.gmra.mrb[28].mxu1 %v1763_v63  ;;  %943 = vmatprep.mubr.bf16.mxu0 %v1764_v0 }
  0x6f   : > { %1104 = vmatprep.mubr.bf16.mxu1 %v1766_v1 }
  0x75   : > { %944 = vmatmul.mubr.bf16.gmra.mrb[32].mxu0 %v1768_v2 }
  0x76   : > { %1105 = vmatmul.mubr.bf16.gmra.mrb[32].mxu1 %v1769_v3  ;;  %951 = vmatprep.mubr.bf16.mxu0 %v1770_v4 }
  0x77   : > { %1112 = vmatprep.mubr.bf16.mxu1 %v1772_v5 }
  0x7d   : > { %952 = vmatmul.mubr.bf16.gmra.mrb[36].mxu0 %v1774_v6 }
  0x7e   : > { %1113 = vmatmul.mubr.bf16.gmra.mrb[36].mxu1 %v1775_v7  ;;  %959 = vmatprep.mubr.bf16.mxu0 %v1776_v8 }
  0x7f   : > { %1120 = vmatprep.mubr.bf16.mxu1 %v1778_v9 }
  0x85   : > { %960 = vmatmul.mubr.bf16.gmra.mrb[40].mxu0 %v1780_v10 }
  0x86   : > { %1121 = vmatmul.mubr.bf16.gmra.mrb[40].mxu1 %v1781_v11  ;;  %967 = vmatprep.mubr.bf16.mxu0 %v1782_v12 }
  0x87   : > { %1128 = vmatprep.mubr.bf16.mxu1 %v1784_v13 }
  0x8d   : > { %968 = vmatmul.mubr.bf16.gmra.mrb[44].mxu0 %v1786_v14 }
  0x8e   : > { %1129 = vmatmul.mubr.bf16.gmra.mrb[44].mxu1 %v1787_v15  ;;  %975 = vmatprep.mubr.bf16.mxu0 %v1788_v16 }
  0x8f   : > { %1136 = vmatprep.mubr.bf16.mxu1 %v1790_v17 }
  0x95   : > { %976 = vmatmul.mubr.bf16.gmra.mrb[48].mxu0 %v1792_v18 }
  0x96   : > { %1137 = vmatmul.mubr.bf16.gmra.mrb[48].mxu1 %v1793_v19  ;;  %983 = vmatprep.mubr.bf16.mxu0 %v1794_v20 }
  0x97   : > { %1144 = vmatprep.mubr.bf16.mxu1 %v1796_v21 }
  0x9d   : > { %984 = vmatmul.mubr.bf16.gmra.mrb[52].mxu0 %v1798_v22 }
  0x9e   : > { %1145 = vmatmul.mubr.bf16.gmra.mrb[52].mxu1 %v1799_v23  ;;  %991 = vmatprep.mubr.bf16.mxu0 %v1800_v24 }
  0x9f   : > { %1152 = vmatprep.mubr.bf16.mxu1 %v1802_v25 }
  0xa5   : > { %992 = vmatmul.mubr.bf16.gmra.mrb[56].mxu0 %v1804_v26 }
  0xa6   : > { %1153 = vmatmul.mubr.bf16.gmra.mrb[56].mxu1 %v1805_v27  ;;  %999 = vmatprep.mubr.bf16.mxu0 %v1806_v28 }
  0xa7   : > { %1160 = vmatprep.mubr.bf16.mxu1 %v1808_v29 }
  0xad   : > { %1000 = vmatmul.mubr.bf16.gmra.mrb[60].mxu0 %v1810_v30 }
  0xae   : > { %1161 = vmatmul.mubr.bf16.gmra.mrb[60].mxu1 %v1811_v31 }
 0x108   : > { %v1436_v32 = vpop.f32.mrb[0].mxu0 }
 0x109   : > { %v1548_v33 = vpop.f32.mrb[0].mxu1  ;;  %v1437_v34 = vpop.f32.mrb[1].mxu0 }
 0x10a   : > { %v1438_v35 = vadd.f32 %v1437_v34, %v1436_v32  ;;  %v1549_v36 = vpop.f32.mrb[1].mxu1  ;;  %v1439_v37 = vpop.f32.mrb[2].mxu0 }
 0x10b   : > { %v1550_v38 = vadd.f32 %v1549_v36, %v1548_v33  ;;  %v1551_v39 = vpop.f32.mrb[2].mxu1  ;;  %v1440_v40 = vpop.f32.mrb[3].mxu0 }
 0x10c   : > { %v1441_v41 = vadd.f32 %v1440_v40, %v1439_v37  ;;  %v1552_v42 = vpop.f32.mrb[3].mxu1 }
 0x10d   : > { %v1043_v43 = vadd.f32 %v1550_v38, %v1438_v35  ;;  %v1553_v44 = vadd.f32 %v1552_v42, %v1551_v39 }
 0x10f   : > { %1170 = vst.msk [vmem:[%s2021_s4] sm:$0xff] %vm1169_vm0, %v1043_v43  ;;  %v1046_v45 = vadd.f32 %v1553_v44, %v1441_v41 }
 0x110   : > { %v1442_v46 = vpop.f32.mrb[4].mxu0 }
 0x111   : > { %1171 = vst.msk [vmem:[%s2021_s4 + $0x8] sm:$0xff] %vm1169_vm0, %v1046_v45  ;;  %v1554_v47 = vpop.f32.mrb[4].mxu1  ;;  %v1443_v48 = vpop.f32.mrb[5].mxu0 }
 0x112   : > { %v1444_v49 = vadd.f32 %v1443_v48, %v1442_v46  ;;  %v1555_v50 = vpop.f32.mrb[5].mxu1  ;;  %v1445_v51 = vpop.f32.mrb[6].mxu0 }
 0x113   : > { %v1556_v52 = vadd.f32 %v1555_v50, %v1554_v47  ;;  %v1557_v53 = vpop.f32.mrb[6].mxu1  ;;  %v1446_v54 = vpop.f32.mrb[7].mxu0 }
 0x114   : > { %v1447_v55 = vadd.f32 %v1446_v54, %v1445_v51  ;;  %v1558_v56 = vpop.f32.mrb[7].mxu1 }
 0x115   : > { %v1051_v57 = vadd.f32 %v1556_v52, %v1444_v49  ;;  %v1559_v58 = vadd.f32 %v1558_v56, %v1557_v53 }
 0x117   : > { %1172 = vst.msk [vmem:[%s2021_s4 + $0x10] sm:$0xff] %vm1169_vm0, %v1051_v57  ;;  %v1054_v59 = vadd.f32 %v1559_v58, %v1447_v55 }
 0x118   : > { %v1448_v60 = vpop.f32.mrb[8].mxu0 }
 0x119   : > { %1173 = vst.msk [vmem:[%s2021_s4 + $0x18] sm:$0xff] %vm1169_vm0, %v1054_v59  ;;  %v1560_v61 = vpop.f32.mrb[8].mxu1  ;;  %v1449_v62 = vpop.f32.mrb[9].mxu0 }
 0x11a   : > { %v1450_v63 = vadd.f32 %v1449_v62, %v1448_v60  ;;  %v1561_v0 = vpop.f32.mrb[9].mxu1  ;;  %v1451_v1 = vpop.f32.mrb[10].mxu0 }
 0x11b   : > { %v1562_v2 = vadd.f32 %v1561_v0, %v1560_v61  ;;  %v1563_v3 = vpop.f32.mrb[10].mxu1  ;;  %v1452_v4 = vpop.f32.mrb[11].mxu0 }
 0x11c   : > { %v1453_v5 = vadd.f32 %v1452_v4, %v1451_v1  ;;  %v1564_v6 = vpop.f32.mrb[11].mxu1 }
 0x11d   : > { %v1059_v7 = vadd.f32 %v1562_v2, %v1450_v63  ;;  %v1565_v8 = vadd.f32 %v1564_v6, %v1563_v3 }
 0x11f   : > { %1174 = vst.msk [vmem:[%s2021_s4 + $0x20] sm:$0xff] %vm1169_vm0, %v1059_v7  ;;  %v1062_v9 = vadd.f32 %v1565_v8, %v1453_v5 }
 0x120   : > { %v1454_v10 = vpop.f32.mrb[12].mxu0 }
 0x121   : > { %1175 = vst.msk [vmem:[%s2021_s4 + $0x28] sm:$0xff] %vm1169_vm0, %v1062_v9  ;;  %v1566_v11 = vpop.f32.mrb[12].mxu1  ;;  %v1455_v12 = vpop.f32.mrb[13].mxu0 }
 0x122   : > { %v1456_v13 = vadd.f32 %v1455_v12, %v1454_v10  ;;  %v1567_v14 = vpop.f32.mrb[13].mxu1  ;;  %v1457_v15 = vpop.f32.mrb[14].mxu0 }
 0x123   : > { %v1568_v16 = vadd.f32 %v1567_v14, %v1566_v11  ;;  %v1569_v17 = vpop.f32.mrb[14].mxu1  ;;  %v1458_v18 = vpop.f32.mrb[15].mxu0 }
 0x124   : > { %v1459_v19 = vadd.f32 %v1458_v18, %v1457_v15  ;;  %v1570_v20 = vpop.f32.mrb[15].mxu1 }
 0x125   : > { %v1067_v21 = vadd.f32 %v1568_v16, %v1456_v13  ;;  %v1571_v22 = vadd.f32 %v1570_v20, %v1569_v17 }
 0x127   : > { %1176 = vst.msk [vmem:[%s2021_s4 + $0x30] sm:$0xff] %vm1169_vm0, %v1067_v21  ;;  %v1070_v23 = vadd.f32 %v1571_v22, %v1459_v19 }
 0x128   : > { %v1460_v24 = vpop.f32.mrb[16].mxu0 }
 0x129   : > { %1177 = vst.msk [vmem:[%s2021_s4 + $0x38] sm:$0xff] %vm1169_vm0, %v1070_v23  ;;  %v1572_v25 = vpop.f32.mrb[16].mxu1  ;;  %v1461_v26 = vpop.f32.mrb[17].mxu0 }
 0x12a   : > { %v1462_v27 = vadd.f32 %v1461_v26, %v1460_v24  ;;  %v1573_v28 = vpop.f32.mrb[17].mxu1  ;;  %v1463_v29 = vpop.f32.mrb[18].mxu0 }
 0x12b   : > { %v1574_v30 = vadd.f32 %v1573_v28, %v1572_v25  ;;  %v1575_v31 = vpop.f32.mrb[18].mxu1  ;;  %v1464_v32 = vpop.f32.mrb[19].mxu0 }
 0x12c   : > { %v1465_v33 = vadd.f32 %v1464_v32, %v1463_v29  ;;  %v1576_v34 = vpop.f32.mrb[19].mxu1 }
 0x12d   : > { %v1075_v35 = vadd.f32 %v1574_v30, %v1462_v27  ;;  %v1577_v36 = vadd.f32 %v1576_v34, %v1575_v31 }
 0x12f   : > { %1178 = vst.msk [vmem:[%s2021_s4 + $0x40] sm:$0xff] %vm1169_vm0, %v1075_v35  ;;  %v1078_v37 = vadd.f32 %v1577_v36, %v1465_v33 }
 0x130   : > { %v1466_v38 = vpop.f32.mrb[20].mxu0 }
 0x131   : > { %1179 = vst.msk [vmem:[%s2021_s4 + $0x48] sm:$0xff] %vm1169_vm0, %v1078_v37  ;;  %v1578_v39 = vpop.f32.mrb[20].mxu1  ;;  %v1467_v40 = vpop.f32.mrb[21].mxu0 }
 0x132   : > { %v1468_v41 = vadd.f32 %v1467_v40, %v1466_v38  ;;  %v1579_v42 = vpop.f32.mrb[21].mxu1  ;;  %v1469_v43 = vpop.f32.mrb[22].mxu0 }
 0x133   : > { %v1580_v44 = vadd.f32 %v1579_v42, %v1578_v39  ;;  %v1581_v45 = vpop.f32.mrb[22].mxu1  ;;  %v1470_v46 = vpop.f32.mrb[23].mxu0 }
 0x134   : > { %v1471_v47 = vadd.f32 %v1470_v46, %v1469_v43  ;;  %v1582_v48 = vpop.f32.mrb[23].mxu1 }
 0x135   : > { %v1083_v49 = vadd.f32 %v1580_v44, %v1468_v41  ;;  %v1583_v50 = vadd.f32 %v1582_v48, %v1581_v45 }
 0x137   : > { %1180 = vst.msk [vmem:[%s2021_s4 + $0x50] sm:$0xff] %vm1169_vm0, %v1083_v49  ;;  %v1086_v51 = vadd.f32 %v1583_v50, %v1471_v47 }
 0x138   : > { %v1472_v52 = vpop.f32.mrb[24].mxu0 }
 0x139   : > { %1181 = vst.msk [vmem:[%s2021_s4 + $0x58] sm:$0xff] %vm1169_vm0, %v1086_v51  ;;  %v1584_v53 = vpop.f32.mrb[24].mxu1  ;;  %v1473_v54 = vpop.f32.mrb[25].mxu0 }
 0x13a   : > { %v1474_v55 = vadd.f32 %v1473_v54, %v1472_v52  ;;  %v1585_v56 = vpop.f32.mrb[25].mxu1  ;;  %v1475_v57 = vpop.f32.mrb[26].mxu0 }
 0x13b   : > { %v1586_v58 = vadd.f32 %v1585_v56, %v1584_v53  ;;  %v1587_v59 = vpop.f32.mrb[26].mxu1  ;;  %v1476_v60 = vpop.f32.mrb[27].mxu0 }
 0x13c   : > { %v1477_v61 = vadd.f32 %v1476_v60, %v1475_v57  ;;  %v1588_v62 = vpop.f32.mrb[27].mxu1 }
 0x13d   : > { %v1091_v63 = vadd.f32 %v1586_v58, %v1474_v55  ;;  %v1589_v0 = vadd.f32 %v1588_v62, %v1587_v59 }
 0x13f   : > { %1182 = vst.msk [vmem:[%s2021_s4 + $0x60] sm:$0xff] %vm1169_vm0, %v1091_v63  ;;  %v1094_v1 = vadd.f32 %v1589_v0, %v1477_v61 }
 0x140   : > { %v1478_v2 = vpop.f32.mrb[28].mxu0 }
 0x141   : > { %1183 = vst.msk [vmem:[%s2021_s4 + $0x68] sm:$0xff] %vm1169_vm0, %v1094_v1  ;;  %v1590_v3 = vpop.f32.mrb[28].mxu1  ;;  %v1479_v4 = vpop.f32.mrb[29].mxu0 }
 0x142   : > { %v1480_v5 = vadd.f32 %v1479_v4, %v1478_v2  ;;  %v1591_v6 = vpop.f32.mrb[29].mxu1  ;;  %v1481_v7 = vpop.f32.mrb[30].mxu0 }
 0x143   : > { %v1592_v8 = vadd.f32 %v1591_v6, %v1590_v3  ;;  %v1593_v9 = vpop.f32.mrb[30].mxu1  ;;  %v1482_v10 = vpop.f32.mrb[31].mxu0 }
 0x144   : > { %v1483_v11 = vadd.f32 %v1482_v10, %v1481_v7  ;;  %v1594_v12 = vpop.f32.mrb[31].mxu1 }
 0x145   : > { %v1099_v13 = vadd.f32 %v1592_v8, %v1480_v5  ;;  %v1595_v14 = vadd.f32 %v1594_v12, %v1593_v9 }
 0x147   : > { %1184 = vst.msk [vmem:[%s2021_s4 + $0x70] sm:$0xff] %vm1169_vm0, %v1099_v13  ;;  %v1102_v15 = vadd.f32 %v1595_v14, %v1483_v11 }
 0x148   : > { %v1484_v16 = vpop.f32.mrb[32].mxu0 }
 0x149   : > { %1185 = vst.msk [vmem:[%s2021_s4 + $0x78] sm:$0xff] %vm1169_vm0, %v1102_v15  ;;  %v1596_v17 = vpop.f32.mrb[32].mxu1  ;;  %v1485_v18 = vpop.f32.mrb[33].mxu0 }
 0x14a   : > { %v1486_v19 = vadd.f32 %v1485_v18, %v1484_v16  ;;  %v1597_v20 = vpop.f32.mrb[33].mxu1  ;;  %v1487_v21 = vpop.f32.mrb[34].mxu0 }
 0x14b   : > { %v1598_v22 = vadd.f32 %v1597_v20, %v1596_v17  ;;  %v1599_v23 = vpop.f32.mrb[34].mxu1  ;;  %v1488_v24 = vpop.f32.mrb[35].mxu0 }
 0x14c   : > { %v1489_v25 = vadd.f32 %v1488_v24, %v1487_v21  ;;  %v1600_v26 = vpop.f32.mrb[35].mxu1 }
 0x14d   : > { %v1107_v27 = vadd.f32 %v1598_v22, %v1486_v19  ;;  %v1601_v28 = vadd.f32 %v1600_v26, %v1599_v23 }
 0x14f   : > { %1186 = vst.msk [vmem:[%s2021_s4 + $0x80] sm:$0xff] %vm1169_vm0, %v1107_v27  ;;  %v1110_v29 = vadd.f32 %v1601_v28, %v1489_v25 }
 0x150   : > { %v1490_v30 = vpop.f32.mrb[36].mxu0 }
 0x151   : > { %1187 = vst.msk [vmem:[%s2021_s4 + $0x88] sm:$0xff] %vm1169_vm0, %v1110_v29  ;;  %v1602_v31 = vpop.f32.mrb[36].mxu1  ;;  %v1491_v32 = vpop.f32.mrb[37].mxu0 }
 0x152   : > { %v1492_v33 = vadd.f32 %v1491_v32, %v1490_v30  ;;  %v1603_v34 = vpop.f32.mrb[37].mxu1  ;;  %v1493_v35 = vpop.f32.mrb[38].mxu0 }
 0x153   : > { %v1604_v36 = vadd.f32 %v1603_v34, %v1602_v31  ;;  %v1605_v37 = vpop.f32.mrb[38].mxu1  ;;  %v1494_v38 = vpop.f32.mrb[39].mxu0 }
 0x154   : > { %v1495_v39 = vadd.f32 %v1494_v38, %v1493_v35  ;;  %v1606_v40 = vpop.f32.mrb[39].mxu1 }
 0x155   : > { %v1115_v41 = vadd.f32 %v1604_v36, %v1492_v33  ;;  %v1607_v42 = vadd.f32 %v1606_v40, %v1605_v37 }
 0x157   : > { %1188 = vst.msk [vmem:[%s2021_s4 + $0x90] sm:$0xff] %vm1169_vm0, %v1115_v41  ;;  %v1118_v43 = vadd.f32 %v1607_v42, %v1495_v39 }
 0x158   : > { %v1496_v44 = vpop.f32.mrb[40].mxu0 }
 0x159   : > { %1189 = vst.msk [vmem:[%s2021_s4 + $0x98] sm:$0xff] %vm1169_vm0, %v1118_v43  ;;  %v1608_v45 = vpop.f32.mrb[40].mxu1  ;;  %v1497_v46 = vpop.f32.mrb[41].mxu0 }
 0x15a   : > { %v1498_v47 = vadd.f32 %v1497_v46, %v1496_v44  ;;  %v1609_v48 = vpop.f32.mrb[41].mxu1  ;;  %v1499_v49 = vpop.f32.mrb[42].mxu0 }
 0x15b   : > { %v1610_v50 = vadd.f32 %v1609_v48, %v1608_v45  ;;  %v1611_v51 = vpop.f32.mrb[42].mxu1  ;;  %v1500_v52 = vpop.f32.mrb[43].mxu0 }
 0x15c   : > { %v1501_v53 = vadd.f32 %v1500_v52, %v1499_v49  ;;  %v1612_v54 = vpop.f32.mrb[43].mxu1 }
 0x15d   : > { %v1123_v55 = vadd.f32 %v1610_v50, %v1498_v47  ;;  %v1613_v56 = vadd.f32 %v1612_v54, %v1611_v51 }
 0x15f   : > { %1190 = vst.msk [vmem:[%s2021_s4 + $0xa0] sm:$0xff] %vm1169_vm0, %v1123_v55  ;;  %v1126_v57 = vadd.f32 %v1613_v56, %v1501_v53 }
 0x160   : > { %v1502_v58 = vpop.f32.mrb[44].mxu0 }
 0x161   : > { %1191 = vst.msk [vmem:[%s2021_s4 + $0xa8] sm:$0xff] %vm1169_vm0, %v1126_v57  ;;  %v1614_v59 = vpop.f32.mrb[44].mxu1  ;;  %v1503_v60 = vpop.f32.mrb[45].mxu0 }
 0x162   : > { %v1504_v61 = vadd.f32 %v1503_v60, %v1502_v58  ;;  %v1615_v62 = vpop.f32.mrb[45].mxu1  ;;  %v1505_v63 = vpop.f32.mrb[46].mxu0 }
 0x163   : > { %v1616_v0 = vadd.f32 %v1615_v62, %v1614_v59  ;;  %v1617_v1 = vpop.f32.mrb[46].mxu1  ;;  %v1506_v2 = vpop.f32.mrb[47].mxu0 }
 0x164   : > { %v1507_v3 = vadd.f32 %v1506_v2, %v1505_v63  ;;  %v1618_v4 = vpop.f32.mrb[47].mxu1 }
 0x165   : > { %v1131_v5 = vadd.f32 %v1616_v0, %v1504_v61  ;;  %v1619_v6 = vadd.f32 %v1618_v4, %v1617_v1 }
 0x167   : > { %1192 = vst.msk [vmem:[%s2021_s4 + $0xb0] sm:$0xff] %vm1169_vm0, %v1131_v5  ;;  %v1134_v7 = vadd.f32 %v1619_v6, %v1507_v3 }
 0x168   : > { %v1508_v8 = vpop.f32.mrb[48].mxu0 }
 0x169   : > { %1193 = vst.msk [vmem:[%s2021_s4 + $0xb8] sm:$0xff] %vm1169_vm0, %v1134_v7  ;;  %v1620_v9 = vpop.f32.mrb[48].mxu1  ;;  %v1509_v10 = vpop.f32.mrb[49].mxu0 }
 0x16a   : > { %v1510_v11 = vadd.f32 %v1509_v10, %v1508_v8  ;;  %v1621_v12 = vpop.f32.mrb[49].mxu1  ;;  %v1511_v13 = vpop.f32.mrb[50].mxu0 }
 0x16b   : > { %v1622_v14 = vadd.f32 %v1621_v12, %v1620_v9  ;;  %v1623_v15 = vpop.f32.mrb[50].mxu1  ;;  %v1512_v16 = vpop.f32.mrb[51].mxu0 }
 0x16c   : > { %v1513_v17 = vadd.f32 %v1512_v16, %v1511_v13  ;;  %v1624_v18 = vpop.f32.mrb[51].mxu1 }
 0x16d   : > { %v1139_v19 = vadd.f32 %v1622_v14, %v1510_v11  ;;  %v1625_v20 = vadd.f32 %v1624_v18, %v1623_v15 }
 0x16f   : > { %1194 = vst.msk [vmem:[%s2021_s4 + $0xc0] sm:$0xff] %vm1169_vm0, %v1139_v19  ;;  %v1142_v21 = vadd.f32 %v1625_v20, %v1513_v17 }
 0x170   : > { %v1514_v22 = vpop.f32.mrb[52].mxu0 }
 0x171   : > { %1195 = vst.msk [vmem:[%s2021_s4 + $0xc8] sm:$0xff] %vm1169_vm0, %v1142_v21  ;;  %v1626_v23 = vpop.f32.mrb[52].mxu1  ;;  %v1515_v24 = vpop.f32.mrb[53].mxu0 }
 0x172   : > { %v1516_v25 = vadd.f32 %v1515_v24, %v1514_v22  ;;  %v1627_v26 = vpop.f32.mrb[53].mxu1  ;;  %v1517_v27 = vpop.f32.mrb[54].mxu0 }
 0x173   : > { %v1628_v28 = vadd.f32 %v1627_v26, %v1626_v23  ;;  %v1629_v29 = vpop.f32.mrb[54].mxu1  ;;  %v1518_v30 = vpop.f32.mrb[55].mxu0 }
 0x174   : > { %v1519_v31 = vadd.f32 %v1518_v30, %v1517_v27  ;;  %v1630_v32 = vpop.f32.mrb[55].mxu1 }
 0x175   : > { %v1147_v33 = vadd.f32 %v1628_v28, %v1516_v25  ;;  %v1631_v34 = vadd.f32 %v1630_v32, %v1629_v29 }
 0x177   : > { %1196 = vst.msk [vmem:[%s2021_s4 + $0xd0] sm:$0xff] %vm1169_vm0, %v1147_v33  ;;  %v1150_v35 = vadd.f32 %v1631_v34, %v1519_v31 }
 0x178   : > { %v1520_v36 = vpop.f32.mrb[56].mxu0 }
 0x179   : > { %1197 = vst.msk [vmem:[%s2021_s4 + $0xd8] sm:$0xff] %vm1169_vm0, %v1150_v35  ;;  %v1632_v37 = vpop.f32.mrb[56].mxu1  ;;  %v1521_v38 = vpop.f32.mrb[57].mxu0 }
 0x17a   : > { %v1522_v39 = vadd.f32 %v1521_v38, %v1520_v36  ;;  %v1633_v40 = vpop.f32.mrb[57].mxu1  ;;  %v1523_v41 = vpop.f32.mrb[58].mxu0 }
 0x17b   : > { %v1634_v42 = vadd.f32 %v1633_v40, %v1632_v37  ;;  %v1635_v43 = vpop.f32.mrb[58].mxu1  ;;  %v1524_v44 = vpop.f32.mrb[59].mxu0 }
 0x17c   : > { %v1525_v45 = vadd.f32 %v1524_v44, %v1523_v41  ;;  %v1636_v46 = vpop.f32.mrb[59].mxu1 }
 0x17d   : > { %v1155_v47 = vadd.f32 %v1634_v42, %v1522_v39  ;;  %v1637_v48 = vadd.f32 %v1636_v46, %v1635_v43 }
 0x17f   : > { %1198 = vst.msk [vmem:[%s2021_s4 + $0xe0] sm:$0xff] %vm1169_vm0, %v1155_v47  ;;  %v1158_v49 = vadd.f32 %v1637_v48, %v1525_v45 }
 0x180   : > { %v1526_v50 = vpop.f32.mrb[60].mxu0 }
 0x181   : > { %1199 = vst.msk [vmem:[%s2021_s4 + $0xe8] sm:$0xff] %vm1169_vm0, %v1158_v49  ;;  %v1638_v51 = vpop.f32.mrb[60].mxu1  ;;  %v1527_v52 = vpop.f32.mrb[61].mxu0 }
 0x182   : > { %v1528_v53 = vadd.f32 %v1527_v52, %v1526_v50  ;;  %v1639_v54 = vpop.f32.mrb[61].mxu1  ;;  %v1529_v55 = vpop.f32.mrb[62].mxu0 }
 0x183   : > { %v1640_v56 = vadd.f32 %v1639_v54, %v1638_v51  ;;  %v1641_v57 = vpop.f32.mrb[62].mxu1  ;;  %v1530_v58 = vpop.f32.mrb[63].mxu0 }
 0x184   : > { %v1531_v59 = vadd.f32 %v1530_v58, %v1529_v55  ;;  %v1642_v60 = vpop.f32.mrb[63].mxu1 }
 0x185   : > { %v1163_v61 = vadd.f32 %v1640_v56, %v1528_v53  ;;  %v1643_v62 = vadd.f32 %v1642_v60, %v1641_v57 }
 0x187   : > { %1200 = vst.msk [vmem:[%s2021_s4 + $0xf0] sm:$0xff] %vm1169_vm0, %v1163_v61  ;;  %v1166_v63 = vadd.f32 %v1643_v62, %v1531_v59 }
 0x189   : > { %1201 = vst.msk [vmem:[%s2021_s4 + $0xf8] sm:$0xff] %vm1169_vm0, %v1166_v63 }
 0x18a PF: > { %s12_s13 = sadd.s32 1, %s1850_s13   ;;  %s2105_s9 = smov %s1842_s11 }
 0x18b   : > { %p9_p7 = scmp.ge.s32.totalorder %s12_s13, 10   ;;  %s2106_s10 = smov %s1846_s12 }
 0x18c   : > { %s2107_s11 = smov %s2110_s14  ;;  %s2108_s12 = smov %s2114_s15 }
 0x18d   :  { %11 = sbr.rel (!%p9_p7) target bundleno = 3 (0x3), region = 61 }

// kernel: generator_forward.16
= control target key start
LH: loop header
LB: loop body
LE: loop exit
PB: predicated region body
PF: predicated region fallthrough
CT: control target
= control target key end

     0   :  { %s1150_s12 = smov 0   ;;  %s1152_s13 = smov 0   ;;  %s2035_s0 = inlined_call_operand.vmem [shape: f32[2048,64], index: 0, kind: input, shape index: {}]   ;;  %s2036_s1 = inlined_call_operand.vmem [shape: f32[1,64], index: 1, kind: input, shape index: {}]   ;;  %s2037_s2 = inlined_call_operand.vmem [shape: f32[1,64], index: 2, kind: input, shape index: {}]   ;;  %s2038_s3 = inlined_call_operand.vmem [shape: f32[2048,64], index: 3, kind: output, shape index: {}]  }
   0x1   :  { %s1154_s14 = smov 0   ;;  %s1156_s15 = smov 0  }
   0x2   :  { %s1158_s16 = smov 0  }
   0x3 LB: > { %s22_s17 = sadd.s32 1, %s1119_s14  ;;  %s25_s18 = sadd.s32 1, %s1123_s15  ;;  %s1127_s16 = sphi %s1158_s16, %s13_s16   ;;  %s1123_s15 = sphi %s1156_s15, %s2042_s15   ;;  %s1119_s14 = sphi %s1154_s14, %s2041_s14   ;;  %s1115_s13 = sphi %s1152_s13, %s2040_s13   ;;  %s1111_s12 = sphi %s1150_s12, %s2039_s12  }
   0x4   : > { %p23_p0 = scmp.ge.s32.totalorder %s22_s17, 4  ;;  %p1035_p1 = scmp.ge.s32.totalorder %s1127_s16, 1 }
   0x5   : > { %p152_p2 = scmp.lt.s32.totalorder %s1127_s16, 9 }
   0x6   : > { %s2044_s17 = smov (%p23_p0, %s22_s17), 0  ;;  %s2046_s18 = smov (!%p23_p0, %s25_s18), %s1123_s15 }
   0x7   : > { %p153_p3 = pnand %p1035_p1, %p152_p2  ;;  %p27_p4 = scmp.ge.s32.totalorder %s2046_s18, 2 }
   0x8   : > { %s1036_s19 = sshll.u32 (!%p153_p3), %s1111_s12, 6  ;;  %s183_s20 = smul.u32 (!%p153_p3), %s1111_s12, %s1115_s13 }
   0x9   : > { %s2048_s18 = smov (%p27_p4, %s2046_s18), 0  ;;  %156 = sbr.rel (%p153_p3) target bundleno = 280 (0x118), region = 32 }
   0xa   : > { %p178_p5 = scmp.lt.s32.totalorder (!%p153_p3), %s1036_s19, 255  ;;  %p191_p6 = scmp.eq.s32.totalorder (!%p153_p3), %s1115_s13, 0 }
   0xb   : > { %s1038_s21 = sshll.u32 (!%p153_p3), %s183_s20, 6  ;;  %p192_p7 = scmp.eq.s32.totalorder (!%p153_p3), %s1111_s12, 0 }
   0xc   : > { %p185_p8 = scmp.lt.s32.totalorder (!%p153_p3), %s1038_s21, 255 }
   0xd   : > { %p193_p9 = pnand (!%p153_p3), %p192_p7, %p191_p6 }
  0x10   : > { %s2050_s19 = smov (!%p178_p5, %s1036_s19), 255  ;;  %s2052_s21 = smov (!%p185_p8, %s1038_s21), 255 }
  0x11   : > { %s1037_s22 = sshll.u32 %s2050_s19, 3  ;;  %s1039_s26 = sshll.u32 %s2052_s21, 3  ;;  %vm197_vm0 = vcmask (!%p193_p9), 516096   ;;  %v1129_v0 = vmov (!%p193_p9), 0.0  }
  0x12   : > { %s1194_s25 = scalar_lea.vmem %s2035_s0, %s1037_s22  ;;  %s1199_s29 = scalar_lea.vmem %s2038_s3, %s1039_s26  ;;  %198 = vst.msk [vmem:[#allocation2] sm:$0x1] (!%p193_p9), %vm197_vm0, %v1129_v0  ;;  %199 = vst.msk [vmem:[#allocation3] sm:$0x1] (!%p193_p9), %vm197_vm0, %v1129_v0 }
  0x13   : > { %196 = sbr.rel (%p193_p9) target bundleno = 26 (0x1a), region = 36 }
  0x1a PF: > { %p1040_p10 = scmp.ne.s32.totalorder %s1115_s13, 0 }
  0x1b   : > { %v203_v1 = vld [vmem:[%s1194_s25] sm:$0xff] (!%p1040_p10)  ;;  %v204_v2 = vld [vmem:[%s1194_s25 + $0x8] sm:$0xff] (!%p1040_p10)  ;;  %v205_v3 = vld [vmem:[%s1194_s25 + $0x10] sm:$0xff] (!%p1040_p10)  ;;  %vm268_vm1 = vcmask (!%p1040_p10), 523264   ;;  %vm403_vm2 = vcmask (!%p1040_p10), 516096  }
  0x1c   : > { %202 = sbr.rel (%p1040_p10) target bundleno = 191 (0xbf), region = 40  ;;  %v269_v4 = vsel (!%p1040_p10), %vm268_vm1, %v203_v1, 0.0  ;;  %v270_v5 = vsel (!%p1040_p10), %vm268_vm1, %v204_v2, 0.0  ;;  %v272_v6 = vsel (!%p1040_p10), %vm268_vm1, %v205_v3, 0.0  ;;  %v206_v7 = vld [vmem:[%s1194_s25 + $0x18] sm:$0xff] (!%p1040_p10)  ;;  %v207_v10 = vld [vmem:[%s1194_s25 + $0x20] sm:$0xff] (!%p1040_p10)  ;;  %v406_v55 = vmul.f32 (!%p1040_p10), %v203_v1, %v203_v1 }
  0x1d   : > { %v271_v8 = vadd.f32 (!%p1040_p10), %v270_v5, %v269_v4  ;;  %v274_v9 = vsel (!%p1040_p10), %vm268_vm1, %v206_v7, 0.0  ;;  %v276_v12 = vsel (!%p1040_p10), %vm268_vm1, %v207_v10, 0.0  ;;  %v208_v13 = vld [vmem:[%s1194_s25 + $0x28] sm:$0xff] (!%p1040_p10)  ;;  %v1215_v16 = vld [vmem:[%s1194_s25 + $0x30] sm:$0xff] (!%p1040_p10)  ;;  %v1220_v19 = vld [vmem:[%s1194_s25 + $0x38] sm:$0xff] (!%p1040_p10)  ;;  %v407_v58 = vmul.f32 (!%p1040_p10), %v204_v2, %v204_v2 }
  0x1e   : > { %v278_v15 = vsel (!%p1040_p10), %vm268_vm1, %v208_v13, 0.0  ;;  %v280_v18 = vsel (!%p1040_p10), %vm268_vm1, %v1215_v16, 0.0  ;;  %v282_v21 = vsel (!%p1040_p10), %vm268_vm1, %v1220_v19, 0.0  ;;  %v1225_v22 = vld [vmem:[%s1194_s25 + $0x40] sm:$0xff] (!%p1040_p10)  ;;  %v1230_v25 = vld [vmem:[%s1194_s25 + $0x48] sm:$0xff] (!%p1040_p10)  ;;  %v1235_v28 = vld [vmem:[%s1194_s25 + $0x50] sm:$0xff] (!%p1040_p10)  ;;  %v408_v59 = vmul.f32 (!%p1040_p10), %v205_v3, %v205_v3 }
  0x1f   : > { %v273_v11 = vadd.f32 (!%p1040_p10), %v272_v6, %v271_v8  ;;  %v284_v24 = vsel (!%p1040_p10), %vm268_vm1, %v1225_v22, 0.0  ;;  %v286_v27 = vsel (!%p1040_p10), %vm268_vm1, %v1230_v25, 0.0  ;;  %v288_v30 = vsel (!%p1040_p10), %vm268_vm1, %v1235_v28, 0.0  ;;  %v1240_v31 = vld [vmem:[%s1194_s25 + $0x58] sm:$0xff] (!%p1040_p10)  ;;  %v1245_v34 = vld [vmem:[%s1194_s25 + $0x60] sm:$0xff] (!%p1040_p10)  ;;  %v1250_v37 = vld [vmem:[%s1194_s25 + $0x68] sm:$0xff] (!%p1040_p10) }
  0x20   : > { %v290_v33 = vsel (!%p1040_p10), %vm268_vm1, %v1240_v31, 0.0  ;;  %v292_v36 = vsel (!%p1040_p10), %vm268_vm1, %v1245_v34, 0.0  ;;  %v294_v39 = vsel (!%p1040_p10), %vm268_vm1, %v1250_v37, 0.0  ;;  %v1255_v40 = vld [vmem:[%s1194_s25 + $0x70] sm:$0xff] (!%p1040_p10)  ;;  %v1260_v43 = vld [vmem:[%s1194_s25 + $0x78] sm:$0xff] (!%p1040_p10)  ;;  %v1265_v46 = vld [vmem:[%s1194_s25 + $0x80] sm:$0xff] (!%p1040_p10)  ;;  %v409_v63 = vmul.f32 (!%p1040_p10), %v206_v7, %v206_v7 }
  0x21   : > { %v275_v14 = vadd.f32 (!%p1040_p10), %v274_v9, %v273_v11  ;;  %v296_v42 = vsel (!%p1040_p10), %vm268_vm1, %v1255_v40, 0.0  ;;  %v298_v45 = vsel (!%p1040_p10), %vm268_vm1, %v1260_v43, 0.0  ;;  %v300_v48 = vsel (!%p1040_p10), %vm268_vm1, %v1265_v46, 0.0  ;;  %v1270_v49 = vld [vmem:[%s1194_s25 + $0x88] sm:$0xff] (!%p1040_p10)  ;;  %v1275_v52 = vld [vmem:[%s1194_s25 + $0x90] sm:$0xff] (!%p1040_p10)  ;;  %v1280_v56 = vld [vmem:[%s1194_s25 + $0x98] sm:$0xff] (!%p1040_p10) }
  0x22   : > { %v302_v51 = vsel (!%p1040_p10), %vm268_vm1, %v1270_v49, 0.0  ;;  %v304_v54 = vsel (!%p1040_p10), %vm268_vm1, %v1275_v52, 0.0  ;;  %v306_v60 = vsel (!%p1040_p10), %vm268_vm1, %v1280_v56, 0.0  ;;  %v1285_v61 = vld [vmem:[%s1194_s25 + $0xa0] sm:$0xff] (!%p1040_p10)  ;;  %v470_v4 = vsel (!%p1040_p10), %vm268_vm1, %v406_v55, 0.0  ;;  %v1291_v1 = vld [vmem:[%s1194_s25 + $0xa8] sm:$0xff] (!%p1040_p10) }
  0x23   : > { %v277_v17 = vadd.f32 %v276_v12, %v275_v14  ;;  %v308_v0 = vsel %vm268_vm1, %v1285_v61, 0.0  ;;  %v410_v6 = vmul.f32 %v207_v10, %v207_v10  ;;  %v471_v2 = vsel %vm268_vm1, %v407_v58, 0.0  ;;  %v1298_v7 = vld [vmem:[%s1194_s25 + $0xb0] sm:$0xff] }
  0x24   : > { %v473_v3 = vsel %vm268_vm1, %v408_v59, 0.0  ;;  %v310_v8 = vsel %vm268_vm1, %v1291_v1, 0.0  ;;  %v472_v9 = vadd.f32 %v471_v2, %v470_v4  ;;  %v411_v12 = vmul.f32 %v208_v13, %v208_v13 }
  0x25   : > { %v279_v20 = vadd.f32 %v278_v15, %v277_v17  ;;  %v475_v14 = vsel %vm268_vm1, %v409_v63, 0.0  ;;  %v312_v15 = vsel %vm268_vm1, %v1298_v7, 0.0  ;;  %v1304_v17 = vld [vmem:[%s1194_s25 + $0xb8] sm:$0xff]  ;;  %v418_v63 = vmul.f32 %v1245_v34, %v1245_v34 }
  0x26   : > { %v474_v10 = vadd.f32 %v473_v3, %v472_v9  ;;  %v419_v2 = vmul.f32 %v1250_v37, %v1250_v37  ;;  %v1368_v9 = vld [vmem:[%s1194_s25 + $0xf8] sm:$0xff] }
  0x27   : > { %v281_v23 = vadd.f32 %v280_v18, %v279_v20  ;;  %v412_v20 = vmul.f32 %v1215_v16, %v1215_v16 }
  0x28   : > { %v476_v13 = vadd.f32 %v475_v14, %v474_v10  ;;  %v493_v14 = vsel %vm268_vm1, %v418_v63, 0.0  ;;  %v1376_v10 = vld [vmem:[%s1194_s25 + $0x100] sm:$0xff]  ;;  %v427_v63 = vmul.f32 %v1291_v1, %v1291_v1 }
  0x29   : > { %v283_v26 = vadd.f32 %v282_v21, %v281_v23  ;;  %v477_v21 = vsel %vm268_vm1, %v410_v6, 0.0  ;;  %v314_v23 = vsel %vm268_vm1, %v1304_v17, 0.0 }
  0x2a   : > { %v478_v16 = vadd.f32 %v477_v21, %v476_v13  ;;  %v495_v21 = vsel %vm268_vm1, %v419_v2, 0.0  ;;  %v1384_v13 = vld [vmem:[%s1194_s25 + $0x108] sm:$0xff]  ;;  %v428_v2 = vmul.f32 %v1298_v7, %v1298_v7 }
  0x2b   : > { %v285_v29 = vadd.f32 %v284_v24, %v283_v26  ;;  %v1312_v24 = vld [vmem:[%s1194_s25 + $0xc0] sm:$0xff] }
  0x2d   : > { %v287_v32 = vadd.f32 %v286_v27, %v285_v29  ;;  %v413_v27 = vmul.f32 %v1220_v19, %v1220_v19  ;;  %v479_v29 = vsel %vm268_vm1, %v411_v12, 0.0  ;;  %v420_v12 = vmul.f32 %v1255_v40, %v1255_v40 }
  0x2e   : > { %v480_v19 = vadd.f32 %v479_v29, %v478_v16  ;;  %v1392_v16 = vld [vmem:[%s1194_s25 + $0x110] sm:$0xff] }
  0x2f   : > { %v289_v35 = vadd.f32 %v288_v30, %v287_v32  ;;  %v316_v30 = vsel %vm268_vm1, %v1312_v24, 0.0  ;;  %v1320_v32 = vld [vmem:[%s1194_s25 + $0xc8] sm:$0xff]  ;;  %v497_v29 = vsel %vm268_vm1, %v420_v12, 0.0  ;;  %v429_v12 = vmul.f32 %v1304_v17, %v1304_v17 }
  0x31   : > { %v291_v38 = vadd.f32 %v290_v33, %v289_v35  ;;  %v414_v35 = vmul.f32 %v1225_v22, %v1225_v22 }
  0x33   : > { %v293_v41 = vadd.f32 %v292_v36, %v291_v38  ;;  %v481_v36 = vsel %vm268_vm1, %v412_v20, 0.0  ;;  %v318_v38 = vsel %vm268_vm1, %v1320_v32, 0.0  ;;  %v421_v20 = vmul.f32 %v1260_v43, %v1260_v43 }
  0x34   : > { %v482_v22 = vadd.f32 %v481_v36, %v480_v19  ;;  %v1400_v19 = vld [vmem:[%s1194_s25 + $0x118] sm:$0xff] }
  0x35   : > { %v295_v44 = vadd.f32 %v294_v39, %v293_v41  ;;  %v1328_v39 = vld [vmem:[%s1194_s25 + $0xd0] sm:$0xff]  ;;  %v499_v36 = vsel %vm268_vm1, %v421_v20, 0.0  ;;  %v430_v20 = vmul.f32 %v1312_v24, %v1312_v24 }
  0x37   : > { %v297_v47 = vadd.f32 %v296_v42, %v295_v44  ;;  %v415_v42 = vmul.f32 %v1230_v25, %v1230_v25  ;;  %v483_v44 = vsel %vm268_vm1, %v413_v27, 0.0  ;;  %v422_v27 = vmul.f32 %v1265_v46, %v1265_v46 }
  0x38   : > { %v484_v25 = vadd.f32 %v483_v44, %v482_v22  ;;  %v1408_v22 = vld [vmem:[%s1194_s25 + $0x120] sm:$0xff] }
  0x39   : > { %v299_v50 = vadd.f32 %v298_v45, %v297_v47  ;;  %v320_v45 = vsel %vm268_vm1, %v1328_v39, 0.0  ;;  %v1336_v47 = vld [vmem:[%s1194_s25 + $0xd8] sm:$0xff]  ;;  %v487_v58 = vsel %vm268_vm1, %v415_v42, 0.0  ;;  %v424_v42 = vmul.f32 %v1275_v52, %v1275_v52 }
  0x3a   : > { %v501_v44 = vsel %vm268_vm1, %v422_v27, 0.0  ;;  %v431_v27 = vmul.f32 %v1320_v32, %v1320_v32 }
  0x3b   : > { %v301_v53 = vadd.f32 %v300_v48, %v299_v50  ;;  %v416_v50 = vmul.f32 %v1235_v28, %v1235_v28 }
  0x3d   : > { %v303_v57 = vadd.f32 %v302_v51, %v301_v53  ;;  %v485_v51 = vsel %vm268_vm1, %v414_v35, 0.0  ;;  %v322_v53 = vsel %vm268_vm1, %v1336_v47, 0.0  ;;  %v423_v35 = vmul.f32 %v1270_v49, %v1270_v49 }
  0x3e   : > { %v486_v28 = vadd.f32 %v485_v51, %v484_v25  ;;  %v1416_v25 = vld [vmem:[%s1194_s25 + $0x128] sm:$0xff] }
  0x3f   : > { %v305_v62 = vadd.f32 %v304_v54, %v303_v57  ;;  %v1344_v54 = vld [vmem:[%s1194_s25 + $0xe0] sm:$0xff]  ;;  %v417_v57 = vmul.f32 %v1240_v31, %v1240_v31  ;;  %v503_v51 = vsel %vm268_vm1, %v423_v35, 0.0  ;;  %v432_v35 = vmul.f32 %v1328_v39, %v1328_v39 }
  0x40   : > { %v324_v59 = vsel %vm268_vm1, %v1344_v54, 0.0  ;;  %v488_v31 = vadd.f32 %v487_v58, %v486_v28  ;;  %v505_v58 = vsel %vm268_vm1, %v424_v42, 0.0  ;;  %v1424_v28 = vld [vmem:[%s1194_s25 + $0x130] sm:$0xff]  ;;  %v433_v42 = vmul.f32 %v1336_v47, %v1336_v47 }
  0x41   : > { %v307_v5 = vadd.f32 %v306_v60, %v305_v62  ;;  %v1352_v60 = vld [vmem:[%s1194_s25 + $0xe8] sm:$0xff]  ;;  %v491_v3 = vsel %vm268_vm1, %v417_v57, 0.0  ;;  %v426_v57 = vmul.f32 %v1285_v61, %v1285_v61 }
  0x42   : > { %v326_v4 = vsel %vm268_vm1, %v1352_v60, 0.0 }
  0x43   : > { %v309_v11 = vadd.f32 %v308_v0, %v307_v5  ;;  %v489_v0 = vsel %vm268_vm1, %v416_v50, 0.0  ;;  %v1360_v5 = vld [vmem:[%s1194_s25 + $0xf0] sm:$0xff]  ;;  %v425_v50 = vmul.f32 %v1280_v56, %v1280_v56 }
  0x44   : > { %v490_v34 = vadd.f32 %v489_v0, %v488_v31  ;;  %v1432_v31 = vld [vmem:[%s1194_s25 + $0x138] sm:$0xff] }
  0x45   : > { %v311_v18 = vadd.f32 %v310_v8, %v309_v11  ;;  %v328_v8 = vsel %vm268_vm1, %v1360_v5, 0.0  ;;  %v507_v0 = vsel %vm268_vm1, %v425_v50, 0.0  ;;  %v434_v50 = vmul.f32 %v1344_v54, %v1344_v54 }
  0x46   : > { %v492_v37 = vadd.f32 %v491_v3, %v490_v34  ;;  %v509_v3 = vsel %vm268_vm1, %v426_v57, 0.0  ;;  %v1440_v34 = vld [vmem:[%s1194_s25 + $0x140] sm:$0xff]  ;;  %v435_v57 = vmul.f32 %v1352_v60, %v1352_v60 }
  0x47   : > { %v313_v26 = vadd.f32 %v312_v15, %v311_v18  ;;  %v330_v15 = vsel %vm268_vm1, %v1368_v9, 0.0 }
  0x48   : > { %v494_v40 = vadd.f32 %v493_v14, %v492_v37  ;;  %v511_v14 = vsel %vm268_vm1, %v427_v63, 0.0  ;;  %v1448_v37 = vld [vmem:[%s1194_s25 + $0x148] sm:$0xff]  ;;  %v436_v63 = vmul.f32 %v1360_v5, %v1360_v5 }
  0x49   : > { %v315_v33 = vadd.f32 %v314_v23, %v313_v26  ;;  %v332_v23 = vsel %vm268_vm1, %v1376_v10, 0.0 }
  0x4a   : > { %v496_v43 = vadd.f32 %v495_v21, %v494_v40  ;;  %v513_v21 = vsel %vm268_vm1, %v428_v2, 0.0  ;;  %v1456_v40 = vld [vmem:[%s1194_s25 + $0x150] sm:$0xff]  ;;  %v437_v2 = vmul.f32 %v1368_v9, %v1368_v9 }
  0x4b   : > { %v317_v41 = vadd.f32 %v316_v30, %v315_v33  ;;  %v334_v30 = vsel %vm268_vm1, %v1384_v13, 0.0 }
  0x4c   : > { %v498_v46 = vadd.f32 %v497_v29, %v496_v43  ;;  %v515_v29 = vsel %vm268_vm1, %v429_v12, 0.0  ;;  %v1464_v43 = vld [vmem:[%s1194_s25 + $0x158] sm:$0xff]  ;;  %v438_v12 = vmul.f32 %v1376_v10, %v1376_v10 }
  0x4d   : > { %v319_v48 = vadd.f32 %v318_v38, %v317_v41  ;;  %v336_v38 = vsel %vm268_vm1, %v1392_v16, 0.0 }
  0x4e   : > { %v500_v49 = vadd.f32 %v499_v36, %v498_v46  ;;  %v517_v36 = vsel %vm268_vm1, %v430_v20, 0.0  ;;  %v1472_v46 = vld [vmem:[%s1194_s25 + $0x160] sm:$0xff]  ;;  %v439_v20 = vmul.f32 %v1384_v13, %v1384_v13 }
  0x4f   : > { %v321_v55 = vadd.f32 %v320_v45, %v319_v48  ;;  %v338_v45 = vsel %vm268_vm1, %v1400_v19, 0.0 }
  0x50   : > { %v502_v52 = vadd.f32 %v501_v44, %v500_v49  ;;  %v519_v44 = vsel %vm268_vm1, %v431_v27, 0.0  ;;  %v1480_v49 = vld [vmem:[%s1194_s25 + $0x168] sm:$0xff]  ;;  %v440_v27 = vmul.f32 %v1392_v16, %v1392_v16 }
  0x51   : > { %v323_v62 = vadd.f32 %v322_v53, %v321_v55  ;;  %v340_v53 = vsel %vm268_vm1, %v1408_v22, 0.0 }
  0x52   : > { %v504_v56 = vadd.f32 %v503_v51, %v502_v52  ;;  %v521_v51 = vsel %vm268_vm1, %v432_v35, 0.0  ;;  %v1488_v52 = vld [vmem:[%s1194_s25 + $0x170] sm:$0xff]  ;;  %v441_v35 = vmul.f32 %v1400_v19, %v1400_v19 }
  0x53   : > { %v325_v6 = vadd.f32 %v324_v59, %v323_v62  ;;  %v342_v59 = vsel %vm268_vm1, %v1416_v25, 0.0 }
  0x54   : > { %v506_v61 = vadd.f32 %v505_v58, %v504_v56  ;;  %v523_v58 = vsel %vm268_vm1, %v433_v42, 0.0  ;;  %v1496_v56 = vld [vmem:[%s1194_s25 + $0x178] sm:$0xff]  ;;  %v442_v42 = vmul.f32 %v1408_v22, %v1408_v22 }
  0x55   : > { %v327_v11 = vadd.f32 %v326_v4, %v325_v6  ;;  %v344_v4 = vsel %vm268_vm1, %v1424_v28, 0.0 }
  0x56   : > { %v508_v1 = vadd.f32 %v507_v0, %v506_v61  ;;  %v525_v0 = vsel %vm268_vm1, %v434_v50, 0.0  ;;  %v1504_v61 = vld [vmem:[%s1194_s25 + $0x180] sm:$0xff]  ;;  %v443_v50 = vmul.f32 %v1416_v25, %v1416_v25 }
  0x57   : > { %v329_v18 = vadd.f32 %v328_v8, %v327_v11  ;;  %v346_v8 = vsel %vm268_vm1, %v1432_v31, 0.0 }
  0x58   : > { %v510_v7 = vadd.f32 %v509_v3, %v508_v1  ;;  %v527_v3 = vsel %vm268_vm1, %v435_v57, 0.0  ;;  %v1512_v1 = vld [vmem:[%s1194_s25 + $0x188] sm:$0xff]  ;;  %v444_v57 = vmul.f32 %v1424_v28, %v1424_v28 }
  0x59   : > { %v331_v26 = vadd.f32 %v330_v15, %v329_v18  ;;  %v348_v15 = vsel %vm268_vm1, %v1440_v34, 0.0 }
  0x5a   : > { %v512_v17 = vadd.f32 %v511_v14, %v510_v7  ;;  %v529_v14 = vsel %vm268_vm1, %v436_v63, 0.0  ;;  %v1520_v7 = vld [vmem:[%s1194_s25 + $0x190] sm:$0xff]  ;;  %v445_v63 = vmul.f32 %v1432_v31, %v1432_v31 }
  0x5b   : > { %v333_v33 = vadd.f32 %v332_v23, %v331_v26  ;;  %v350_v23 = vsel %vm268_vm1, %v1448_v37, 0.0 }
  0x5c   : > { %v514_v24 = vadd.f32 %v513_v21, %v512_v17  ;;  %v531_v21 = vsel %vm268_vm1, %v437_v2, 0.0  ;;  %v1528_v17 = vld [vmem:[%s1194_s25 + $0x198] sm:$0xff]  ;;  %v446_v2 = vmul.f32 %v1440_v34, %v1440_v34 }
  0x5d   : > { %v335_v41 = vadd.f32 %v334_v30, %v333_v33  ;;  %v352_v30 = vsel %vm268_vm1, %v1456_v40, 0.0 }
  0x5e   : > { %v516_v32 = vadd.f32 %v515_v29, %v514_v24  ;;  %v533_v29 = vsel %vm268_vm1, %v438_v12, 0.0  ;;  %v1536_v24 = vld [vmem:[%s1194_s25 + $0x1a0] sm:$0xff]  ;;  %v447_v12 = vmul.f32 %v1448_v37, %v1448_v37 }
  0x5f   : > { %v337_v48 = vadd.f32 %v336_v38, %v335_v41  ;;  %v354_v38 = vsel %vm268_vm1, %v1464_v43, 0.0 }
  0x60   : > { %v518_v39 = vadd.f32 %v517_v36, %v516_v32  ;;  %v535_v36 = vsel %vm268_vm1, %v439_v20, 0.0  ;;  %v1544_v32 = vld [vmem:[%s1194_s25 + $0x1a8] sm:$0xff]  ;;  %v448_v20 = vmul.f32 %v1456_v40, %v1456_v40 }
  0x61   : > { %v339_v55 = vadd.f32 %v338_v45, %v337_v48  ;;  %v356_v45 = vsel %vm268_vm1, %v1472_v46, 0.0 }
  0x62   : > { %v520_v47 = vadd.f32 %v519_v44, %v518_v39  ;;  %v537_v44 = vsel %vm268_vm1, %v440_v27, 0.0  ;;  %v1552_v39 = vld [vmem:[%s1194_s25 + $0x1b0] sm:$0xff]  ;;  %v449_v27 = vmul.f32 %v1464_v43, %v1464_v43 }
  0x63   : > { %v341_v62 = vadd.f32 %v340_v53, %v339_v55  ;;  %v358_v53 = vsel %vm268_vm1, %v1480_v49, 0.0  ;;  %v1616_v43 = vld [vmem:[%s1194_s25 + $0x1f0] sm:$0xff] }
  0x64   : > { %v522_v54 = vadd.f32 %v521_v51, %v520_v47  ;;  %v539_v51 = vsel %vm268_vm1, %v441_v35, 0.0  ;;  %v1560_v47 = vld [vmem:[%s1194_s25 + $0x1b8] sm:$0xff]  ;;  %v450_v35 = vmul.f32 %v1472_v46, %v1472_v46 }
  0x65   : > { %v343_v6 = vadd.f32 %v342_v59, %v341_v62  ;;  %v360_v59 = vsel %vm268_vm1, %v1488_v52, 0.0 }
  0x66   : > { %v524_v60 = vadd.f32 %v523_v58, %v522_v54  ;;  %v541_v58 = vsel %vm268_vm1, %v442_v42, 0.0  ;;  %v1568_v54 = vld [vmem:[%s1194_s25 + $0x1c0] sm:$0xff]  ;;  %v451_v42 = vmul.f32 %v1480_v49, %v1480_v49  ;;  %v453_v49 = vmul.f32 %v1496_v56, %v1496_v56 }
  0x67   : > { %v345_v11 = vadd.f32 %v344_v4, %v343_v6  ;;  %v362_v4 = vsel %vm268_vm1, %v1496_v56, 0.0  ;;  %v456_v56 = vmul.f32 %v1520_v7, %v1520_v7 }
  0x68   : > { %v526_v5 = vadd.f32 %v525_v0, %v524_v60  ;;  %v543_v0 = vsel %vm268_vm1, %v443_v50, 0.0  ;;  %v1576_v60 = vld [vmem:[%s1194_s25 + $0x1c8] sm:$0xff]  ;;  %v452_v50 = vmul.f32 %v1488_v52, %v1488_v52 }
  0x69   : > { %v347_v18 = vadd.f32 %v346_v8, %v345_v11  ;;  %v364_v8 = vsel %vm268_vm1, %v1504_v61, 0.0 }
  0x6a   : > { %v528_v9 = vadd.f32 %v527_v3, %v526_v5  ;;  %v545_v3 = vsel %vm268_vm1, %v444_v57, 0.0  ;;  %v1584_v5 = vld [vmem:[%s1194_s25 + $0x1d0] sm:$0xff]  ;;  %v559_v57 = vsel %vm268_vm1, %v451_v42, 0.0 }
  0x6b   : > { %v349_v26 = vadd.f32 %v348_v15, %v347_v18  ;;  %v366_v15 = vsel %vm268_vm1, %v1512_v1, 0.0 }
  0x6c   : > { %v530_v10 = vadd.f32 %v529_v14, %v528_v9  ;;  %v547_v14 = vsel %vm268_vm1, %v445_v63, 0.0  ;;  %v1592_v9 = vld [vmem:[%s1194_s25 + $0x1d8] sm:$0xff] }
  0x6d   : > { %v351_v33 = vadd.f32 %v350_v23, %v349_v26  ;;  %v368_v23 = vsel %vm268_vm1, %v1520_v7, 0.0  ;;  %v459_v7 = vmul.f32 %v1544_v32, %v1544_v32 }
  0x6e   : > { %v532_v13 = vadd.f32 %v531_v21, %v530_v10  ;;  %v549_v21 = vsel %vm268_vm1, %v446_v2, 0.0  ;;  %v1600_v10 = vld [vmem:[%s1194_s25 + $0x1e0] sm:$0xff] }
  0x6f   : > { %v353_v41 = vadd.f32 %v352_v30, %v351_v33  ;;  %v370_v30 = vsel %vm268_vm1, %v1528_v17, 0.0 }
  0x70   : > { %v534_v16 = vadd.f32 %v533_v29, %v532_v13  ;;  %v551_v29 = vsel %vm268_vm1, %v447_v12, 0.0  ;;  %v1608_v13 = vld [vmem:[%s1194_s25 + $0x1e8] sm:$0xff] }
  0x71   : > { %v355_v48 = vadd.f32 %v354_v38, %v353_v41  ;;  %v372_v38 = vsel %vm268_vm1, %v1536_v24, 0.0 }
  0x72   : > { %v536_v19 = vadd.f32 %v535_v36, %v534_v16  ;;  %v553_v36 = vsel %vm268_vm1, %v448_v20, 0.0  ;;  %v267_v20 = vld [vmem:[#allocation2] sm:$0x1] }
  0x73   : > { %v357_v55 = vadd.f32 %v356_v45, %v355_v48  ;;  %v374_v45 = vsel %vm268_vm1, %v1544_v32, 0.0  ;;  %v462_v32 = vmul.f32 %v1568_v54, %v1568_v54 }
  0x74   : > { %v538_v22 = vadd.f32 %v537_v44, %v536_v19  ;;  %v555_v44 = vsel %vm268_vm1, %v449_v27, 0.0  ;;  %v461_v27 = vmul.f32 %v1560_v47, %v1560_v47 }
  0x75   : > { %v359_v62 = vadd.f32 %v358_v53, %v357_v55  ;;  %v376_v53 = vsel %vm268_vm1, %v1552_v39, 0.0 }
  0x76   : > { %v540_v25 = vadd.f32 %v539_v51, %v538_v22  ;;  %v557_v51 = vsel %vm268_vm1, %v450_v35, 0.0  ;;  %v579_v35 = vsel %vm268_vm1, %v461_v27, 0.0 }
  0x77   : > { %v361_v6 = vadd.f32 %v360_v59, %v359_v62  ;;  %v378_v59 = vsel %vm268_vm1, %v1560_v47, 0.0  ;;  %v464_v47 = vmul.f32 %v1584_v5, %v1584_v5 }
  0x78   : > { %v542_v28 = vadd.f32 %v541_v58, %v540_v25  ;;  %v454_v25 = vmul.f32 %v1504_v61, %v1504_v61  ;;  %v457_v61 = vmul.f32 %v1528_v17, %v1528_v17  ;;  %v460_v17 = vmul.f32 %v1552_v39, %v1552_v39 }
  0x79   : > { %v363_v11 = vadd.f32 %v362_v4, %v361_v6  ;;  %v380_v4 = vsel %vm268_vm1, %v1568_v54, 0.0  ;;  %v463_v39 = vmul.f32 %v1576_v60, %v1576_v60 }
  0x7a   : > { %v544_v31 = vadd.f32 %v543_v0, %v542_v28  ;;  %v455_v0 = vmul.f32 %v1512_v1, %v1512_v1  ;;  %v565_v2 = vsel %vm268_vm1, %v454_v25, 0.0  ;;  %v458_v1 = vmul.f32 %v1536_v24, %v1536_v24 }
  0x7b   : > { %v365_v18 = vadd.f32 %v364_v8, %v363_v11  ;;  %v382_v8 = vsel %vm268_vm1, %v1576_v60, 0.0  ;;  %v583_v54 = vsel %vm268_vm1, %v463_v39, 0.0  ;;  %v585_v60 = vsel %vm268_vm1, %v464_v47, 0.0 }
  0x7c   : > { %v546_v34 = vadd.f32 %v545_v3, %v544_v31  ;;  %v567_v31 = vsel %vm268_vm1, %v455_v0, 0.0 }
  0x7d   : > { %v367_v26 = vadd.f32 %v366_v15, %v365_v18  ;;  %v384_v15 = vsel %vm268_vm1, %v1584_v5, 0.0 }
  0x7e   : > { %v548_v37 = vadd.f32 %v547_v14, %v546_v34  ;;  %v569_v14 = vsel %vm268_vm1, %v456_v56, 0.0 }
  0x7f   : > { %v369_v33 = vadd.f32 %v368_v23, %v367_v26  ;;  %v386_v23 = vsel %vm268_vm1, %v1592_v9, 0.0 }
  0x80   : > { %v550_v40 = vadd.f32 %v549_v21, %v548_v37  ;;  %v573_v37 = vsel %vm268_vm1, %v458_v1, 0.0 }
  0x81   : > { %v371_v41 = vadd.f32 %v370_v30, %v369_v33  ;;  %v388_v30 = vsel %vm268_vm1, %v1600_v10, 0.0 }
  0x82   : > { %v552_v16 = vadd.f32 %v551_v29, %v550_v40  ;;  %v575_v29 = vsel %vm268_vm1, %v459_v7, 0.0  ;;  %v577_v40 = vsel %vm268_vm1, %v460_v17, 0.0 }
  0x83   : > { %v373_v48 = vadd.f32 %v372_v38, %v371_v41  ;;  %v390_v38 = vsel %vm268_vm1, %v1608_v13, 0.0 }
  0x84   : > { %v554_v19 = vadd.f32 %v553_v36, %v552_v16 }
  0x85   : > { %v375_v55 = vadd.f32 %v374_v45, %v373_v48  ;;  %v392_v45 = vsel %vm268_vm1, %v1616_v43, 0.0  ;;  %v1624_v48 = vld [vmem:[%s1194_s25 + $0x1f8] sm:$0xff] }
  0x86   : > { %v556_v22 = vadd.f32 %v555_v44, %v554_v19  ;;  %v466_v44 = vmul.f32 %v1600_v10, %v1600_v10  ;;  %v467_v19 = vmul.f32 %v1608_v13, %v1608_v13 }
  0x87   : > { %v377_v62 = vadd.f32 %v376_v53, %v375_v55  ;;  %v394_v53 = vsel %vm268_vm1, %v1624_v48, 0.0 }
  0x88   : > { %v558_v58 = vadd.f32 %v557_v51, %v556_v22  ;;  %v591_v10 = vsel %vm268_vm1, %v467_v19, 0.0 }
  0x89   : > { %v379_v6 = vadd.f32 %v378_v59, %v377_v62  ;;  %v561_v62 = vsel %vm268_vm1, %v452_v50, 0.0  ;;  %v468_v50 = vmul.f32 %v1616_v43, %v1616_v43 }
  0x8a   : > { %v560_v52 = vadd.f32 %v559_v57, %v558_v58 }
  0x8b   : > { %v381_v11 = vadd.f32 %v380_v4, %v379_v6  ;;  %v563_v4 = vsel %vm268_vm1, %v453_v49, 0.0 }
  0x8c   : > { %v562_v28 = vadd.f32 %v561_v62, %v560_v52 }
  0x8d   : > { %v383_v18 = vadd.f32 %v382_v8, %v381_v11 }
  0x8e   : > { %v564_v3 = vadd.f32 %v563_v4, %v562_v28 }
  0x8f   : > { %v385_v26 = vadd.f32 %v384_v15, %v383_v18  ;;  %v571_v18 = vsel %vm268_vm1, %v457_v61, 0.0 }
  0x90   : > { %v566_v11 = vadd.f32 %v565_v2, %v564_v3 }
  0x91   : > { %v387_v33 = vadd.f32 %v386_v23, %v385_v26 }
  0x92   : > { %v568_v15 = vadd.f32 %v567_v31, %v566_v11 }
  0x93   : > { %v389_v41 = vadd.f32 %v388_v30, %v387_v33 }
  0x94   : > { %v570_v21 = vadd.f32 %v569_v14, %v568_v15 }
  0x95   : > { %v391_v46 = vadd.f32 %v390_v38, %v389_v41  ;;  %v581_v38 = vsel %vm268_vm1, %v462_v32, 0.0  ;;  %v465_v41 = vmul.f32 %v1592_v9, %v1592_v9  ;;  %v589_v9 = vsel %vm268_vm1, %v466_v44, 0.0 }
  0x96   : > { %v572_v26 = vadd.f32 %v571_v18, %v570_v21 }
  0x97   : > { %v393_v55 = vadd.f32 %v392_v45, %v391_v46  ;;  %v587_v5 = vsel %vm268_vm1, %v465_v41, 0.0 }
  0x98   : > { %v574_v30 = vadd.f32 %v573_v37, %v572_v26 }
  0x99   : > { %v395_v59 = vadd.f32 %v394_v53, %v393_v55  ;;  %v469_v53 = vmul.f32 %v1624_v48, %v1624_v48  ;;  %v593_v55 = vsel %vm268_vm1, %v468_v50, 0.0 }
  0x9a   : > { %v576_v33 = vadd.f32 %v575_v29, %v574_v30 }
  0x9b   : > { %v396_v63 = vrot.slane %v395_v59, 4  ;;  %v595_v13 = vsel %vm268_vm1, %v469_v53, 0.0 }
  0x9c   : > { %v578_v36 = vadd.f32 %v577_v40, %v576_v33 }
  0x9d   : > { %v397_v6 = vadd.f32 %v396_v63, %v395_v59  ;;  %v405_v63 = vld [vmem:[#allocation3] sm:$0x1] }
  0x9e   : > { %v580_v16 = vadd.f32 %v579_v35, %v578_v36 }
  0x9f   : > { %v398_v8 = vrot.slane %v397_v6, 2 }
  0xa0   : > { %v582_v42 = vadd.f32 %v581_v38, %v580_v16 }
  0xa1   : > { %v399_v12 = vadd.f32 %v398_v8, %v397_v6 }
  0xa2   : > { %v584_v45 = vadd.f32 %v583_v54, %v582_v42 }
  0xa3   : > { %v400_v34 = vrot.slane %v399_v12, 1 }
  0xa4   : > { %v586_v46 = vadd.f32 %v585_v60, %v584_v45 }
  0xa5   : > { %v401_v23 = vadd.f32 %v400_v34, %v399_v12 }
  0xa6   : > { %v588_v51 = vadd.f32 %v587_v5, %v586_v46 }
  0xa7   : > { %v402_v24 = vadd.f32 %v401_v23, %v267_v20 }
  0xa8   : > { %v590_v22 = vadd.f32 %v589_v9, %v588_v51 }
  0xa9   : > { %404 = vst.msk [vmem:[#allocation2] sm:$0x1] %vm403_vm2, %v402_v24 }
  0xaa   : > { %v592_v49 = vadd.f32 %v591_v10, %v590_v22 }
  0xac   : > { %v594_v57 = vadd.f32 %v593_v55, %v592_v49 }
  0xae   : > { %v596_v58 = vadd.f32 %v595_v13, %v594_v57 }
  0xb0   : > { %v597_v59 = vrot.slane %v596_v58, 4 }
  0xb2   : > { %v598_v25 = vadd.f32 %v597_v59, %v596_v58 }
  0xb4   : > { %v599_v62 = vrot.slane %v598_v25, 2 }
  0xb6   : > { %v600_v43 = vadd.f32 %v599_v62, %v598_v25 }
  0xb8   : > { %v601_v52 = vrot.slane %v600_v43, 1 }
  0xba   : > { %v602_v0 = vadd.f32 %v601_v52, %v600_v43 }
  0xbc   : > { %v603_v4 = vadd.f32 %v602_v0, %v405_v63 }
  0xbe   : > { %604 = vst.msk [vmem:[#allocation3] sm:$0x1] %vm403_vm2, %v603_v4 }
  0xbf PF: > { %p605_p11 = scmp.eq.s32.totalorder %s1115_s13, 1 }
  0xc1   : > { %p606_p12 = pnand %p605_p11, %p192_p7 }
  0xc2   : > { %v610_v48 = vld [vmem:[#allocation2] sm:$0x1] (!%p606_p12)  ;;  %vm620_vm3 = vcmask (!%p606_p12), 516096  }
  0xc3   : > { %609 = sbr.rel (%p606_p12) target bundleno = 222 (0xde), region = 44  ;;  %v611_v6 = vmul.f32 (!%p606_p12), 0.00048828125, %v610_v48  ;;  %v618_v61 = vld [vmem:[%s2036_s1] sm:$0x1] (!%p606_p12) }
  0xc4   : > { %v622_v12 = vld [vmem:[%s2037_s2] sm:$0x1] (!%p606_p12) }
  0xc5   : > { %v612_v28 = vld [vmem:[#allocation3] sm:$0x1] (!%p606_p12)  ;;  %v614_v2 = vmul.f32 (!%p606_p12), %v611_v6, %v611_v6 }
  0xc6   : > { %v613_v56 = vmul.f32 (!%p606_p12), 0.00048828125, %v612_v28 }
  0xc8   : > { %v615_v3 = vsub.f32 (!%p606_p12), %v613_v56, %v614_v2 }
  0xca   : > { %v616_v8 = vadd.f32 1e-05, %v615_v3 }
  0xcc   : > { %1087 = vrsqrt.f32 %v616_v8 }
  0xd6   : > { %v1088_v31 = vpop.eup %1087 }
  0xd7   : > { %v619_v11 = vmul.f32 %v1088_v31, %v618_v61 }
  0xd9   : > { %621 = vst.msk [vmem:[#allocation4] sm:$0x1] %vm620_vm3, %v619_v11  ;;  %v623_v1 = vmul.f32 %v619_v11, %v611_v6 }
  0xdb   : > { %v624_v14 = vsub.f32 %v622_v12, %v623_v1 }
  0xdd   : > { %625 = vst.msk [vmem:[#allocation4 + $0x1] sm:$0x1] %vm620_vm3, %v624_v14 }
  0xde PF: > { %p1041_p13 = scmp.ne.s32.totalorder %s1115_s13, 1 }
  0xdf   : > { %v629_v15 = vld [vmem:[%s1194_s25] sm:$0xff] (!%p1041_p13)  ;;  %v630_v20 = vld [vmem:[%s1194_s25 + $0x8] sm:$0xff] (!%p1041_p13)  ;;  %v631_v21 = vld [vmem:[%s1194_s25 + $0x10] sm:$0xff] (!%p1041_p13)  ;;  %vm895_vm4 = vcmask (!%p1041_p13), 523264  }
  0xe0   : > { %628 = sbr.rel (%p1041_p13) target bundleno = 280 (0x118), region = 48  ;;  %v1697_v34 = vld [vmem:[#allocation4] ss:$0 sm:$0xff] (!%p1041_p13)  ;;  %v632_v23 = vld [vmem:[%s1194_s25 + $0x18] sm:$0xff] (!%p1041_p13)  ;;  %v634_v27 = vld [vmem:[%s1194_s25 + $0x28] sm:$0xff] (!%p1041_p13) }
  0xe1   : > { %v698_v18 = vmul.f32 (!%p1041_p13), %v1697_v34, %v629_v15  ;;  %v699_v17 = vmul.f32 (!%p1041_p13), %v1697_v34, %v630_v20  ;;  %v700_v37 = vmul.f32 (!%p1041_p13), %v1697_v34, %v631_v21  ;;  %v701_v26 = vmul.f32 (!%p1041_p13), %v1697_v34, %v632_v23  ;;  %v633_v24 = vld [vmem:[%s1194_s25 + $0x20] sm:$0xff] (!%p1041_p13)  ;;  %v635_v29 = vld [vmem:[%s1194_s25 + $0x30] sm:$0xff] (!%p1041_p13)  ;;  %v636_v39 = vld [vmem:[%s1194_s25 + $0x38] sm:$0xff] (!%p1041_p13) }
  0xe2   : > { %v702_v32 = vmul.f32 (!%p1041_p13), %v1697_v34, %v633_v24  ;;  %v703_v40 = vmul.f32 (!%p1041_p13), %v1697_v34, %v634_v27  ;;  %v704_v33 = vmul.f32 (!%p1041_p13), %v1697_v34, %v635_v29  ;;  %v705_v38 = vmul.f32 (!%p1041_p13), %v1697_v34, %v636_v39  ;;  %v637_v16 = vld [vmem:[%s1194_s25 + $0x40] sm:$0xff] (!%p1041_p13)  ;;  %v638_v60 = vld [vmem:[%s1194_s25 + $0x48] sm:$0xff] (!%p1041_p13)  ;;  %v639_v45 = vld [vmem:[%s1194_s25 + $0x50] sm:$0xff] (!%p1041_p13) }
  0xe3   : > { %v640_v19 = vld [vmem:[%s1194_s25 + $0x58] sm:$0xff] (!%p1041_p13)  ;;  %v641_v51 = vld [vmem:[%s1194_s25 + $0x60] sm:$0xff] (!%p1041_p13)  ;;  %v642_v53 = vld [vmem:[%s1194_s25 + $0x68] sm:$0xff] (!%p1041_p13)  ;;  %v706_v13 = vmul.f32 (!%p1041_p13), %v1697_v34, %v637_v16  ;;  %v707_v59 = vmul.f32 (!%p1041_p13), %v1697_v34, %v638_v60  ;;  %v708_v25 = vmul.f32 (!%p1041_p13), %v1697_v34, %v639_v45 }
  0xe4   : > { %v1699_v7 = vld [vmem:[#allocation4 + $0x1] ss:$0 sm:$0xff] (!%p1041_p13)  ;;  %v643_v10 = vld [vmem:[%s1194_s25 + $0x70] sm:$0xff] (!%p1041_p13)  ;;  %v644_v57 = vld [vmem:[%s1194_s25 + $0x78] sm:$0xff] (!%p1041_p13)  ;;  %v709_v62 = vmul.f32 (!%p1041_p13), %v1697_v34, %v640_v19  ;;  %v710_v52 = vmul.f32 (!%p1041_p13), %v1697_v34, %v641_v51  ;;  %v711_v63 = vmul.f32 (!%p1041_p13), %v1697_v34, %v642_v53 }
  0xe5   : > { %v767_v30 = vadd.f32 (!%p1041_p13), %v1699_v7, %v698_v18  ;;  %v768_v35 = vadd.f32 (!%p1041_p13), %v1699_v7, %v699_v17  ;;  %v769_v36 = vadd.f32 (!%p1041_p13), %v1699_v7, %v700_v37  ;;  %v770_v47 = vadd.f32 (!%p1041_p13), %v1699_v7, %v701_v26  ;;  %v645_v56 = vld [vmem:[%s1194_s25 + $0x80] sm:$0xff] (!%p1041_p13)  ;;  %v646_v31 = vld [vmem:[%s1194_s25 + $0x88] sm:$0xff] (!%p1041_p13)  ;;  %v647_v11 = vld [vmem:[%s1194_s25 + $0x90] sm:$0xff] (!%p1041_p13) }
  0xe6   : > { %v771_v54 = vadd.f32 (!%p1041_p13), %v1699_v7, %v702_v32  ;;  %v772_v42 = vadd.f32 (!%p1041_p13), %v1699_v7, %v703_v40  ;;  %v773_v44 = vadd.f32 (!%p1041_p13), %v1699_v7, %v704_v33  ;;  %v774_v9 = vadd.f32 (!%p1041_p13), %v1699_v7, %v705_v38  ;;  %v648_v12 = vld [vmem:[%s1194_s25 + $0x98] sm:$0xff] (!%p1041_p13)  ;;  %v649_v20 = vld [vmem:[%s1194_s25 + $0xa0] sm:$0xff] (!%p1041_p13)  ;;  %v650_v21 = vld [vmem:[%s1194_s25 + $0xa8] sm:$0xff] (!%p1041_p13) }
  0xe7   : > { %v831_v41 = vmax.f32 %v767_v30, 0.0  ;;  %v832_v5 = vmax.f32 %v768_v35, 0.0  ;;  %v833_v46 = vmax.f32 %v769_v36, 0.0  ;;  %v834_v50 = vmax.f32 %v770_v47, 0.0  ;;  %v651_v23 = vld [vmem:[%s1194_s25 + $0xb0] sm:$0xff]  ;;  %v652_v27 = vld [vmem:[%s1194_s25 + $0xb8] sm:$0xff] }
  0xe8   : > { %v835_v22 = vmax.f32 %v771_v54, 0.0  ;;  %v836_v55 = vmax.f32 %v772_v42, 0.0  ;;  %v837_v49 = vmax.f32 %v773_v44, 0.0  ;;  %v838_v58 = vmax.f32 %v774_v9, 0.0  ;;  %v653_v54 = vld [vmem:[%s1194_s25 + $0xc0] sm:$0xff]  ;;  %v654_v19 = vld [vmem:[%s1194_s25 + $0xc8] sm:$0xff] }
  0xe9   : > { %896 = vst.msk [vmem:[%s1199_s29] sm:$0xff] %vm895_vm4, %v831_v41  ;;  %897 = vst.msk [vmem:[%s1199_s29 + $0x8] sm:$0xff] %vm895_vm4, %v832_v5  ;;  %v775_v43 = vadd.f32 %v1699_v7, %v706_v13  ;;  %v712_v0 = vmul.f32 %v1697_v34, %v643_v10  ;;  %v776_v4 = vadd.f32 %v1699_v7, %v707_v59  ;;  %v655_v5 = vld [vmem:[%s1194_s25 + $0xd0] sm:$0xff]  ;;  %v657_v10 = vld [vmem:[%s1194_s25 + $0xe0] sm:$0xff] }
  0xea   : > { %898 = vst.msk [vmem:[%s1199_s29 + $0x10] sm:$0xff] %vm895_vm4, %v833_v46  ;;  %899 = vst.msk [vmem:[%s1199_s29 + $0x18] sm:$0xff] %vm895_vm4, %v834_v50  ;;  %v777_v48 = vadd.f32 %v1699_v7, %v708_v25  ;;  %v778_v28 = vadd.f32 %v1699_v7, %v709_v62  ;;  %v713_v6 = vmul.f32 %v1697_v34, %v644_v57  ;;  %v656_v46 = vld [vmem:[%s1194_s25 + $0xd8] sm:$0xff] }
  0xeb   : > { %900 = vst.msk [vmem:[%s1199_s29 + $0x20] sm:$0xff] %vm895_vm4, %v835_v22  ;;  %901 = vst.msk [vmem:[%s1199_s29 + $0x28] sm:$0xff] %vm895_vm4, %v836_v55  ;;  %v839_v2 = vmax.f32 %v775_v43, 0.0  ;;  %v779_v3 = vadd.f32 %v1699_v7, %v710_v52  ;;  %v780_v8 = vadd.f32 %v1699_v7, %v711_v63  ;;  %v781_v61 = vadd.f32 %v1699_v7, %v712_v0  ;;  %v658_v22 = vld [vmem:[%s1194_s25 + $0xe8] sm:$0xff]  ;;  %v659_v55 = vld [vmem:[%s1194_s25 + $0xf0] sm:$0xff] }
  0xec   : > { %902 = vst.msk [vmem:[%s1199_s29 + $0x30] sm:$0xff] %vm895_vm4, %v837_v49  ;;  %903 = vst.msk [vmem:[%s1199_s29 + $0x38] sm:$0xff] %vm895_vm4, %v838_v58  ;;  %v840_v1 = vmax.f32 %v776_v4, 0.0  ;;  %v841_v14 = vmax.f32 %v777_v48, 0.0  ;;  %v842_v15 = vmax.f32 %v778_v28, 0.0  ;;  %v782_v18 = vadd.f32 %v1699_v7, %v713_v6  ;;  %v660_v59 = vld [vmem:[%s1194_s25 + $0xf8] sm:$0xff] }
  0xed   : > { %904 = vst.msk [vmem:[%s1199_s29 + $0x40] sm:$0xff] %vm895_vm4, %v839_v2  ;;  %v843_v17 = vmax.f32 %v779_v3, 0.0  ;;  %v844_v37 = vmax.f32 %v780_v8, 0.0  ;;  %v845_v26 = vmax.f32 %v781_v61, 0.0  ;;  %v714_v24 = vmul.f32 %v1697_v34, %v645_v56  ;;  %v661_v3 = vld [vmem:[%s1194_s25 + $0x100] sm:$0xff] }
  0xee   : > { %905 = vst.msk [vmem:[%s1199_s29 + $0x48] sm:$0xff] %vm895_vm4, %v840_v1  ;;  %906 = vst.msk [vmem:[%s1199_s29 + $0x50] sm:$0xff] %vm895_vm4, %v841_v14  ;;  %v846_v29 = vmax.f32 %v782_v18, 0.0  ;;  %v715_v30 = vmul.f32 %v1697_v34, %v646_v31  ;;  %v716_v32 = vmul.f32 %v1697_v34, %v647_v11  ;;  %v717_v40 = vmul.f32 %v1697_v34, %v648_v12  ;;  %v662_v12 = vld [vmem:[%s1194_s25 + $0x108] sm:$0xff]  ;;  %v663_v1 = vld [vmem:[%s1194_s25 + $0x110] sm:$0xff] }
  0xef   : > { %907 = vst.msk [vmem:[%s1199_s29 + $0x58] sm:$0xff] %vm895_vm4, %v842_v15  ;;  %908 = vst.msk [vmem:[%s1199_s29 + $0x60] sm:$0xff] %vm895_vm4, %v843_v17  ;;  %v783_v33 = vadd.f32 %v1699_v7, %v714_v24  ;;  %v718_v39 = vmul.f32 %v1697_v34, %v649_v20  ;;  %v719_v35 = vmul.f32 %v1697_v34, %v650_v21  ;;  %v664_v14 = vld [vmem:[%s1194_s25 + $0x118] sm:$0xff]  ;;  %v666_v17 = vld [vmem:[%s1194_s25 + $0x128] sm:$0xff] }
  0xf0   : > { %909 = vst.msk [vmem:[%s1199_s29 + $0x68] sm:$0xff] %vm895_vm4, %v844_v37  ;;  %910 = vst.msk [vmem:[%s1199_s29 + $0x70] sm:$0xff] %vm895_vm4, %v845_v26  ;;  %v720_v36 = vmul.f32 %v1697_v34, %v651_v23  ;;  %v784_v47 = vadd.f32 %v1699_v7, %v715_v30  ;;  %v785_v38 = vadd.f32 %v1699_v7, %v716_v32  ;;  %v665_v23 = vld [vmem:[%s1194_s25 + $0x120] sm:$0xff]  ;;  %v667_v37 = vld [vmem:[%s1194_s25 + $0x130] sm:$0xff] }
  0xf1   : > { %911 = vst.msk [vmem:[%s1199_s29 + $0x78] sm:$0xff] %vm895_vm4, %v846_v29  ;;  %v786_v16 = vadd.f32 %v1699_v7, %v717_v40  ;;  %v721_v41 = vmul.f32 %v1697_v34, %v652_v27  ;;  %v847_v42 = vmax.f32 %v783_v33, 0.0  ;;  %v787_v44 = vadd.f32 %v1699_v7, %v718_v39  ;;  %v668_v30 = vld [vmem:[%s1194_s25 + $0x138] sm:$0xff] }
  0xf2   : > { %v788_v60 = vadd.f32 %v1699_v7, %v719_v35  ;;  %v789_v45 = vadd.f32 %v1699_v7, %v720_v36  ;;  %v848_v50 = vmax.f32 %v784_v47, 0.0  ;;  %v849_v9 = vmax.f32 %v785_v38, 0.0 }
  0xf3   : > { %v850_v51 = vmax.f32 %v786_v16, 0.0  ;;  %v790_v53 = vadd.f32 %v1699_v7, %v721_v41  ;;  %912 = vst.msk [vmem:[%s1199_s29 + $0x80] sm:$0xff] %vm895_vm4, %v847_v42  ;;  %v851_v49 = vmax.f32 %v787_v44, 0.0  ;;  %v722_v58 = vmul.f32 %v1697_v34, %v653_v54  ;;  %v669_v44 = vld [vmem:[%s1194_s25 + $0x140] sm:$0xff] }
  0xf4   : > { %v852_v13 = vmax.f32 %v788_v60, 0.0  ;;  %v853_v57 = vmax.f32 %v789_v45, 0.0  ;;  %913 = vst.msk [vmem:[%s1199_s29 + $0x88] sm:$0xff] %vm895_vm4, %v848_v50  ;;  %914 = vst.msk [vmem:[%s1199_s29 + $0x90] sm:$0xff] %vm895_vm4, %v849_v9  ;;  %v723_v62 = vmul.f32 %v1697_v34, %v654_v19  ;;  %v724_v43 = vmul.f32 %v1697_v34, %v655_v5  ;;  %v671_v50 = vld [vmem:[%s1194_s25 + $0x150] sm:$0xff]  ;;  %v672_v9 = vld [vmem:[%s1194_s25 + $0x158] sm:$0xff] }
  0xf5   : > { %915 = vst.msk [vmem:[%s1199_s29 + $0x98] sm:$0xff] %vm895_vm4, %v850_v51  ;;  %v854_v25 = vmax.f32 %v790_v53, 0.0  ;;  %v725_v52 = vmul.f32 %v1697_v34, %v656_v46  ;;  %916 = vst.msk [vmem:[%s1199_s29 + $0xa0] sm:$0xff] %vm895_vm4, %v851_v49  ;;  %v791_v63 = vadd.f32 %v1699_v7, %v722_v58  ;;  %v726_v0 = vmul.f32 %v1697_v34, %v657_v10  ;;  %v670_v46 = vld [vmem:[%s1194_s25 + $0x148] sm:$0xff] }
  0xf6   : > { %917 = vst.msk [vmem:[%s1199_s29 + $0xa8] sm:$0xff] %vm895_vm4, %v852_v13  ;;  %918 = vst.msk [vmem:[%s1199_s29 + $0xb0] sm:$0xff] %vm895_vm4, %v853_v57  ;;  %v727_v4 = vmul.f32 %v1697_v34, %v658_v22  ;;  %v728_v48 = vmul.f32 %v1697_v34, %v659_v55  ;;  %v792_v28 = vadd.f32 %v1699_v7, %v723_v62  ;;  %v673_v55 = vld [vmem:[%s1194_s25 + $0x160] sm:$0xff]  ;;  %v674_v49 = vld [vmem:[%s1194_s25 + $0x168] sm:$0xff] }
  0xf7   : > { %919 = vst.msk [vmem:[%s1199_s29 + $0xb8] sm:$0xff] %vm895_vm4, %v854_v25  ;;  %v793_v6 = vadd.f32 %v1699_v7, %v724_v43  ;;  %v794_v56 = vadd.f32 %v1699_v7, %v725_v52  ;;  %v729_v2 = vmul.f32 %v1697_v34, %v660_v59  ;;  %v855_v8 = vmax.f32 %v791_v63, 0.0  ;;  %v675_v13 = vld [vmem:[%s1194_s25 + $0x170] sm:$0xff]  ;;  %v676_v62 = vld [vmem:[%s1194_s25 + $0x178] sm:$0xff] }
  0xf8   : > { %v795_v61 = vadd.f32 %v1699_v7, %v726_v0  ;;  %v796_v31 = vadd.f32 %v1699_v7, %v727_v4  ;;  %v797_v11 = vadd.f32 %v1699_v7, %v728_v48  ;;  %v856_v15 = vmax.f32 %v792_v28, 0.0 }
  0xf9   : > { %v857_v18 = vmax.f32 %v793_v6, 0.0  ;;  %v858_v20 = vmax.f32 %v794_v56, 0.0  ;;  %v798_v21 = vadd.f32 %v1699_v7, %v729_v2  ;;  %920 = vst.msk [vmem:[%s1199_s29 + $0xc0] sm:$0xff] %vm895_vm4, %v855_v8  ;;  %v730_v29 = vmul.f32 %v1697_v34, %v661_v3 }
  0xfa   : > { %v859_v26 = vmax.f32 %v795_v61, 0.0  ;;  %v860_v24 = vmax.f32 %v796_v31, 0.0  ;;  %v861_v27 = vmax.f32 %v797_v11, 0.0  ;;  %921 = vst.msk [vmem:[%s1199_s29 + $0xc8] sm:$0xff] %vm895_vm4, %v856_v15  ;;  %v731_v40 = vmul.f32 %v1697_v34, %v662_v12  ;;  %v677_v61 = vld [vmem:[%s1194_s25 + $0x180] sm:$0xff]  ;;  %v679_v15 = vld [vmem:[%s1194_s25 + $0x190] sm:$0xff] }
  0xfb   : > { %922 = vst.msk [vmem:[%s1199_s29 + $0xd0] sm:$0xff] %vm895_vm4, %v857_v18  ;;  %923 = vst.msk [vmem:[%s1199_s29 + $0xd8] sm:$0xff] %vm895_vm4, %v858_v20  ;;  %v862_v32 = vmax.f32 %v798_v21, 0.0  ;;  %v732_v33 = vmul.f32 %v1697_v34, %v663_v1  ;;  %v733_v39 = vmul.f32 %v1697_v34, %v664_v14  ;;  %v799_v35 = vadd.f32 %v1699_v7, %v730_v29  ;;  %v678_v14 = vld [vmem:[%s1194_s25 + $0x188] sm:$0xff]  ;;  %v680_v18 = vld [vmem:[%s1194_s25 + $0x198] sm:$0xff] }
  0xfc   : > { %924 = vst.msk [vmem:[%s1199_s29 + $0xe0] sm:$0xff] %vm895_vm4, %v859_v26  ;;  %925 = vst.msk [vmem:[%s1199_s29 + $0xe8] sm:$0xff] %vm895_vm4, %v860_v24  ;;  %v734_v36 = vmul.f32 %v1697_v34, %v665_v23  ;;  %v735_v47 = vmul.f32 %v1697_v34, %v666_v17  ;;  %v736_v38 = vmul.f32 %v1697_v34, %v667_v37  ;;  %v681_v37 = vld [vmem:[%s1194_s25 + $0x1a0] sm:$0xff]  ;;  %v682_v26 = vld [vmem:[%s1194_s25 + $0x1a8] sm:$0xff] }
  0xfd   : > { %926 = vst.msk [vmem:[%s1199_s29 + $0xf0] sm:$0xff] %vm895_vm4, %v861_v27  ;;  %927 = vst.msk [vmem:[%s1199_s29 + $0xf8] sm:$0xff] %vm895_vm4, %v862_v32  ;;  %v800_v16 = vadd.f32 %v1699_v7, %v731_v40  ;;  %v801_v41 = vadd.f32 %v1699_v7, %v732_v33  ;;  %v802_v54 = vadd.f32 %v1699_v7, %v733_v39  ;;  %v863_v60 = vmax.f32 %v799_v35, 0.0  ;;  %v683_v24 = vld [vmem:[%s1194_s25 + $0x1b0] sm:$0xff]  ;;  %v684_v40 = vld [vmem:[%s1194_s25 + $0x1b8] sm:$0xff] }
  0xfe   : > { %v737_v42 = vmul.f32 %v1697_v34, %v668_v30  ;;  %v803_v45 = vadd.f32 %v1699_v7, %v734_v36  ;;  %v804_v19 = vadd.f32 %v1699_v7, %v735_v47  ;;  %v805_v5 = vadd.f32 %v1699_v7, %v736_v38 }
  0xff   : > { %v864_v51 = vmax.f32 %v800_v16, 0.0  ;;  %v865_v53 = vmax.f32 %v801_v41, 0.0  ;;  %v866_v10 = vmax.f32 %v802_v54, 0.0  ;;  %928 = vst.msk [vmem:[%s1199_s29 + $0x100] sm:$0xff] %vm895_vm4, %v863_v60  ;;  %v738_v25 = vmul.f32 %v1697_v34, %v669_v44 }
 0x100   : > { %v806_v22 = vadd.f32 %v1699_v7, %v737_v42  ;;  %v867_v57 = vmax.f32 %v803_v45, 0.0  ;;  %v868_v58 = vmax.f32 %v804_v19, 0.0  ;;  %v869_v59 = vmax.f32 %v805_v5, 0.0  ;;  %v685_v45 = vld [vmem:[%s1194_s25 + $0x1c0] sm:$0xff] }
 0x101   : > { %929 = vst.msk [vmem:[%s1199_s29 + $0x108] sm:$0xff] %vm895_vm4, %v864_v51  ;;  %930 = vst.msk [vmem:[%s1199_s29 + $0x110] sm:$0xff] %vm895_vm4, %v865_v53  ;;  %v739_v52 = vmul.f32 %v1697_v34, %v670_v46  ;;  %v740_v63 = vmul.f32 %v1697_v34, %v671_v50  ;;  %v741_v0 = vmul.f32 %v1697_v34, %v672_v9  ;;  %v686_v9 = vld [vmem:[%s1194_s25 + $0x1c8] sm:$0xff]  ;;  %v687_v51 = vld [vmem:[%s1194_s25 + $0x1d0] sm:$0xff] }
 0x102   : > { %931 = vst.msk [vmem:[%s1199_s29 + $0x118] sm:$0xff] %vm895_vm4, %v866_v10  ;;  %v870_v43 = vmax.f32 %v806_v22, 0.0  ;;  %932 = vst.msk [vmem:[%s1199_s29 + $0x120] sm:$0xff] %vm895_vm4, %v867_v57  ;;  %v807_v4 = vadd.f32 %v1699_v7, %v738_v25  ;;  %v742_v48 = vmul.f32 %v1697_v34, %v673_v55  ;;  %v743_v28 = vmul.f32 %v1697_v34, %v674_v49  ;;  %v688_v53 = vld [vmem:[%s1194_s25 + $0x1d8] sm:$0xff]  ;;  %v690_v57 = vld [vmem:[%s1194_s25 + $0x1e8] sm:$0xff] }
 0x103   : > { %933 = vst.msk [vmem:[%s1199_s29 + $0x128] sm:$0xff] %vm895_vm4, %v868_v58  ;;  %934 = vst.msk [vmem:[%s1199_s29 + $0x130] sm:$0xff] %vm895_vm4, %v869_v59  ;;  %v744_v6 = vmul.f32 %v1697_v34, %v675_v13  ;;  %v808_v56 = vadd.f32 %v1699_v7, %v739_v52  ;;  %v809_v2 = vadd.f32 %v1699_v7, %v740_v63  ;;  %v689_v13 = vld [vmem:[%s1194_s25 + $0x1e0] sm:$0xff]  ;;  %v691_v58 = vld [vmem:[%s1194_s25 + $0x1f0] sm:$0xff] }
 0x104   : > { %935 = vst.msk [vmem:[%s1199_s29 + $0x138] sm:$0xff] %vm895_vm4, %v870_v43  ;;  %v810_v3 = vadd.f32 %v1699_v7, %v741_v0  ;;  %v745_v8 = vmul.f32 %v1697_v34, %v676_v62  ;;  %v871_v31 = vmax.f32 %v807_v4, 0.0  ;;  %v811_v11 = vadd.f32 %v1699_v7, %v742_v48  ;;  %v692_v52 = vld [vmem:[%s1194_s25 + $0x1f8] sm:$0xff] }
 0x105   : > { %v812_v12 = vadd.f32 %v1699_v7, %v743_v28  ;;  %v813_v1 = vadd.f32 %v1699_v7, %v744_v6  ;;  %v872_v20 = vmax.f32 %v808_v56, 0.0  ;;  %v873_v21 = vmax.f32 %v809_v2, 0.0 }
 0x106   : > { %v874_v23 = vmax.f32 %v810_v3, 0.0  ;;  %v814_v17 = vadd.f32 %v1699_v7, %v745_v8  ;;  %936 = vst.msk [vmem:[%s1199_s29 + $0x140] sm:$0xff] %vm895_vm4, %v871_v31  ;;  %v875_v27 = vmax.f32 %v811_v11, 0.0  ;;  %v746_v32 = vmul.f32 %v1697_v34, %v677_v61 }
 0x107   : > { %v876_v29 = vmax.f32 %v812_v12, 0.0  ;;  %v877_v30 = vmax.f32 %v813_v1, 0.0  ;;  %937 = vst.msk [vmem:[%s1199_s29 + $0x148] sm:$0xff] %vm895_vm4, %v872_v20  ;;  %938 = vst.msk [vmem:[%s1199_s29 + $0x150] sm:$0xff] %vm895_vm4, %v873_v21  ;;  %v747_v39 = vmul.f32 %v1697_v34, %v678_v14  ;;  %v748_v35 = vmul.f32 %v1697_v34, %v679_v15 }
 0x108   : > { %939 = vst.msk [vmem:[%s1199_s29 + $0x158] sm:$0xff] %vm895_vm4, %v874_v23  ;;  %v878_v33 = vmax.f32 %v814_v17, 0.0  ;;  %v749_v36 = vmul.f32 %v1697_v34, %v680_v18  ;;  %940 = vst.msk [vmem:[%s1199_s29 + $0x160] sm:$0xff] %vm895_vm4, %v875_v27  ;;  %v815_v47 = vadd.f32 %v1699_v7, %v746_v32  ;;  %v750_v38 = vmul.f32 %v1697_v34, %v681_v37 }
 0x109   : > { %941 = vst.msk [vmem:[%s1199_s29 + $0x168] sm:$0xff] %vm895_vm4, %v876_v29  ;;  %942 = vst.msk [vmem:[%s1199_s29 + $0x170] sm:$0xff] %vm895_vm4, %v877_v30  ;;  %v751_v16 = vmul.f32 %v1697_v34, %v682_v26  ;;  %v752_v41 = vmul.f32 %v1697_v34, %v683_v24  ;;  %v816_v54 = vadd.f32 %v1699_v7, %v747_v39 }
 0x10a   : > { %943 = vst.msk [vmem:[%s1199_s29 + $0x178] sm:$0xff] %vm895_vm4, %v878_v33  ;;  %v817_v42 = vadd.f32 %v1699_v7, %v748_v35  ;;  %v818_v44 = vadd.f32 %v1699_v7, %v749_v36  ;;  %v753_v60 = vmul.f32 %v1697_v34, %v684_v40  ;;  %v879_v19 = vmax.f32 %v815_v47, 0.0 }
 0x10b   : > { %v819_v5 = vadd.f32 %v1699_v7, %v750_v38  ;;  %v820_v46 = vadd.f32 %v1699_v7, %v751_v16  ;;  %v821_v50 = vadd.f32 %v1699_v7, %v752_v41  ;;  %v880_v10 = vmax.f32 %v816_v54, 0.0 }
 0x10c   : > { %v881_v22 = vmax.f32 %v817_v42, 0.0  ;;  %v882_v55 = vmax.f32 %v818_v44, 0.0  ;;  %v822_v49 = vadd.f32 %v1699_v7, %v753_v60  ;;  %944 = vst.msk [vmem:[%s1199_s29 + $0x180] sm:$0xff] %vm895_vm4, %v879_v19  ;;  %v754_v43 = vmul.f32 %v1697_v34, %v685_v45 }
 0x10d   : > { %v883_v59 = vmax.f32 %v819_v5, 0.0  ;;  %v884_v25 = vmax.f32 %v820_v46, 0.0  ;;  %v885_v62 = vmax.f32 %v821_v50, 0.0  ;;  %945 = vst.msk [vmem:[%s1199_s29 + $0x188] sm:$0xff] %vm895_vm4, %v880_v10  ;;  %v755_v0 = vmul.f32 %v1697_v34, %v686_v9 }
 0x10e   : > { %946 = vst.msk [vmem:[%s1199_s29 + $0x190] sm:$0xff] %vm895_vm4, %v881_v22  ;;  %947 = vst.msk [vmem:[%s1199_s29 + $0x198] sm:$0xff] %vm895_vm4, %v882_v55  ;;  %v886_v63 = vmax.f32 %v822_v49, 0.0  ;;  %v756_v4 = vmul.f32 %v1697_v34, %v687_v51  ;;  %v757_v48 = vmul.f32 %v1697_v34, %v688_v53  ;;  %v823_v28 = vadd.f32 %v1699_v7, %v754_v43 }
 0x10f   : > { %948 = vst.msk [vmem:[%s1199_s29 + $0x1a0] sm:$0xff] %vm895_vm4, %v883_v59  ;;  %949 = vst.msk [vmem:[%s1199_s29 + $0x1a8] sm:$0xff] %vm895_vm4, %v884_v25  ;;  %v758_v6 = vmul.f32 %v1697_v34, %v689_v13  ;;  %v759_v56 = vmul.f32 %v1697_v34, %v690_v57  ;;  %v760_v2 = vmul.f32 %v1697_v34, %v691_v58 }
 0x110   : > { %950 = vst.msk [vmem:[%s1199_s29 + $0x1b0] sm:$0xff] %vm895_vm4, %v885_v62  ;;  %951 = vst.msk [vmem:[%s1199_s29 + $0x1b8] sm:$0xff] %vm895_vm4, %v886_v63  ;;  %v824_v3 = vadd.f32 %v1699_v7, %v755_v0  ;;  %v825_v8 = vadd.f32 %v1699_v7, %v756_v4  ;;  %v826_v61 = vadd.f32 %v1699_v7, %v757_v48  ;;  %v887_v11 = vmax.f32 %v823_v28, 0.0 }
 0x111   : > { %v761_v31 = vmul.f32 %v1697_v34, %v692_v52  ;;  %v827_v12 = vadd.f32 %v1699_v7, %v758_v6  ;;  %v828_v1 = vadd.f32 %v1699_v7, %v759_v56  ;;  %v829_v14 = vadd.f32 %v1699_v7, %v760_v2 }
 0x112   : > { %v888_v15 = vmax.f32 %v824_v3, 0.0  ;;  %v889_v18 = vmax.f32 %v825_v8, 0.0  ;;  %v890_v20 = vmax.f32 %v826_v61, 0.0  ;;  %952 = vst.msk [vmem:[%s1199_s29 + $0x1c0] sm:$0xff] %vm895_vm4, %v887_v11 }
 0x113   : > { %v830_v21 = vadd.f32 %v1699_v7, %v761_v31  ;;  %v891_v23 = vmax.f32 %v827_v12, 0.0  ;;  %v892_v34 = vmax.f32 %v828_v1, 0.0  ;;  %v893_v17 = vmax.f32 %v829_v14, 0.0 }
 0x114   : > { %953 = vst.msk [vmem:[%s1199_s29 + $0x1c8] sm:$0xff] %vm895_vm4, %v888_v15  ;;  %954 = vst.msk [vmem:[%s1199_s29 + $0x1d0] sm:$0xff] %vm895_vm4, %v889_v18 }
 0x115   : > { %955 = vst.msk [vmem:[%s1199_s29 + $0x1d8] sm:$0xff] %vm895_vm4, %v890_v20  ;;  %v894_v37 = vmax.f32 %v830_v21, 0.0  ;;  %956 = vst.msk [vmem:[%s1199_s29 + $0x1e0] sm:$0xff] %vm895_vm4, %v891_v23 }
 0x116   : > { %957 = vst.msk [vmem:[%s1199_s29 + $0x1e8] sm:$0xff] %vm895_vm4, %v892_v34  ;;  %958 = vst.msk [vmem:[%s1199_s29 + $0x1f0] sm:$0xff] %vm895_vm4, %v893_v17 }
 0x117   : > { %959 = vst.msk [vmem:[%s1199_s29 + $0x1f8] sm:$0xff] %vm895_vm4, %v894_v37 }
 0x118 PF: > { %s13_s16 = sadd.s32 1, %s1127_s16   ;;  %s2039_s12 = smov %s1119_s14 }
 0x119   : > { %p10_p0 = scmp.ge.s32.totalorder %s13_s16, 10   ;;  %s2040_s13 = smov %s1123_s15 }
 0x11a   : > { %s2041_s14 = smov %s2044_s17  ;;  %s2042_s15 = smov %s2048_s18 }
 0x11b   :  { %12 = sbr.rel (!%p10_p0) target bundleno = 3 (0x3), region = 78 }

// kernel: generator_forward.17
= control target key start
LH: loop header
LB: loop body
LE: loop exit
PB: predicated region body
PF: predicated region fallthrough
CT: control target
= control target key end

     0   :  { %s1273_s9 = smov 0   ;;  %s1275_s10 = smov 0   ;;  %s1416_s0 = inlined_call_operand.vmem [shape: bf16[4,2048,256], index: 0, kind: input, shape index: {}]   ;;  %s1417_s1 = inlined_call_operand.vmem [shape: bf16[4,256,128], index: 1, kind: input, shape index: {}]   ;;  %s1418_s2 = inlined_call_operand.vmem [shape: f32[4,2048,128], index: 2, kind: output, shape index: {}]  }
   0x1   :  { %s1277_s11 = smov 0   ;;  %s1279_s12 = smov 0  }
   0x2   :  { %s1281_s13 = smov 0  }
   0x3 LB: > { %s21_s14 = sadd.s32 1, %s1248_s11  ;;  %s24_s15 = sadd.s32 1, %s1252_s12  ;;  %s1256_s13 = sphi %s1281_s13, %s12_s13   ;;  %s1252_s12 = sphi %s1279_s12, %s1422_s12   ;;  %s1248_s11 = sphi %s1277_s11, %s1421_s11   ;;  %s1244_s10 = sphi %s1275_s10, %s1420_s10   ;;  %s1240_s9 = sphi %s1273_s9, %s1419_s9  }
   0x4   : > { %p22_p0 = scmp.ge.s32.totalorder %s21_s14, 8  ;;  %p861_p1 = scmp.ge.s32.totalorder %s1256_s13, 1 }
   0x5   : > { %p144_p2 = scmp.lt.s32.totalorder %s1256_s13, 33 }
   0x6   : > { %s1424_s14 = smov (%p22_p0, %s21_s14), 0  ;;  %s1426_s15 = smov (!%p22_p0, %s24_s15), %s1252_s12 }
   0x7   : > { %p145_p3 = pnand %p861_p1, %p144_p2  ;;  %p26_p4 = scmp.ge.s32.totalorder %s1426_s15, 4 }
   0x8   : > { %p181_p5 = scmp.lt.s32.totalorder (!%p145_p3), %s1244_s10, 3  ;;  %s862_s16 = sshll.u32 (!%p145_p3), %s1240_s9, 5 }
   0x9   : > { %s1428_s15 = smov (%p26_p4, %s1426_s15), 0  ;;  %148 = sbr.rel (%p145_p3) target bundleno = 339 (0x153), region = 28 }
   0xa   : > { %p183_p6 = scmp.lt.s32.totalorder (!%p145_p3), %s862_s16, 255 }
  0x10   : > { %s1430_s10 = smov (!%p181_p5, %s1244_s10), 3  ;;  %s1432_s16 = smov (!%p183_p6, %s862_s16), 255 }
  0x11   : > { %s921_s17 = sshll.u32 %s1430_s10, 7  ;;  %s869_s21 = sshll.u32 %s1430_s10, 8 }
  0x12   : > { %s1306_s20 = scalar_lea.vmem %s1417_s1, %s921_s17  ;;  %s1310_s22 = sadd.s32 %s869_s21, %s1432_s16 }
  0x13   : > { %v1090_v0 = vld [vmem:[%s1306_s20 + $0x40] sm:$0xff]   ;;  %v1092_v2 = vld [vmem:[%s1306_s20 + $0x48] sm:$0xff]   ;;  %v1094_v4 = vld [vmem:[%s1306_s20 + $0x50] sm:$0xff]   ;;  %s863_s23 = sshll.u32 %s1432_s16, 1  ;;  %s864_s24 = sshll.u32 %s1430_s10, 9 }
  0x14   : > { %v1091_v1 = vld [vmem:[%s1306_s20] sm:$0xff]   ;;  %922 = vmatprep.subr.bf16.mxu0 %v1090_v0  ;;  %1034 = vmatprep.subr.bf16.mxu1 %v1090_v0  ;;  %v1093_v3 = vld [vmem:[%s1306_s20 + $0x8] sm:$0xff]   ;;  %v1095_v5 = vld [vmem:[%s1306_s20 + $0x10] sm:$0xff]   ;;  %s187_s25 = sadd.s32 %s864_s24, %s863_s23  ;;  %s870_s30 = sshll.u32 %s1310_s22, 3 }
  0x15   : > { %923 = vmatpush3.bf16.msra.mxu0 %v1091_v1  ;;  %1042 = vmatpush3.bf16.msra.mxu1 %v1091_v1  ;;  %v1096_v6 = vld [vmem:[%s1306_s20 + $0x58] sm:$0xff]   ;;  %s865_s26 = sshll.u32 %s187_s25, 2  ;;  %v1098_v8 = vld [vmem:[%s1306_s20 + $0x60] sm:$0xff]   ;;  %v1100_v10 = vld [vmem:[%s1306_s20 + $0x68] sm:$0xff]   ;;  %s1367_s5 = scalar_lea.vmem %s1418_s2, %s870_s30 }
  0x16   : > { %924 = vmatprep.subr.bf16.mxu0 %v1092_v2  ;;  %1035 = vmatprep.subr.bf16.mxu1 %v1092_v2  ;;  %v1097_v7 = vld [vmem:[%s1306_s20 + $0x18] sm:$0xff]   ;;  %s1322_s29 = scalar_lea.vmem %s1416_s0, %s865_s26  ;;  %v1099_v9 = vld [vmem:[%s1306_s20 + $0x20] sm:$0xff]   ;;  %v1101_v13 = vld [vmem:[%s1306_s20 + $0x28] sm:$0xff]  }
  0x17   : > { %v1108_v11 = vld [vmem:[%s1322_s29 + $0x4] ss:$8 sps:$4 sm:$0xff]   ;;  %v1102_v14 = vld [vmem:[%s1306_s20 + $0x70] sm:$0xff]   ;;  %v1104_v16 = vld [vmem:[%s1306_s20 + $0x78] sm:$0xff]  }
  0x18   : > { %v1111_v12 = vld [vmem:[%s1322_s29 + $0x84] ss:$8 sps:$4 sm:$0xff]   ;;  %559 = vmatprep.mubr.bf16.mxu0 %v1108_v11  ;;  %v1103_v15 = vld [vmem:[%s1306_s20 + $0x30] sm:$0xff]   ;;  %v1105_v17 = vld [vmem:[%s1306_s20 + $0x38] sm:$0xff]  }
  0x19   : > { %925 = vmatpush3.bf16.msra.mxu0 %v1093_v3  ;;  %1043 = vmatpush3.bf16.msra.mxu1 %v1093_v3  ;;  %v1106_v18 = vld [vmem:[%s1322_s29] ss:$8 sps:$4 sm:$0xff]   ;;  %v1112_v20 = vld [vmem:[%s1322_s29 + $0x14] ss:$8 sps:$4 sm:$0xff]   ;;  %v1116_v22 = vld [vmem:[%s1322_s29 + $0x10] ss:$8 sps:$4 sm:$0xff]  }
  0x1a   : > { %926 = vmatprep.subr.bf16.mxu0 %v1094_v4  ;;  %1036 = vmatprep.subr.bf16.mxu1 %v1094_v4  ;;  %v1109_v19 = vld [vmem:[%s1322_s29 + $0x80] ss:$8 sps:$4 sm:$0xff]   ;;  %v1114_v21 = vld [vmem:[%s1322_s29 + $0x94] ss:$8 sps:$4 sm:$0xff]   ;;  %v1117_v23 = vld [vmem:[%s1322_s29 + $0x90] ss:$8 sps:$4 sm:$0xff]  }
  0x1b   : > { %623 = vmatprep.mubr.bf16.mxu1 %v1111_v12  ;;  %v1118_v24 = vld [vmem:[%s1322_s29 + $0x24] ss:$8 sps:$4 sm:$0xff]   ;;  %v1122_v26 = vld [vmem:[%s1322_s29 + $0x20] ss:$8 sps:$4 sm:$0xff]   ;;  %v1124_v28 = vld [vmem:[%s1322_s29 + $0x34] ss:$8 sps:$4 sm:$0xff]  }
  0x1c   : > { %v1120_v25 = vld [vmem:[%s1322_s29 + $0xa4] ss:$8 sps:$4 sm:$0xff]   ;;  %v1123_v27 = vld [vmem:[%s1322_s29 + $0xa0] ss:$8 sps:$4 sm:$0xff]   ;;  %v1126_v29 = vld [vmem:[%s1322_s29 + $0xb4] ss:$8 sps:$4 sm:$0xff]  }
  0x1d   : > { %927 = vmatpush3.bf16.msra.mxu0 %v1095_v5  ;;  %1044 = vmatpush3.bf16.msra.mxu1 %v1095_v5  ;;  %v1128_v30 = vld [vmem:[%s1322_s29 + $0x30] ss:$8 sps:$4 sm:$0xff]   ;;  %v1130_v32 = vld [vmem:[%s1322_s29 + $0x44] ss:$8 sps:$4 sm:$0xff]   ;;  %v1134_v34 = vld [vmem:[%s1322_s29 + $0x40] ss:$8 sps:$4 sm:$0xff]  }
  0x1e   : > { %928 = vmatprep.subr.bf16.mxu0 %v1096_v6  ;;  %1037 = vmatprep.subr.bf16.mxu1 %v1096_v6  ;;  %v1129_v31 = vld [vmem:[%s1322_s29 + $0xb0] ss:$8 sps:$4 sm:$0xff]   ;;  %v1132_v33 = vld [vmem:[%s1322_s29 + $0xc4] ss:$8 sps:$4 sm:$0xff]   ;;  %v1135_v35 = vld [vmem:[%s1322_s29 + $0xc0] ss:$8 sps:$4 sm:$0xff]  }
  0x1f   : > { %v1136_v36 = vld [vmem:[%s1322_s29 + $0x54] ss:$8 sps:$4 sm:$0xff]   ;;  %v1140_v38 = vld [vmem:[%s1322_s29 + $0x50] ss:$8 sps:$4 sm:$0xff]   ;;  %v1142_v40 = vld [vmem:[%s1322_s29 + $0x64] ss:$8 sps:$4 sm:$0xff]  }
  0x20   : > { %v1138_v37 = vld [vmem:[%s1322_s29 + $0xd4] ss:$8 sps:$4 sm:$0xff]   ;;  %v1141_v39 = vld [vmem:[%s1322_s29 + $0xd0] ss:$8 sps:$4 sm:$0xff]   ;;  %v1144_v41 = vld [vmem:[%s1322_s29 + $0xe4] ss:$8 sps:$4 sm:$0xff]  }
  0x21   : > { %929 = vmatpush3.bf16.msra.mxu0 %v1097_v7  ;;  %1045 = vmatpush3.bf16.msra.mxu1 %v1097_v7  ;;  %v1146_v42 = vld [vmem:[%s1322_s29 + $0x60] ss:$8 sps:$4 sm:$0xff]   ;;  %v1148_v44 = vld [vmem:[%s1322_s29 + $0x74] ss:$8 sps:$4 sm:$0xff]   ;;  %v1152_v46 = vld [vmem:[%s1322_s29 + $0x70] ss:$8 sps:$4 sm:$0xff]  }
  0x22   : > { %930 = vmatprep.subr.bf16.mxu0 %v1098_v8  ;;  %1038 = vmatprep.subr.bf16.mxu1 %v1098_v8  ;;  %v1147_v43 = vld [vmem:[%s1322_s29 + $0xe0] ss:$8 sps:$4 sm:$0xff]   ;;  %v1150_v45 = vld [vmem:[%s1322_s29 + $0xf4] ss:$8 sps:$4 sm:$0xff]   ;;  %v1153_v47 = vld [vmem:[%s1322_s29 + $0xf0] ss:$8 sps:$4 sm:$0xff]  }
  0x25   : > { %931 = vmatpush3.bf16.msra.mxu0 %v1099_v9  ;;  %1046 = vmatpush3.bf16.msra.mxu1 %v1099_v9 }
  0x26   : > { %932 = vmatprep.subr.bf16.mxu0 %v1100_v10  ;;  %1039 = vmatprep.subr.bf16.mxu1 %v1100_v10 }
  0x29   : > { %933 = vmatpush3.bf16.msra.mxu0 %v1101_v13  ;;  %1047 = vmatpush3.bf16.msra.mxu1 %v1101_v13 }
  0x2a   : > { %934 = vmatprep.subr.bf16.mxu0 %v1102_v14  ;;  %1040 = vmatprep.subr.bf16.mxu1 %v1102_v14 }
  0x2d   : > { %935 = vmatpush3.bf16.msra.mxu0 %v1103_v15  ;;  %1048 = vmatpush3.bf16.msra.mxu1 %v1103_v15 }
  0x2e   : > { %936 = vmatprep.subr.bf16.mxu0 %v1104_v16  ;;  %1041 = vmatprep.subr.bf16.mxu1 %v1104_v16 }
  0x31   : > { %937 = vmatpush3.bf16.msra.mxu0 %v1105_v17  ;;  %1049 = vmatpush3.bf16.msra.mxu1 %v1105_v17 }
  0x34   : > { %560 = vmatmul.mubr.bf16.vlgmr.msra.gmra.mrb[0].mxu0 %v1106_v18  ;;  %624 = vmatmul.mubr.bf16.vlgmr.msra.gmra.mrb[0].mxu1 %v1109_v19 }
  0x35   : > { %567 = vmatprep.mubr.bf16.mxu0 %v1112_v20  ;;  %631 = vmatprep.mubr.bf16.mxu1 %v1114_v21 }
  0x3c   : > { %568 = vmatmul.mubr.bf16.gmra.mrb[4].mxu0 %v1116_v22  ;;  %632 = vmatmul.mubr.bf16.gmra.mrb[4].mxu1 %v1117_v23 }
  0x3d   : > { %575 = vmatprep.mubr.bf16.mxu0 %v1118_v24  ;;  %639 = vmatprep.mubr.bf16.mxu1 %v1120_v25 }
  0x44   : > { %576 = vmatmul.mubr.bf16.gmra.mrb[8].mxu0 %v1122_v26  ;;  %640 = vmatmul.mubr.bf16.gmra.mrb[8].mxu1 %v1123_v27 }
  0x45   : > { %583 = vmatprep.mubr.bf16.mxu0 %v1124_v28  ;;  %647 = vmatprep.mubr.bf16.mxu1 %v1126_v29 }
  0x4c   : > { %584 = vmatmul.mubr.bf16.gmra.mrb[12].mxu0 %v1128_v30  ;;  %648 = vmatmul.mubr.bf16.gmra.mrb[12].mxu1 %v1129_v31 }
  0x4d   : > { %591 = vmatprep.mubr.bf16.mxu0 %v1130_v32  ;;  %655 = vmatprep.mubr.bf16.mxu1 %v1132_v33 }
  0x54   : > { %592 = vmatmul.mubr.bf16.gmra.mrb[16].mxu0 %v1134_v34  ;;  %656 = vmatmul.mubr.bf16.gmra.mrb[16].mxu1 %v1135_v35 }
  0x55   : > { %599 = vmatprep.mubr.bf16.mxu0 %v1136_v36  ;;  %663 = vmatprep.mubr.bf16.mxu1 %v1138_v37 }
  0x5c   : > { %600 = vmatmul.mubr.bf16.gmra.mrb[20].mxu0 %v1140_v38  ;;  %664 = vmatmul.mubr.bf16.gmra.mrb[20].mxu1 %v1141_v39 }
  0x5d   : > { %607 = vmatprep.mubr.bf16.mxu0 %v1142_v40  ;;  %671 = vmatprep.mubr.bf16.mxu1 %v1144_v41 }
  0x64   : > { %608 = vmatmul.mubr.bf16.gmra.mrb[24].mxu0 %v1146_v42  ;;  %672 = vmatmul.mubr.bf16.gmra.mrb[24].mxu1 %v1147_v43 }
  0x65   : > { %615 = vmatprep.mubr.bf16.mxu0 %v1148_v44  ;;  %679 = vmatprep.mubr.bf16.mxu1 %v1150_v45 }
  0x6c   : > { %616 = vmatmul.mubr.bf16.gmra.mrb[28].mxu0 %v1152_v46  ;;  %680 = vmatmul.mubr.bf16.gmra.mrb[28].mxu1 %v1153_v47 }
 0x107   : > { %v938_v48 = vpop.f32.mrb[0].mxu0  ;;  %v986_v49 = vpop.f32.mrb[0].mxu1 }
 0x108   : > { %v939_v50 = vpop.f32.mrb[1].mxu0  ;;  %v987_v51 = vpop.f32.mrb[1].mxu1 }
 0x109   : > { %v940_v52 = vadd.f32 %v939_v50, %v938_v48  ;;  %v988_v53 = vadd.f32 %v987_v51, %v986_v49  ;;  %v941_v54 = vpop.f32.mrb[2].mxu0  ;;  %v989_v55 = vpop.f32.mrb[2].mxu1 }
 0x10a   : > { %v942_v56 = vpop.f32.mrb[3].mxu0  ;;  %v990_v57 = vpop.f32.mrb[3].mxu1 }
 0x10b   : > { %1154 = vtanh.f32 %v940_v52  ;;  %v943_v58 = vadd.f32 %v942_v56, %v941_v54  ;;  %v991_v59 = vadd.f32 %v990_v57, %v989_v55 }
 0x10c   : > { %1156 = vtanh.f32 %v988_v53 }
 0x10d   : > { %1158 = vtanh.f32 %v943_v58 }
 0x10e   : > { %1160 = vtanh.f32 %v991_v59 }
 0x10f   : > { %v944_v60 = vpop.f32.mrb[4].mxu0  ;;  %v992_v61 = vpop.f32.mrb[4].mxu1 }
 0x110   : > { %v945_v62 = vpop.f32.mrb[5].mxu0  ;;  %v993_v63 = vpop.f32.mrb[5].mxu1 }
 0x111   : > { %v946_v0 = vadd.f32 %v945_v62, %v944_v60  ;;  %v994_v1 = vadd.f32 %v993_v63, %v992_v61  ;;  %v947_v2 = vpop.f32.mrb[6].mxu0  ;;  %v995_v3 = vpop.f32.mrb[6].mxu1 }
 0x112   : > { %v948_v4 = vpop.f32.mrb[7].mxu0  ;;  %v996_v5 = vpop.f32.mrb[7].mxu1 }
 0x113   : > { %1162 = vtanh.f32 %v946_v0  ;;  %v949_v6 = vadd.f32 %v948_v4, %v947_v2  ;;  %v997_v7 = vadd.f32 %v996_v5, %v995_v3 }
 0x114   : > { %1164 = vtanh.f32 %v994_v1 }
 0x115   : > { %v1155_v8 = vpop.eup %1154  ;;  %1166 = vtanh.f32 %v949_v6 }
 0x116   : > { %v1157_v9 = vpop.eup %1156  ;;  %720 = vst [vmem:[%s1367_s5] sm:$0xff] %v1155_v8  ;;  %1168 = vtanh.f32 %v997_v7 }
 0x117   : > { %v1159_v10 = vpop.eup %1158  ;;  %736 = vst [vmem:[%s1367_s5 + $0x80] sm:$0xff] %v1157_v9  ;;  %v950_v11 = vpop.f32.mrb[8].mxu0 }
 0x118   : > { %v998_v12 = vpop.f32.mrb[8].mxu1  ;;  %v1161_v13 = vpop.eup %1160  ;;  %721 = vst [vmem:[%s1367_s5 + $0x8] sm:$0xff] %v1159_v10 }
 0x119   : > { %v951_v14 = vpop.f32.mrb[9].mxu0  ;;  %v999_v15 = vpop.f32.mrb[9].mxu1  ;;  %737 = vst [vmem:[%s1367_s5 + $0x88] sm:$0xff] %v1161_v13 }
 0x11a   : > { %v952_v16 = vadd.f32 %v951_v14, %v950_v11  ;;  %v1000_v17 = vadd.f32 %v999_v15, %v998_v12  ;;  %v953_v18 = vpop.f32.mrb[10].mxu0  ;;  %v1001_v19 = vpop.f32.mrb[10].mxu1 }
 0x11b   : > { %v954_v20 = vpop.f32.mrb[11].mxu0  ;;  %v1002_v21 = vpop.f32.mrb[11].mxu1 }
 0x11c   : > { %1170 = vtanh.f32 %v952_v16  ;;  %v955_v22 = vadd.f32 %v954_v20, %v953_v18  ;;  %v1003_v23 = vadd.f32 %v1002_v21, %v1001_v19 }
 0x11d   : > { %1172 = vtanh.f32 %v1000_v17  ;;  %v1163_v24 = vpop.eup %1162 }
 0x11e   : > { %1174 = vtanh.f32 %v955_v22  ;;  %v1165_v25 = vpop.eup %1164  ;;  %722 = vst [vmem:[%s1367_s5 + $0x10] sm:$0xff] %v1163_v24 }
 0x11f   : > { %1176 = vtanh.f32 %v1003_v23  ;;  %v1167_v26 = vpop.eup %1166  ;;  %738 = vst [vmem:[%s1367_s5 + $0x90] sm:$0xff] %v1165_v25  ;;  %v956_v27 = vpop.f32.mrb[12].mxu0 }
 0x120   : > { %v1004_v28 = vpop.f32.mrb[12].mxu1  ;;  %v1169_v29 = vpop.eup %1168  ;;  %723 = vst [vmem:[%s1367_s5 + $0x18] sm:$0xff] %v1167_v26 }
 0x121   : > { %v957_v30 = vpop.f32.mrb[13].mxu0  ;;  %v1005_v31 = vpop.f32.mrb[13].mxu1  ;;  %739 = vst [vmem:[%s1367_s5 + $0x98] sm:$0xff] %v1169_v29 }
 0x122   : > { %v958_v32 = vadd.f32 %v957_v30, %v956_v27  ;;  %v1006_v33 = vadd.f32 %v1005_v31, %v1004_v28  ;;  %v959_v34 = vpop.f32.mrb[14].mxu0  ;;  %v1007_v35 = vpop.f32.mrb[14].mxu1 }
 0x123   : > { %v960_v36 = vpop.f32.mrb[15].mxu0  ;;  %v1008_v37 = vpop.f32.mrb[15].mxu1 }
 0x124   : > { %1178 = vtanh.f32 %v958_v32  ;;  %v961_v38 = vadd.f32 %v960_v36, %v959_v34  ;;  %v1009_v39 = vadd.f32 %v1008_v37, %v1007_v35 }
 0x125   : > { %1180 = vtanh.f32 %v1006_v33 }
 0x126   : > { %v1171_v40 = vpop.eup %1170  ;;  %1182 = vtanh.f32 %v961_v38 }
 0x127   : > { %v1173_v41 = vpop.eup %1172  ;;  %724 = vst [vmem:[%s1367_s5 + $0x20] sm:$0xff] %v1171_v40  ;;  %1184 = vtanh.f32 %v1009_v39  ;;  %v962_v43 = vpop.f32.mrb[16].mxu0 }
 0x128   : > { %v1175_v42 = vpop.eup %1174  ;;  %740 = vst [vmem:[%s1367_s5 + $0xa0] sm:$0xff] %v1173_v41  ;;  %v1010_v44 = vpop.f32.mrb[16].mxu1 }
 0x129   : > { %v1177_v45 = vpop.eup %1176  ;;  %725 = vst [vmem:[%s1367_s5 + $0x28] sm:$0xff] %v1175_v42  ;;  %v963_v46 = vpop.f32.mrb[17].mxu0 }
 0x12a   : > { %v1011_v47 = vpop.f32.mrb[17].mxu1  ;;  %741 = vst [vmem:[%s1367_s5 + $0xa8] sm:$0xff] %v1177_v45  ;;  %v964_v48 = vadd.f32 %v963_v46, %v962_v43  ;;  %v965_v50 = vpop.f32.mrb[18].mxu0 }
 0x12b   : > { %v1012_v49 = vadd.f32 %v1011_v47, %v1010_v44  ;;  %v1013_v51 = vpop.f32.mrb[18].mxu1  ;;  %v966_v52 = vpop.f32.mrb[19].mxu0 }
 0x12c   : > { %v1014_v53 = vpop.f32.mrb[19].mxu1  ;;  %1186 = vtanh.f32 %v964_v48  ;;  %v967_v54 = vadd.f32 %v966_v52, %v965_v50 }
 0x12d   : > { %v1015_v55 = vadd.f32 %v1014_v53, %v1013_v51  ;;  %1188 = vtanh.f32 %v1012_v49 }
 0x12e   : > { %v1179_v56 = vpop.eup %1178  ;;  %1190 = vtanh.f32 %v967_v54 }
 0x12f   : > { %v1181_v57 = vpop.eup %1180  ;;  %726 = vst [vmem:[%s1367_s5 + $0x30] sm:$0xff] %v1179_v56  ;;  %1192 = vtanh.f32 %v1015_v55  ;;  %v968_v59 = vpop.f32.mrb[20].mxu0 }
 0x130   : > { %v1183_v58 = vpop.eup %1182  ;;  %742 = vst [vmem:[%s1367_s5 + $0xb0] sm:$0xff] %v1181_v57  ;;  %v1016_v60 = vpop.f32.mrb[20].mxu1 }
 0x131   : > { %v1185_v61 = vpop.eup %1184  ;;  %727 = vst [vmem:[%s1367_s5 + $0x38] sm:$0xff] %v1183_v58  ;;  %v969_v62 = vpop.f32.mrb[21].mxu0 }
 0x132   : > { %v1017_v63 = vpop.f32.mrb[21].mxu1  ;;  %743 = vst [vmem:[%s1367_s5 + $0xb8] sm:$0xff] %v1185_v61  ;;  %v970_v0 = vadd.f32 %v969_v62, %v968_v59  ;;  %v971_v2 = vpop.f32.mrb[22].mxu0 }
 0x133   : > { %v1018_v1 = vadd.f32 %v1017_v63, %v1016_v60  ;;  %v1019_v3 = vpop.f32.mrb[22].mxu1  ;;  %v972_v4 = vpop.f32.mrb[23].mxu0 }
 0x134   : > { %v1020_v5 = vpop.f32.mrb[23].mxu1  ;;  %1194 = vtanh.f32 %v970_v0  ;;  %v973_v6 = vadd.f32 %v972_v4, %v971_v2 }
 0x135   : > { %v1021_v7 = vadd.f32 %v1020_v5, %v1019_v3  ;;  %1196 = vtanh.f32 %v1018_v1 }
 0x136   : > { %v1187_v8 = vpop.eup %1186  ;;  %1198 = vtanh.f32 %v973_v6 }
 0x137   : > { %v1189_v9 = vpop.eup %1188  ;;  %728 = vst [vmem:[%s1367_s5 + $0x40] sm:$0xff] %v1187_v8  ;;  %1200 = vtanh.f32 %v1021_v7  ;;  %v974_v11 = vpop.f32.mrb[24].mxu0 }
 0x138   : > { %v1191_v10 = vpop.eup %1190  ;;  %744 = vst [vmem:[%s1367_s5 + $0xc0] sm:$0xff] %v1189_v9  ;;  %v1022_v12 = vpop.f32.mrb[24].mxu1 }
 0x139   : > { %v1193_v13 = vpop.eup %1192  ;;  %729 = vst [vmem:[%s1367_s5 + $0x48] sm:$0xff] %v1191_v10  ;;  %v975_v14 = vpop.f32.mrb[25].mxu0 }
 0x13a   : > { %v1023_v15 = vpop.f32.mrb[25].mxu1  ;;  %745 = vst [vmem:[%s1367_s5 + $0xc8] sm:$0xff] %v1193_v13  ;;  %v976_v16 = vadd.f32 %v975_v14, %v974_v11  ;;  %v977_v18 = vpop.f32.mrb[26].mxu0 }
 0x13b   : > { %v1024_v17 = vadd.f32 %v1023_v15, %v1022_v12  ;;  %v1025_v19 = vpop.f32.mrb[26].mxu1  ;;  %v978_v20 = vpop.f32.mrb[27].mxu0 }
 0x13c   : > { %v1026_v21 = vpop.f32.mrb[27].mxu1  ;;  %1202 = vtanh.f32 %v976_v16  ;;  %v979_v22 = vadd.f32 %v978_v20, %v977_v18 }
 0x13d   : > { %v1027_v23 = vadd.f32 %v1026_v21, %v1025_v19  ;;  %1204 = vtanh.f32 %v1024_v17 }
 0x13e   : > { %v1195_v24 = vpop.eup %1194  ;;  %1206 = vtanh.f32 %v979_v22 }
 0x13f   : > { %v1197_v25 = vpop.eup %1196  ;;  %730 = vst [vmem:[%s1367_s5 + $0x50] sm:$0xff] %v1195_v24  ;;  %1208 = vtanh.f32 %v1027_v23  ;;  %v980_v27 = vpop.f32.mrb[28].mxu0 }
 0x140   : > { %v1199_v26 = vpop.eup %1198  ;;  %746 = vst [vmem:[%s1367_s5 + $0xd0] sm:$0xff] %v1197_v25  ;;  %v1028_v28 = vpop.f32.mrb[28].mxu1 }
 0x141   : > { %v1201_v29 = vpop.eup %1200  ;;  %731 = vst [vmem:[%s1367_s5 + $0x58] sm:$0xff] %v1199_v26  ;;  %v981_v30 = vpop.f32.mrb[29].mxu0 }
 0x142   : > { %v1029_v31 = vpop.f32.mrb[29].mxu1  ;;  %747 = vst [vmem:[%s1367_s5 + $0xd8] sm:$0xff] %v1201_v29  ;;  %v982_v32 = vadd.f32 %v981_v30, %v980_v27  ;;  %v983_v34 = vpop.f32.mrb[30].mxu0 }
 0x143   : > { %v1030_v33 = vadd.f32 %v1029_v31, %v1028_v28  ;;  %v1031_v35 = vpop.f32.mrb[30].mxu1  ;;  %v984_v36 = vpop.f32.mrb[31].mxu0 }
 0x144   : > { %v1032_v37 = vpop.f32.mrb[31].mxu1  ;;  %1210 = vtanh.f32 %v982_v32  ;;  %v985_v38 = vadd.f32 %v984_v36, %v983_v34 }
 0x145   : > { %v1033_v39 = vadd.f32 %v1032_v37, %v1031_v35  ;;  %1212 = vtanh.f32 %v1030_v33 }
 0x146   : > { %v1203_v40 = vpop.eup %1202  ;;  %1214 = vtanh.f32 %v985_v38 }
 0x147   : > { %v1205_v41 = vpop.eup %1204  ;;  %732 = vst [vmem:[%s1367_s5 + $0x60] sm:$0xff] %v1203_v40  ;;  %1216 = vtanh.f32 %v1033_v39 }
 0x148   : > { %v1207_v42 = vpop.eup %1206  ;;  %748 = vst [vmem:[%s1367_s5 + $0xe0] sm:$0xff] %v1205_v41 }
 0x149   : > { %v1209_v43 = vpop.eup %1208  ;;  %733 = vst [vmem:[%s1367_s5 + $0x68] sm:$0xff] %v1207_v42 }
 0x14a   : > { %749 = vst [vmem:[%s1367_s5 + $0xe8] sm:$0xff] %v1209_v43 }
 0x14e   : > { %v1211_v44 = vpop.eup %1210 }
 0x14f   : > { %v1213_v45 = vpop.eup %1212  ;;  %734 = vst [vmem:[%s1367_s5 + $0x70] sm:$0xff] %v1211_v44 }
 0x150   : > { %v1215_v46 = vpop.eup %1214  ;;  %750 = vst [vmem:[%s1367_s5 + $0xf0] sm:$0xff] %v1213_v45 }
 0x151   : > { %v1217_v47 = vpop.eup %1216  ;;  %735 = vst [vmem:[%s1367_s5 + $0x78] sm:$0xff] %v1215_v46 }
 0x152   : > { %751 = vst [vmem:[%s1367_s5 + $0xf8] sm:$0xff] %v1217_v47 }
 0x153 PF: > { %s12_s13 = sadd.s32 1, %s1256_s13   ;;  %s1419_s9 = smov %s1248_s11 }
 0x154   : > { %p9_p7 = scmp.ge.s32.totalorder %s12_s13, 34   ;;  %s1420_s10 = smov %s1252_s12 }
 0x155   : > { %s1421_s11 = smov %s1424_s14  ;;  %s1422_s12 = smov %s1428_s15 }
 0x156   :  { %11 = sbr.rel (!%p9_p7) target bundleno = 3 (0x3), region = 61 }

</bundles_post_ra>
